<compile_context>
chip_gen: v7x
topology: tpu7x:2x2x1
jax: 0.10.0
libtpu: 0.0.40
codegen_flags: <defaults>
</compile_context>

<pallas_src>
import functools

import jax
import jax.numpy as jnp
import numpy as np
from jax import lax
from jax.experimental import pallas as pl
from jax.experimental.pallas import tpu as pltpu


# ----------------------------------------------------------------------------
# Fused kernel: upconv(k=2,s=2) + interleave + concat + pad + DoubleConv.
# ----------------------------------------------------------------------------
def upsample_fused_kernel(x1_ref, x2_ref, wt_ref, bt_ref, w1_ref, w2_ref,
                          o_ref, cat_ref, h_ref, *, H, W, Ls):
    """One batch element.

    Layouts (channels-last inside the kernel), with Wp = W + 1, M = H * Wp:
      x1_ref : (1, M, Cin)        x1 rows padded with one zero column (j == W)
      x2_ref : (1, 2, 2, M, Ch)   skip features, phase-separated (di, dj),
                                  flat over (i, j) with the zero pad column
      wt_ref : (Cin, 4*Ch)        ConvTranspose2d, column (2*di+dj)*Ch + c
      bt_ref : (1, Ch)            ConvTranspose2d bias
      w1_ref : (9*Ccat, Cout)     conv1, row block t = 3*dy+dx is (Ccat, Cout)
      w2_ref : (9*Cout, Cout)     conv2, same packing
      o_ref  : (1, 2, 2, M, Cout) parity-major wide output slab
      cat_ref: (4*Ls, Ccat)       padded concat([up, skip]) in parity groups
      h_ref  : (4*Ls, Cout)       padded relu(conv1), same layout

    Parity-group layout: group g = 2*rp + cp holds padded samples
    pad[2a+rp, 2b+cp] at row g*Ls + a*Wp + b  (a in 0..H, b in 0..W).
    """
    Wp = W + 1
    M = H * Wp
    Ch = x2_ref.shape[-1]
    Ccat = cat_ref.shape[-1]
    Cout = h_ref.shape[-1]

    # Column-validity mask over the wide row layout: True where j < W.
    col_idx = lax.broadcasted_iota(jnp.int32, (M, 1), 0) % Wp
    valid = col_idx < W

    # ------------------------------------------------------------------
    # Halo maintenance: only the few positions the data stores never touch
    # (one halo row per group + one halo-column scalar for cp==0 groups).
    # Everything else is fully (re)written every grid step, so no full-buffer
    # zeroing and no dependence on program_id / scratch persistence.
    # ------------------------------------------------------------------
    def zero_halo(buf_ref, c):
        zrow = jnp.zeros((Wp, c), jnp.float32)
        zone = jnp.zeros((1, c), jnp.float32)
        for rp in range(2):
            for cp in range(2):
                base = (2 * rp + cp) * Ls
                halo_row = H * Wp if rp == 1 else 0
                buf_ref[pl.ds(base + halo_row, Wp), :] = zrow
                if cp == 0:
                    a0 = 1 - rp
                    buf_ref[pl.ds(base + a0 * Wp, 1), :] = zone

    zero_halo(cat_ref, Ccat)
    zero_halo(h_ref, Cout)

    # ------------------------------------------------------------------
    # ConvTranspose2d(kernel=2, stride=2): all 4 phases in ONE MXU matmul.
    # ------------------------------------------------------------------
    y = jnp.dot(x1_ref[0], wt_ref[...], preferred_element_type=jnp.float32)
    bt = bt_ref[...]                                   # (1, Ch)

    # Scatter up-phases + skip into the padded concat buffer:
    # ONE contiguous full-width store per parity group.
    for di in range(2):
        for dj in range(2):
            k = 2 * di + dj                            # upconv phase
            g = 2 * (1 - di) + (1 - dj)                # destination parity group
            up_k = jnp.where(valid, y[:, k * Ch:(k + 1) * Ch] + bt, 0.0)
            cat_val = jnp.concatenate([up_k, x2_ref[0, di, dj]], axis=-1)
            cat_ref[pl.ds(g * Ls + di * Wp + dj, M), :] = cat_val

    # ------------------------------------------------------------------
    # 3x3 conv (pad=1, no bias) + ReLU: direct tap accumulation.
    # Each tap is a zero-copy contiguous row slice; 9 accumulated matmuls.
    # ------------------------------------------------------------------
    def conv3x3_relu(src_ref, w_ref, qy, qx):
        c_in = w_ref.shape[0] // 9
        acc = None
        for dy in range(3):
            for dx in range(3):
                s, t = qy + dy, qx + dx
                gsrc = 2 * (s % 2) + (t % 2)
                start = gsrc * Ls + (s // 2) * Wp + (t // 2)
                tap = src_ref[pl.ds(start, M), :]               # (M, c_in)
                w_tap = w_ref[pl.ds((3 * dy + dx) * c_in, c_in), :]
                contrib = jnp.dot(tap, w_tap,
                                  preferred_element_type=jnp.float32)
                acc = contrib if acc is None else acc + contrib
        return jnp.maximum(acc, 0.0)

    # conv1 + ReLU -> h parity groups (mask the wide pad column so it lands
    # as zero on halo positions of h_ref).
    for qy in range(2):
        for qx in range(2):
            hval = jnp.where(valid, conv3x3_relu(cat_ref, w1_ref, qy, qx), 0.0)
            g = 2 * (1 - qy) + (1 - qx)
            h_ref[pl.ds(g * Ls + qy * Wp + qx, M), :] = hval

    # conv2 + ReLU -> parity-major wide output (pad column discarded outside).
    for qy in range(2):
        for qx in range(2):
            oval = conv3x3_relu(h_ref, w2_ref, qy, qx)
            o_ref[0, qy, qx] = oval.astype(o_ref.dtype)


# ----------------------------------------------------------------------------
# Wrapper: boundary layout only (transposes / pads / reshapes of tiny arrays).
# ----------------------------------------------------------------------------
def upsample_forward(x1_nchw, x2_nchw, params):
    wt, bt, w1, w2 = params["wt"], params["bt"], params["w1"], params["w2"]
    N, Cin, H, W = x1_nchw.shape
    Ch = wt.shape[1]
    Ccat = Ch + x2_nchw.shape[1]          # == Cin
    Cout = w1.shape[0]
    Wp = W + 1
    M = H * Wp
    Ls = -(-((H + 1) * Wp + 1) // 8) * 8  # per-group flat rows (+slack, 8-aligned)

    # x1: NCHW -> NHWC -> pad one zero column -> flat wide rows.
    x1 = jnp.transpose(x1_nchw, (0, 2, 3, 1))                        # (N,H,W,Cin)
    x1w = jnp.pad(x1, ((0, 0), (0, 0), (0, 1), (0, 0))).reshape(N, M, Cin)

    # x2: NCHW -> phase-separated (di, dj) -> pad column -> flat wide rows.
    x2 = jnp.transpose(x2_nchw, (0, 2, 3, 1)).reshape(N, H, 2, W, 2, Ch)
    x2p = jnp.transpose(x2, (0, 2, 4, 1, 3, 5))                      # (N,di,dj,H,W,Ch)
    x2w = jnp.pad(x2p, ((0, 0),) * 4 + ((0, 1), (0, 0))).reshape(N, 2, 2, M, Ch)

    # Weight repacking for the in-kernel matmul formulations.
    wt4 = jnp.transpose(wt, (0, 2, 3, 1)).reshape(Cin, 4 * Ch)       # [ci,(2di+dj)*Ch+c]
    btk = bt.reshape(1, Ch)
    w1k = jnp.transpose(w1, (2, 3, 1, 0)).reshape(9 * Ccat, Cout)    # [(3dy+dx)*Ccat+ci, co]
    w2k = jnp.transpose(w2, (2, 3, 1, 0)).reshape(9 * Cout, Cout)

    kernel = functools.partial(upsample_fused_kernel, H=H, W=W, Ls=Ls)

    out_wide = pl.pallas_call(
        kernel,
        out_shape=jax.ShapeDtypeStruct((N, 2, 2, M, Cout), jnp.float32),
        grid=(N,),
        in_specs=[
            pl.BlockSpec((1, M, Cin), lambda n: (n, 0, 0)),
            pl.BlockSpec((1, 2, 2, M, Ch), lambda n: (n, 0, 0, 0, 0)),
            pl.BlockSpec((Cin, 4 * Ch), lambda n: (0, 0)),
            pl.BlockSpec((1, Ch), lambda n: (0, 0)),
            pl.BlockSpec((9 * Ccat, Cout), lambda n: (0, 0)),
            pl.BlockSpec((9 * Cout, Cout), lambda n: (0, 0)),
        ],
        out_specs=pl.BlockSpec((1, 2, 2, M, Cout), lambda n: (n, 0, 0, 0, 0)),
        scratch_shapes=[
            pltpu.VMEM((4 * Ls, Ccat), jnp.float32),   # padded concat, parity groups
            pltpu.VMEM((4 * Ls, Cout), jnp.float32),   # padded relu(conv1)
        ],
        compiler_params=pltpu.CompilerParams(
            dimension_semantics=("parallel",),
            vmem_limit_bytes=32 * 1024 * 1024,
        ),
    )(x1w, x2w, wt4, btk, w1k, w2k)

    # out_wide[n, qy, qx, i*Wp + j, c] = out[n, 2i+qy, 2j+qx, c]  (j == W is pad)
    out = out_wide.reshape(N, 2, 2, H, Wp, Cout)[:, :, :, :, :W, :]
    out = jnp.transpose(out, (0, 3, 1, 4, 2, 5)).reshape(N, 2 * H, 2 * W, Cout)
    return jnp.transpose(out, (0, 3, 1, 2))            # back to NCHW


# ----------------------------------------------------------------------------
# Pure-JAX reference (mirrors the PyTorch semantics exactly)
# ----------------------------------------------------------------------------
def upsample_reference(x1, x2, params):
    wt, bt, w1, w2 = params["wt"], params["bt"], params["w1"], params["w2"]
    N, Cin, H, W = x1.shape
    Ch = wt.shape[1]
    up = jnp.einsum("nchw,cokl->nohkwl", x1, wt,
                    precision=jax.lax.Precision.HIGHEST)
    up = up.reshape(N, Ch, 2 * H, 2 * W) + bt[None, :, None, None]
    xcat = jnp.concatenate([up, x2], axis=1)

    def conv(x, w):
        return jax.lax.conv_general_dilated(
            x, w, (1, 1), ((1, 1), (1, 1)),
            dimension_numbers=("NCHW", "OIHW", "NCHW"),
            precision=jax.lax.Precision.HIGHEST)

    h = jax.nn.relu(conv(xcat, w1))
    return jax.nn.relu(conv(h, w2))


if __name__ == "__main__":
    key = jax.random.PRNGKey(0)
    k1, k2, k3, k4, k5, k6 = jax.random.split(key, 6)

    N, Cin, H, W = 2, 4, 8, 8      # x1: previous-layer features
    Cout = 4
    Ch = Cin // 2                  # x2 (skip connection) channels

    x1 = jax.random.normal(k1, (N, Cin, H, W), jnp.float32)
    x2 = jax.random.normal(k2, (N, Ch, 2 * H, 2 * W), jnp.float32)

    # Deterministic synthetic parameters (PyTorch weight layouts):
    params = dict(
        wt=0.2 * jax.random.normal(k3, (Cin, Ch, 2, 2), jnp.float32),     # ConvTranspose2d (in, out, kh, kw)
        bt=0.1 * jax.random.normal(k4, (Ch,), jnp.float32),               # ConvTranspose2d bias
        w1=0.2 * jax.random.normal(k5, (Cout, Cin, 3, 3), jnp.float32),   # Conv2d #1 (out, in, 3, 3)
        w2=0.2 * jax.random.normal(k6, (Cout, Cout, 3, 3), jnp.float32),  # Conv2d #2
    )

    out = jax.block_until_ready(upsample_forward(x1, x2, params))
    ref = jax.block_until_ready(upsample_reference(x1, x2, params))

    assert out.shape == (N, Cout, 2 * H, 2 * W), out.shape
    np.testing.assert_allclose(np.asarray(out), np.asarray(ref),
                               rtol=2e-3, atol=2e-3)
    print("KERNEL_OK")
</pallas_src>

<mosaic_0001>
module attributes {stable_mosaic.version = 11 : i64} {
  func.func @upsample_fused_kernel(%arg0: i32, %arg1: memref<1x72x4xf32, #tpu.memory_space<vmem>>, %arg2: memref<1x2x2x72x2xf32, #tpu.memory_space<vmem>>, %arg3: memref<4x8xf32, #tpu.memory_space<vmem>>, %arg4: memref<1x2xf32, #tpu.memory_space<vmem>>, %arg5: memref<36x4xf32, #tpu.memory_space<vmem>>, %arg6: memref<36x4xf32, #tpu.memory_space<vmem>>, %arg7: memref<1x2x2x72x4xf32, #tpu.memory_space<vmem>>, %arg8: memref<352x4xf32, #tpu.memory_space<vmem>>, %arg9: memref<352x4xf32, #tpu.memory_space<vmem>>) attributes {dimension_semantics = [#tpu.dimension_semantics<parallel>], iteration_bounds = array<i64: 2>, scalar_prefetch = 0 : i64, scratch_operands = 2 : i64, tpu.core_type = #tpu.core_type<tc>, window_params = [{transform_indices = @transform_0, window_bounds = array<i64: 1, 72, 4>}, {transform_indices = @transform_1, window_bounds = array<i64: 1, 2, 2, 72, 2>}, {pipeline_mode = #tpu.pipeline_mode<synchronous>, transform_indices = @transform_2, window_bounds = array<i64: 4, 8>}, {pipeline_mode = #tpu.pipeline_mode<synchronous>, transform_indices = @transform_3, window_bounds = array<i64: 1, 2>}, {pipeline_mode = #tpu.pipeline_mode<synchronous>, transform_indices = @transform_4, window_bounds = array<i64: 36, 4>}, {pipeline_mode = #tpu.pipeline_mode<synchronous>, transform_indices = @transform_5, window_bounds = array<i64: 36, 4>}, {transform_indices = @transform_6, window_bounds = array<i64: 1, 2, 2, 72, 4>}]} {
    %0 = tpu.iota {dimensions = array<i32: 0>} : vector<72x1xi32>
    %c9_i32 = arith.constant 9 : i32
    %c0_i32 = arith.constant 0 : i32
    %1 = arith.cmpi eq, %c9_i32, %c0_i32 : i32
    %c1_i32 = arith.constant 1 : i32
    %2 = arith.select %1, %c1_i32, %c9_i32 : i32
    %3 = vector.broadcast %2 : i32 to vector<72x1xi32>
    %4 = arith.remsi %0, %3 : vector<72x1xi32>
    %c0_i32_0 = arith.constant 0 : i32
    %5 = vector.broadcast %c0_i32_0 : i32 to vector<72x1xi32>
    %6 = arith.cmpi ne, %4, %5 : vector<72x1xi32>
    %c0_i32_1 = arith.constant 0 : i32
    %7 = vector.broadcast %c0_i32_1 : i32 to vector<72x1xi32>
    %8 = arith.cmpi slt, %4, %7 : vector<72x1xi32>
    %c0_i32_2 = arith.constant 0 : i32
    %9 = arith.cmpi slt, %2, %c0_i32_2 : i32
    %10 = vector.broadcast %9 : i1 to vector<72x1xi1>
    %11 = vector.broadcast %10 : vector<72x1xi1> to vector<72x1xi1>
    %12 = arith.xori %8, %11 : vector<72x1xi1>
    %13 = arith.andi %12, %6 : vector<72x1xi1>
    %14 = vector.broadcast %2 : i32 to vector<72x1xi32>
    %15 = arith.addi %4, %14 : vector<72x1xi32>
    %16 = arith.select %13, %15, %4 : vector<72x1xi1>, vector<72x1xi32>
    %c8_i32 = arith.constant 8 : i32
    %17 = vector.broadcast %c8_i32 : i32 to vector<72x1xi32>
    %18 = arith.cmpi slt, %16, %17 : vector<72x1xi32>
    %cst = arith.constant 0.000000e+00 : f32
    %19 = vector.broadcast %cst : f32 to vector<9x4xf32>
    %cst_3 = arith.constant 0.000000e+00 : f32
    %20 = vector.broadcast %cst_3 : f32 to vector<1x4xf32>
    %c0 = arith.constant 0 : index
    %c0_4 = arith.constant 0 : index
    %21 = vector.load %arg8[%c0, %c0_4] : memref<352x4xf32, #tpu.memory_space<vmem>>, vector<9x4xf32>
    tpu.vector_store %arg8[%c0, %c0_4], %19 {strides = array<i32>} : memref<352x4xf32, #tpu.memory_space<vmem>>, vector<9x4xf32>,
    %c9 = arith.constant 9 : index
    %c0_5 = arith.constant 0 : index
    %22 = vector.load %arg8[%c9, %c0_5] : memref<352x4xf32, #tpu.memory_space<vmem>>, vector<1x4xf32>
    tpu.vector_store %arg8[%c9, %c0_5], %20 {strides = array<i32>} : memref<352x4xf32, #tpu.memory_space<vmem>>, vector<1x4xf32>,
    %c88 = arith.constant 88 : index
    %c0_6 = arith.constant 0 : index
    %23 = vector.load %arg8[%c88, %c0_6] : memref<352x4xf32, #tpu.memory_space<vmem>>, vector<9x4xf32>
    tpu.vector_store %arg8[%c88, %c0_6], %19 {strides = array<i32>} : memref<352x4xf32, #tpu.memory_space<vmem>>, vector<9x4xf32>,
    %c248 = arith.constant 248 : index
    %c0_7 = arith.constant 0 : index
    %24 = vector.load %arg8[%c248, %c0_7] : memref<352x4xf32, #tpu.memory_space<vmem>>, vector<9x4xf32>
    tpu.vector_store %arg8[%c248, %c0_7], %19 {strides = array<i32>} : memref<352x4xf32, #tpu.memory_space<vmem>>, vector<9x4xf32>,
    %c176 = arith.constant 176 : index
    %c0_8 = arith.constant 0 : index
    %25 = vector.load %arg8[%c176, %c0_8] : memref<352x4xf32, #tpu.memory_space<vmem>>, vector<1x4xf32>
    tpu.vector_store %arg8[%c176, %c0_8], %20 {strides = array<i32>} : memref<352x4xf32, #tpu.memory_space<vmem>>, vector<1x4xf32>,
    %c336 = arith.constant 336 : index
    %c0_9 = arith.constant 0 : index
    %26 = vector.load %arg8[%c336, %c0_9] : memref<352x4xf32, #tpu.memory_space<vmem>>, vector<9x4xf32>
    tpu.vector_store %arg8[%c336, %c0_9], %19 {strides = array<i32>} : memref<352x4xf32, #tpu.memory_space<vmem>>, vector<9x4xf32>,
    %cst_10 = arith.constant 0.000000e+00 : f32
    %27 = vector.broadcast %cst_10 : f32 to vector<9x4xf32>
    %cst_11 = arith.constant 0.000000e+00 : f32
    %28 = vector.broadcast %cst_11 : f32 to vector<1x4xf32>
    %c0_12 = arith.constant 0 : index
    %c0_13 = arith.constant 0 : index
    %29 = vector.load %arg9[%c0_12, %c0_13] : memref<352x4xf32, #tpu.memory_space<vmem>>, vector<9x4xf32>
    tpu.vector_store %arg9[%c0_12, %c0_13], %27 {strides = array<i32>} : memref<352x4xf32, #tpu.memory_space<vmem>>, vector<9x4xf32>,
    %c9_14 = arith.constant 9 : index
    %c0_15 = arith.constant 0 : index
    %30 = vector.load %arg9[%c9_14, %c0_15] : memref<352x4xf32, #tpu.memory_space<vmem>>, vector<1x4xf32>
    tpu.vector_store %arg9[%c9_14, %c0_15], %28 {strides = array<i32>} : memref<352x4xf32, #tpu.memory_space<vmem>>, vector<1x4xf32>,
    %c88_16 = arith.constant 88 : index
    %c0_17 = arith.constant 0 : index
    %31 = vector.load %arg9[%c88_16, %c0_17] : memref<352x4xf32, #tpu.memory_space<vmem>>, vector<9x4xf32>
    tpu.vector_store %arg9[%c88_16, %c0_17], %27 {strides = array<i32>} : memref<352x4xf32, #tpu.memory_space<vmem>>, vector<9x4xf32>,
    %c248_18 = arith.constant 248 : index
    %c0_19 = arith.constant 0 : index
    %32 = vector.load %arg9[%c248_18, %c0_19] : memref<352x4xf32, #tpu.memory_space<vmem>>, vector<9x4xf32>
    tpu.vector_store %arg9[%c248_18, %c0_19], %27 {strides = array<i32>} : memref<352x4xf32, #tpu.memory_space<vmem>>, vector<9x4xf32>,
    %c176_20 = arith.constant 176 : index
    %c0_21 = arith.constant 0 : index
    %33 = vector.load %arg9[%c176_20, %c0_21] : memref<352x4xf32, #tpu.memory_space<vmem>>, vector<1x4xf32>
    tpu.vector_store %arg9[%c176_20, %c0_21], %28 {strides = array<i32>} : memref<352x4xf32, #tpu.memory_space<vmem>>, vector<1x4xf32>,
    %c336_22 = arith.constant 336 : index
    %c0_23 = arith.constant 0 : index
    %34 = vector.load %arg9[%c336_22, %c0_23] : memref<352x4xf32, #tpu.memory_space<vmem>>, vector<9x4xf32>
    tpu.vector_store %arg9[%c336_22, %c0_23], %27 {strides = array<i32>} : memref<352x4xf32, #tpu.memory_space<vmem>>, vector<9x4xf32>,
    %c0_24 = arith.constant 0 : index
    %c0_25 = arith.constant 0 : index
    %c0_26 = arith.constant 0 : index
    %35 = vector.load %arg1[%c0_24, %c0_25, %c0_26] : memref<1x72x4xf32, #tpu.memory_space<vmem>>, vector<1x72x4xf32>
    %36 = vector.shape_cast %35 : vector<1x72x4xf32> to vector<72x4xf32>
    %c0_27 = arith.constant 0 : index
    %c0_28 = arith.constant 0 : index
    %37 = vector.load %arg3[%c0_27, %c0_28] : memref<4x8xf32, #tpu.memory_space<vmem>>, vector<4x8xf32>
    %cst_29 = arith.constant dense<0.000000e+00> : vector<72x8xf32>
    %38 = tpu.matmul %36, %37, %cst_29 {dimension_numbers = #tpu.dot_dimension_numbers<[1], [0], [0], [1], [0, 0, 1, 1], [], []>} : vector<72x4xf32>, vector<4x8xf32>, vector<72x8xf32> -> vector<72x8xf32>
    %c0_30 = arith.constant 0 : index
    %c0_31 = arith.constant 0 : index
    %39 = vector.load %arg4[%c0_30, %c0_31] : memref<1x2xf32, #tpu.memory_space<vmem>>, vector<1x2xf32>
    %40 = vector.extract_strided_slice %38 {offsets = [0, 0], sizes = [72, 2], strides = [1, 1]} : vector<72x8xf32> to vector<72x2xf32>
    %41 = vector.broadcast %39 : vector<1x2xf32> to vector<72x2xf32>
    %42 = arith.addf %40, %41 : vector<72x2xf32>
    %cst_32 = arith.constant 0.000000e+00 : f32
    %43 = vector.shape_cast %18 : vector<72x1xi1> to vector<72x1xi1>
    %44 = vector.broadcast %43 : vector<72x1xi1> to vector<72x2xi1>
    %45 = vector.broadcast %cst_32 : f32 to vector<72x2xf32>
    %46 = arith.select %44, %42, %45 : vector<72x2xi1>, vector<72x2xf32>
    %c0_33 = arith.constant 0 : index
    %c0_34 = arith.constant 0 : index
    %c0_35 = arith.constant 0 : index
    %c0_36 = arith.constant 0 : index
    %c0_37 = arith.constant 0 : index
    %47 = vector.load %arg2[%c0_33, %c0_34, %c0_35, %c0_36, %c0_37] : memref<1x2x2x72x2xf32, #tpu.memory_space<vmem>>, vector<1x1x1x72x2xf32>
    %48 = vector.shape_cast %47 : vector<1x1x1x72x2xf32> to vector<72x2xf32>
    %49 = tpu.concatenate %46, %48 in 1 : vector<72x2xf32>, vector<72x2xf32> -> vector<72x4xf32>
    %c264 = arith.constant 264 : index
    %c0_38 = arith.constant 0 : index
    %50 = vector.load %arg8[%c264, %c0_38] : memref<352x4xf32, #tpu.memory_space<vmem>>, vector<72x4xf32>
    tpu.vector_store %arg8[%c264, %c0_38], %49 {strides = array<i32>} : memref<352x4xf32, #tpu.memory_space<vmem>>, vector<72x4xf32>,
    %51 = vector.extract_strided_slice %38 {offsets = [0, 2], sizes = [72, 2], strides = [1, 1]} : vector<72x8xf32> to vector<72x2xf32>
    %52 = vector.broadcast %39 : vector<1x2xf32> to vector<72x2xf32>
    %53 = arith.addf %51, %52 : vector<72x2xf32>
    %cst_39 = arith.constant 0.000000e+00 : f32
    %54 = vector.shape_cast %18 : vector<72x1xi1> to vector<72x1xi1>
    %55 = vector.broadcast %54 : vector<72x1xi1> to vector<72x2xi1>
    %56 = vector.broadcast %cst_39 : f32 to vector<72x2xf32>
    %57 = arith.select %55, %53, %56 : vector<72x2xi1>, vector<72x2xf32>
    %c0_40 = arith.constant 0 : index
    %c0_41 = arith.constant 0 : index
    %c1 = arith.constant 1 : index
    %c0_42 = arith.constant 0 : index
    %c0_43 = arith.constant 0 : index
    %58 = vector.load %arg2[%c0_40, %c0_41, %c1, %c0_42, %c0_43] : memref<1x2x2x72x2xf32, #tpu.memory_space<vmem>>, vector<1x1x1x72x2xf32>
    %59 = vector.shape_cast %58 : vector<1x1x1x72x2xf32> to vector<72x2xf32>
    %60 = tpu.concatenate %57, %59 in 1 : vector<72x2xf32>, vector<72x2xf32> -> vector<72x4xf32>
    %c177 = arith.constant 177 : index
    %c0_44 = arith.constant 0 : index
    %61 = vector.load %arg8[%c177, %c0_44] : memref<352x4xf32, #tpu.memory_space<vmem>>, vector<72x4xf32>
    tpu.vector_store %arg8[%c177, %c0_44], %60 {strides = array<i32>} : memref<352x4xf32, #tpu.memory_space<vmem>>, vector<72x4xf32>,
    %62 = vector.extract_strided_slice %38 {offsets = [0, 4], sizes = [72, 2], strides = [1, 1]} : vector<72x8xf32> to vector<72x2xf32>
    %63 = vector.broadcast %39 : vector<1x2xf32> to vector<72x2xf32>
    %64 = arith.addf %62, %63 : vector<72x2xf32>
    %cst_45 = arith.constant 0.000000e+00 : f32
    %65 = vector.shape_cast %18 : vector<72x1xi1> to vector<72x1xi1>
    %66 = vector.broadcast %65 : vector<72x1xi1> to vector<72x2xi1>
    %67 = vector.broadcast %cst_45 : f32 to vector<72x2xf32>
    %68 = arith.select %66, %64, %67 : vector<72x2xi1>, vector<72x2xf32>
    %c0_46 = arith.constant 0 : index
    %c1_47 = arith.constant 1 : index
    %c0_48 = arith.constant 0 : index
    %c0_49 = arith.constant 0 : index
    %c0_50 = arith.constant 0 : index
    %69 = vector.load %arg2[%c0_46, %c1_47, %c0_48, %c0_49, %c0_50] : memref<1x2x2x72x2xf32, #tpu.memory_space<vmem>>, vector<1x1x1x72x2xf32>
    %70 = vector.shape_cast %69 : vector<1x1x1x72x2xf32> to vector<72x2xf32>
    %71 = tpu.concatenate %68, %70 in 1 : vector<72x2xf32>, vector<72x2xf32> -> vector<72x4xf32>
    %c97 = arith.constant 97 : index
    %c0_51 = arith.constant 0 : index
    %72 = vector.load %arg8[%c97, %c0_51] : memref<352x4xf32, #tpu.memory_space<vmem>>, vector<72x4xf32>
    tpu.vector_store %arg8[%c97, %c0_51], %71 {strides = array<i32>} : memref<352x4xf32, #tpu.memory_space<vmem>>, vector<72x4xf32>,
    %73 = vector.extract_strided_slice %38 {offsets = [0, 6], sizes = [72, 2], strides = [1, 1]} : vector<72x8xf32> to vector<72x2xf32>
    %74 = vector.broadcast %39 : vector<1x2xf32> to vector<72x2xf32>
    %75 = arith.addf %73, %74 : vector<72x2xf32>
    %cst_52 = arith.constant 0.000000e+00 : f32
    %76 = vector.shape_cast %18 : vector<72x1xi1> to vector<72x1xi1>
    %77 = vector.broadcast %76 : vector<72x1xi1> to vector<72x2xi1>
    %78 = vector.broadcast %cst_52 : f32 to vector<72x2xf32>
    %79 = arith.select %77, %75, %78 : vector<72x2xi1>, vector<72x2xf32>
    %c0_53 = arith.constant 0 : index
    %c1_54 = arith.constant 1 : index
    %c1_55 = arith.constant 1 : index
    %c0_56 = arith.constant 0 : index
    %c0_57 = arith.constant 0 : index
    %80 = vector.load %arg2[%c0_53, %c1_54, %c1_55, %c0_56, %c0_57] : memref<1x2x2x72x2xf32, #tpu.memory_space<vmem>>, vector<1x1x1x72x2xf32>
    %81 = vector.shape_cast %80 : vector<1x1x1x72x2xf32> to vector<72x2xf32>
    %82 = tpu.concatenate %79, %81 in 1 : vector<72x2xf32>, vector<72x2xf32> -> vector<72x4xf32>
    %c10 = arith.constant 10 : index
    %c0_58 = arith.constant 0 : index
    %83 = vector.load %arg8[%c10, %c0_58] : memref<352x4xf32, #tpu.memory_space<vmem>>, vector<72x4xf32>
    tpu.vector_store %arg8[%c10, %c0_58], %82 {strides = array<i32>} : memref<352x4xf32, #tpu.memory_space<vmem>>, vector<72x4xf32>,
    %c0_59 = arith.constant 0 : index
    %c0_60 = arith.constant 0 : index
    %84 = vector.load %arg8[%c0_59, %c0_60] : memref<352x4xf32, #tpu.memory_space<vmem>>, vector<72x4xf32>
    %c0_61 = arith.constant 0 : index
    %c0_62 = arith.constant 0 : index
    %85 = vector.load %arg5[%c0_61, %c0_62] : memref<36x4xf32, #tpu.memory_space<vmem>>, vector<4x4xf32>
    %cst_63 = arith.constant dense<0.000000e+00> : vector<72x4xf32>
    %86 = tpu.matmul %84, %85, %cst_63 {dimension_numbers = #tpu.dot_dimension_numbers<[1], [0], [0], [1], [0, 0, 1, 1], [], []>} : vector<72x4xf32>, vector<4x4xf32>, vector<72x4xf32> -> vector<72x4xf32>
    %c88_64 = arith.constant 88 : index
    %c0_65 = arith.constant 0 : index
    %87 = vector.load %arg8[%c88_64, %c0_65] : memref<352x4xf32, #tpu.memory_space<vmem>>, vector<72x4xf32>
    %c4 = arith.constant 4 : index
    %c0_66 = arith.constant 0 : index
    %88 = vector.load %arg5[%c4, %c0_66] : memref<36x4xf32, #tpu.memory_space<vmem>>, vector<4x4xf32>
    %cst_67 = arith.constant dense<0.000000e+00> : vector<72x4xf32>
    %89 = tpu.matmul %87, %88, %cst_67 {dimension_numbers = #tpu.dot_dimension_numbers<[1], [0], [0], [1], [0, 0, 1, 1], [], []>} : vector<72x4xf32>, vector<4x4xf32>, vector<72x4xf32> -> vector<72x4xf32>
    %90 = arith.addf %86, %89 : vector<72x4xf32>
    %c1_68 = arith.constant 1 : index
    %c0_69 = arith.constant 0 : index
    %91 = vector.load %arg8[%c1_68, %c0_69] : memref<352x4xf32, #tpu.memory_space<vmem>>, vector<72x4xf32>
    %c8 = arith.constant 8 : index
    %c0_70 = arith.constant 0 : index
    %92 = vector.load %arg5[%c8, %c0_70] : memref<36x4xf32, #tpu.memory_space<vmem>>, vector<4x4xf32>
    %cst_71 = arith.constant dense<0.000000e+00> : vector<72x4xf32>
    %93 = tpu.matmul %91, %92, %cst_71 {dimension_numbers = #tpu.dot_dimension_numbers<[1], [0], [0], [1], [0, 0, 1, 1], [], []>} : vector<72x4xf32>, vector<4x4xf32>, vector<72x4xf32> -> vector<72x4xf32>
    %94 = arith.addf %90, %93 : vector<72x4xf32>
    %c176_72 = arith.constant 176 : index
    %c0_73 = arith.constant 0 : index
    %95 = vector.load %arg8[%c176_72, %c0_73] : memref<352x4xf32, #tpu.memory_space<vmem>>, vector<72x4xf32>
    %c12 = arith.constant 12 : index
    %c0_74 = arith.constant 0 : index
    %96 = vector.load %arg5[%c12, %c0_74] : memref<36x4xf32, #tpu.memory_space<vmem>>, vector<4x4xf32>
    %cst_75 = arith.constant dense<0.000000e+00> : vector<72x4xf32>
    %97 = tpu.matmul %95, %96, %cst_75 {dimension_numbers = #tpu.dot_dimension_numbers<[1], [0], [0], [1], [0, 0, 1, 1], [], []>} : vector<72x4xf32>, vector<4x4xf32>, vector<72x4xf32> -> vector<72x4xf32>
    %98 = arith.addf %94, %97 : vector<72x4xf32>
    %c264_76 = arith.constant 264 : index
    %c0_77 = arith.constant 0 : index
    %99 = vector.load %arg8[%c264_76, %c0_77] : memref<352x4xf32, #tpu.memory_space<vmem>>, vector<72x4xf32>
    %c16 = arith.constant 16 : index
    %c0_78 = arith.constant 0 : index
    %100 = vector.load %arg5[%c16, %c0_78] : memref<36x4xf32, #tpu.memory_space<vmem>>, vector<4x4xf32>
    %cst_79 = arith.constant dense<0.000000e+00> : vector<72x4xf32>
    %101 = tpu.matmul %99, %100, %cst_79 {dimension_numbers = #tpu.dot_dimension_numbers<[1], [0], [0], [1], [0, 0, 1, 1], [], []>} : vector<72x4xf32>, vector<4x4xf32>, vector<72x4xf32> -> vector<72x4xf32>
    %102 = arith.addf %98, %101 : vector<72x4xf32>
    %c177_80 = arith.constant 177 : index
    %c0_81 = arith.constant 0 : index
    %103 = vector.load %arg8[%c177_80, %c0_81] : memref<352x4xf32, #tpu.memory_space<vmem>>, vector<72x4xf32>
    %c20 = arith.constant 20 : index
    %c0_82 = arith.constant 0 : index
    %104 = vector.load %arg5[%c20, %c0_82] : memref<36x4xf32, #tpu.memory_space<vmem>>, vector<4x4xf32>
    %cst_83 = arith.constant dense<0.000000e+00> : vector<72x4xf32>
    %105 = tpu.matmul %103, %104, %cst_83 {dimension_numbers = #tpu.dot_dimension_numbers<[1], [0], [0], [1], [0, 0, 1, 1], [], []>} : vector<72x4xf32>, vector<4x4xf32>, vector<72x4xf32> -> vector<72x4xf32>
    %106 = arith.addf %102, %105 : vector<72x4xf32>
    %c9_84 = arith.constant 9 : index
    %c0_85 = arith.constant 0 : index
    %107 = vector.load %arg8[%c9_84, %c0_85] : memref<352x4xf32, #tpu.memory_space<vmem>>, vector<72x4xf32>
    %c24 = arith.constant 24 : index
    %c0_86 = arith.constant 0 : index
    %108 = vector.load %arg5[%c24, %c0_86] : memref<36x4xf32, #tpu.memory_space<vmem>>, vector<4x4xf32>
    %cst_87 = arith.constant dense<0.000000e+00> : vector<72x4xf32>
    %109 = tpu.matmul %107, %108, %cst_87 {dimension_numbers = #tpu.dot_dimension_numbers<[1], [0], [0], [1], [0, 0, 1, 1], [], []>} : vector<72x4xf32>, vector<4x4xf32>, vector<72x4xf32> -> vector<72x4xf32>
    %110 = arith.addf %106, %109 : vector<72x4xf32>
    %c97_88 = arith.constant 97 : index
    %c0_89 = arith.constant 0 : index
    %111 = vector.load %arg8[%c97_88, %c0_89] : memref<352x4xf32, #tpu.memory_space<vmem>>, vector<72x4xf32>
    %c28 = arith.constant 28 : index
    %c0_90 = arith.constant 0 : index
    %112 = vector.load %arg5[%c28, %c0_90] : memref<36x4xf32, #tpu.memory_space<vmem>>, vector<4x4xf32>
    %cst_91 = arith.constant dense<0.000000e+00> : vector<72x4xf32>
    %113 = tpu.matmul %111, %112, %cst_91 {dimension_numbers = #tpu.dot_dimension_numbers<[1], [0], [0], [1], [0, 0, 1, 1], [], []>} : vector<72x4xf32>, vector<4x4xf32>, vector<72x4xf32> -> vector<72x4xf32>
    %114 = arith.addf %110, %113 : vector<72x4xf32>
    %c10_92 = arith.constant 10 : index
    %c0_93 = arith.constant 0 : index
    %115 = vector.load %arg8[%c10_92, %c0_93] : memref<352x4xf32, #tpu.memory_space<vmem>>, vector<72x4xf32>
    %c32 = arith.constant 32 : index
    %c0_94 = arith.constant 0 : index
    %116 = vector.load %arg5[%c32, %c0_94] : memref<36x4xf32, #tpu.memory_space<vmem>>, vector<4x4xf32>
    %cst_95 = arith.constant dense<0.000000e+00> : vector<72x4xf32>
    %117 = tpu.matmul %115, %116, %cst_95 {dimension_numbers = #tpu.dot_dimension_numbers<[1], [0], [0], [1], [0, 0, 1, 1], [], []>} : vector<72x4xf32>, vector<4x4xf32>, vector<72x4xf32> -> vector<72x4xf32>
    %118 = arith.addf %114, %117 : vector<72x4xf32>
    %cst_96 = arith.constant 0.000000e+00 : f32
    %119 = vector.broadcast %cst_96 : f32 to vector<72x4xf32>
    %120 = arith.maximumf %118, %119 : vector<72x4xf32>
    %cst_97 = arith.constant 0.000000e+00 : f32
    %121 = vector.shape_cast %18 : vector<72x1xi1> to vector<72x1xi1>
    %122 = vector.broadcast %121 : vector<72x1xi1> to vector<72x4xi1>
    %123 = vector.broadcast %cst_97 : f32 to vector<72x4xf32>
    %124 = arith.select %122, %120, %123 : vector<72x4xi1>, vector<72x4xf32>
    %c264_98 = arith.constant 264 : index
    %c0_99 = arith.constant 0 : index
    %125 = vector.load %arg9[%c264_98, %c0_99] : memref<352x4xf32, #tpu.memory_space<vmem>>, vector<72x4xf32>
    tpu.vector_store %arg9[%c264_98, %c0_99], %124 {strides = array<i32>} : memref<352x4xf32, #tpu.memory_space<vmem>>, vector<72x4xf32>,
    %c88_100 = arith.constant 88 : index
    %c0_101 = arith.constant 0 : index
    %126 = vector.load %arg8[%c88_100, %c0_101] : memref<352x4xf32, #tpu.memory_space<vmem>>, vector<72x4xf32>
    %c0_102 = arith.constant 0 : index
    %c0_103 = arith.constant 0 : index
    %127 = vector.load %arg5[%c0_102, %c0_103] : memref<36x4xf32, #tpu.memory_space<vmem>>, vector<4x4xf32>
    %cst_104 = arith.constant dense<0.000000e+00> : vector<72x4xf32>
    %128 = tpu.matmul %126, %127, %cst_104 {dimension_numbers = #tpu.dot_dimension_numbers<[1], [0], [0], [1], [0, 0, 1, 1], [], []>} : vector<72x4xf32>, vector<4x4xf32>, vector<72x4xf32> -> vector<72x4xf32>
    %c1_105 = arith.constant 1 : index
    %c0_106 = arith.constant 0 : index
    %129 = vector.load %arg8[%c1_105, %c0_106] : memref<352x4xf32, #tpu.memory_space<vmem>>, vector<72x4xf32>
    %c4_107 = arith.constant 4 : index
    %c0_108 = arith.constant 0 : index
    %130 = vector.load %arg5[%c4_107, %c0_108] : memref<36x4xf32, #tpu.memory_space<vmem>>, vector<4x4xf32>
    %cst_109 = arith.constant dense<0.000000e+00> : vector<72x4xf32>
    %131 = tpu.matmul %129, %130, %cst_109 {dimension_numbers = #tpu.dot_dimension_numbers<[1], [0], [0], [1], [0, 0, 1, 1], [], []>} : vector<72x4xf32>, vector<4x4xf32>, vector<72x4xf32> -> vector<72x4xf32>
    %132 = arith.addf %128, %131 : vector<72x4xf32>
    %c89 = arith.constant 89 : index
    %c0_110 = arith.constant 0 : index
    %133 = vector.load %arg8[%c89, %c0_110] : memref<352x4xf32, #tpu.memory_space<vmem>>, vector<72x4xf32>
    %c8_111 = arith.constant 8 : index
    %c0_112 = arith.constant 0 : index
    %134 = vector.load %arg5[%c8_111, %c0_112] : memref<36x4xf32, #tpu.memory_space<vmem>>, vector<4x4xf32>
    %cst_113 = arith.constant dense<0.000000e+00> : vector<72x4xf32>
    %135 = tpu.matmul %133, %134, %cst_113 {dimension_numbers = #tpu.dot_dimension_numbers<[1], [0], [0], [1], [0, 0, 1, 1], [], []>} : vector<72x4xf32>, vector<4x4xf32>, vector<72x4xf32> -> vector<72x4xf32>
    %136 = arith.addf %132, %135 : vector<72x4xf32>
    %c264_114 = arith.constant 264 : index
    %c0_115 = arith.constant 0 : index
    %137 = vector.load %arg8[%c264_114, %c0_115] : memref<352x4xf32, #tpu.memory_space<vmem>>, vector<72x4xf32>
    %c12_116 = arith.constant 12 : index
    %c0_117 = arith.constant 0 : index
    %138 = vector.load %arg5[%c12_116, %c0_117] : memref<36x4xf32, #tpu.memory_space<vmem>>, vector<4x4xf32>
    %cst_118 = arith.constant dense<0.000000e+00> : vector<72x4xf32>
    %139 = tpu.matmul %137, %138, %cst_118 {dimension_numbers = #tpu.dot_dimension_numbers<[1], [0], [0], [1], [0, 0, 1, 1], [], []>} : vector<72x4xf32>, vector<4x4xf32>, vector<72x4xf32> -> vector<72x4xf32>
    %140 = arith.addf %136, %139 : vector<72x4xf32>
    %c177_119 = arith.constant 177 : index
    %c0_120 = arith.constant 0 : index
    %141 = vector.load %arg8[%c177_119, %c0_120] : memref<352x4xf32, #tpu.memory_space<vmem>>, vector<72x4xf32>
    %c16_121 = arith.constant 16 : index
    %c0_122 = arith.constant 0 : index
    %142 = vector.load %arg5[%c16_121, %c0_122] : memref<36x4xf32, #tpu.memory_space<vmem>>, vector<4x4xf32>
    %cst_123 = arith.constant dense<0.000000e+00> : vector<72x4xf32>
    %143 = tpu.matmul %141, %142, %cst_123 {dimension_numbers = #tpu.dot_dimension_numbers<[1], [0], [0], [1], [0, 0, 1, 1], [], []>} : vector<72x4xf32>, vector<4x4xf32>, vector<72x4xf32> -> vector<72x4xf32>
    %144 = arith.addf %140, %143 : vector<72x4xf32>
    %c265 = arith.constant 265 : index
    %c0_124 = arith.constant 0 : index
    %145 = vector.load %arg8[%c265, %c0_124] : memref<352x4xf32, #tpu.memory_space<vmem>>, vector<72x4xf32>
    %c20_125 = arith.constant 20 : index
    %c0_126 = arith.constant 0 : index
    %146 = vector.load %arg5[%c20_125, %c0_126] : memref<36x4xf32, #tpu.memory_space<vmem>>, vector<4x4xf32>
    %cst_127 = arith.constant dense<0.000000e+00> : vector<72x4xf32>
    %147 = tpu.matmul %145, %146, %cst_127 {dimension_numbers = #tpu.dot_dimension_numbers<[1], [0], [0], [1], [0, 0, 1, 1], [], []>} : vector<72x4xf32>, vector<4x4xf32>, vector<72x4xf32> -> vector<72x4xf32>
    %148 = arith.addf %144, %147 : vector<72x4xf32>
    %c97_128 = arith.constant 97 : index
    %c0_129 = arith.constant 0 : index
    %149 = vector.load %arg8[%c97_128, %c0_129] : memref<352x4xf32, #tpu.memory_space<vmem>>, vector<72x4xf32>
    %c24_130 = arith.constant 24 : index
    %c0_131 = arith.constant 0 : index
    %150 = vector.load %arg5[%c24_130, %c0_131] : memref<36x4xf32, #tpu.memory_space<vmem>>, vector<4x4xf32>
    %cst_132 = arith.constant dense<0.000000e+00> : vector<72x4xf32>
    %151 = tpu.matmul %149, %150, %cst_132 {dimension_numbers = #tpu.dot_dimension_numbers<[1], [0], [0], [1], [0, 0, 1, 1], [], []>} : vector<72x4xf32>, vector<4x4xf32>, vector<72x4xf32> -> vector<72x4xf32>
    %152 = arith.addf %148, %151 : vector<72x4xf32>
    %c10_133 = arith.constant 10 : index
    %c0_134 = arith.constant 0 : index
    %153 = vector.load %arg8[%c10_133, %c0_134] : memref<352x4xf32, #tpu.memory_space<vmem>>, vector<72x4xf32>
    %c28_135 = arith.constant 28 : index
    %c0_136 = arith.constant 0 : index
    %154 = vector.load %arg5[%c28_135, %c0_136] : memref<36x4xf32, #tpu.memory_space<vmem>>, vector<4x4xf32>
    %cst_137 = arith.constant dense<0.000000e+00> : vector<72x4xf32>
    %155 = tpu.matmul %153, %154, %cst_137 {dimension_numbers = #tpu.dot_dimension_numbers<[1], [0], [0], [1], [0, 0, 1, 1], [], []>} : vector<72x4xf32>, vector<4x4xf32>, vector<72x4xf32> -> vector<72x4xf32>
    %156 = arith.addf %152, %155 : vector<72x4xf32>
    %c98 = arith.constant 98 : index
    %c0_138 = arith.constant 0 : index
    %157 = vector.load %arg8[%c98, %c0_138] : memref<352x4xf32, #tpu.memory_space<vmem>>, vector<72x4xf32>
    %c32_139 = arith.constant 32 : index
    %c0_140 = arith.constant 0 : index
    %158 = vector.load %arg5[%c32_139, %c0_140] : memref<36x4xf32, #tpu.memory_space<vmem>>, vector<4x4xf32>
    %cst_141 = arith.constant dense<0.000000e+00> : vector<72x4xf32>
    %159 = tpu.matmul %157, %158, %cst_141 {dimension_numbers = #tpu.dot_dimension_numbers<[1], [0], [0], [1], [0, 0, 1, 1], [], []>} : vector<72x4xf32>, vector<4x4xf32>, vector<72x4xf32> -> vector<72x4xf32>
    %160 = arith.addf %156, %159 : vector<72x4xf32>
    %cst_142 = arith.constant 0.000000e+00 : f32
    %161 = vector.broadcast %cst_142 : f32 to vector<72x4xf32>
    %162 = arith.maximumf %160, %161 : vector<72x4xf32>
    %cst_143 = arith.constant 0.000000e+00 : f32
    %163 = vector.shape_cast %18 : vector<72x1xi1> to vector<72x1xi1>
    %164 = vector.broadcast %163 : vector<72x1xi1> to vector<72x4xi1>
    %165 = vector.broadcast %cst_143 : f32 to vector<72x4xf32>
    %166 = arith.select %164, %162, %165 : vector<72x4xi1>, vector<72x4xf32>
    %c177_144 = arith.constant 177 : index
    %c0_145 = arith.constant 0 : index
    %167 = vector.load %arg9[%c177_144, %c0_145] : memref<352x4xf32, #tpu.memory_space<vmem>>, vector<72x4xf32>
    tpu.vector_store %arg9[%c177_144, %c0_145], %166 {strides = array<i32>} : memref<352x4xf32, #tpu.memory_space<vmem>>, vector<72x4xf32>,
    %c176_146 = arith.constant 176 : index
    %c0_147 = arith.constant 0 : index
    %168 = vector.load %arg8[%c176_146, %c0_147] : memref<352x4xf32, #tpu.memory_space<vmem>>, vector<72x4xf32>
    %c0_148 = arith.constant 0 : index
    %c0_149 = arith.constant 0 : index
    %169 = vector.load %arg5[%c0_148, %c0_149] : memref<36x4xf32, #tpu.memory_space<vmem>>, vector<4x4xf32>
    %cst_150 = arith.constant dense<0.000000e+00> : vector<72x4xf32>
    %170 = tpu.matmul %168, %169, %cst_150 {dimension_numbers = #tpu.dot_dimension_numbers<[1], [0], [0], [1], [0, 0, 1, 1], [], []>} : vector<72x4xf32>, vector<4x4xf32>, vector<72x4xf32> -> vector<72x4xf32>
    %c264_151 = arith.constant 264 : index
    %c0_152 = arith.constant 0 : index
    %171 = vector.load %arg8[%c264_151, %c0_152] : memref<352x4xf32, #tpu.memory_space<vmem>>, vector<72x4xf32>
    %c4_153 = arith.constant 4 : index
    %c0_154 = arith.constant 0 : index
    %172 = vector.load %arg5[%c4_153, %c0_154] : memref<36x4xf32, #tpu.memory_space<vmem>>, vector<4x4xf32>
    %cst_155 = arith.constant dense<0.000000e+00> : vector<72x4xf32>
    %173 = tpu.matmul %171, %172, %cst_155 {dimension_numbers = #tpu.dot_dimension_numbers<[1], [0], [0], [1], [0, 0, 1, 1], [], []>} : vector<72x4xf32>, vector<4x4xf32>, vector<72x4xf32> -> vector<72x4xf32>
    %174 = arith.addf %170, %173 : vector<72x4xf32>
    %c177_156 = arith.constant 177 : index
    %c0_157 = arith.constant 0 : index
    %175 = vector.load %arg8[%c177_156, %c0_157] : memref<352x4xf32, #tpu.memory_space<vmem>>, vector<72x4xf32>
    %c8_158 = arith.constant 8 : index
    %c0_159 = arith.constant 0 : index
    %176 = vector.load %arg5[%c8_158, %c0_159] : memref<36x4xf32, #tpu.memory_space<vmem>>, vector<4x4xf32>
    %cst_160 = arith.constant dense<0.000000e+00> : vector<72x4xf32>
    %177 = tpu.matmul %175, %176, %cst_160 {dimension_numbers = #tpu.dot_dimension_numbers<[1], [0], [0], [1], [0, 0, 1, 1], [], []>} : vector<72x4xf32>, vector<4x4xf32>, vector<72x4xf32> -> vector<72x4xf32>
    %178 = arith.addf %174, %177 : vector<72x4xf32>
    %c9_161 = arith.constant 9 : index
    %c0_162 = arith.constant 0 : index
    %179 = vector.load %arg8[%c9_161, %c0_162] : memref<352x4xf32, #tpu.memory_space<vmem>>, vector<72x4xf32>
    %c12_163 = arith.constant 12 : index
    %c0_164 = arith.constant 0 : index
    %180 = vector.load %arg5[%c12_163, %c0_164] : memref<36x4xf32, #tpu.memory_space<vmem>>, vector<4x4xf32>
    %cst_165 = arith.constant dense<0.000000e+00> : vector<72x4xf32>
    %181 = tpu.matmul %179, %180, %cst_165 {dimension_numbers = #tpu.dot_dimension_numbers<[1], [0], [0], [1], [0, 0, 1, 1], [], []>} : vector<72x4xf32>, vector<4x4xf32>, vector<72x4xf32> -> vector<72x4xf32>
    %182 = arith.addf %178, %181 : vector<72x4xf32>
    %c97_166 = arith.constant 97 : index
    %c0_167 = arith.constant 0 : index
    %183 = vector.load %arg8[%c97_166, %c0_167] : memref<352x4xf32, #tpu.memory_space<vmem>>, vector<72x4xf32>
    %c16_168 = arith.constant 16 : index
    %c0_169 = arith.constant 0 : index
    %184 = vector.load %arg5[%c16_168, %c0_169] : memref<36x4xf32, #tpu.memory_space<vmem>>, vector<4x4xf32>
    %cst_170 = arith.constant dense<0.000000e+00> : vector<72x4xf32>
    %185 = tpu.matmul %183, %184, %cst_170 {dimension_numbers = #tpu.dot_dimension_numbers<[1], [0], [0], [1], [0, 0, 1, 1], [], []>} : vector<72x4xf32>, vector<4x4xf32>, vector<72x4xf32> -> vector<72x4xf32>
    %186 = arith.addf %182, %185 : vector<72x4xf32>
    %c10_171 = arith.constant 10 : index
    %c0_172 = arith.constant 0 : index
    %187 = vector.load %arg8[%c10_171, %c0_172] : memref<352x4xf32, #tpu.memory_space<vmem>>, vector<72x4xf32>
    %c20_173 = arith.constant 20 : index
    %c0_174 = arith.constant 0 : index
    %188 = vector.load %arg5[%c20_173, %c0_174] : memref<36x4xf32, #tpu.memory_space<vmem>>, vector<4x4xf32>
    %cst_175 = arith.constant dense<0.000000e+00> : vector<72x4xf32>
    %189 = tpu.matmul %187, %188, %cst_175 {dimension_numbers = #tpu.dot_dimension_numbers<[1], [0], [0], [1], [0, 0, 1, 1], [], []>} : vector<72x4xf32>, vector<4x4xf32>, vector<72x4xf32> -> vector<72x4xf32>
    %190 = arith.addf %186, %189 : vector<72x4xf32>
    %c185 = arith.constant 185 : index
    %c0_176 = arith.constant 0 : index
    %191 = vector.load %arg8[%c185, %c0_176] : memref<352x4xf32, #tpu.memory_space<vmem>>, vector<72x4xf32>
    %c24_177 = arith.constant 24 : index
    %c0_178 = arith.constant 0 : index
    %192 = vector.load %arg5[%c24_177, %c0_178] : memref<36x4xf32, #tpu.memory_space<vmem>>, vector<4x4xf32>
    %cst_179 = arith.constant dense<0.000000e+00> : vector<72x4xf32>
    %193 = tpu.matmul %191, %192, %cst_179 {dimension_numbers = #tpu.dot_dimension_numbers<[1], [0], [0], [1], [0, 0, 1, 1], [], []>} : vector<72x4xf32>, vector<4x4xf32>, vector<72x4xf32> -> vector<72x4xf32>
    %194 = arith.addf %190, %193 : vector<72x4xf32>
    %c273 = arith.constant 273 : index
    %c0_180 = arith.constant 0 : index
    %195 = vector.load %arg8[%c273, %c0_180] : memref<352x4xf32, #tpu.memory_space<vmem>>, vector<72x4xf32>
    %c28_181 = arith.constant 28 : index
    %c0_182 = arith.constant 0 : index
    %196 = vector.load %arg5[%c28_181, %c0_182] : memref<36x4xf32, #tpu.memory_space<vmem>>, vector<4x4xf32>
    %cst_183 = arith.constant dense<0.000000e+00> : vector<72x4xf32>
    %197 = tpu.matmul %195, %196, %cst_183 {dimension_numbers = #tpu.dot_dimension_numbers<[1], [0], [0], [1], [0, 0, 1, 1], [], []>} : vector<72x4xf32>, vector<4x4xf32>, vector<72x4xf32> -> vector<72x4xf32>
    %198 = arith.addf %194, %197 : vector<72x4xf32>
    %c186 = arith.constant 186 : index
    %c0_184 = arith.constant 0 : index
    %199 = vector.load %arg8[%c186, %c0_184] : memref<352x4xf32, #tpu.memory_space<vmem>>, vector<72x4xf32>
    %c32_185 = arith.constant 32 : index
    %c0_186 = arith.constant 0 : index
    %200 = vector.load %arg5[%c32_185, %c0_186] : memref<36x4xf32, #tpu.memory_space<vmem>>, vector<4x4xf32>
    %cst_187 = arith.constant dense<0.000000e+00> : vector<72x4xf32>
    %201 = tpu.matmul %199, %200, %cst_187 {dimension_numbers = #tpu.dot_dimension_numbers<[1], [0], [0], [1], [0, 0, 1, 1], [], []>} : vector<72x4xf32>, vector<4x4xf32>, vector<72x4xf32> -> vector<72x4xf32>
    %202 = arith.addf %198, %201 : vector<72x4xf32>
    %cst_188 = arith.constant 0.000000e+00 : f32
    %203 = vector.broadcast %cst_188 : f32 to vector<72x4xf32>
    %204 = arith.maximumf %202, %203 : vector<72x4xf32>
    %cst_189 = arith.constant 0.000000e+00 : f32
    %205 = vector.shape_cast %18 : vector<72x1xi1> to vector<72x1xi1>
    %206 = vector.broadcast %205 : vector<72x1xi1> to vector<72x4xi1>
    %207 = vector.broadcast %cst_189 : f32 to vector<72x4xf32>
    %208 = arith.select %206, %204, %207 : vector<72x4xi1>, vector<72x4xf32>
    %c97_190 = arith.constant 97 : index
    %c0_191 = arith.constant 0 : index
    %209 = vector.load %arg9[%c97_190, %c0_191] : memref<352x4xf32, #tpu.memory_space<vmem>>, vector<72x4xf32>
    tpu.vector_store %arg9[%c97_190, %c0_191], %208 {strides = array<i32>} : memref<352x4xf32, #tpu.memory_space<vmem>>, vector<72x4xf32>,
    %c264_192 = arith.constant 264 : index
    %c0_193 = arith.constant 0 : index
    %210 = vector.load %arg8[%c264_192, %c0_193] : memref<352x4xf32, #tpu.memory_space<vmem>>, vector<72x4xf32>
    %c0_194 = arith.constant 0 : index
    %c0_195 = arith.constant 0 : index
    %211 = vector.load %arg5[%c0_194, %c0_195] : memref<36x4xf32, #tpu.memory_space<vmem>>, vector<4x4xf32>
    %cst_196 = arith.constant dense<0.000000e+00> : vector<72x4xf32>
    %212 = tpu.matmul %210, %211, %cst_196 {dimension_numbers = #tpu.dot_dimension_numbers<[1], [0], [0], [1], [0, 0, 1, 1], [], []>} : vector<72x4xf32>, vector<4x4xf32>, vector<72x4xf32> -> vector<72x4xf32>
    %c177_197 = arith.constant 177 : index
    %c0_198 = arith.constant 0 : index
    %213 = vector.load %arg8[%c177_197, %c0_198] : memref<352x4xf32, #tpu.memory_space<vmem>>, vector<72x4xf32>
    %c4_199 = arith.constant 4 : index
    %c0_200 = arith.constant 0 : index
    %214 = vector.load %arg5[%c4_199, %c0_200] : memref<36x4xf32, #tpu.memory_space<vmem>>, vector<4x4xf32>
    %cst_201 = arith.constant dense<0.000000e+00> : vector<72x4xf32>
    %215 = tpu.matmul %213, %214, %cst_201 {dimension_numbers = #tpu.dot_dimension_numbers<[1], [0], [0], [1], [0, 0, 1, 1], [], []>} : vector<72x4xf32>, vector<4x4xf32>, vector<72x4xf32> -> vector<72x4xf32>
    %216 = arith.addf %212, %215 : vector<72x4xf32>
    %c265_202 = arith.constant 265 : index
    %c0_203 = arith.constant 0 : index
    %217 = vector.load %arg8[%c265_202, %c0_203] : memref<352x4xf32, #tpu.memory_space<vmem>>, vector<72x4xf32>
    %c8_204 = arith.constant 8 : index
    %c0_205 = arith.constant 0 : index
    %218 = vector.load %arg5[%c8_204, %c0_205] : memref<36x4xf32, #tpu.memory_space<vmem>>, vector<4x4xf32>
    %cst_206 = arith.constant dense<0.000000e+00> : vector<72x4xf32>
    %219 = tpu.matmul %217, %218, %cst_206 {dimension_numbers = #tpu.dot_dimension_numbers<[1], [0], [0], [1], [0, 0, 1, 1], [], []>} : vector<72x4xf32>, vector<4x4xf32>, vector<72x4xf32> -> vector<72x4xf32>
    %220 = arith.addf %216, %219 : vector<72x4xf32>
    %c97_207 = arith.constant 97 : index
    %c0_208 = arith.constant 0 : index
    %221 = vector.load %arg8[%c97_207, %c0_208] : memref<352x4xf32, #tpu.memory_space<vmem>>, vector<72x4xf32>
    %c12_209 = arith.constant 12 : index
    %c0_210 = arith.constant 0 : index
    %222 = vector.load %arg5[%c12_209, %c0_210] : memref<36x4xf32, #tpu.memory_space<vmem>>, vector<4x4xf32>
    %cst_211 = arith.constant dense<0.000000e+00> : vector<72x4xf32>
    %223 = tpu.matmul %221, %222, %cst_211 {dimension_numbers = #tpu.dot_dimension_numbers<[1], [0], [0], [1], [0, 0, 1, 1], [], []>} : vector<72x4xf32>, vector<4x4xf32>, vector<72x4xf32> -> vector<72x4xf32>
    %224 = arith.addf %220, %223 : vector<72x4xf32>
    %c10_212 = arith.constant 10 : index
    %c0_213 = arith.constant 0 : index
    %225 = vector.load %arg8[%c10_212, %c0_213] : memref<352x4xf32, #tpu.memory_space<vmem>>, vector<72x4xf32>
    %c16_214 = arith.constant 16 : index
    %c0_215 = arith.constant 0 : index
    %226 = vector.load %arg5[%c16_214, %c0_215] : memref<36x4xf32, #tpu.memory_space<vmem>>, vector<4x4xf32>
    %cst_216 = arith.constant dense<0.000000e+00> : vector<72x4xf32>
    %227 = tpu.matmul %225, %226, %cst_216 {dimension_numbers = #tpu.dot_dimension_numbers<[1], [0], [0], [1], [0, 0, 1, 1], [], []>} : vector<72x4xf32>, vector<4x4xf32>, vector<72x4xf32> -> vector<72x4xf32>
    %228 = arith.addf %224, %227 : vector<72x4xf32>
    %c98_217 = arith.constant 98 : index
    %c0_218 = arith.constant 0 : index
    %229 = vector.load %arg8[%c98_217, %c0_218] : memref<352x4xf32, #tpu.memory_space<vmem>>, vector<72x4xf32>
    %c20_219 = arith.constant 20 : index
    %c0_220 = arith.constant 0 : index
    %230 = vector.load %arg5[%c20_219, %c0_220] : memref<36x4xf32, #tpu.memory_space<vmem>>, vector<4x4xf32>
    %cst_221 = arith.constant dense<0.000000e+00> : vector<72x4xf32>
    %231 = tpu.matmul %229, %230, %cst_221 {dimension_numbers = #tpu.dot_dimension_numbers<[1], [0], [0], [1], [0, 0, 1, 1], [], []>} : vector<72x4xf32>, vector<4x4xf32>, vector<72x4xf32> -> vector<72x4xf32>
    %232 = arith.addf %228, %231 : vector<72x4xf32>
    %c273_222 = arith.constant 273 : index
    %c0_223 = arith.constant 0 : index
    %233 = vector.load %arg8[%c273_222, %c0_223] : memref<352x4xf32, #tpu.memory_space<vmem>>, vector<72x4xf32>
    %c24_224 = arith.constant 24 : index
    %c0_225 = arith.constant 0 : index
    %234 = vector.load %arg5[%c24_224, %c0_225] : memref<36x4xf32, #tpu.memory_space<vmem>>, vector<4x4xf32>
    %cst_226 = arith.constant dense<0.000000e+00> : vector<72x4xf32>
    %235 = tpu.matmul %233, %234, %cst_226 {dimension_numbers = #tpu.dot_dimension_numbers<[1], [0], [0], [1], [0, 0, 1, 1], [], []>} : vector<72x4xf32>, vector<4x4xf32>, vector<72x4xf32> -> vector<72x4xf32>
    %236 = arith.addf %232, %235 : vector<72x4xf32>
    %c186_227 = arith.constant 186 : index
    %c0_228 = arith.constant 0 : index
    %237 = vector.load %arg8[%c186_227, %c0_228] : memref<352x4xf32, #tpu.memory_space<vmem>>, vector<72x4xf32>
    %c28_229 = arith.constant 28 : index
    %c0_230 = arith.constant 0 : index
    %238 = vector.load %arg5[%c28_229, %c0_230] : memref<36x4xf32, #tpu.memory_space<vmem>>, vector<4x4xf32>
    %cst_231 = arith.constant dense<0.000000e+00> : vector<72x4xf32>
    %239 = tpu.matmul %237, %238, %cst_231 {dimension_numbers = #tpu.dot_dimension_numbers<[1], [0], [0], [1], [0, 0, 1, 1], [], []>} : vector<72x4xf32>, vector<4x4xf32>, vector<72x4xf32> -> vector<72x4xf32>
    %240 = arith.addf %236, %239 : vector<72x4xf32>
    %c274 = arith.constant 274 : index
    %c0_232 = arith.constant 0 : index
    %241 = vector.load %arg8[%c274, %c0_232] : memref<352x4xf32, #tpu.memory_space<vmem>>, vector<72x4xf32>
    %c32_233 = arith.constant 32 : index
    %c0_234 = arith.constant 0 : index
    %242 = vector.load %arg5[%c32_233, %c0_234] : memref<36x4xf32, #tpu.memory_space<vmem>>, vector<4x4xf32>
    %cst_235 = arith.constant dense<0.000000e+00> : vector<72x4xf32>
    %243 = tpu.matmul %241, %242, %cst_235 {dimension_numbers = #tpu.dot_dimension_numbers<[1], [0], [0], [1], [0, 0, 1, 1], [], []>} : vector<72x4xf32>, vector<4x4xf32>, vector<72x4xf32> -> vector<72x4xf32>
    %244 = arith.addf %240, %243 : vector<72x4xf32>
    %cst_236 = arith.constant 0.000000e+00 : f32
    %245 = vector.broadcast %cst_236 : f32 to vector<72x4xf32>
    %246 = arith.maximumf %244, %245 : vector<72x4xf32>
    %cst_237 = arith.constant 0.000000e+00 : f32
    %247 = vector.shape_cast %18 : vector<72x1xi1> to vector<72x1xi1>
    %248 = vector.broadcast %247 : vector<72x1xi1> to vector<72x4xi1>
    %249 = vector.broadcast %cst_237 : f32 to vector<72x4xf32>
    %250 = arith.select %248, %246, %249 : vector<72x4xi1>, vector<72x4xf32>
    %c10_238 = arith.constant 10 : index
    %c0_239 = arith.constant 0 : index
    %251 = vector.load %arg9[%c10_238, %c0_239] : memref<352x4xf32, #tpu.memory_space<vmem>>, vector<72x4xf32>
    tpu.vector_store %arg9[%c10_238, %c0_239], %250 {strides = array<i32>} : memref<352x4xf32, #tpu.memory_space<vmem>>, vector<72x4xf32>,
    %c0_240 = arith.constant 0 : index
    %c0_241 = arith.constant 0 : index
    %252 = vector.load %arg9[%c0_240, %c0_241] : memref<352x4xf32, #tpu.memory_space<vmem>>, vector<72x4xf32>
    %c0_242 = arith.constant 0 : index
    %c0_243 = arith.constant 0 : index
    %253 = vector.load %arg6[%c0_242, %c0_243] : memref<36x4xf32, #tpu.memory_space<vmem>>, vector<4x4xf32>
    %cst_244 = arith.constant dense<0.000000e+00> : vector<72x4xf32>
    %254 = tpu.matmul %252, %253, %cst_244 {dimension_numbers = #tpu.dot_dimension_numbers<[1], [0], [0], [1], [0, 0, 1, 1], [], []>} : vector<72x4xf32>, vector<4x4xf32>, vector<72x4xf32> -> vector<72x4xf32>
    %c88_245 = arith.constant 88 : index
    %c0_246 = arith.constant 0 : index
    %255 = vector.load %arg9[%c88_245, %c0_246] : memref<352x4xf32, #tpu.memory_space<vmem>>, vector<72x4xf32>
    %c4_247 = arith.constant 4 : index
    %c0_248 = arith.constant 0 : index
    %256 = vector.load %arg6[%c4_247, %c0_248] : memref<36x4xf32, #tpu.memory_space<vmem>>, vector<4x4xf32>
    %cst_249 = arith.constant dense<0.000000e+00> : vector<72x4xf32>
    %257 = tpu.matmul %255, %256, %cst_249 {dimension_numbers = #tpu.dot_dimension_numbers<[1], [0], [0], [1], [0, 0, 1, 1], [], []>} : vector<72x4xf32>, vector<4x4xf32>, vector<72x4xf32> -> vector<72x4xf32>
    %258 = arith.addf %254, %257 : vector<72x4xf32>
    %c1_250 = arith.constant 1 : index
    %c0_251 = arith.constant 0 : index
    %259 = vector.load %arg9[%c1_250, %c0_251] : memref<352x4xf32, #tpu.memory_space<vmem>>, vector<72x4xf32>
    %c8_252 = arith.constant 8 : index
    %c0_253 = arith.constant 0 : index
    %260 = vector.load %arg6[%c8_252, %c0_253] : memref<36x4xf32, #tpu.memory_space<vmem>>, vector<4x4xf32>
    %cst_254 = arith.constant dense<0.000000e+00> : vector<72x4xf32>
    %261 = tpu.matmul %259, %260, %cst_254 {dimension_numbers = #tpu.dot_dimension_numbers<[1], [0], [0], [1], [0, 0, 1, 1], [], []>} : vector<72x4xf32>, vector<4x4xf32>, vector<72x4xf32> -> vector<72x4xf32>
    %262 = arith.addf %258, %261 : vector<72x4xf32>
    %c176_255 = arith.constant 176 : index
    %c0_256 = arith.constant 0 : index
    %263 = vector.load %arg9[%c176_255, %c0_256] : memref<352x4xf32, #tpu.memory_space<vmem>>, vector<72x4xf32>
    %c12_257 = arith.constant 12 : index
    %c0_258 = arith.constant 0 : index
    %264 = vector.load %arg6[%c12_257, %c0_258] : memref<36x4xf32, #tpu.memory_space<vmem>>, vector<4x4xf32>
    %cst_259 = arith.constant dense<0.000000e+00> : vector<72x4xf32>
    %265 = tpu.matmul %263, %264, %cst_259 {dimension_numbers = #tpu.dot_dimension_numbers<[1], [0], [0], [1], [0, 0, 1, 1], [], []>} : vector<72x4xf32>, vector<4x4xf32>, vector<72x4xf32> -> vector<72x4xf32>
    %266 = arith.addf %262, %265 : vector<72x4xf32>
    %c264_260 = arith.constant 264 : index
    %c0_261 = arith.constant 0 : index
    %267 = vector.load %arg9[%c264_260, %c0_261] : memref<352x4xf32, #tpu.memory_space<vmem>>, vector<72x4xf32>
    %c16_262 = arith.constant 16 : index
    %c0_263 = arith.constant 0 : index
    %268 = vector.load %arg6[%c16_262, %c0_263] : memref<36x4xf32, #tpu.memory_space<vmem>>, vector<4x4xf32>
    %cst_264 = arith.constant dense<0.000000e+00> : vector<72x4xf32>
    %269 = tpu.matmul %267, %268, %cst_264 {dimension_numbers = #tpu.dot_dimension_numbers<[1], [0], [0], [1], [0, 0, 1, 1], [], []>} : vector<72x4xf32>, vector<4x4xf32>, vector<72x4xf32> -> vector<72x4xf32>
    %270 = arith.addf %266, %269 : vector<72x4xf32>
    %c177_265 = arith.constant 177 : index
    %c0_266 = arith.constant 0 : index
    %271 = vector.load %arg9[%c177_265, %c0_266] : memref<352x4xf32, #tpu.memory_space<vmem>>, vector<72x4xf32>
    %c20_267 = arith.constant 20 : index
    %c0_268 = arith.constant 0 : index
    %272 = vector.load %arg6[%c20_267, %c0_268] : memref<36x4xf32, #tpu.memory_space<vmem>>, vector<4x4xf32>
    %cst_269 = arith.constant dense<0.000000e+00> : vector<72x4xf32>
    %273 = tpu.matmul %271, %272, %cst_269 {dimension_numbers = #tpu.dot_dimension_numbers<[1], [0], [0], [1], [0, 0, 1, 1], [], []>} : vector<72x4xf32>, vector<4x4xf32>, vector<72x4xf32> -> vector<72x4xf32>
    %274 = arith.addf %270, %273 : vector<72x4xf32>
    %c9_270 = arith.constant 9 : index
    %c0_271 = arith.constant 0 : index
    %275 = vector.load %arg9[%c9_270, %c0_271] : memref<352x4xf32, #tpu.memory_space<vmem>>, vector<72x4xf32>
    %c24_272 = arith.constant 24 : index
    %c0_273 = arith.constant 0 : index
    %276 = vector.load %arg6[%c24_272, %c0_273] : memref<36x4xf32, #tpu.memory_space<vmem>>, vector<4x4xf32>
    %cst_274 = arith.constant dense<0.000000e+00> : vector<72x4xf32>
    %277 = tpu.matmul %275, %276, %cst_274 {dimension_numbers = #tpu.dot_dimension_numbers<[1], [0], [0], [1], [0, 0, 1, 1], [], []>} : vector<72x4xf32>, vector<4x4xf32>, vector<72x4xf32> -> vector<72x4xf32>
    %278 = arith.addf %274, %277 : vector<72x4xf32>
    %c97_275 = arith.constant 97 : index
    %c0_276 = arith.constant 0 : index
    %279 = vector.load %arg9[%c97_275, %c0_276] : memref<352x4xf32, #tpu.memory_space<vmem>>, vector<72x4xf32>
    %c28_277 = arith.constant 28 : index
    %c0_278 = arith.constant 0 : index
    %280 = vector.load %arg6[%c28_277, %c0_278] : memref<36x4xf32, #tpu.memory_space<vmem>>, vector<4x4xf32>
    %cst_279 = arith.constant dense<0.000000e+00> : vector<72x4xf32>
    %281 = tpu.matmul %279, %280, %cst_279 {dimension_numbers = #tpu.dot_dimension_numbers<[1], [0], [0], [1], [0, 0, 1, 1], [], []>} : vector<72x4xf32>, vector<4x4xf32>, vector<72x4xf32> -> vector<72x4xf32>
    %282 = arith.addf %278, %281 : vector<72x4xf32>
    %c10_280 = arith.constant 10 : index
    %c0_281 = arith.constant 0 : index
    %283 = vector.load %arg9[%c10_280, %c0_281] : memref<352x4xf32, #tpu.memory_space<vmem>>, vector<72x4xf32>
    %c32_282 = arith.constant 32 : index
    %c0_283 = arith.constant 0 : index
    %284 = vector.load %arg6[%c32_282, %c0_283] : memref<36x4xf32, #tpu.memory_space<vmem>>, vector<4x4xf32>
    %cst_284 = arith.constant dense<0.000000e+00> : vector<72x4xf32>
    %285 = tpu.matmul %283, %284, %cst_284 {dimension_numbers = #tpu.dot_dimension_numbers<[1], [0], [0], [1], [0, 0, 1, 1], [], []>} : vector<72x4xf32>, vector<4x4xf32>, vector<72x4xf32> -> vector<72x4xf32>
    %286 = arith.addf %282, %285 : vector<72x4xf32>
    %cst_285 = arith.constant 0.000000e+00 : f32
    %287 = vector.broadcast %cst_285 : f32 to vector<72x4xf32>
    %288 = arith.maximumf %286, %287 : vector<72x4xf32>
    %c0_286 = arith.constant 0 : index
    %c0_287 = arith.constant 0 : index
    %c0_288 = arith.constant 0 : index
    %c0_289 = arith.constant 0 : index
    %c0_290 = arith.constant 0 : index
    %289 = vector.load %arg7[%c0_286, %c0_287, %c0_288, %c0_289, %c0_290] : memref<1x2x2x72x4xf32, #tpu.memory_space<vmem>>, vector<1x1x1x72x4xf32>
    %290 = vector.shape_cast %289 : vector<1x1x1x72x4xf32> to vector<72x4xf32>
    %291 = vector.shape_cast %288 : vector<72x4xf32> to vector<1x1x1x72x4xf32>
    tpu.vector_store %arg7[%c0_286, %c0_287, %c0_288, %c0_289, %c0_290], %291 {strides = array<i32>} : memref<1x2x2x72x4xf32, #tpu.memory_space<vmem>>, vector<1x1x1x72x4xf32>,
    %c88_291 = arith.constant 88 : index
    %c0_292 = arith.constant 0 : index
    %292 = vector.load %arg9[%c88_291, %c0_292] : memref<352x4xf32, #tpu.memory_space<vmem>>, vector<72x4xf32>
    %c0_293 = arith.constant 0 : index
    %c0_294 = arith.constant 0 : index
    %293 = vector.load %arg6[%c0_293, %c0_294] : memref<36x4xf32, #tpu.memory_space<vmem>>, vector<4x4xf32>
    %cst_295 = arith.constant dense<0.000000e+00> : vector<72x4xf32>
    %294 = tpu.matmul %292, %293, %cst_295 {dimension_numbers = #tpu.dot_dimension_numbers<[1], [0], [0], [1], [0, 0, 1, 1], [], []>} : vector<72x4xf32>, vector<4x4xf32>, vector<72x4xf32> -> vector<72x4xf32>
    %c1_296 = arith.constant 1 : index
    %c0_297 = arith.constant 0 : index
    %295 = vector.load %arg9[%c1_296, %c0_297] : memref<352x4xf32, #tpu.memory_space<vmem>>, vector<72x4xf32>
    %c4_298 = arith.constant 4 : index
    %c0_299 = arith.constant 0 : index
    %296 = vector.load %arg6[%c4_298, %c0_299] : memref<36x4xf32, #tpu.memory_space<vmem>>, vector<4x4xf32>
    %cst_300 = arith.constant dense<0.000000e+00> : vector<72x4xf32>
    %297 = tpu.matmul %295, %296, %cst_300 {dimension_numbers = #tpu.dot_dimension_numbers<[1], [0], [0], [1], [0, 0, 1, 1], [], []>} : vector<72x4xf32>, vector<4x4xf32>, vector<72x4xf32> -> vector<72x4xf32>
    %298 = arith.addf %294, %297 : vector<72x4xf32>
    %c89_301 = arith.constant 89 : index
    %c0_302 = arith.constant 0 : index
    %299 = vector.load %arg9[%c89_301, %c0_302] : memref<352x4xf32, #tpu.memory_space<vmem>>, vector<72x4xf32>
    %c8_303 = arith.constant 8 : index
    %c0_304 = arith.constant 0 : index
    %300 = vector.load %arg6[%c8_303, %c0_304] : memref<36x4xf32, #tpu.memory_space<vmem>>, vector<4x4xf32>
    %cst_305 = arith.constant dense<0.000000e+00> : vector<72x4xf32>
    %301 = tpu.matmul %299, %300, %cst_305 {dimension_numbers = #tpu.dot_dimension_numbers<[1], [0], [0], [1], [0, 0, 1, 1], [], []>} : vector<72x4xf32>, vector<4x4xf32>, vector<72x4xf32> -> vector<72x4xf32>
    %302 = arith.addf %298, %301 : vector<72x4xf32>
    %c264_306 = arith.constant 264 : index
    %c0_307 = arith.constant 0 : index
    %303 = vector.load %arg9[%c264_306, %c0_307] : memref<352x4xf32, #tpu.memory_space<vmem>>, vector<72x4xf32>
    %c12_308 = arith.constant 12 : index
    %c0_309 = arith.constant 0 : index
    %304 = vector.load %arg6[%c12_308, %c0_309] : memref<36x4xf32, #tpu.memory_space<vmem>>, vector<4x4xf32>
    %cst_310 = arith.constant dense<0.000000e+00> : vector<72x4xf32>
    %305 = tpu.matmul %303, %304, %cst_310 {dimension_numbers = #tpu.dot_dimension_numbers<[1], [0], [0], [1], [0, 0, 1, 1], [], []>} : vector<72x4xf32>, vector<4x4xf32>, vector<72x4xf32> -> vector<72x4xf32>
    %306 = arith.addf %302, %305 : vector<72x4xf32>
    %c177_311 = arith.constant 177 : index
    %c0_312 = arith.constant 0 : index
    %307 = vector.load %arg9[%c177_311, %c0_312] : memref<352x4xf32, #tpu.memory_space<vmem>>, vector<72x4xf32>
    %c16_313 = arith.constant 16 : index
    %c0_314 = arith.constant 0 : index
    %308 = vector.load %arg6[%c16_313, %c0_314] : memref<36x4xf32, #tpu.memory_space<vmem>>, vector<4x4xf32>
    %cst_315 = arith.constant dense<0.000000e+00> : vector<72x4xf32>
    %309 = tpu.matmul %307, %308, %cst_315 {dimension_numbers = #tpu.dot_dimension_numbers<[1], [0], [0], [1], [0, 0, 1, 1], [], []>} : vector<72x4xf32>, vector<4x4xf32>, vector<72x4xf32> -> vector<72x4xf32>
    %310 = arith.addf %306, %309 : vector<72x4xf32>
    %c265_316 = arith.constant 265 : index
    %c0_317 = arith.constant 0 : index
    %311 = vector.load %arg9[%c265_316, %c0_317] : memref<352x4xf32, #tpu.memory_space<vmem>>, vector<72x4xf32>
    %c20_318 = arith.constant 20 : index
    %c0_319 = arith.constant 0 : index
    %312 = vector.load %arg6[%c20_318, %c0_319] : memref<36x4xf32, #tpu.memory_space<vmem>>, vector<4x4xf32>
    %cst_320 = arith.constant dense<0.000000e+00> : vector<72x4xf32>
    %313 = tpu.matmul %311, %312, %cst_320 {dimension_numbers = #tpu.dot_dimension_numbers<[1], [0], [0], [1], [0, 0, 1, 1], [], []>} : vector<72x4xf32>, vector<4x4xf32>, vector<72x4xf32> -> vector<72x4xf32>
    %314 = arith.addf %310, %313 : vector<72x4xf32>
    %c97_321 = arith.constant 97 : index
    %c0_322 = arith.constant 0 : index
    %315 = vector.load %arg9[%c97_321, %c0_322] : memref<352x4xf32, #tpu.memory_space<vmem>>, vector<72x4xf32>
    %c24_323 = arith.constant 24 : index
    %c0_324 = arith.constant 0 : index
    %316 = vector.load %arg6[%c24_323, %c0_324] : memref<36x4xf32, #tpu.memory_space<vmem>>, vector<4x4xf32>
    %cst_325 = arith.constant dense<0.000000e+00> : vector<72x4xf32>
    %317 = tpu.matmul %315, %316, %cst_325 {dimension_numbers = #tpu.dot_dimension_numbers<[1], [0], [0], [1], [0, 0, 1, 1], [], []>} : vector<72x4xf32>, vector<4x4xf32>, vector<72x4xf32> -> vector<72x4xf32>
    %318 = arith.addf %314, %317 : vector<72x4xf32>
    %c10_326 = arith.constant 10 : index
    %c0_327 = arith.constant 0 : index
    %319 = vector.load %arg9[%c10_326, %c0_327] : memref<352x4xf32, #tpu.memory_space<vmem>>, vector<72x4xf32>
    %c28_328 = arith.constant 28 : index
    %c0_329 = arith.constant 0 : index
    %320 = vector.load %arg6[%c28_328, %c0_329] : memref<36x4xf32, #tpu.memory_space<vmem>>, vector<4x4xf32>
    %cst_330 = arith.constant dense<0.000000e+00> : vector<72x4xf32>
    %321 = tpu.matmul %319, %320, %cst_330 {dimension_numbers = #tpu.dot_dimension_numbers<[1], [0], [0], [1], [0, 0, 1, 1], [], []>} : vector<72x4xf32>, vector<4x4xf32>, vector<72x4xf32> -> vector<72x4xf32>
    %322 = arith.addf %318, %321 : vector<72x4xf32>
    %c98_331 = arith.constant 98 : index
    %c0_332 = arith.constant 0 : index
    %323 = vector.load %arg9[%c98_331, %c0_332] : memref<352x4xf32, #tpu.memory_space<vmem>>, vector<72x4xf32>
    %c32_333 = arith.constant 32 : index
    %c0_334 = arith.constant 0 : index
    %324 = vector.load %arg6[%c32_333, %c0_334] : memref<36x4xf32, #tpu.memory_space<vmem>>, vector<4x4xf32>
    %cst_335 = arith.constant dense<0.000000e+00> : vector<72x4xf32>
    %325 = tpu.matmul %323, %324, %cst_335 {dimension_numbers = #tpu.dot_dimension_numbers<[1], [0], [0], [1], [0, 0, 1, 1], [], []>} : vector<72x4xf32>, vector<4x4xf32>, vector<72x4xf32> -> vector<72x4xf32>
    %326 = arith.addf %322, %325 : vector<72x4xf32>
    %cst_336 = arith.constant 0.000000e+00 : f32
    %327 = vector.broadcast %cst_336 : f32 to vector<72x4xf32>
    %328 = arith.maximumf %326, %327 : vector<72x4xf32>
    %c0_337 = arith.constant 0 : index
    %c0_338 = arith.constant 0 : index
    %c1_339 = arith.constant 1 : index
    %c0_340 = arith.constant 0 : index
    %c0_341 = arith.constant 0 : index
    %329 = vector.load %arg7[%c0_337, %c0_338, %c1_339, %c0_340, %c0_341] : memref<1x2x2x72x4xf32, #tpu.memory_space<vmem>>, vector<1x1x1x72x4xf32>
    %330 = vector.shape_cast %329 : vector<1x1x1x72x4xf32> to vector<72x4xf32>
    %331 = vector.shape_cast %328 : vector<72x4xf32> to vector<1x1x1x72x4xf32>
    tpu.vector_store %arg7[%c0_337, %c0_338, %c1_339, %c0_340, %c0_341], %331 {strides = array<i32>} : memref<1x2x2x72x4xf32, #tpu.memory_space<vmem>>, vector<1x1x1x72x4xf32>,
    %c176_342 = arith.constant 176 : index
    %c0_343 = arith.constant 0 : index
    %332 = vector.load %arg9[%c176_342, %c0_343] : memref<352x4xf32, #tpu.memory_space<vmem>>, vector<72x4xf32>
    %c0_344 = arith.constant 0 : index
    %c0_345 = arith.constant 0 : index
    %333 = vector.load %arg6[%c0_344, %c0_345] : memref<36x4xf32, #tpu.memory_space<vmem>>, vector<4x4xf32>
    %cst_346 = arith.constant dense<0.000000e+00> : vector<72x4xf32>
    %334 = tpu.matmul %332, %333, %cst_346 {dimension_numbers = #tpu.dot_dimension_numbers<[1], [0], [0], [1], [0, 0, 1, 1], [], []>} : vector<72x4xf32>, vector<4x4xf32>, vector<72x4xf32> -> vector<72x4xf32>
    %c264_347 = arith.constant 264 : index
    %c0_348 = arith.constant 0 : index
    %335 = vector.load %arg9[%c264_347, %c0_348] : memref<352x4xf32, #tpu.memory_space<vmem>>, vector<72x4xf32>
    %c4_349 = arith.constant 4 : index
    %c0_350 = arith.constant 0 : index
    %336 = vector.load %arg6[%c4_349, %c0_350] : memref<36x4xf32, #tpu.memory_space<vmem>>, vector<4x4xf32>
    %cst_351 = arith.constant dense<0.000000e+00> : vector<72x4xf32>
    %337 = tpu.matmul %335, %336, %cst_351 {dimension_numbers = #tpu.dot_dimension_numbers<[1], [0], [0], [1], [0, 0, 1, 1], [], []>} : vector<72x4xf32>, vector<4x4xf32>, vector<72x4xf32> -> vector<72x4xf32>
    %338 = arith.addf %334, %337 : vector<72x4xf32>
    %c177_352 = arith.constant 177 : index
    %c0_353 = arith.constant 0 : index
    %339 = vector.load %arg9[%c177_352, %c0_353] : memref<352x4xf32, #tpu.memory_space<vmem>>, vector<72x4xf32>
    %c8_354 = arith.constant 8 : index
    %c0_355 = arith.constant 0 : index
    %340 = vector.load %arg6[%c8_354, %c0_355] : memref<36x4xf32, #tpu.memory_space<vmem>>, vector<4x4xf32>
    %cst_356 = arith.constant dense<0.000000e+00> : vector<72x4xf32>
    %341 = tpu.matmul %339, %340, %cst_356 {dimension_numbers = #tpu.dot_dimension_numbers<[1], [0], [0], [1], [0, 0, 1, 1], [], []>} : vector<72x4xf32>, vector<4x4xf32>, vector<72x4xf32> -> vector<72x4xf32>
    %342 = arith.addf %338, %341 : vector<72x4xf32>
    %c9_357 = arith.constant 9 : index
    %c0_358 = arith.constant 0 : index
    %343 = vector.load %arg9[%c9_357, %c0_358] : memref<352x4xf32, #tpu.memory_space<vmem>>, vector<72x4xf32>
    %c12_359 = arith.constant 12 : index
    %c0_360 = arith.constant 0 : index
    %344 = vector.load %arg6[%c12_359, %c0_360] : memref<36x4xf32, #tpu.memory_space<vmem>>, vector<4x4xf32>
    %cst_361 = arith.constant dense<0.000000e+00> : vector<72x4xf32>
    %345 = tpu.matmul %343, %344, %cst_361 {dimension_numbers = #tpu.dot_dimension_numbers<[1], [0], [0], [1], [0, 0, 1, 1], [], []>} : vector<72x4xf32>, vector<4x4xf32>, vector<72x4xf32> -> vector<72x4xf32>
    %346 = arith.addf %342, %345 : vector<72x4xf32>
    %c97_362 = arith.constant 97 : index
    %c0_363 = arith.constant 0 : index
    %347 = vector.load %arg9[%c97_362, %c0_363] : memref<352x4xf32, #tpu.memory_space<vmem>>, vector<72x4xf32>
    %c16_364 = arith.constant 16 : index
    %c0_365 = arith.constant 0 : index
    %348 = vector.load %arg6[%c16_364, %c0_365] : memref<36x4xf32, #tpu.memory_space<vmem>>, vector<4x4xf32>
    %cst_366 = arith.constant dense<0.000000e+00> : vector<72x4xf32>
    %349 = tpu.matmul %347, %348, %cst_366 {dimension_numbers = #tpu.dot_dimension_numbers<[1], [0], [0], [1], [0, 0, 1, 1], [], []>} : vector<72x4xf32>, vector<4x4xf32>, vector<72x4xf32> -> vector<72x4xf32>
    %350 = arith.addf %346, %349 : vector<72x4xf32>
    %c10_367 = arith.constant 10 : index
    %c0_368 = arith.constant 0 : index
    %351 = vector.load %arg9[%c10_367, %c0_368] : memref<352x4xf32, #tpu.memory_space<vmem>>, vector<72x4xf32>
    %c20_369 = arith.constant 20 : index
    %c0_370 = arith.constant 0 : index
    %352 = vector.load %arg6[%c20_369, %c0_370] : memref<36x4xf32, #tpu.memory_space<vmem>>, vector<4x4xf32>
    %cst_371 = arith.constant dense<0.000000e+00> : vector<72x4xf32>
    %353 = tpu.matmul %351, %352, %cst_371 {dimension_numbers = #tpu.dot_dimension_numbers<[1], [0], [0], [1], [0, 0, 1, 1], [], []>} : vector<72x4xf32>, vector<4x4xf32>, vector<72x4xf32> -> vector<72x4xf32>
    %354 = arith.addf %350, %353 : vector<72x4xf32>
    %c185_372 = arith.constant 185 : index
    %c0_373 = arith.constant 0 : index
    %355 = vector.load %arg9[%c185_372, %c0_373] : memref<352x4xf32, #tpu.memory_space<vmem>>, vector<72x4xf32>
    %c24_374 = arith.constant 24 : index
    %c0_375 = arith.constant 0 : index
    %356 = vector.load %arg6[%c24_374, %c0_375] : memref<36x4xf32, #tpu.memory_space<vmem>>, vector<4x4xf32>
    %cst_376 = arith.constant dense<0.000000e+00> : vector<72x4xf32>
    %357 = tpu.matmul %355, %356, %cst_376 {dimension_numbers = #tpu.dot_dimension_numbers<[1], [0], [0], [1], [0, 0, 1, 1], [], []>} : vector<72x4xf32>, vector<4x4xf32>, vector<72x4xf32> -> vector<72x4xf32>
    %358 = arith.addf %354, %357 : vector<72x4xf32>
    %c273_377 = arith.constant 273 : index
    %c0_378 = arith.constant 0 : index
    %359 = vector.load %arg9[%c273_377, %c0_378] : memref<352x4xf32, #tpu.memory_space<vmem>>, vector<72x4xf32>
    %c28_379 = arith.constant 28 : index
    %c0_380 = arith.constant 0 : index
    %360 = vector.load %arg6[%c28_379, %c0_380] : memref<36x4xf32, #tpu.memory_space<vmem>>, vector<4x4xf32>
    %cst_381 = arith.constant dense<0.000000e+00> : vector<72x4xf32>
    %361 = tpu.matmul %359, %360, %cst_381 {dimension_numbers = #tpu.dot_dimension_numbers<[1], [0], [0], [1], [0, 0, 1, 1], [], []>} : vector<72x4xf32>, vector<4x4xf32>, vector<72x4xf32> -> vector<72x4xf32>
    %362 = arith.addf %358, %361 : vector<72x4xf32>
    %c186_382 = arith.constant 186 : index
    %c0_383 = arith.constant 0 : index
    %363 = vector.load %arg9[%c186_382, %c0_383] : memref<352x4xf32, #tpu.memory_space<vmem>>, vector<72x4xf32>
    %c32_384 = arith.constant 32 : index
    %c0_385 = arith.constant 0 : index
    %364 = vector.load %arg6[%c32_384, %c0_385] : memref<36x4xf32, #tpu.memory_space<vmem>>, vector<4x4xf32>
    %cst_386 = arith.constant dense<0.000000e+00> : vector<72x4xf32>
    %365 = tpu.matmul %363, %364, %cst_386 {dimension_numbers = #tpu.dot_dimension_numbers<[1], [0], [0], [1], [0, 0, 1, 1], [], []>} : vector<72x4xf32>, vector<4x4xf32>, vector<72x4xf32> -> vector<72x4xf32>
    %366 = arith.addf %362, %365 : vector<72x4xf32>
    %cst_387 = arith.constant 0.000000e+00 : f32
    %367 = vector.broadcast %cst_387 : f32 to vector<72x4xf32>
    %368 = arith.maximumf %366, %367 : vector<72x4xf32>
    %c0_388 = arith.constant 0 : index
    %c1_389 = arith.constant 1 : index
    %c0_390 = arith.constant 0 : index
    %c0_391 = arith.constant 0 : index
    %c0_392 = arith.constant 0 : index
    %369 = vector.load %arg7[%c0_388, %c1_389, %c0_390, %c0_391, %c0_392] : memref<1x2x2x72x4xf32, #tpu.memory_space<vmem>>, vector<1x1x1x72x4xf32>
    %370 = vector.shape_cast %369 : vector<1x1x1x72x4xf32> to vector<72x4xf32>
    %371 = vector.shape_cast %368 : vector<72x4xf32> to vector<1x1x1x72x4xf32>
    tpu.vector_store %arg7[%c0_388, %c1_389, %c0_390, %c0_391, %c0_392], %371 {strides = array<i32>} : memref<1x2x2x72x4xf32, #tpu.memory_space<vmem>>, vector<1x1x1x72x4xf32>,
    %c264_393 = arith.constant 264 : index
    %c0_394 = arith.constant 0 : index
    %372 = vector.load %arg9[%c264_393, %c0_394] : memref<352x4xf32, #tpu.memory_space<vmem>>, vector<72x4xf32>
    %c0_395 = arith.constant 0 : index
    %c0_396 = arith.constant 0 : index
    %373 = vector.load %arg6[%c0_395, %c0_396] : memref<36x4xf32, #tpu.memory_space<vmem>>, vector<4x4xf32>
    %cst_397 = arith.constant dense<0.000000e+00> : vector<72x4xf32>
    %374 = tpu.matmul %372, %373, %cst_397 {dimension_numbers = #tpu.dot_dimension_numbers<[1], [0], [0], [1], [0, 0, 1, 1], [], []>} : vector<72x4xf32>, vector<4x4xf32>, vector<72x4xf32> -> vector<72x4xf32>
    %c177_398 = arith.constant 177 : index
    %c0_399 = arith.constant 0 : index
    %375 = vector.load %arg9[%c177_398, %c0_399] : memref<352x4xf32, #tpu.memory_space<vmem>>, vector<72x4xf32>
    %c4_400 = arith.constant 4 : index
    %c0_401 = arith.constant 0 : index
    %376 = vector.load %arg6[%c4_400, %c0_401] : memref<36x4xf32, #tpu.memory_space<vmem>>, vector<4x4xf32>
    %cst_402 = arith.constant dense<0.000000e+00> : vector<72x4xf32>
    %377 = tpu.matmul %375, %376, %cst_402 {dimension_numbers = #tpu.dot_dimension_numbers<[1], [0], [0], [1], [0, 0, 1, 1], [], []>} : vector<72x4xf32>, vector<4x4xf32>, vector<72x4xf32> -> vector<72x4xf32>
    %378 = arith.addf %374, %377 : vector<72x4xf32>
    %c265_403 = arith.constant 265 : index
    %c0_404 = arith.constant 0 : index
    %379 = vector.load %arg9[%c265_403, %c0_404] : memref<352x4xf32, #tpu.memory_space<vmem>>, vector<72x4xf32>
    %c8_405 = arith.constant 8 : index
    %c0_406 = arith.constant 0 : index
    %380 = vector.load %arg6[%c8_405, %c0_406] : memref<36x4xf32, #tpu.memory_space<vmem>>, vector<4x4xf32>
    %cst_407 = arith.constant dense<0.000000e+00> : vector<72x4xf32>
    %381 = tpu.matmul %379, %380, %cst_407 {dimension_numbers = #tpu.dot_dimension_numbers<[1], [0], [0], [1], [0, 0, 1, 1], [], []>} : vector<72x4xf32>, vector<4x4xf32>, vector<72x4xf32> -> vector<72x4xf32>
    %382 = arith.addf %378, %381 : vector<72x4xf32>
    %c97_408 = arith.constant 97 : index
    %c0_409 = arith.constant 0 : index
    %383 = vector.load %arg9[%c97_408, %c0_409] : memref<352x4xf32, #tpu.memory_space<vmem>>, vector<72x4xf32>
    %c12_410 = arith.constant 12 : index
    %c0_411 = arith.constant 0 : index
    %384 = vector.load %arg6[%c12_410, %c0_411] : memref<36x4xf32, #tpu.memory_space<vmem>>, vector<4x4xf32>
    %cst_412 = arith.constant dense<0.000000e+00> : vector<72x4xf32>
    %385 = tpu.matmul %383, %384, %cst_412 {dimension_numbers = #tpu.dot_dimension_numbers<[1], [0], [0], [1], [0, 0, 1, 1], [], []>} : vector<72x4xf32>, vector<4x4xf32>, vector<72x4xf32> -> vector<72x4xf32>
    %386 = arith.addf %382, %385 : vector<72x4xf32>
    %c10_413 = arith.constant 10 : index
    %c0_414 = arith.constant 0 : index
    %387 = vector.load %arg9[%c10_413, %c0_414] : memref<352x4xf32, #tpu.memory_space<vmem>>, vector<72x4xf32>
    %c16_415 = arith.constant 16 : index
    %c0_416 = arith.constant 0 : index
    %388 = vector.load %arg6[%c16_415, %c0_416] : memref<36x4xf32, #tpu.memory_space<vmem>>, vector<4x4xf32>
    %cst_417 = arith.constant dense<0.000000e+00> : vector<72x4xf32>
    %389 = tpu.matmul %387, %388, %cst_417 {dimension_numbers = #tpu.dot_dimension_numbers<[1], [0], [0], [1], [0, 0, 1, 1], [], []>} : vector<72x4xf32>, vector<4x4xf32>, vector<72x4xf32> -> vector<72x4xf32>
    %390 = arith.addf %386, %389 : vector<72x4xf32>
    %c98_418 = arith.constant 98 : index
    %c0_419 = arith.constant 0 : index
    %391 = vector.load %arg9[%c98_418, %c0_419] : memref<352x4xf32, #tpu.memory_space<vmem>>, vector<72x4xf32>
    %c20_420 = arith.constant 20 : index
    %c0_421 = arith.constant 0 : index
    %392 = vector.load %arg6[%c20_420, %c0_421] : memref<36x4xf32, #tpu.memory_space<vmem>>, vector<4x4xf32>
    %cst_422 = arith.constant dense<0.000000e+00> : vector<72x4xf32>
    %393 = tpu.matmul %391, %392, %cst_422 {dimension_numbers = #tpu.dot_dimension_numbers<[1], [0], [0], [1], [0, 0, 1, 1], [], []>} : vector<72x4xf32>, vector<4x4xf32>, vector<72x4xf32> -> vector<72x4xf32>
    %394 = arith.addf %390, %393 : vector<72x4xf32>
    %c273_423 = arith.constant 273 : index
    %c0_424 = arith.constant 0 : index
    %395 = vector.load %arg9[%c273_423, %c0_424] : memref<352x4xf32, #tpu.memory_space<vmem>>, vector<72x4xf32>
    %c24_425 = arith.constant 24 : index
    %c0_426 = arith.constant 0 : index
    %396 = vector.load %arg6[%c24_425, %c0_426] : memref<36x4xf32, #tpu.memory_space<vmem>>, vector<4x4xf32>
    %cst_427 = arith.constant dense<0.000000e+00> : vector<72x4xf32>
    %397 = tpu.matmul %395, %396, %cst_427 {dimension_numbers = #tpu.dot_dimension_numbers<[1], [0], [0], [1], [0, 0, 1, 1], [], []>} : vector<72x4xf32>, vector<4x4xf32>, vector<72x4xf32> -> vector<72x4xf32>
    %398 = arith.addf %394, %397 : vector<72x4xf32>
    %c186_428 = arith.constant 186 : index
    %c0_429 = arith.constant 0 : index
    %399 = vector.load %arg9[%c186_428, %c0_429] : memref<352x4xf32, #tpu.memory_space<vmem>>, vector<72x4xf32>
    %c28_430 = arith.constant 28 : index
    %c0_431 = arith.constant 0 : index
    %400 = vector.load %arg6[%c28_430, %c0_431] : memref<36x4xf32, #tpu.memory_space<vmem>>, vector<4x4xf32>
    %cst_432 = arith.constant dense<0.000000e+00> : vector<72x4xf32>
    %401 = tpu.matmul %399, %400, %cst_432 {dimension_numbers = #tpu.dot_dimension_numbers<[1], [0], [0], [1], [0, 0, 1, 1], [], []>} : vector<72x4xf32>, vector<4x4xf32>, vector<72x4xf32> -> vector<72x4xf32>
    %402 = arith.addf %398, %401 : vector<72x4xf32>
    %c274_433 = arith.constant 274 : index
    %c0_434 = arith.constant 0 : index
    %403 = vector.load %arg9[%c274_433, %c0_434] : memref<352x4xf32, #tpu.memory_space<vmem>>, vector<72x4xf32>
    %c32_435 = arith.constant 32 : index
    %c0_436 = arith.constant 0 : index
    %404 = vector.load %arg6[%c32_435, %c0_436] : memref<36x4xf32, #tpu.memory_space<vmem>>, vector<4x4xf32>
    %cst_437 = arith.constant dense<0.000000e+00> : vector<72x4xf32>
    %405 = tpu.matmul %403, %404, %cst_437 {dimension_numbers = #tpu.dot_dimension_numbers<[1], [0], [0], [1], [0, 0, 1, 1], [], []>} : vector<72x4xf32>, vector<4x4xf32>, vector<72x4xf32> -> vector<72x4xf32>
    %406 = arith.addf %402, %405 : vector<72x4xf32>
    %cst_438 = arith.constant 0.000000e+00 : f32
    %407 = vector.broadcast %cst_438 : f32 to vector<72x4xf32>
    %408 = arith.maximumf %406, %407 : vector<72x4xf32>
    %c0_439 = arith.constant 0 : index
    %c1_440 = arith.constant 1 : index
    %c1_441 = arith.constant 1 : index
    %c0_442 = arith.constant 0 : index
    %c0_443 = arith.constant 0 : index
    %409 = vector.load %arg7[%c0_439, %c1_440, %c1_441, %c0_442, %c0_443] : memref<1x2x2x72x4xf32, #tpu.memory_space<vmem>>, vector<1x1x1x72x4xf32>
    %410 = vector.shape_cast %409 : vector<1x1x1x72x4xf32> to vector<72x4xf32>
    %411 = vector.shape_cast %408 : vector<72x4xf32> to vector<1x1x1x72x4xf32>
    tpu.vector_store %arg7[%c0_439, %c1_440, %c1_441, %c0_442, %c0_443], %411 {strides = array<i32>} : memref<1x2x2x72x4xf32, #tpu.memory_space<vmem>>, vector<1x1x1x72x4xf32>,
    return
  }
  func.func @transform_0(%arg0: i32) -> (i32, i32, i32) {
    %c0_i32 = arith.constant 0 : i32
    %c0_i32_0 = arith.constant 0 : i32
    %c0_i32_1 = arith.constant 0 : i32
    return %arg0, %c0_i32, %c0_i32_0 : i32, i32, i32
  }
  func.func @transform_1(%arg0: i32) -> (i32, i32, i32, i32, i32) {
    %c0_i32 = arith.constant 0 : i32
    %c0_i32_0 = arith.constant 0 : i32
    %c0_i32_1 = arith.constant 0 : i32
    %c0_i32_2 = arith.constant 0 : i32
    %c0_i32_3 = arith.constant 0 : i32
    return %arg0, %c0_i32, %c0_i32_0, %c0_i32_1, %c0_i32_2 : i32, i32, i32, i32, i32
  }
  func.func @transform_2(%arg0: i32) -> (i32, i32) {
    %c0_i32 = arith.constant 0 : i32
    %c0_i32_0 = arith.constant 0 : i32
    %c0_i32_1 = arith.constant 0 : i32
    return %c0_i32, %c0_i32_0 : i32, i32
  }
  func.func @transform_3(%arg0: i32) -> (i32, i32) {
    %c0_i32 = arith.constant 0 : i32
    %c0_i32_0 = arith.constant 0 : i32
    %c0_i32_1 = arith.constant 0 : i32
    return %c0_i32, %c0_i32_0 : i32, i32
  }
  func.func @transform_4(%arg0: i32) -> (i32, i32) {
    %c0_i32 = arith.constant 0 : i32
    %c0_i32_0 = arith.constant 0 : i32
    %c0_i32_1 = arith.constant 0 : i32
    return %c0_i32, %c0_i32_0 : i32, i32
  }
  func.func @transform_5(%arg0: i32) -> (i32, i32) {
    %c0_i32 = arith.constant 0 : i32
    %c0_i32_0 = arith.constant 0 : i32
    %c0_i32_1 = arith.constant 0 : i32
    return %c0_i32, %c0_i32_0 : i32, i32
  }
  func.func @transform_6(%arg0: i32) -> (i32, i32, i32, i32, i32) {
    %c0_i32 = arith.constant 0 : i32
    %c0_i32_0 = arith.constant 0 : i32
    %c0_i32_1 = arith.constant 0 : i32
    %c0_i32_2 = arith.constant 0 : i32
    %c0_i32_3 = arith.constant 0 : i32
    return %arg0, %c0_i32, %c0_i32_0, %c0_i32_1, %c0_i32_2 : i32, i32, i32, i32, i32
  }
}

</mosaic_0001>

<bundles_post_ra>
// kernel: tpu_custom_call.1
= control target key start
LH: loop header
LB: loop body
LE: loop exit
PB: predicated region body
PF: predicated region fallthrough
CT: control target
= control target key end

     0   :  { %s17516_s21 = smov 0   ;;  %s21448_s0 = inlined_call_operand.vmem [shape: f32[2,72,4], index: 0, kind: input, shape index: {}]   ;;  %s21449_s1 = inlined_call_operand.vmem [shape: f32[2,2,2,72,2], index: 1, kind: input, shape index: {}]   ;;  %s21450_s2 = inlined_call_operand.vmem [shape: f32[4,8], index: 2, kind: input, shape index: {}]   ;;  %s21451_s3 = inlined_call_operand.vmem [shape: f32[1,2], index: 3, kind: input, shape index: {}]   ;;  %s21452_s4 = inlined_call_operand.vmem [shape: f32[36,4], index: 4, kind: input, shape index: {}]   ;;  %s21453_s5 = inlined_call_operand.vmem [shape: f32[36,4], index: 5, kind: input, shape index: {}]   ;;  %s21454_s6 = inlined_call_operand.vmem [shape: f32[2,2,2,72,4], index: 6, kind: output, shape index: {}]  }
   0x1 LB: > { %s12632_s22 = sadd.s32 4294967295, %s17471_s21   ;;  %p12636_p0 = scmp.ge.s32.totalorder %s17471_s21, 1  ;;  %s17471_s21 = sphi %s17516_s21, %s16_s21  }
   0x2   : > { %p222_p1 = scmp.lt.s32.totalorder %s17471_s21, 3 }
   0x4   : > { %p223_p2 = pnand %p12636_p0, %p222_p1 }
   0x6   : > { %226 = sbr.rel (%p223_p2) target bundleno = 2135 (0x857), region = 44 }
   0xd   : > { %v466_v0 = vld [vmem:[%s21450_s2] sm:$0xf]  ;;  %vm494_vm0 = vcmask 1043456   ;;  %p257_p3 = scmp.lt.s32.totalorder %s12632_s22, 1  ;;  %v17473_v1 = vmov 0.0   ;;  %vm435_vm1 = vcmask 31744   ;;  %v272_v21 = vlaneseq }
   0xe   : > { %14157 = vmatprep.subr.mxu0 %v17473_v1  ;;  %16274 = vmatprep.subr.mxu1 %v17473_v1  ;;  %v17532_v2 = vld [vmem:[%s21451_s3] ss:$0 sm:$0xff]  ;;  %436 = vst.msk [vmem:[#allocation2] sm:$0xff] %vm435_vm1, %v17473_v1  ;;  %440 = vst.msk [vmem:[#allocation2 + $0x58] sm:$0xff] %vm435_vm1, %v17473_v1  ;;  %vm17474_vm2 = vmmov 0   ;;  %s17475_s28 = smov 4  }
   0xf   : > { %14158 = vmatpush3.msk.msra.mxu0 %vm494_vm0, %v466_v0  ;;  %16275 = vmatpush3.msk.msra.mxu1 %vm494_vm0, %v466_v0  ;;  %s21526_s22 = smov (!%p257_p3, %s12632_s22), 1  ;;  %442 = vst.msk [vmem:[#allocation2 + $0xf8] sm:$0xff] %vm435_vm1, %v17473_v1  ;;  %445 = vst.msk [vmem:[#allocation2 + $0x150] sm:$0xff] %vm435_vm1, %v17473_v1  ;;  %s17476_s12 = smov 6   ;;  %v17630_v22 = vshrl.u32 %v272_v21, 7  ;;  %vm437_vm3 = vcmask 24576  }
  0x10   : > { %447 = vst.msk [vmem:[#allocation3] sm:$0xff] %vm435_vm1, %v17473_v1  ;;  %450 = vst.msk [vmem:[#allocation3 + $0x58] sm:$0xff] %vm435_vm1, %v17473_v1  ;;  %14159 = vmatprep.mubr.msk.f32.mxu0 %vm17474_vm2, %v17473_v1  ;;  %14174 = vmatprep.mubr.msk.f32.mxu1 %vm17474_vm2, %v17473_v1  ;;  %s17428_s27 = smul.u32 72, %s21526_s22  ;;  %s17477_s13 = smov 2   ;;  %v1097_v48 = vld [vmem:[%s21452_s4 + $0x4] sm:$0xf] }
  0x11   : > { %452 = vst.msk [vmem:[#allocation3 + $0xf8] sm:$0xff] %vm435_vm1, %v17473_v1  ;;  %455 = vst.msk [vmem:[#allocation3 + $0x150] sm:$0xff] %vm435_vm1, %v17473_v1  ;;  %836 = vrot.lane.b32.xlu0 %v17532_v2, %s17475_s28  ;;  %14186 = vmatprep.subr.mxu1 %v17473_v1  ;;  %s17429_s29 = smul.u32 288, %s21526_s22  ;;  %v17633_v23 = vmul.u32.u64.low 3817748708, %v17630_v22  ;;  %v17634_v24 = vmul.u32.u64.high 3817748708, %v17630_v22, %v17633_v23  ;;  %v278_v25 = vadd.s32 40, %v17630_v22 }
  0x12   : > { %14447 = vmatprep.subr.mxu0 %v17473_v1  ;;  %s17566_s8 = scalar_lea.vmem %s21448_s0, %s17428_s27  ;;  %v274_v29 = vadd.s32 8, %v17630_v22  ;;  %v17647_v34 = vadd.s32 48, %v17630_v22  ;;  %v17655_v39 = vadd.s32 16, %v17630_v22  ;;  %438 = vst.msk [vmem:[#allocation2 + $0x8] sm:$0x1] %vm437_vm3, %v17473_v1  ;;  %v17709_v58 = vadd.s32 24, %v17630_v22 }
  0x13   : > { %s17573_s11 = scalar_lea.vmem %s21449_s1, %s17429_s29  ;;  %v457_v3 = vld [vmem:[%s17566_s8] sm:$0xff]  ;;  %v462_v4 = vld [vmem:[%s17566_s8 + $0x28] sm:$0xff]  ;;  %v463_v6 = vld [vmem:[%s17566_s8 + $0x30] sm:$0xff]  ;;  %v17637_v26 = vmul.u32.u64.low 3817748708, %v278_v25  ;;  %v17638_v27 = vmul.u32.u64.high 3817748708, %v278_v25, %v17637_v26  ;;  %v288_v28 = vshrl.u32 %v17634_v24, 3  ;;  %s21094_s30 = scalar_lea.vmem %s21454_s6, %s17429_s29 }
  0x14   : > { %14160 = vmatmul.mubr.msk.f32.vlgmr.msra.gmra.mrb[0].mxu0 %vm435_vm1, %v457_v3  ;;  %14175 = vmatmul.mubr.msk.f32.vlgmr.msra.gmra.mrb[0].mxu1 %vm435_vm1, %v462_v4  ;;  %v458_v5 = vld [vmem:[%s17566_s8 + $0x8] sm:$0xff]  ;;  %v12660_v7 = vld [vmem:[%s17573_s11 + $0x90] sm:$0xff]  ;;  %v12669_v8 = vld [vmem:[%s17573_s11 + $0xd8] sm:$0xff]  ;;  %v17642_v31 = vmul.u32.u64.low 3817748708, %v274_v29  ;;  %v17643_v32 = vmul.u32.u64.high 3817748708, %v274_v29, %v17642_v31  ;;  %s17478_s18 = smov 122  }
  0x15   : > { %14162 = vmatprep.mubr.msk.f32.mxu0 %vm17474_vm2, %v17473_v1  ;;  %14177 = vmatprep.mubr.msk.f32.mxu1 %vm17474_vm2, %v17473_v1  ;;  %v459_v9 = vld [vmem:[%s17566_s8 + $0x10] sm:$0xff]  ;;  %v464_v10 = vld [vmem:[%s17566_s8 + $0x38] sm:$0xff]  ;;  %v465_v13 = vld [vmem:[%s17566_s8 + $0x40] sm:$0xff]  ;;  %v289_v30 = vmul.u32 9, %v288_v28  ;;  %v343_v33 = vshrl.u32 %v17638_v27, 3  ;;  %s17479_s19 = smov 124  }
  0x16   : > { %957 = vrot.lane.b32.xlu0 %v17532_v2, %s17476_s12  ;;  %912 = vrot.lane.b32.xlu1 %v12660_v7, %s17477_s13  ;;  %v12661_v11 = vld [vmem:[%s17573_s11 + $0x98] sm:$0xff]  ;;  %v12670_v14 = vld [vmem:[%s17573_s11 + $0xe0] sm:$0xff]  ;;  %v17651_v37 = vmul.u32.u64.low 3817748708, %v17647_v34  ;;  %v17652_v38 = vmul.u32.u64.high 3817748708, %v17647_v34, %v17651_v37  ;;  %439 = vst.msk [vmem:[#allocation2 + $0x9] sm:$0x1] %vm437_vm3, %v17473_v1 }
  0x17   : > { %v460_v12 = vld [vmem:[%s17566_s8 + $0x18] sm:$0xff]  ;;  %v461_v15 = vld [vmem:[%s17566_s8 + $0x20] sm:$0xff]  ;;  %v12671_v17 = vld [vmem:[%s17573_s11 + $0xe8] sm:$0xff]  ;;  %v290_v35 = vsub.s32 %v17630_v22, %v289_v30  ;;  %v344_v36 = vmul.u32 9, %v343_v33  ;;  %441 = vst.msk [vmem:[#allocation2 + $0x60] sm:$0x1] %vm437_vm3, %v17473_v1  ;;  %14187 = vmatpush3.msk.msra.mxu1 %vm494_vm0, %v1097_v48 }
  0x18   : > { %14163 = vmatmul.mubr.msk.f32.gmra.mrb[2].mxu0 %vm435_vm1, %v458_v5  ;;  %14178 = vmatmul.mubr.msk.f32.gmra.mrb[2].mxu1 %vm435_vm1, %v463_v6  ;;  %v12662_v16 = vld [vmem:[%s17573_s11 + $0xa0] sm:$0xff]  ;;  %v12663_v18 = vld [vmem:[%s17573_s11 + $0xa8] sm:$0xff]  ;;  %v12672_v19 = vld [vmem:[%s17573_s11 + $0xf0] sm:$0xff]  ;;  %443 = vst.msk [vmem:[#allocation2 + $0x100] sm:$0x1] %vm437_vm3, %v17473_v1  ;;  %v299_v40 = vshrl.u32 %v17643_v32, 3 }
  0x19   : > { %14165 = vmatprep.mubr.msk.f32.mxu0 %vm17474_vm2, %v17473_v1  ;;  %14180 = vmatprep.mubr.msk.f32.mxu1 %vm17474_vm2, %v17473_v1  ;;  %v12664_v20 = vld [vmem:[%s17573_s11 + $0xb0] sm:$0xff]  ;;  %444 = vst.msk [vmem:[#allocation2 + $0xb0] sm:$0x1] %vm437_vm3, %v17473_v1  ;;  %446 = vst.msk [vmem:[#allocation2 + $0x158] sm:$0x1] %vm437_vm3, %v17473_v1  ;;  %vm381_vm4 = vcmp.ne.s32.totalorder %v290_v35, 0  ;;  %v345_v41 = vsub.s32 %v278_v25, %v344_v36 }
  0x1a   : > { %1033 = vrot.lane.b32.xlu1 %v12669_v8, %s17477_s13  ;;  %448 = vst.msk [vmem:[#allocation3 + $0x8] sm:$0x1] %vm437_vm3, %v17473_v1  ;;  %449 = vst.msk [vmem:[#allocation3 + $0x9] sm:$0x1] %vm437_vm3, %v17473_v1  ;;  %vm390_vm5 = vcmp.lt.s32.totalorder %v290_v35, 0  ;;  %v408_v44 = vadd.s32 9, %v290_v35  ;;  %14215 = vmatprep.subr.mxu1 %v17473_v1 }
  0x1b   : > { %451 = vst.msk [vmem:[#allocation3 + $0x60] sm:$0x1] %vm437_vm3, %v17473_v1  ;;  %453 = vst.msk [vmem:[#allocation3 + $0x100] sm:$0x1] %vm437_vm3, %v17473_v1  ;;  %v17677_v45 = vmul.u32.u64.low 3817748708, %v17655_v39  ;;  %v17678_v46 = vmul.u32.u64.high 3817748708, %v17655_v39, %v17677_v45 }
  0x1c   : > { %14166 = vmatmul.mubr.msk.f32.gmra.mrb[4].mxu0 %vm435_vm1, %v459_v9  ;;  %14181 = vmatmul.mubr.msk.f32.gmra.mrb[4].mxu1 %vm435_vm1, %v464_v10  ;;  %454 = vst.msk [vmem:[#allocation3 + $0xb0] sm:$0x1] %vm437_vm3, %v17473_v1  ;;  %456 = vst.msk [vmem:[#allocation3 + $0x158] sm:$0x1] %vm437_vm3, %v17473_v1  ;;  %v300_v47 = vmul.u32 9, %v299_v40  ;;  %v17686_v50 = vld [vmem:[#allocation2 + $0x58] sm:$0xff] }
  0x1d   : > { %14168 = vmatprep.mubr.msk.f32.mxu0 %vm17474_vm2, %v17473_v1  ;;  %14183 = vmatprep.mubr.msk.f32.mxu1 %vm17474_vm2, %v17473_v1  ;;  %vm17672_vm6 = vmand %vm390_vm5, %vm381_vm4  ;;  %v2537_v49 = vld [vmem:[%s21452_s4 + $0x4] sm:$0xf]  ;;  %vm386_vm7 = vcmp.ne.s32.totalorder %v345_v41, 0  ;;  %vm395_vm8 = vcmp.lt.s32.totalorder %v345_v41, 0  ;;  %v413_v53 = vadd.s32 9, %v345_v41  ;;  %v354_v54 = vshrl.u32 %v17652_v38, 3 }
  0x1e   : > { %914 = vrot.lane.b32.xlu1 %v12661_v11, %s17477_s13  ;;  %14448 = vmatpush3.msk.msra.mxu0 %vm494_vm0, %v2537_v49  ;;  %v17692_v51 = vld [vmem:[#allocation2 + $0x1] sm:$0xff]  ;;  %v417_v52 = vsel %vm17672_vm6, %v408_v44, %v290_v35  ;;  %vm17704_vm9 = vmand %vm395_vm8, %vm386_vm7  ;;  %v301_v57 = vsub.s32 %v274_v29, %v300_v47  ;;  %v310_v6 = vshrl.u32 %v17678_v46, 3  ;;  %v17761_v25 = vadd.s32 32, %v17630_v22  ;;  %v12665_v30 = vld [vmem:[%s17573_s11 + $0xb8] sm:$0xff]  ;;  %s17480_s26 = smov 126  }
  0x1f   : > { %14476 = vmatprep.subr.mxu0 %v17473_v1  ;;  %vm17718_vm10 = vcmp.lt.s32.totalorder %v417_v52, 8  ;;  %v422_v4 = vsel %vm17704_vm9, %v413_v53, %v345_v41  ;;  %v355_v5 = vmul.u32 9, %v354_v54  ;;  %v12674_v43 = vld [vmem:[%s17573_s11 + $0x100] sm:$0xff] }
  0x20   : > { %14169 = vmatmul.mubr.msk.f32.gmra.mrb[6].mxu0 %vm435_vm1, %v460_v12  ;;  %14184 = vmatmul.mubr.msk.f32.gmra.mrb[6].mxu1 %vm435_vm1, %v465_v13  ;;  %vm382_vm11 = vcmp.ne.s32.totalorder %v301_v57, 0  ;;  %v17730_v7 = vmul.u32.u64.low 3817748708, %v17709_v58  ;;  %v17731_v8 = vmul.u32.u64.high 3817748708, %v17709_v58, %v17730_v7  ;;  %vm391_vm12 = vcmp.lt.s32.totalorder %v301_v57, 0  ;;  %v12666_v53 = vld [vmem:[%s17573_s11 + $0xc0] sm:$0xff] }
  0x21   : > { %14171 = vmatprep.mubr.msk.f32.mxu0 %vm17474_vm2, %v17473_v1  ;;  %14188 = vmatprep.mubr.msk.f32.mxu1 %vm17474_vm2, %v17473_v1  ;;  %vm17745_vm13 = vcmp.lt.s32.totalorder %v422_v4, 8  ;;  %vm17751_vm14 = vmand %vm391_vm12, %vm382_vm11  ;;  %v311_v21 = vmul.u32 9, %v310_v6  ;;  %v17779_v36 = vmul.u32.u64.low 3817748708, %v17761_v25  ;;  %v17780_v37 = vmul.u32.u64.high 3817748708, %v17761_v25, %v17779_v36 }
  0x22   : > { %1035 = vrot.lane.b32.xlu1 %v12670_v14, %s17477_s13  ;;  %v21477_v14 = vmov 0  ;;  %v321_v33 = vshrl.u32 %v17731_v8, 3  ;;  %v21488_v6 = vmov 0 }
  0x23   : > { %v21478_v14 = vsel %vm17745_vm13, 4294967295, %v21477_v14  ;;  %v312_v32 = vsub.s32 %v17655_v39, %v311_v21 }
  0x24   : > { %14172 = vmatmul.mubr.msk.f32.gmra.mrb[8].mxu0 %vm435_vm1, %v461_v15  ;;  %14189 = vmatmul.mubr.msk.f32.vlgmr.msra.gmra.mrb[8].mxu1 %vm435_vm1, %v17686_v50  ;;  %21479 = vst [vmem:[#allocation4_spill] sm:$0xff] %v21478_v14  ;;  %v322_v47 = vmul.u32 9, %v321_v33 }
  0x25   : > { %14449 = vmatprep.mubr.msk.f32.mxu0 %vm17474_vm2, %v17473_v1  ;;  %14191 = vmatprep.mubr.msk.f32.mxu1 %vm17474_vm2, %v17473_v1  ;;  %vm383_vm6 = vcmp.ne.s32.totalorder %v312_v32, 0  ;;  %vm392_vm7 = vcmp.lt.s32.totalorder %v312_v32, 0  ;;  %v410_v56 = vadd.s32 9, %v312_v32 }
  0x26   : > { %916 = vrot.lane.b32.xlu1 %v12662_v16, %s17477_s13  ;;  %vm17810_vm8 = vmand %vm392_vm7, %vm383_vm6 }
  0x27   : > { %v419_v7 = vsel %vm17810_vm8, %v410_v56, %v312_v32  ;;  %v651_v32 = vld [vmem:[%s17573_s11] sm:$0xff] }
  0x28   : > { %14450 = vmatmul.mubr.msk.f32.vlgmr.msra.gmra.mrb[10].mxu0 %vm435_vm1, %v17692_v51 }
  0x29   : > { %14452 = vmatprep.mubr.msk.f32.mxu0 %vm17474_vm2, %v17473_v1 }
  0x2a   : > { %1037 = vrot.lane.b32.xlu1 %v12671_v17, %s17477_s13  ;;  %v12673_v17 = vld [vmem:[%s17573_s11 + $0xf8] sm:$0xff] }
  0x2e   : > { %918 = vrot.lane.b32.xlu1 %v12663_v18, %s17477_s13  ;;  %v409_v18 = vadd.s32 9, %v301_v57 }
  0x30   : > { %v418_v31 = vsel %vm17751_vm14, %v409_v18, %v301_v57  ;;  %vm17839_vm14 = vcmp.lt.s32.totalorder %v419_v7, 8 }
  0x31   : > { %vm17788_vm4 = vcmp.lt.s32.totalorder %v418_v31, 8 }
  0x32   : > { %1039 = vrot.lane.b32.xlu1 %v12672_v19, %s17477_s13 }
  0x36   : > { %920 = vrot.lane.b32.xlu1 %v12664_v20, %s17477_s13  ;;  %v356_v20 = vsub.s32 %v17647_v34, %v355_v5  ;;  %v332_v5 = vshrl.u32 %v17780_v37, 3 }
  0x38   : > { %vm387_vm15 = vcmp.ne.s32.totalorder %v356_v20, 0  ;;  %vm396_vm3 = vcmp.lt.s32.totalorder %v356_v20, 0  ;;  %v414_v44 = vadd.s32 9, %v356_v20 }
  0x39   : > { %vm17795_vm5 = vmand %vm396_vm3, %vm387_vm15 }
  0x3a   : > { %v423_v54 = vsel %vm17795_vm5, %v414_v44, %v356_v20 }
  0x3b   : > { %vm17823_vm9 = vcmp.lt.s32.totalorder %v423_v54, 8  ;;  %v12651_v54 = vld [vmem:[%s17573_s11 + $0x48] sm:$0xff] }
  0x3c   : > { %v21489_v6 = vsel %vm17823_vm9, 4294967295, %v21488_v6 }
  0x3d   : > { %21490 = vst [vmem:[#allocation5_spill] sm:$0xff] %v21489_v6 }
  0x83   : > { %v17670_v42 = vpop.permute.xlu0 %836 }
  0x88   : > { %v17702_v55 = vpop.permute.xlu0 %957  ;;  %v913_v7 = vpop.permute.xlu1 %912 }
  0xe7   : > { %v17714_v59 = vpop.f32.mrb[0].mxu0  ;;  %v17716_v60 = vpop.f32.mrb[0].mxu1 }
  0xe8   : > { %v14161_v62 = vpop.f32.mrb[1].mxu0  ;;  %v14176_v63 = vpop.f32.mrb[1].mxu1  ;;  %v960_v0 = vadd.f32 %v17702_v55, %v17714_v59  ;;  %v839_v3 = vadd.f32 %v17670_v42, %v17714_v59  ;;  %v844_v11 = vadd.f32 %v17670_v42, %v17716_v60  ;;  %v965_v24 = vadd.f32 %v17702_v55, %v17716_v60 }
  0xe9   : > { %v323_v63 = vsub.s32 %v17709_v58, %v322_v47  ;;  %v12675_v58 = vld [vmem:[%s17573_s11 + $0x108] sm:$0xff] }
  0xea   : > { %v969_v9 = vsel %vm17718_vm10, %v960_v0, 0.0  ;;  %v848_v10 = vsel %vm17718_vm10, %v839_v3, 0.0  ;;  %v853_v23 = vsel %vm17745_vm13, %v844_v11, 0.0  ;;  %v974_v34 = vsel %vm17745_vm13, %v965_v24, 0.0  ;;  %v12676_v24 = vld [vmem:[%s17573_s11 + $0x110] sm:$0xff] }
  0xeb   : > { %v17739_v12 = vpop.f32.mrb[2].mxu1  ;;  %997 = vrot.lane.b32.xlu0 %v969_v9, %s17478_s18  ;;  %876 = vrot.lane.b32.xlu1 %v848_v10, %s17479_s19  ;;  %v17743_v13 = vpop.f32.mrb[2].mxu0  ;;  %v280_v0 = vadd.s32 56, %v17630_v22  ;;  %vm384_vm11 = vcmp.ne.s32.totalorder %v323_v63, 0  ;;  %vm393_vm12 = vcmp.lt.s32.totalorder %v323_v63, 0  ;;  %v411_v18 = vadd.s32 9, %v323_v63 }
  0xec   : > { %v14164_v15 = vpop.f32.mrb[3].mxu0  ;;  %v14179_v16 = vpop.f32.mrb[3].mxu1  ;;  %v840_v35 = vadd.f32 %v17670_v42, %v17743_v13  ;;  %v961_v49 = vadd.f32 %v17702_v55, %v17743_v13  ;;  %v845_v4 = vadd.f32 %v17670_v42, %v17739_v12  ;;  %vm17844_vm15 = vmand %vm393_vm12, %vm384_vm11 }
  0xed   : > { %v17830_v8 = vmul.u32.u64.low 3817748708, %v280_v0  ;;  %v17831_v9 = vmul.u32.u64.high 3817748708, %v280_v0, %v17830_v8  ;;  %v333_v15 = vmul.u32 9, %v332_v5  ;;  %v2527_v5 = vld [vmem:[%s21452_s4] sm:$0xf] }
  0xee   : > { %v849_v48 = vsel %vm17788_vm4, %v840_v35, 0.0  ;;  %v970_v3 = vsel %vm17788_vm4, %v961_v49, 0.0  ;;  %v854_v10 = vsel %vm17823_vm9, %v845_v4, 0.0  ;;  %14477 = vmatpush3.msk.msra.mxu0 %vm494_vm0, %v2527_v5  ;;  %v1034_v8 = vpop.permute.xlu1 %1033 }
  0xef   : > { %v17763_v26 = vpop.f32.mrb[4].mxu1  ;;  %886 = vrot.lane.b32.xlu0 %v853_v23, %s17479_s19  ;;  %1041 = vrot.lane.b32.xlu1 %v12673_v17, %s17477_s13  ;;  %v17767_v27 = vpop.f32.mrb[4].mxu0  ;;  %v12667_v17 = vld [vmem:[%s17573_s11 + $0xc8] sm:$0xff]  ;;  %v334_v23 = vsub.s32 %v17761_v25, %v333_v15 }
  0xf0   : > { %v14167_v28 = vpop.f32.mrb[5].mxu0  ;;  %v14182_v29 = vpop.f32.mrb[5].mxu1  ;;  %v841_v11 = vadd.f32 %v17670_v42, %v17767_v27  ;;  %v962_v21 = vadd.f32 %v17702_v55, %v17767_v27  ;;  %v846_v62 = vadd.f32 %v17670_v42, %v17763_v26  ;;  %v967_v4 = vadd.f32 %v17702_v55, %v17763_v26  ;;  %14505 = vmatprep.subr.mxu0 %v17473_v1 }
  0xf1   : > { %v420_v28 = vsel %vm17844_vm15, %v411_v18, %v323_v63  ;;  %v365_v29 = vshrl.u32 %v17831_v9, 3  ;;  %vm385_vm3 = vcmp.ne.s32.totalorder %v334_v23, 0  ;;  %vm394_vm5 = vcmp.lt.s32.totalorder %v334_v23, 0 }
  0xf2   : > { %v850_v20 = vsel %vm17839_vm14, %v841_v11, 0.0  ;;  %vm17865_vm6 = vcmp.lt.s32.totalorder %v420_v28, 8  ;;  %v412_v33 = vadd.s32 9, %v334_v23  ;;  %vm403_vm7 = vmand %vm394_vm5, %vm385_vm3  ;;  %v21500_v63 = vmov 0  ;;  %v915_v9 = vpop.permute.xlu1 %914 }
  0xf3   : > { %v17782_v38 = vpop.f32.mrb[6].mxu1  ;;  %1007 = vrot.lane.b32.xlu0 %v974_v34, %s17478_s18  ;;  %922 = vrot.lane.b32.xlu1 %v12665_v30, %s17477_s13  ;;  %v17786_v39 = vpop.f32.mrb[6].mxu0  ;;  %v971_v30 = vsel %vm17839_vm14, %v962_v21, 0.0  ;;  %v366_v36 = vmul.u32 9, %v365_v29  ;;  %vm696_vm5 = vcmask 15360  }
  0xf4   : > { %v14170_v41 = vpop.f32.mrb[7].mxu0  ;;  %v14185_v45 = vpop.f32.mrb[7].mxu1  ;;  %v842_v31 = vadd.f32 %v17670_v42, %v17786_v39  ;;  %v963_v35 = vadd.f32 %v17702_v55, %v17786_v39  ;;  %v421_v37 = vsel %vm403_vm7, %v412_v33, %v334_v23 }
  0xf5   : > { %v367_v44 = vsub.s32 %v280_v0, %v366_v36  ;;  %vm17881_vm8 = vcmp.lt.s32.totalorder %v421_v37, 8  ;;  %v21497_v45 = vmov 0  ;;  %v1087_v0 = vld [vmem:[%s21452_s4] sm:$0xf] }
  0xf6   : > { %v851_v34 = vsel %vm17865_vm6, %v842_v31, 0.0  ;;  %v972_v41 = vsel %vm17865_vm6, %v963_v35, 0.0  ;;  %v21498_v45 = vsel %vm17881_vm8, 4294967295, %v21497_v45  ;;  %14216 = vmatpush3.msk.msra.mxu1 %vm494_vm0, %v1087_v0  ;;  %v615_v0 = vadd.f32 %v17532_v2, %v17714_v59 }
  0xf7   : > { %1043 = vrot.lane.b32.xlu1 %v12674_v43, %s17477_s13  ;;  %878 = vrot.lane.b32.xlu0 %v849_v48, %s17479_s19  ;;  %v17805_v52 = vpop.f32.mrb[8].mxu0  ;;  %21499 = vst [vmem:[#allocation6_spill] sm:$0xff] %v21498_v45  ;;  %vm388_vm11 = vcmp.ne.s32.totalorder %v367_v44, 0  ;;  %vm397_vm12 = vcmp.lt.s32.totalorder %v367_v44, 0  ;;  %v415_v48 = vadd.s32 9, %v367_v44 }
  0xf8   : > { %v14173_v57 = vpop.f32.mrb[9].mxu0  ;;  %v843_v43 = vadd.f32 %v17670_v42, %v17805_v52  ;;  %v964_v47 = vadd.f32 %v17702_v55, %v17805_v52  ;;  %vm406_vm15 = vmand %vm397_vm12, %vm388_vm11  ;;  %14244 = vmatprep.subr.mxu1 %v17473_v1 }
  0xf9   : > { %v424_v56 = vsel %vm406_vm15, %v415_v48, %v367_v44 }
  0xfa   : > { %v852_v46 = vsel %vm17881_vm8, %v843_v43, 0.0  ;;  %v973_v49 = vsel %vm17881_vm8, %v964_v47, 0.0  ;;  %vm17902_vm3 = vcmp.lt.s32.totalorder %v424_v56, 8 }
  0xfb   : > { %924 = vrot.lane.b32.xlu1 %v12666_v53, %s17477_s13  ;;  %999 = vrot.lane.b32.xlu0 %v970_v3, %s17478_s18  ;;  %v966_v53 = vadd.f32 %v17702_v55, %v17739_v12  ;;  %v21501_v63 = vsel %vm17902_vm3, 4294967295, %v21500_v63  ;;  %v855_v3 = vsel %vm17902_vm3, %v846_v62, 0.0 }
  0xfc   : > { %21502 = vst [vmem:[#allocation7_spill] sm:$0xff] %v21501_v63  ;;  %v3781_v63 = vld [vmem:[%s21452_s4 + $0x20] sm:$0xf] }
  0xfd   : > { %v975_v57 = vsel %vm17823_vm9, %v966_v53, 0.0 }
  0xff   : > { %1045 = vrot.lane.b32.xlu1 %v12675_v58, %s17477_s13  ;;  %888 = vrot.lane.b32.xlu0 %v854_v10, %s17479_s19  ;;  %v976_v58 = vsel %vm17902_vm3, %v967_v4, 0.0  ;;  %v1036_v10 = vpop.permute.xlu1 %1035 }
 0x103   : > { %926 = vrot.lane.b32.xlu1 %v12667_v17, %s17477_s13  ;;  %880 = vrot.lane.b32.xlu0 %v850_v20, %s17479_s19  ;;  %v917_v11 = vpop.permute.xlu1 %916 }
 0x107   : > { %1047 = vrot.lane.b32.xlu1 %v12676_v24, %s17477_s13  ;;  %1001 = vrot.lane.b32.xlu0 %v971_v30, %s17478_s18  ;;  %v1038_v15 = vpop.permute.xlu1 %1037 }
 0x10b   : > { %669 = vrot.lane.b32.xlu1 %v651_v32, %s17477_s13  ;;  %882 = vrot.lane.b32.xlu0 %v851_v34, %s17479_s19  ;;  %v919_v17 = vpop.permute.xlu1 %918 }
 0x10f   : > { %1003 = vrot.lane.b32.xlu0 %v972_v41, %s17478_s18  ;;  %791 = vrot.lane.b32.xlu1 %v12651_v54, %s17477_s13  ;;  %v1040_v18 = vpop.permute.xlu1 %1039 }
 0x113   : > { %884 = vrot.lane.b32.xlu0 %v852_v46, %s17479_s19  ;;  %v17926_v19 = vpop.permute.xlu1 %920 }
 0x117   : > { %1005 = vrot.lane.b32.xlu0 %v973_v49, %s17478_s18 }
 0x11b   : > { %1009 = vrot.lane.b32.xlu0 %v975_v57, %s17478_s18 }
 0x11f   : > { %890 = vrot.lane.b32.xlu0 %v855_v3, %s17479_s19 }
 0x123   : > { %1011 = vrot.lane.b32.xlu0 %v976_v58, %s17478_s18 }
 0x127   : > { %715 = vrot.lane.b32.xlu0 %v17532_v2, %s17477_s13 }
 0x15d   : > { %v998_v20 = vpop.permute.xlu0 %997  ;;  %v877_v21 = vpop.permute.xlu1 %876 }
 0x15e   : > { %v1060_v23 = vsel %vm696_vm5, %v998_v20, %v1034_v8  ;;  %v939_v24 = vsel %vm696_vm5, %v877_v21, %v913_v7  ;;  %v642_v7 = vsel %vm17718_vm10, %v615_v0, 0.0 }
 0x15f   : > { %1069 = vst.msk [vmem:[#allocation2 + $0xa] sm:$0xff] %vm435_vm1, %v1060_v23  ;;  %948 = vst.msk [vmem:[#allocation2 + $0x61] sm:$0xff] %vm435_vm1, %v939_v24 }
 0x161   : > { %v887_v28 = vpop.permute.xlu0 %886  ;;  %v17932_v29 = vpop.permute.xlu1 %1041 }
 0x165   : > { %v1008_v30 = vpop.permute.xlu0 %1007  ;;  %v923_v31 = vpop.permute.xlu1 %922 }
 0x166   : > { %v944_v32 = vsel %vm696_vm5, %v887_v28, %v923_v31  ;;  %v17935_v33 = vld [vmem:[#allocation2 + $0x60] sm:$0xff]  ;;  %v17937_v34 = vld [vmem:[#allocation2 + $0x9] sm:$0xff] }
 0x167   : > { %953 = vst.msk [vmem:[#allocation2 + $0x89] sm:$0xff] %vm435_vm1, %v944_v32  ;;  %14192 = vmatmul.mubr.msk.f32.gmra.mrb[10].mxu1 %vm435_vm1, %v17935_v33  ;;  %14453 = vmatmul.mubr.msk.f32.gmra.mrb[12].mxu0 %vm435_vm1, %v17937_v34 }
 0x168   : > { %14194 = vmatprep.mubr.msk.f32.mxu1 %vm17474_vm2, %v17473_v1  ;;  %14455 = vmatprep.mubr.msk.f32.mxu0 %vm17474_vm2, %v17473_v1 }
 0x169   : > { %v1044_v35 = vpop.permute.xlu1 %1043  ;;  %v879_v36 = vpop.permute.xlu0 %878 }
 0x16a   : > { %v1065_v37 = vsel %vm696_vm5, %v1008_v30, %v1044_v35  ;;  %v940_v41 = vsel %vm696_vm5, %v879_v36, %v915_v9 }
 0x16b   : > { %1074 = vst.msk [vmem:[#allocation2 + $0x32] sm:$0xff] %vm435_vm1, %v1065_v37  ;;  %949 = vst.msk [vmem:[#allocation2 + $0x69] sm:$0xff] %vm435_vm1, %v940_v41 }
 0x16d   : > { %v925_v43 = vpop.permute.xlu1 %924  ;;  %v1000_v44 = vpop.permute.xlu0 %999 }
 0x16e   : > { %v1061_v46 = vsel %vm696_vm5, %v1000_v44, %v1036_v10 }
 0x16f   : > { %1070 = vst.msk [vmem:[#allocation2 + $0x12] sm:$0xff] %vm435_vm1, %v1061_v46 }
 0x171   : > { %v1046_v47 = vpop.permute.xlu1 %1045  ;;  %v889_v48 = vpop.permute.xlu0 %888 }
 0x172   : > { %v945_v49 = vsel %vm696_vm5, %v889_v48, %v925_v43  ;;  %v17955_v53 = vld [vmem:[#allocation2 + $0x68] sm:$0xff] }
 0x173   : > { %954 = vst.msk [vmem:[#allocation2 + $0x91] sm:$0xff] %vm435_vm1, %v945_v49  ;;  %14195 = vmatmul.mubr.msk.f32.gmra.mrb[12].mxu1 %vm435_vm1, %v17955_v53 }
 0x174   : > { %14197 = vmatprep.mubr.msk.f32.mxu1 %vm17474_vm2, %v17473_v1 }
 0x175   : > { %v927_v54 = vpop.permute.xlu1 %926  ;;  %v881_v56 = vpop.permute.xlu0 %880 }
 0x176   : > { %v941_v57 = vsel %vm696_vm5, %v881_v56, %v917_v11  ;;  %v17963_v62 = vld [vmem:[#allocation2 + $0x11] sm:$0xff] }
 0x177   : > { %950 = vst.msk [vmem:[#allocation2 + $0x71] sm:$0xff] %vm435_vm1, %v941_v57  ;;  %14456 = vmatmul.mubr.msk.f32.gmra.mrb[14].mxu0 %vm435_vm1, %v17963_v62  ;;  %v18850_v6 = vld [vmem:[#allocation2 + $0x12] sm:$0xff] }
 0x178   : > { %14458 = vmatprep.mubr.msk.f32.mxu0 %vm17474_vm2, %v17473_v1 }
 0x179   : > { %v1048_v3 = vpop.permute.xlu1 %1047  ;;  %v1002_v4 = vpop.permute.xlu0 %1001 }
 0x17a   : > { %v1062_v5 = vsel %vm696_vm5, %v1002_v4, %v1038_v15  ;;  %v18035_v43 = vld [vmem:[#allocation2 + $0x90] sm:$0xff]  ;;  %v652_v4 = vld [vmem:[%s17573_s11 + $0x8] sm:$0xff] }
 0x17b   : > { %1071 = vst.msk [vmem:[#allocation2 + $0x1a] sm:$0xff] %vm435_vm1, %v1062_v5  ;;  %v1387_v5 = vld [vmem:[%s21452_s4 + $0x8] sm:$0xf] }
 0x17d   : > { %v670_v58 = vpop.permute.xlu1 %669  ;;  %v883_v8 = vpop.permute.xlu0 %882 }
 0x17e   : > { %v697_v9 = vsel %vm696_vm5, %v642_v7, %v670_v58  ;;  %v942_v10 = vsel %vm696_vm5, %v883_v8, %v919_v17  ;;  %v17978_v11 = vld [vmem:[#allocation2 + $0x70] sm:$0xff]  ;;  %v1079_v58 = vld [vmem:[#allocation2 + $0x8] sm:$0xff]  ;;  %v12653_v7 = vld [vmem:[%s17573_s11 + $0x58] sm:$0xff] }
 0x17f   : > { %706 = vst.msk [vmem:[#allocation2 + $0x108] sm:$0xff] %vm435_vm1, %v697_v9  ;;  %951 = vst.msk [vmem:[#allocation2 + $0x79] sm:$0xff] %vm435_vm1, %v942_v10  ;;  %14198 = vmatmul.mubr.msk.f32.gmra.mrb[14].mxu1 %vm435_vm1, %v17978_v11  ;;  %v12652_v8 = vld [vmem:[%s17573_s11 + $0x50] sm:$0xff]  ;;  %v2827_v9 = vld [vmem:[%s21452_s4 + $0x8] sm:$0xf] }
 0x180   : > { %14200 = vmatprep.mubr.msk.f32.mxu1 %vm17474_vm2, %v17473_v1  ;;  %v18950_v14 = vld [vmem:[#allocation2 + $0x6a] sm:$0xff] }
 0x181   : > { %v1004_v2 = vpop.permute.xlu0 %1003 }
 0x182   : > { %v1063_v15 = vsel %vm696_vm5, %v1004_v2, %v1040_v18  ;;  %v17987_v20 = vld [vmem:[#allocation2 + $0x19] sm:$0xff] }
 0x183   : > { %1072 = vst.msk [vmem:[#allocation2 + $0x22] sm:$0xff] %vm435_vm1, %v1063_v15  ;;  %14459 = vmatmul.mubr.msk.f32.gmra.mrb[16].mxu0 %vm435_vm1, %v17987_v20 }
 0x184   : > { %14461 = vmatprep.mubr.msk.f32.mxu0 %vm17474_vm2, %v17473_v1 }
 0x185   : > { %v885_v17 = vpop.permute.xlu0 %884 }
 0x186   : > { %v943_v21 = vsel %vm696_vm5, %v885_v17, %v17926_v19  ;;  %v17996_v23 = vld [vmem:[#allocation2 + $0x78] sm:$0xff] }
 0x187   : > { %952 = vst.msk [vmem:[#allocation2 + $0x81] sm:$0xff] %vm435_vm1, %v943_v21  ;;  %14201 = vmatmul.mubr.msk.f32.gmra.mrb[16].mxu1 %vm435_vm1, %v17996_v23  ;;  %v1081_v21 = vld [vmem:[#allocation2 + $0x18] sm:$0xff] }
 0x188   : > { %14203 = vmatprep.mubr.msk.f32.mxu1 %vm17474_vm2, %v17473_v1 }
 0x189   : > { %v1006_v18 = vpop.permute.xlu0 %1005 }
 0x18a   : > { %v1064_v24 = vsel %vm696_vm5, %v1006_v18, %v17932_v29  ;;  %v18005_v28 = vld [vmem:[#allocation2 + $0x21] sm:$0xff]  ;;  %v654_v18 = vld [vmem:[%s17573_s11 + $0x18] sm:$0xff] }
 0x18b   : > { %1073 = vst.msk [vmem:[#allocation2 + $0x2a] sm:$0xff] %vm435_vm1, %v1064_v24  ;;  %14462 = vmatmul.mubr.msk.f32.gmra.mrb[18].mxu0 %vm435_vm1, %v18005_v28  ;;  %v281_v24 = vadd.s32 64, %v17630_v22  ;;  %v12655_v22 = vld [vmem:[%s17573_s11 + $0x68] sm:$0xff] }
 0x18c   : > { %14464 = vmatprep.mubr.msk.f32.mxu0 %vm17474_vm2, %v17473_v1 }
 0x18d   : > { %v1010_v19 = vpop.permute.xlu0 %1009 }
 0x18e   : > { %v1066_v30 = vsel %vm696_vm5, %v1010_v19, %v1046_v47  ;;  %v18013_v31 = vld [vmem:[#allocation2 + $0x80] sm:$0xff]  ;;  %v18021_v35 = vld [vmem:[#allocation2 + $0x88] sm:$0xff] }
 0x18f   : > { %1075 = vst.msk [vmem:[#allocation2 + $0x3a] sm:$0xff] %vm435_vm1, %v1066_v30  ;;  %14204 = vmatmul.mubr.msk.f32.gmra.mrb[18].mxu1 %vm435_vm1, %v18013_v31  ;;  %v1082_v19 = vld [vmem:[#allocation2 + $0x20] sm:$0xff] }
 0x190   : > { %14206 = vmatprep.mubr.msk.f32.mxu1 %vm17474_vm2, %v17473_v1  ;;  %v12654_v30 = vld [vmem:[%s17573_s11 + $0x60] sm:$0xff] }
 0x191   : > { %v891_v29 = vpop.permute.xlu0 %890  ;;  %v18983_v45 = vld [vmem:[#allocation2 + $0x82] sm:$0xff] }
 0x192   : > { %v946_v32 = vsel %vm696_vm5, %v891_v29, %v927_v54  ;;  %v18023_v36 = vld [vmem:[#allocation2 + $0x29] sm:$0xff]  ;;  %v18037_v44 = vld [vmem:[#allocation2 + $0x31] sm:$0xff]  ;;  %21509 = vst [vmem:[#allocation10_spill] sm:$0xff] %v18983_v45 }
 0x193   : > { %955 = vst.msk [vmem:[#allocation2 + $0x99] sm:$0xff] %vm435_vm1, %v946_v32  ;;  %14207 = vmatmul.mubr.msk.f32.gmra.mrb[20].mxu1 %vm435_vm1, %v18021_v35  ;;  %14465 = vmatmul.mubr.msk.f32.gmra.mrb[20].mxu0 %vm435_vm1, %v18023_v36  ;;  %v18137_v29 = vmul.u32.u64.low 3817748708, %v281_v24  ;;  %v18138_v32 = vmul.u32.u64.high 3817748708, %v281_v24, %v18137_v29 }
 0x194   : > { %14209 = vmatprep.mubr.msk.f32.mxu1 %vm17474_vm2, %v17473_v1  ;;  %14467 = vmatprep.mubr.msk.f32.mxu0 %vm17474_vm2, %v17473_v1 }
 0x195   : > { %v1012_v37 = vpop.permute.xlu0 %1011 }
 0x196   : > { %v1067_v41 = vsel %vm696_vm5, %v1012_v37, %v1048_v3  ;;  %v18052_v48 = vld [vmem:[#allocation2 + $0x39] sm:$0xff]  ;;  %v653_v3 = vld [vmem:[%s17573_s11 + $0x10] sm:$0xff]  ;;  %v1083_v37 = vld [vmem:[#allocation2 + $0x28] sm:$0xff] }
 0x197   : > { %1076 = vst.msk [vmem:[#allocation2 + $0x42] sm:$0xff] %vm435_vm1, %v1067_v41  ;;  %14210 = vmatmul.mubr.msk.f32.gmra.mrb[22].mxu1 %vm435_vm1, %v18035_v43  ;;  %14468 = vmatmul.mubr.msk.f32.gmra.mrb[22].mxu0 %vm435_vm1, %v18037_v44  ;;  %v656_v41 = vld [vmem:[%s17573_s11 + $0x28] sm:$0xff] }
 0x198   : > { %14212 = vmatprep.mubr.msk.f32.mxu1 %vm17474_vm2, %v17473_v1  ;;  %14470 = vmatprep.mubr.msk.f32.mxu0 %vm17474_vm2, %v17473_v1 }
 0x199   : > { %v18048_v46 = vpop.permute.xlu0 %715 }
 0x19a   : > { %v18050_v47 = vld [vmem:[#allocation2 + $0x98] sm:$0xff]  ;;  %v719_v49 = vadd.f32 %v18048_v46, %v17743_v13  ;;  %v718_v54 = vadd.f32 %v18048_v46, %v17714_v59  ;;  %v1078_v59 = vld [vmem:[#allocation2] sm:$0xff]  ;;  %v721_v10 = vadd.f32 %v18048_v46, %v17786_v39  ;;  %v720_v2 = vadd.f32 %v18048_v46, %v17767_v27 }
 0x19b   : > { %14213 = vmatmul.mubr.msk.f32.gmra.mrb[24].mxu1 %vm435_vm1, %v18050_v47  ;;  %14471 = vmatmul.mubr.msk.f32.gmra.mrb[24].mxu0 %vm435_vm1, %v18052_v48 }
 0x19c   : > { %v728_v56 = vsel %vm17788_vm4, %v719_v49, 0.0  ;;  %v727_v57 = vsel %vm17718_vm10, %v718_v54, 0.0  ;;  %14217 = vmatprep.mubr.msk.f32.mxu1 %vm17474_vm2, %v17473_v1  ;;  %14473 = vmatprep.mubr.msk.f32.mxu0 %vm17474_vm2, %v17473_v1  ;;  %v730_v15 = vsel %vm17865_vm6, %v721_v10, 0.0  ;;  %v729_v17 = vsel %vm17839_vm14, %v720_v2, 0.0  ;;  %v1084_v49 = vld [vmem:[#allocation2 + $0x30] sm:$0xff]  ;;  %v659_v10 = vld [vmem:[%s17573_s11 + $0x40] sm:$0xff] }
 0x19d   : > { %757 = vrot.lane.b32.xlu1 %v728_v56, %s17480_s26  ;;  %755 = vrot.lane.b32.xlu0 %v727_v57, %s17480_s26  ;;  %v657_v54 = vld [vmem:[%s17573_s11 + $0x30] sm:$0xff]  ;;  %v376_v57 = vshrl.u32 %v18138_v32, 3  ;;  %v1546_v2 = vld [vmem:[%s21452_s4 + $0xc] sm:$0xf] }
 0x19e   : > { %v18072_v0 = vld [vmem:[#allocation2 + $0x41] sm:$0xff]  ;;  %v12656_v56 = vld [vmem:[%s17573_s11 + $0x70] sm:$0xff] }
 0x19f   : > { %14218 = vmatmul.mubr.msk.f32.vlgmr.msra.gmra.mrb[8].mxu1 %vm435_vm1, %v1078_v59  ;;  %14474 = vmatmul.mubr.msk.f32.gmra.mrb[26].mxu0 %vm435_vm1, %v18072_v0  ;;  %v1085_v59 = vld [vmem:[#allocation2 + $0x38] sm:$0xff] }
 0x1a0   : > { %14220 = vmatprep.mubr.msk.f32.mxu1 %vm17474_vm2, %v17473_v1  ;;  %14478 = vmatprep.mubr.msk.f32.mxu0 %vm17474_vm2, %v17473_v1 }
 0x1a1   : > { %673 = vrot.lane.b32.xlu1 %v653_v3, %s17477_s13  ;;  %671 = vrot.lane.b32.xlu0 %v652_v4, %s17477_s13  ;;  %v12657_v3 = vld [vmem:[%s17573_s11 + $0x78] sm:$0xff]  ;;  %v377_v4 = vmul.u32 9, %v376_v57 }
 0x1a2   : > { %14245 = vmatpush3.msk.msra.mxu1 %vm494_vm0, %v1387_v5  ;;  %v725_v5 = vadd.f32 %v18048_v46, %v17763_v26 }
 0x1a3   : > { %14221 = vmatmul.mubr.msk.f32.gmra.mrb[10].mxu1 %vm435_vm1, %v1079_v58  ;;  %14479 = vmatmul.mubr.msk.f32.vlgmr.msra.gmra.mrb[10].mxu0 %vm435_vm1, %v17686_v50  ;;  %v1080_v50 = vld [vmem:[#allocation2 + $0x10] sm:$0xff]  ;;  %v724_v58 = vadd.f32 %v18048_v46, %v17739_v12 }
 0x1a4   : > { %14223 = vmatprep.mubr.msk.f32.mxu1 %vm17474_vm2, %v17473_v1  ;;  %14481 = vmatprep.mubr.msk.f32.mxu0 %vm17474_vm2, %v17473_v1 }
 0x1a5   : > { %795 = vrot.lane.b32.xlu1 %v12653_v7, %s17477_s13  ;;  %793 = vrot.lane.b32.xlu0 %v12652_v8, %s17477_s13  ;;  %v378_v7 = vsub.s32 %v281_v24, %v377_v4  ;;  %v734_v8 = vsel %vm17902_vm3, %v725_v5, 0.0  ;;  %v12668_v24 = vld [vmem:[%s17573_s11 + $0xd0] sm:$0xff] }
 0x1a6   : > { %14506 = vmatpush3.msk.msra.mxu0 %vm494_vm0, %v2827_v9  ;;  %14273 = vmatprep.subr.mxu1 %v17473_v1  ;;  %v733_v9 = vsel %vm17823_vm9, %v724_v58, 0.0 }
 0x1a7   : > { %14224 = vmatmul.mubr.msk.f32.gmra.mrb[12].mxu1 %vm435_vm1, %v1080_v50  ;;  %14482 = vmatmul.mubr.msk.f32.gmra.mrb[12].mxu0 %vm435_vm1, %v17935_v33  ;;  %v655_v33 = vld [vmem:[%s17573_s11 + $0x20] sm:$0xff]  ;;  %vm389_vm7 = vcmp.ne.s32.totalorder %v378_v7, 0  ;;  %vm398_vm11 = vcmp.lt.s32.totalorder %v378_v7, 0 }
 0x1a8   : > { %14226 = vmatprep.mubr.msk.f32.mxu1 %vm17474_vm2, %v17473_v1  ;;  %14484 = vmatprep.mubr.msk.f32.mxu0 %vm17474_vm2, %v17473_v1  ;;  %v2818_v50 = vld [vmem:[#allocation2 + $0x59] sm:$0xff]  ;;  %vm18221_vm12 = vmand %vm398_vm11, %vm389_vm7 }
 0x1a9   : > { %761 = vrot.lane.b32.xlu1 %v730_v15, %s17480_s26  ;;  %759 = vrot.lane.b32.xlu0 %v729_v17, %s17480_s26  ;;  %v416_v15 = vadd.s32 9, %v378_v7  ;;  %v12659_v17 = vld [vmem:[%s17573_s11 + $0x88] sm:$0xff] }
 0x1aa   : > { %14534 = vmatprep.subr.mxu0 %v17473_v1 }
 0x1ab   : > { %14227 = vmatmul.mubr.msk.f32.gmra.mrb[14].mxu1 %vm435_vm1, %v1081_v21  ;;  %14485 = vmatmul.mubr.msk.f32.gmra.mrb[14].mxu0 %vm435_vm1, %v17955_v53  ;;  %v723_v53 = vadd.f32 %v18048_v46, %v17716_v60  ;;  %v2986_v21 = vld [vmem:[%s21452_s4 + $0xc] sm:$0xf] }
 0x1ac   : > { %14229 = vmatprep.mubr.msk.f32.mxu1 %vm17474_vm2, %v17473_v1  ;;  %14487 = vmatprep.mubr.msk.f32.mxu0 %vm17474_vm2, %v17473_v1 }
 0x1ad   : > { %677 = vrot.lane.b32.xlu1 %v655_v33, %s17477_s13  ;;  %675 = vrot.lane.b32.xlu0 %v654_v18, %s17477_s13  ;;  %v425_v33 = vsel %vm18221_vm12, %v416_v15, %v378_v7  ;;  %v726_v18 = vadd.f32 %v18048_v46, %v17782_v38 }
 0x1ae   : > { %vm18253_vm15 = vcmp.lt.s32.totalorder %v425_v33, 8 }
 0x1af   : > { %14230 = vmatmul.mubr.msk.f32.gmra.mrb[16].mxu1 %vm435_vm1, %v1082_v19  ;;  %14488 = vmatmul.mubr.msk.f32.gmra.mrb[16].mxu0 %vm435_vm1, %v17978_v11  ;;  %v732_v11 = vsel %vm17745_vm13, %v723_v53, 0.0  ;;  %v735_v19 = vsel %vm18253_vm15, %v726_v18, 0.0  ;;  %v3145_v53 = vld [vmem:[%s21452_s4 + $0x10] sm:$0xf] }
 0x1b0   : > { %14232 = vmatprep.mubr.msk.f32.mxu1 %vm17474_vm2, %v17473_v1  ;;  %14490 = vmatprep.mubr.msk.f32.mxu0 %vm17474_vm2, %v17473_v1 }
 0x1b1   : > { %799 = vrot.lane.b32.xlu1 %v12655_v22, %s17477_s13  ;;  %797 = vrot.lane.b32.xlu0 %v12654_v30, %s17477_s13  ;;  %v847_v22 = vadd.f32 %v17670_v42, %v17782_v38  ;;  %v12677_v30 = vld [vmem:[%s17573_s11 + $0x118] sm:$0xff]  ;;  %v968_v42 = vadd.f32 %v17702_v55, %v17782_v38 }
 0x1b2   : > { %v18298_v55 = vld [vmem:[#allocation2 + $0x79] sm:$0xff] }
 0x1b3   : > { %14233 = vmatmul.mubr.msk.f32.gmra.mrb[18].mxu1 %vm435_vm1, %v1083_v37  ;;  %14491 = vmatmul.mubr.msk.f32.gmra.mrb[18].mxu0 %vm435_vm1, %v17996_v23  ;;  %v722_v23 = vadd.f32 %v18048_v46, %v17805_v52  ;;  %v21505_v46 = vmov 0  ;;  %v856_v29 = vsel %vm18253_vm15, %v847_v22, 0.0  ;;  %v977_v32 = vsel %vm18253_vm15, %v968_v42, 0.0  ;;  %v18347_v37 = vld [vmem:[#allocation2 + $0x108] sm:$0xff] }
 0x1b4   : > { %14235 = vmatprep.mubr.msk.f32.mxu1 %vm17474_vm2, %v17473_v1  ;;  %14493 = vmatprep.mubr.msk.f32.mxu0 %vm17474_vm2, %v17473_v1  ;;  %v21506_v46 = vsel %vm18253_vm15, 4294967295, %v21505_v46 }
 0x1b5   : > { %765 = vrot.lane.b32.xlu1 %v732_v11, %s17480_s26  ;;  %679 = vrot.lane.b32.xlu0 %v656_v41, %s17477_s13  ;;  %21507 = vst [vmem:[#allocation8_spill] sm:$0xff] %v21506_v46  ;;  %v792_v41 = vpop.permute.xlu1 %791  ;;  %v18358_v11 = vld [vmem:[%s21451_s3] ss:$0 sm:$0xff]  ;;  %v18833_v46 = vld [vmem:[#allocation2 + $0xa] sm:$0xff] }
 0x1b6   : > { %v621_v42 = vadd.f32 %v18358_v11, %v17739_v12 }
 0x1b7   : > { %14236 = vmatmul.mubr.msk.f32.gmra.mrb[20].mxu1 %vm435_vm1, %v1084_v49  ;;  %14494 = vmatmul.mubr.msk.f32.gmra.mrb[20].mxu0 %vm435_vm1, %v18013_v31  ;;  %v731_v31 = vsel %vm17881_vm8, %v722_v23, 0.0  ;;  %v616_v49 = vadd.f32 %v18358_v11, %v17743_v13 }
 0x1b8   : > { %14238 = vmatprep.mubr.msk.f32.mxu1 %vm17474_vm2, %v17473_v1  ;;  %14496 = vmatprep.mubr.msk.f32.mxu0 %vm17474_vm2, %v17473_v1  ;;  %v648_v12 = vsel %vm17823_vm9, %v621_v42, 0.0 }
 0x1b9   : > { %681 = vrot.lane.b32.xlu1 %v657_v54, %s17477_s13  ;;  %801 = vrot.lane.b32.xlu0 %v12656_v56, %s17477_s13  ;;  %v617_v54 = vadd.f32 %v18358_v11, %v17767_v27  ;;  %v643_v4 = vsel %vm17788_vm4, %v616_v49, 0.0 }
 0x1bb   : > { %14239 = vmatmul.mubr.msk.f32.gmra.mrb[22].mxu1 %vm435_vm1, %v1085_v59  ;;  %14497 = vmatmul.mubr.msk.f32.gmra.mrb[22].mxu0 %vm435_vm1, %v18021_v35  ;;  %v1086_v35 = vld [vmem:[#allocation2 + $0x40] sm:$0xff]  ;;  %v644_v59 = vsel %vm17839_vm14, %v617_v54, 0.0 }
 0x1bc   : > { %14241 = vmatprep.mubr.msk.f32.mxu1 %vm17474_vm2, %v17473_v1  ;;  %14499 = vmatprep.mubr.msk.f32.mxu0 %vm17474_vm2, %v17473_v1 }
 0x1bd   : > { %803 = vrot.lane.b32.xlu1 %v12657_v3, %s17477_s13  ;;  %763 = vrot.lane.b32.xlu0 %v731_v31, %s17480_s26 }
 0x1bf   : > { %14242 = vmatmul.mubr.msk.f32.gmra.mrb[24].mxu1 %vm435_vm1, %v1086_v35  ;;  %14500 = vmatmul.mubr.msk.f32.gmra.mrb[24].mxu0 %vm435_vm1, %v18035_v43  ;;  %v658_v43 = vld [vmem:[%s17573_s11 + $0x38] sm:$0xff]  ;;  %v1705_v35 = vld [vmem:[%s21452_s4 + $0x10] sm:$0xf] }
 0x1c0   : > { %14246 = vmatprep.mubr.msk.f32.mxu1 %vm17474_vm2, %v17473_v1  ;;  %14502 = vmatprep.mubr.msk.f32.mxu0 %vm17474_vm2, %v17473_v1 }
 0x1c1   : > { %769 = vrot.lane.b32.xlu1 %v734_v8, %s17480_s26  ;;  %767 = vrot.lane.b32.xlu0 %v733_v9, %s17480_s26  ;;  %v618_v9 = vadd.f32 %v18358_v11, %v17786_v39 }
 0x1c3   : > { %14247 = vmatmul.mubr.msk.f32.vlgmr.msra.gmra.mrb[8].mxu1 %vm435_vm1, %v17692_v51  ;;  %14503 = vmatmul.mubr.msk.f32.gmra.mrb[26].mxu0 %vm435_vm1, %v18050_v47  ;;  %v12658_v47 = vld [vmem:[%s17573_s11 + $0x80] sm:$0xff]  ;;  %v645_v51 = vsel %vm17865_vm6, %v618_v9, 0.0 }
 0x1c4   : > { %14249 = vmatprep.mubr.msk.f32.mxu1 %vm17474_vm2, %v17473_v1  ;;  %14507 = vmatprep.mubr.msk.f32.mxu0 %vm17474_vm2, %v17473_v1 }
 0x1c5   : > { %685 = vrot.lane.b32.xlu1 %v659_v10, %s17477_s13  ;;  %683 = vrot.lane.b32.xlu0 %v658_v43, %s17477_s13  ;;  %v619_v10 = vadd.f32 %v18358_v11, %v17805_v52 }
 0x1c6   : > { %14274 = vmatpush3.msk.msra.mxu1 %vm494_vm0, %v1546_v2 }
 0x1c7   : > { %14250 = vmatmul.mubr.msk.f32.gmra.mrb[10].mxu1 %vm435_vm1, %v17937_v34  ;;  %14508 = vmatmul.mubr.msk.f32.vlgmr.msra.gmra.mrb[10].mxu0 %vm435_vm1, %v2818_v50  ;;  %v18244_v34 = vld [vmem:[#allocation2 + $0x61] sm:$0xff]  ;;  %v646_v52 = vsel %vm17881_vm8, %v619_v10, 0.0 }
 0x1c8   : > { %14252 = vmatprep.mubr.msk.f32.mxu1 %vm17474_vm2, %v17473_v1  ;;  %14510 = vmatprep.mubr.msk.f32.mxu0 %vm17474_vm2, %v17473_v1 }
 0x1c9   : > { %805 = vrot.lane.b32.xlu0 %v12658_v47, %s17477_s13  ;;  %807 = vrot.lane.b32.xlu1 %v12659_v17, %s17477_s13 }
 0x1ca   : > { %14535 = vmatpush3.msk.msra.mxu0 %vm494_vm0, %v2986_v21  ;;  %14302 = vmatprep.subr.mxu1 %v17473_v1 }
 0x1cb   : > { %14253 = vmatmul.mubr.msk.f32.gmra.mrb[12].mxu1 %vm435_vm1, %v17963_v62  ;;  %14511 = vmatmul.mubr.msk.f32.gmra.mrb[12].mxu0 %vm435_vm1, %v18244_v34  ;;  %v18267_v62 = vld [vmem:[#allocation2 + $0x69] sm:$0xff] }
 0x1cc   : > { %14255 = vmatprep.mubr.msk.f32.mxu1 %vm17474_vm2, %v17473_v1  ;;  %14513 = vmatprep.mubr.msk.f32.mxu0 %vm17474_vm2, %v17473_v1 }
 0x1cd   : > { %771 = vrot.lane.b32.xlu0 %v735_v19, %s17480_s26  ;;  %928 = vrot.lane.b32.xlu1 %v12668_v24, %s17477_s13  ;;  %v620_v24 = vadd.f32 %v18358_v11, %v17716_v60 }
 0x1ce   : > { %14563 = vmatprep.subr.mxu0 %v17473_v1 }
 0x1cf   : > { %14256 = vmatmul.mubr.msk.f32.gmra.mrb[14].mxu1 %vm435_vm1, %v17987_v20  ;;  %14514 = vmatmul.mubr.msk.f32.gmra.mrb[14].mxu0 %vm435_vm1, %v18267_v62  ;;  %v18285_v20 = vld [vmem:[#allocation2 + $0x71] sm:$0xff]  ;;  %v647_v60 = vsel %vm17745_vm13, %v620_v24, 0.0 }
 0x1d0   : > { %14258 = vmatprep.mubr.msk.f32.mxu1 %vm17474_vm2, %v17473_v1  ;;  %14516 = vmatprep.mubr.msk.f32.mxu0 %vm17474_vm2, %v17473_v1 }
 0x1d1   : > { %892 = vrot.lane.b32.xlu0 %v856_v29, %s17479_s19  ;;  %1049 = vrot.lane.b32.xlu1 %v12677_v30, %s17477_s13 }
 0x1d3   : > { %14259 = vmatmul.mubr.msk.f32.gmra.mrb[16].mxu1 %vm435_vm1, %v18005_v28  ;;  %14517 = vmatmul.mubr.msk.f32.gmra.mrb[16].mxu0 %vm435_vm1, %v18285_v20  ;;  %v18308_v28 = vld [vmem:[#allocation2 + $0x81] sm:$0xff] }
 0x1d4   : > { %14261 = vmatprep.mubr.msk.f32.mxu1 %vm17474_vm2, %v17473_v1  ;;  %14519 = vmatprep.mubr.msk.f32.mxu0 %vm17474_vm2, %v17473_v1 }
 0x1d5   : > { %1013 = vrot.lane.b32.xlu0 %v977_v32, %s17478_s18 }
 0x1d7   : > { %14262 = vmatmul.mubr.msk.f32.gmra.mrb[18].mxu1 %vm435_vm1, %v18023_v36  ;;  %14520 = vmatmul.mubr.msk.f32.gmra.mrb[18].mxu0 %vm435_vm1, %v18298_v55  ;;  %v18318_v36 = vld [vmem:[#allocation2 + $0x89] sm:$0xff] }
 0x1d8   : > { %14264 = vmatprep.mubr.msk.f32.mxu1 %vm17474_vm2, %v17473_v1  ;;  %14522 = vmatprep.mubr.msk.f32.mxu0 %vm17474_vm2, %v17473_v1 }
 0x1db   : > { %14265 = vmatmul.mubr.msk.f32.gmra.mrb[20].mxu1 %vm435_vm1, %v18037_v44  ;;  %14523 = vmatmul.mubr.msk.f32.gmra.mrb[20].mxu0 %vm435_vm1, %v18308_v28  ;;  %v18328_v44 = vld [vmem:[#allocation2 + $0x91] sm:$0xff] }
 0x1dc   : > { %14267 = vmatprep.mubr.msk.f32.mxu1 %vm17474_vm2, %v17473_v1  ;;  %14525 = vmatprep.mubr.msk.f32.mxu0 %vm17474_vm2, %v17473_v1 }
 0x1df   : > { %14268 = vmatmul.mubr.msk.f32.gmra.mrb[22].mxu1 %vm435_vm1, %v18052_v48  ;;  %14526 = vmatmul.mubr.msk.f32.gmra.mrb[22].mxu0 %vm435_vm1, %v18318_v36  ;;  %v18338_v48 = vld [vmem:[#allocation2 + $0x99] sm:$0xff] }
 0x1e0   : > { %14270 = vmatprep.mubr.msk.f32.mxu1 %vm17474_vm2, %v17473_v1  ;;  %14528 = vmatprep.mubr.msk.f32.mxu0 %vm17474_vm2, %v17473_v1 }
 0x1e3   : > { %14271 = vmatmul.mubr.msk.f32.gmra.mrb[24].mxu1 %vm435_vm1, %v18072_v0  ;;  %14529 = vmatmul.mubr.msk.f32.gmra.mrb[24].mxu0 %vm435_vm1, %v18328_v44 }
 0x1e4   : > { %14531 = vmatprep.mubr.msk.f32.mxu0 %vm17474_vm2, %v17473_v1  ;;  %14275 = vmatprep.mubr.msk.f32.mxu1 %vm17474_vm2, %v17473_v1 }
 0x1e7   : > { %14532 = vmatmul.mubr.msk.f32.gmra.mrb[26].mxu0 %vm435_vm1, %v18338_v48 }
 0x1e8   : > { %14536 = vmatprep.mubr.msk.f32.mxu0 %vm17474_vm2, %v17473_v1 }
 0x1eb   : > { %14537 = vmatmul.mubr.msk.f32.vlgmr.msra.gmra.mrb[10].mxu0 %vm435_vm1, %v18347_v37 }
 0x1ec   : > { %14539 = vmatprep.mubr.msk.f32.mxu0 %vm17474_vm2, %v17473_v1  ;;  %14564 = vmatpush3.msk.msra.mxu0 %vm494_vm0, %v3145_v53 }
 0x1ed   : > { %14592 = vmatprep.subr.mxu0 %v17473_v1 }
 0x20f   : > { %v758_v56 = vpop.permute.xlu1 %757  ;;  %v756_v57 = vpop.permute.xlu0 %755 }
 0x210   : > { %v818_v23 = vsel %vm696_vm5, %v756_v57, %v792_v41 }
 0x211   : > { %827 = vst.msk [vmem:[#allocation2 + $0xb1] sm:$0xff] %vm435_vm1, %v818_v23 }
 0x213   : > { %v674_v3 = vpop.permute.xlu1 %673  ;;  %v672_v31 = vpop.permute.xlu0 %671 }
 0x214   : > { %v699_v5 = vsel %vm696_vm5, %v644_v59, %v674_v3  ;;  %v698_v13 = vsel %vm696_vm5, %v643_v4, %v672_v31 }
 0x215   : > { %708 = vst.msk [vmem:[#allocation2 + $0x118] sm:$0xff] %vm435_vm1, %v699_v5  ;;  %707 = vst.msk [vmem:[#allocation2 + $0x110] sm:$0xff] %vm435_vm1, %v698_v13 }
 0x217   : > { %v796_v27 = vpop.permute.xlu1 %795  ;;  %v794_v58 = vpop.permute.xlu0 %793 }
 0x218   : > { %v819_v7 = vsel %vm696_vm5, %v758_v56, %v794_v58  ;;  %v18378_v8 = vld [vmem:[#allocation2 + $0xb0] sm:$0xff]  ;;  %v623_v58 = vadd.f32 %v18358_v11, %v17782_v38 }
 0x219   : > { %828 = vst.msk [vmem:[#allocation2 + $0xb9] sm:$0xff] %vm435_vm1, %v819_v7  ;;  %14276 = vmatmul.mubr.msk.f32.vlgmr.msra.gmra.mrb[8].mxu1 %vm435_vm1, %v18378_v8 }
 0x21a   : > { %14278 = vmatprep.mubr.msk.f32.mxu1 %vm17474_vm2, %v17473_v1  ;;  %14303 = vmatpush3.msk.msra.mxu1 %vm494_vm0, %v1705_v35 }
 0x21b   : > { %v762_v43 = vpop.permute.xlu1 %761  ;;  %v760_v2 = vpop.permute.xlu0 %759  ;;  %14331 = vmatprep.subr.mxu1 %v17473_v1 }
 0x21c   : > { %v820_v50 = vsel %vm696_vm5, %v760_v2, %v796_v27  ;;  %v18392_v15 = vld [vmem:[#allocation2 + $0x110] sm:$0xff]  ;;  %v18407_v18 = vld [vmem:[#allocation2 + $0x118] sm:$0xff]  ;;  %v622_v27 = vadd.f32 %v18358_v11, %v17763_v26  ;;  %v650_v26 = vsel %vm18253_vm15, %v623_v58, 0.0 }
 0x21d   : > { %829 = vst.msk [vmem:[#allocation2 + $0xc1] sm:$0xff] %vm435_vm1, %v820_v50  ;;  %14540 = vmatmul.mubr.msk.f32.gmra.mrb[12].mxu0 %vm435_vm1, %v18392_v15 }
 0x21e   : > { %14542 = vmatprep.mubr.msk.f32.mxu0 %vm17474_vm2, %v17473_v1  ;;  %v649_v38 = vsel %vm17902_vm3, %v622_v27, 0.0 }
 0x21f   : > { %v678_v39 = vpop.permute.xlu1 %677  ;;  %v676_v47 = vpop.permute.xlu0 %675 }
 0x220   : > { %v701_v17 = vsel %vm696_vm5, %v646_v52, %v678_v39  ;;  %v700_v21 = vsel %vm696_vm5, %v645_v51, %v676_v47  ;;  %v18405_v33 = vld [vmem:[#allocation2 + $0xb8] sm:$0xff] }
 0x221   : > { %710 = vst.msk [vmem:[#allocation2 + $0x128] sm:$0xff] %vm435_vm1, %v701_v17  ;;  %709 = vst.msk [vmem:[#allocation2 + $0x120] sm:$0xff] %vm435_vm1, %v700_v21  ;;  %14279 = vmatmul.mubr.msk.f32.gmra.mrb[10].mxu1 %vm435_vm1, %v18405_v33  ;;  %14543 = vmatmul.mubr.msk.f32.gmra.mrb[14].mxu0 %vm435_vm1, %v18407_v18 }
 0x222   : > { %14281 = vmatprep.mubr.msk.f32.mxu1 %vm17474_vm2, %v17473_v1  ;;  %14545 = vmatprep.mubr.msk.f32.mxu0 %vm17474_vm2, %v17473_v1 }
 0x223   : > { %v800_v19 = vpop.permute.xlu1 %799  ;;  %v798_v22 = vpop.permute.xlu0 %797 }
 0x224   : > { %v821_v30 = vsel %vm696_vm5, %v762_v43, %v798_v22  ;;  %v18422_v29 = vld [vmem:[#allocation2 + $0xc0] sm:$0xff] }
 0x225   : > { %830 = vst.msk [vmem:[#allocation2 + $0xc9] sm:$0xff] %vm435_vm1, %v821_v30  ;;  %14282 = vmatmul.mubr.msk.f32.gmra.mrb[12].mxu1 %vm435_vm1, %v18422_v29 }
 0x226   : > { %14284 = vmatprep.mubr.msk.f32.mxu1 %vm17474_vm2, %v17473_v1 }
 0x227   : > { %v766_v32 = vpop.permute.xlu1 %765  ;;  %v680_v53 = vpop.permute.xlu0 %679 }
 0x228   : > { %v702_v41 = vsel %vm696_vm5, %v647_v60, %v680_v53  ;;  %v18434_v49 = vld [vmem:[#allocation2 + $0x120] sm:$0xff]  ;;  %v18447_v3 = vld [vmem:[#allocation2 + $0x128] sm:$0xff] }
 0x229   : > { %711 = vst.msk [vmem:[#allocation2 + $0x130] sm:$0xff] %vm435_vm1, %v702_v41  ;;  %14546 = vmatmul.mubr.msk.f32.gmra.mrb[16].mxu0 %vm435_vm1, %v18434_v49 }
 0x22a   : > { %14548 = vmatprep.mubr.msk.f32.mxu0 %vm17474_vm2, %v17473_v1 }
 0x22b   : > { %v682_v54 = vpop.permute.xlu1 %681  ;;  %v802_v56 = vpop.permute.xlu0 %801 }
 0x22c   : > { %v703_v57 = vsel %vm696_vm5, %v648_v12, %v682_v54  ;;  %v823_v23 = vsel %vm696_vm5, %v766_v32, %v802_v56  ;;  %v18445_v59 = vld [vmem:[#allocation2 + $0xc8] sm:$0xff] }
 0x22d   : > { %712 = vst.msk [vmem:[#allocation2 + $0x138] sm:$0xff] %vm435_vm1, %v703_v57  ;;  %832 = vst.msk [vmem:[#allocation2 + $0xd9] sm:$0xff] %vm435_vm1, %v823_v23  ;;  %14285 = vmatmul.mubr.msk.f32.gmra.mrb[14].mxu1 %vm435_vm1, %v18445_v59  ;;  %14549 = vmatmul.mubr.msk.f32.gmra.mrb[18].mxu0 %vm435_vm1, %v18447_v3  ;;  %v18532_v57 = vld [vmem:[#allocation2 + $0xb1] sm:$0xff]  ;;  %v18573_v27 = vld [vmem:[#allocation2 + $0xc9] sm:$0xff] }
 0x22e   : > { %14551 = vmatprep.mubr.msk.f32.mxu0 %vm17474_vm2, %v17473_v1  ;;  %14287 = vmatprep.mubr.msk.f32.mxu1 %vm17474_vm2, %v17473_v1  ;;  %v3304_v23 = vld [vmem:[%s21452_s4 + $0x14] sm:$0xf] }
 0x22f   : > { %v804_v4 = vpop.permute.xlu1 %803  ;;  %v764_v31 = vpop.permute.xlu0 %763 }
 0x230   : > { %v822_v5 = vsel %vm696_vm5, %v764_v31, %v800_v19  ;;  %v18460_v13 = vld [vmem:[#allocation2 + $0x130] sm:$0xff]  ;;  %v18550_v31 = vld [vmem:[#allocation2 + $0xb9] sm:$0xff] }
 0x231   : > { %831 = vst.msk [vmem:[#allocation2 + $0xd1] sm:$0xff] %vm435_vm1, %v822_v5  ;;  %14552 = vmatmul.mubr.msk.f32.gmra.mrb[20].mxu0 %vm435_vm1, %v18460_v13  ;;  %v18563_v5 = vld [vmem:[#allocation2 + $0xc1] sm:$0xff] }
 0x232   : > { %14554 = vmatprep.mubr.msk.f32.mxu0 %vm17474_vm2, %v17473_v1 }
 0x233   : > { %v770_v35 = vpop.permute.xlu1 %769  ;;  %v768_v7 = vpop.permute.xlu0 %767 }
 0x234   : > { %v824_v9 = vsel %vm696_vm5, %v768_v7, %v804_v4  ;;  %v18472_v10 = vld [vmem:[#allocation2 + $0x138] sm:$0xff]  ;;  %v1864_v4 = vld [vmem:[%s21452_s4 + $0x14] sm:$0xf] }
 0x235   : > { %833 = vst.msk [vmem:[#allocation2 + $0xe1] sm:$0xff] %vm435_vm1, %v824_v9  ;;  %14555 = vmatmul.mubr.msk.f32.gmra.mrb[22].mxu0 %vm435_vm1, %v18472_v10 }
 0x236   : > { %14557 = vmatprep.mubr.msk.f32.mxu0 %vm17474_vm2, %v17473_v1 }
 0x237   : > { %v686_v43 = vpop.permute.xlu1 %685  ;;  %v684_v11 = vpop.permute.xlu0 %683 }
 0x238   : > { %v705_v2 = vsel %vm696_vm5, %v650_v26, %v686_v43  ;;  %v704_v50 = vsel %vm696_vm5, %v649_v38, %v684_v11  ;;  %v18485_v39 = vld [vmem:[#allocation2 + $0xd0] sm:$0xff]  ;;  %v18494_v17 = vld [vmem:[#allocation2 + $0xd8] sm:$0xff] }
 0x239   : > { %714 = vst.msk [vmem:[#allocation2 + $0x148] sm:$0xff] %vm435_vm1, %v705_v2  ;;  %713 = vst.msk [vmem:[#allocation2 + $0x140] sm:$0xff] %vm435_vm1, %v704_v50  ;;  %14288 = vmatmul.mubr.msk.f32.gmra.mrb[16].mxu1 %vm435_vm1, %v18485_v39  ;;  %v18583_v58 = vld [vmem:[#allocation2 + $0xd1] sm:$0xff]  ;;  %v18633_v43 = vld [vmem:[#allocation2 + $0x109] sm:$0xff] }
 0x23a   : > { %14290 = vmatprep.mubr.msk.f32.mxu1 %vm17474_vm2, %v17473_v1  ;;  %v3463_v38 = vld [vmem:[%s21452_s4 + $0x18] sm:$0xf] }
 0x23b   : > { %v806_v52 = vpop.permute.xlu0 %805  ;;  %v808_v51 = vpop.permute.xlu1 %807  ;;  %v2023_v11 = vld [vmem:[%s21452_s4 + $0x18] sm:$0xf] }
 0x23c   : > { %v825_v47 = vsel %vm696_vm5, %v770_v35, %v806_v52  ;;  %v18502_v22 = vld [vmem:[#allocation2 + $0xe0] sm:$0xff]  ;;  %v18650_v2 = vld [vmem:[#allocation2 + $0x111] sm:$0xff] }
 0x23d   : > { %834 = vst.msk [vmem:[#allocation2 + $0xe9] sm:$0xff] %vm435_vm1, %v825_v47  ;;  %14291 = vmatmul.mubr.msk.f32.gmra.mrb[18].mxu1 %vm435_vm1, %v18494_v17  ;;  %v18593_v35 = vld [vmem:[#allocation2 + $0xd9] sm:$0xff]  ;;  %v18603_v7 = vld [vmem:[#allocation2 + $0xe1] sm:$0xff]  ;;  %v18693_v47 = vld [vmem:[#allocation2 + $0x131] sm:$0xff] }
 0x23e   : > { %14293 = vmatprep.mubr.msk.f32.mxu1 %vm17474_vm2, %v17473_v1  ;;  %v18663_v50 = vld [vmem:[#allocation2 + $0x119] sm:$0xff]  ;;  %v18673_v52 = vld [vmem:[#allocation2 + $0x121] sm:$0xff] }
 0x23f   : > { %v772_v21 = vpop.permute.xlu0 %771  ;;  %v929_v24 = vpop.permute.xlu1 %928 }
 0x240   : > { %v826_v19 = vsel %vm696_vm5, %v772_v21, %v808_v51  ;;  %v18504_v30 = vld [vmem:[#allocation2 + $0x140] sm:$0xff]  ;;  %v18518_v53 = vld [vmem:[#allocation2 + $0x148] sm:$0xff] }
 0x241   : > { %835 = vst.msk [vmem:[#allocation2 + $0xf1] sm:$0xff] %vm435_vm1, %v826_v19  ;;  %14294 = vmatmul.mubr.msk.f32.gmra.mrb[20].mxu1 %vm435_vm1, %v18502_v22  ;;  %14558 = vmatmul.mubr.msk.f32.gmra.mrb[24].mxu0 %vm435_vm1, %v18504_v30  ;;  %v18683_v51 = vld [vmem:[#allocation2 + $0x129] sm:$0xff]  ;;  %v18703_v21 = vld [vmem:[#allocation2 + $0x139] sm:$0xff] }
 0x242   : > { %14296 = vmatprep.mubr.msk.f32.mxu1 %vm17474_vm2, %v17473_v1  ;;  %14560 = vmatprep.mubr.msk.f32.mxu0 %vm17474_vm2, %v17473_v1  ;;  %v18723_v19 = vld [vmem:[#allocation2 + $0x149] sm:$0xff] }
 0x243   : > { %v893_v42 = vpop.permute.xlu0 %892  ;;  %v1050_v41 = vpop.permute.xlu1 %1049 }
 0x244   : > { %v947_v32 = vsel %vm696_vm5, %v893_v42, %v929_v24  ;;  %v18516_v60 = vld [vmem:[#allocation2 + $0xe8] sm:$0xff]  ;;  %v3622_v42 = vld [vmem:[%s21452_s4 + $0x1c] sm:$0xf] }
 0x245   : > { %956 = vst.msk [vmem:[#allocation2 + $0xa1] sm:$0xff] %vm435_vm1, %v947_v32  ;;  %14297 = vmatmul.mubr.msk.f32.gmra.mrb[22].mxu1 %vm435_vm1, %v18516_v60  ;;  %14561 = vmatmul.mubr.msk.f32.gmra.mrb[26].mxu0 %vm435_vm1, %v18518_v53  ;;  %v18613_v9 = vld [vmem:[#allocation2 + $0xe9] sm:$0xff]  ;;  %v18713_v24 = vld [vmem:[#allocation2 + $0x141] sm:$0xff]  ;;  %v2182_v32 = vld [vmem:[%s21452_s4 + $0x1c] sm:$0xf] }
 0x246   : > { %14299 = vmatprep.mubr.msk.f32.mxu1 %vm17474_vm2, %v17473_v1  ;;  %14565 = vmatprep.mubr.msk.f32.mxu0 %vm17474_vm2, %v17473_v1 }
 0x247   : > { %v1014_v12 = vpop.permute.xlu0 %1013 }
 0x248   : > { %v1068_v54 = vsel %vm696_vm5, %v1014_v12, %v1050_v41  ;;  %v18530_v56 = vld [vmem:[#allocation2 + $0xf0] sm:$0xff] }
 0x249   : > { %1077 = vst.msk [vmem:[#allocation2 + $0x4a] sm:$0xff] %vm435_vm1, %v1068_v54  ;;  %14300 = vmatmul.mubr.msk.f32.gmra.mrb[24].mxu1 %vm435_vm1, %v18530_v56  ;;  %14566 = vmatmul.mubr.msk.f32.vlgmr.msra.gmra.mrb[10].mxu0 %vm435_vm1, %v18532_v57  ;;  %v18623_v26 = vld [vmem:[#allocation2 + $0xf1] sm:$0xff]  ;;  %v18748_v41 = vld [vmem:[#allocation2 + $0x9] sm:$0xff]  ;;  %v18771_v54 = vld [vmem:[#allocation2 + $0x19] sm:$0xff] }
 0x24a   : > { %14304 = vmatprep.mubr.msk.f32.mxu1 %vm17474_vm2, %v17473_v1  ;;  %14568 = vmatprep.mubr.msk.f32.mxu0 %vm17474_vm2, %v17473_v1  ;;  %v18761_v12 = vld [vmem:[#allocation2 + $0x11] sm:$0xff] }
 0x24b   : > { %14593 = vmatpush3.msk.msra.mxu0 %vm494_vm0, %v3304_v23  ;;  %v18781_v23 = vld [vmem:[#allocation2 + $0x21] sm:$0xff] }
 0x24c   : > { %14621 = vmatprep.subr.mxu0 %v17473_v1 }
 0x24d   : > { %14305 = vmatmul.mubr.msk.f32.vlgmr.msra.gmra.mrb[8].mxu1 %vm435_vm1, %v18347_v37  ;;  %14569 = vmatmul.mubr.msk.f32.gmra.mrb[12].mxu0 %vm435_vm1, %v18550_v31 }
 0x24e   : > { %14332 = vmatpush3.msk.msra.mxu1 %vm494_vm0, %v1864_v4  ;;  %14307 = vmatprep.mubr.msk.f32.mxu1 %vm17474_vm2, %v17473_v1  ;;  %v18791_v4 = vld [vmem:[#allocation2 + $0x29] sm:$0xff] }
 0x24f   : > { %14571 = vmatprep.mubr.msk.f32.mxu0 %vm17474_vm2, %v17473_v1  ;;  %14360 = vmatprep.subr.mxu1 %v17473_v1 }
 0x251   : > { %14308 = vmatmul.mubr.msk.f32.gmra.mrb[10].mxu1 %vm435_vm1, %v18392_v15  ;;  %14572 = vmatmul.mubr.msk.f32.gmra.mrb[14].mxu0 %vm435_vm1, %v18563_v5 }
 0x252   : > { %14310 = vmatprep.mubr.msk.f32.mxu1 %vm17474_vm2, %v17473_v1  ;;  %14574 = vmatprep.mubr.msk.f32.mxu0 %vm17474_vm2, %v17473_v1 }
 0x255   : > { %14311 = vmatmul.mubr.msk.f32.gmra.mrb[12].mxu1 %vm435_vm1, %v18407_v18  ;;  %14575 = vmatmul.mubr.msk.f32.gmra.mrb[16].mxu0 %vm435_vm1, %v18573_v27 }
 0x256   : > { %14313 = vmatprep.mubr.msk.f32.mxu1 %vm17474_vm2, %v17473_v1  ;;  %14577 = vmatprep.mubr.msk.f32.mxu0 %vm17474_vm2, %v17473_v1 }
 0x259   : > { %14314 = vmatmul.mubr.msk.f32.gmra.mrb[14].mxu1 %vm435_vm1, %v18434_v49  ;;  %14578 = vmatmul.mubr.msk.f32.gmra.mrb[18].mxu0 %vm435_vm1, %v18583_v58 }
 0x25a   : > { %14316 = vmatprep.mubr.msk.f32.mxu1 %vm17474_vm2, %v17473_v1  ;;  %14580 = vmatprep.mubr.msk.f32.mxu0 %vm17474_vm2, %v17473_v1 }
 0x25d   : > { %14317 = vmatmul.mubr.msk.f32.gmra.mrb[16].mxu1 %vm435_vm1, %v18447_v3  ;;  %14581 = vmatmul.mubr.msk.f32.gmra.mrb[20].mxu0 %vm435_vm1, %v18593_v35 }
 0x25e   : > { %14319 = vmatprep.mubr.msk.f32.mxu1 %vm17474_vm2, %v17473_v1  ;;  %14583 = vmatprep.mubr.msk.f32.mxu0 %vm17474_vm2, %v17473_v1 }
 0x261   : > { %14320 = vmatmul.mubr.msk.f32.gmra.mrb[18].mxu1 %vm435_vm1, %v18460_v13  ;;  %14584 = vmatmul.mubr.msk.f32.gmra.mrb[22].mxu0 %vm435_vm1, %v18603_v7 }
 0x262   : > { %14322 = vmatprep.mubr.msk.f32.mxu1 %vm17474_vm2, %v17473_v1  ;;  %14586 = vmatprep.mubr.msk.f32.mxu0 %vm17474_vm2, %v17473_v1 }
 0x265   : > { %14323 = vmatmul.mubr.msk.f32.gmra.mrb[20].mxu1 %vm435_vm1, %v18472_v10  ;;  %14587 = vmatmul.mubr.msk.f32.gmra.mrb[24].mxu0 %vm435_vm1, %v18613_v9 }
 0x266   : > { %14325 = vmatprep.mubr.msk.f32.mxu1 %vm17474_vm2, %v17473_v1  ;;  %14589 = vmatprep.mubr.msk.f32.mxu0 %vm17474_vm2, %v17473_v1 }
 0x269   : > { %14326 = vmatmul.mubr.msk.f32.gmra.mrb[22].mxu1 %vm435_vm1, %v18504_v30  ;;  %14590 = vmatmul.mubr.msk.f32.gmra.mrb[26].mxu0 %vm435_vm1, %v18623_v26 }
 0x26a   : > { %14328 = vmatprep.mubr.msk.f32.mxu1 %vm17474_vm2, %v17473_v1  ;;  %14594 = vmatprep.mubr.msk.f32.mxu0 %vm17474_vm2, %v17473_v1 }
 0x26d   : > { %14329 = vmatmul.mubr.msk.f32.gmra.mrb[24].mxu1 %vm435_vm1, %v18518_v53  ;;  %14595 = vmatmul.mubr.msk.f32.vlgmr.msra.gmra.mrb[10].mxu0 %vm435_vm1, %v18633_v43 }
 0x26e   : > { %14333 = vmatprep.mubr.msk.f32.mxu1 %vm17474_vm2, %v17473_v1  ;;  %14597 = vmatprep.mubr.msk.f32.mxu0 %vm17474_vm2, %v17473_v1 }
 0x26f   : > { %14622 = vmatpush3.msk.msra.mxu0 %vm494_vm0, %v3463_v38  ;;  %v18801_v38 = vld [vmem:[#allocation2 + $0x31] sm:$0xff] }
 0x270   : > { %14650 = vmatprep.subr.mxu0 %v17473_v1 }
 0x271   : > { %14334 = vmatmul.mubr.msk.f32.vlgmr.msra.gmra.mrb[8].mxu1 %vm435_vm1, %v18532_v57  ;;  %14598 = vmatmul.mubr.msk.f32.gmra.mrb[12].mxu0 %vm435_vm1, %v18650_v2 }
 0x272   : > { %14361 = vmatpush3.msk.msra.mxu1 %vm494_vm0, %v2023_v11  ;;  %14336 = vmatprep.mubr.msk.f32.mxu1 %vm17474_vm2, %v17473_v1  ;;  %v18811_v11 = vld [vmem:[#allocation2 + $0x39] sm:$0xff] }
 0x273   : > { %14600 = vmatprep.mubr.msk.f32.mxu0 %vm17474_vm2, %v17473_v1  ;;  %14389 = vmatprep.subr.mxu1 %v17473_v1 }
 0x275   : > { %14337 = vmatmul.mubr.msk.f32.gmra.mrb[10].mxu1 %vm435_vm1, %v18550_v31  ;;  %14601 = vmatmul.mubr.msk.f32.gmra.mrb[14].mxu0 %vm435_vm1, %v18663_v50 }
 0x276   : > { %14339 = vmatprep.mubr.msk.f32.mxu1 %vm17474_vm2, %v17473_v1  ;;  %14603 = vmatprep.mubr.msk.f32.mxu0 %vm17474_vm2, %v17473_v1 }
 0x279   : > { %14340 = vmatmul.mubr.msk.f32.gmra.mrb[12].mxu1 %vm435_vm1, %v18563_v5  ;;  %14604 = vmatmul.mubr.msk.f32.gmra.mrb[16].mxu0 %vm435_vm1, %v18673_v52 }
 0x27a   : > { %14342 = vmatprep.mubr.msk.f32.mxu1 %vm17474_vm2, %v17473_v1  ;;  %14606 = vmatprep.mubr.msk.f32.mxu0 %vm17474_vm2, %v17473_v1 }
 0x27d   : > { %14343 = vmatmul.mubr.msk.f32.gmra.mrb[14].mxu1 %vm435_vm1, %v18573_v27  ;;  %14607 = vmatmul.mubr.msk.f32.gmra.mrb[18].mxu0 %vm435_vm1, %v18683_v51 }
 0x27e   : > { %14345 = vmatprep.mubr.msk.f32.mxu1 %vm17474_vm2, %v17473_v1  ;;  %14609 = vmatprep.mubr.msk.f32.mxu0 %vm17474_vm2, %v17473_v1 }
 0x281   : > { %14346 = vmatmul.mubr.msk.f32.gmra.mrb[16].mxu1 %vm435_vm1, %v18583_v58  ;;  %14610 = vmatmul.mubr.msk.f32.gmra.mrb[20].mxu0 %vm435_vm1, %v18693_v47 }
 0x282   : > { %14348 = vmatprep.mubr.msk.f32.mxu1 %vm17474_vm2, %v17473_v1  ;;  %14612 = vmatprep.mubr.msk.f32.mxu0 %vm17474_vm2, %v17473_v1 }
 0x285   : > { %14349 = vmatmul.mubr.msk.f32.gmra.mrb[18].mxu1 %vm435_vm1, %v18593_v35  ;;  %14613 = vmatmul.mubr.msk.f32.gmra.mrb[22].mxu0 %vm435_vm1, %v18703_v21 }
 0x286   : > { %14351 = vmatprep.mubr.msk.f32.mxu1 %vm17474_vm2, %v17473_v1  ;;  %14615 = vmatprep.mubr.msk.f32.mxu0 %vm17474_vm2, %v17473_v1 }
 0x289   : > { %14352 = vmatmul.mubr.msk.f32.gmra.mrb[20].mxu1 %vm435_vm1, %v18603_v7  ;;  %14616 = vmatmul.mubr.msk.f32.gmra.mrb[24].mxu0 %vm435_vm1, %v18713_v24 }
 0x28a   : > { %14354 = vmatprep.mubr.msk.f32.mxu1 %vm17474_vm2, %v17473_v1  ;;  %14618 = vmatprep.mubr.msk.f32.mxu0 %vm17474_vm2, %v17473_v1 }
 0x28d   : > { %14355 = vmatmul.mubr.msk.f32.gmra.mrb[22].mxu1 %vm435_vm1, %v18613_v9  ;;  %14619 = vmatmul.mubr.msk.f32.gmra.mrb[26].mxu0 %vm435_vm1, %v18723_v19 }
 0x28e   : > { %14357 = vmatprep.mubr.msk.f32.mxu1 %vm17474_vm2, %v17473_v1  ;;  %14623 = vmatprep.mubr.msk.f32.mxu0 %vm17474_vm2, %v17473_v1 }
 0x291   : > { %14358 = vmatmul.mubr.msk.f32.gmra.mrb[24].mxu1 %vm435_vm1, %v18623_v26  ;;  %14624 = vmatmul.mubr.msk.f32.vlgmr.msra.gmra.mrb[10].mxu0 %vm435_vm1, %v18244_v34 }
 0x292   : > { %14362 = vmatprep.mubr.msk.f32.mxu1 %vm17474_vm2, %v17473_v1  ;;  %14626 = vmatprep.mubr.msk.f32.mxu0 %vm17474_vm2, %v17473_v1 }
 0x293   : > { %14651 = vmatpush3.msk.msra.mxu0 %vm494_vm0, %v3622_v42  ;;  %v18821_v42 = vld [vmem:[#allocation2 + $0xa1] sm:$0xff] }
 0x294   : > { %14679 = vmatprep.subr.mxu0 %v17473_v1 }
 0x295   : > { %14363 = vmatmul.mubr.msk.f32.vlgmr.msra.gmra.mrb[8].mxu1 %vm435_vm1, %v18748_v41  ;;  %14627 = vmatmul.mubr.msk.f32.gmra.mrb[12].mxu0 %vm435_vm1, %v18267_v62 }
 0x296   : > { %14390 = vmatpush3.msk.msra.mxu1 %vm494_vm0, %v2182_v32  ;;  %14365 = vmatprep.mubr.msk.f32.mxu1 %vm17474_vm2, %v17473_v1  ;;  %v18831_v32 = vld [vmem:[#allocation2 + $0x49] sm:$0xff] }
 0x297   : > { %14629 = vmatprep.mubr.msk.f32.mxu0 %vm17474_vm2, %v17473_v1  ;;  %14418 = vmatprep.subr.mxu1 %v17473_v1 }
 0x299   : > { %14366 = vmatmul.mubr.msk.f32.gmra.mrb[10].mxu1 %vm435_vm1, %v18761_v12  ;;  %14630 = vmatmul.mubr.msk.f32.gmra.mrb[14].mxu0 %vm435_vm1, %v18285_v20 }
 0x29a   : > { %14368 = vmatprep.mubr.msk.f32.mxu1 %vm17474_vm2, %v17473_v1  ;;  %14632 = vmatprep.mubr.msk.f32.mxu0 %vm17474_vm2, %v17473_v1 }
 0x29d   : > { %14369 = vmatmul.mubr.msk.f32.gmra.mrb[12].mxu1 %vm435_vm1, %v18771_v54  ;;  %14633 = vmatmul.mubr.msk.f32.gmra.mrb[16].mxu0 %vm435_vm1, %v18298_v55 }
 0x29e   : > { %14371 = vmatprep.mubr.msk.f32.mxu1 %vm17474_vm2, %v17473_v1  ;;  %14635 = vmatprep.mubr.msk.f32.mxu0 %vm17474_vm2, %v17473_v1 }
 0x2a1   : > { %14372 = vmatmul.mubr.msk.f32.gmra.mrb[14].mxu1 %vm435_vm1, %v18781_v23  ;;  %14636 = vmatmul.mubr.msk.f32.gmra.mrb[18].mxu0 %vm435_vm1, %v18308_v28 }
 0x2a2   : > { %14374 = vmatprep.mubr.msk.f32.mxu1 %vm17474_vm2, %v17473_v1  ;;  %14638 = vmatprep.mubr.msk.f32.mxu0 %vm17474_vm2, %v17473_v1 }
 0x2a5   : > { %14375 = vmatmul.mubr.msk.f32.gmra.mrb[16].mxu1 %vm435_vm1, %v18791_v4  ;;  %14639 = vmatmul.mubr.msk.f32.gmra.mrb[20].mxu0 %vm435_vm1, %v18318_v36 }
 0x2a6   : > { %14377 = vmatprep.mubr.msk.f32.mxu1 %vm17474_vm2, %v17473_v1  ;;  %14641 = vmatprep.mubr.msk.f32.mxu0 %vm17474_vm2, %v17473_v1 }
 0x2a9   : > { %14378 = vmatmul.mubr.msk.f32.gmra.mrb[18].mxu1 %vm435_vm1, %v18801_v38  ;;  %14642 = vmatmul.mubr.msk.f32.gmra.mrb[22].mxu0 %vm435_vm1, %v18328_v44 }
 0x2aa   : > { %14380 = vmatprep.mubr.msk.f32.mxu1 %vm17474_vm2, %v17473_v1  ;;  %14644 = vmatprep.mubr.msk.f32.mxu0 %vm17474_vm2, %v17473_v1 }
 0x2ad   : > { %14381 = vmatmul.mubr.msk.f32.gmra.mrb[20].mxu1 %vm435_vm1, %v18811_v11  ;;  %14645 = vmatmul.mubr.msk.f32.gmra.mrb[24].mxu0 %vm435_vm1, %v18338_v48 }
 0x2ae   : > { %14383 = vmatprep.mubr.msk.f32.mxu1 %vm17474_vm2, %v17473_v1  ;;  %14647 = vmatprep.mubr.msk.f32.mxu0 %vm17474_vm2, %v17473_v1 }
 0x2b1   : > { %14384 = vmatmul.mubr.msk.f32.gmra.mrb[22].mxu1 %vm435_vm1, %v18072_v0  ;;  %14648 = vmatmul.mubr.msk.f32.gmra.mrb[26].mxu0 %vm435_vm1, %v18821_v42  ;;  %v2341_v0 = vld [vmem:[%s21452_s4 + $0x20] sm:$0xf] }
 0x2b2   : > { %14386 = vmatprep.mubr.msk.f32.mxu1 %vm17474_vm2, %v17473_v1  ;;  %14652 = vmatprep.mubr.msk.f32.mxu0 %vm17474_vm2, %v17473_v1 }
 0x2b5   : > { %14387 = vmatmul.mubr.msk.f32.gmra.mrb[24].mxu1 %vm435_vm1, %v18831_v32  ;;  %14653 = vmatmul.mubr.msk.f32.vlgmr.msra.gmra.mrb[10].mxu0 %vm435_vm1, %v18833_v46 }
 0x2b6   : > { %14391 = vmatprep.mubr.msk.f32.mxu1 %vm17474_vm2, %v17473_v1  ;;  %14655 = vmatprep.mubr.msk.f32.mxu0 %vm17474_vm2, %v17473_v1 }
 0x2b7   : > { %14680 = vmatpush3.msk.msra.mxu0 %vm494_vm0, %v3781_v63  ;;  %v18863_v63 = vld [vmem:[#allocation2 + $0x1a] sm:$0xff] }
 0x2b8   : > { %14969 = vmatprep.subr.mxu0 %v17473_v1 }
 0x2b9   : > { %14392 = vmatmul.mubr.msk.f32.vlgmr.msra.gmra.mrb[8].mxu1 %vm435_vm1, %v18244_v34  ;;  %14656 = vmatmul.mubr.msk.f32.gmra.mrb[12].mxu0 %vm435_vm1, %v18850_v6  ;;  %v18873_v34 = vld [vmem:[#allocation2 + $0x22] sm:$0xff] }
 0x2ba   : > { %14419 = vmatpush3.msk.msra.mxu1 %vm494_vm0, %v2341_v0  ;;  %14394 = vmatprep.mubr.msk.f32.mxu1 %vm17474_vm2, %v17473_v1  ;;  %v5417_v0 = vld [vmem:[%s21452_s4 + $0x4] sm:$0xf] }
 0x2bb   : > { %14658 = vmatprep.mubr.msk.f32.mxu0 %vm17474_vm2, %v17473_v1  ;;  %14708 = vmatprep.subr.mxu1 %v17473_v1 }
 0x2bd   : > { %14395 = vmatmul.mubr.msk.f32.gmra.mrb[10].mxu1 %vm435_vm1, %v18267_v62  ;;  %14659 = vmatmul.mubr.msk.f32.gmra.mrb[14].mxu0 %vm435_vm1, %v18863_v63  ;;  %v18883_v62 = vld [vmem:[#allocation2 + $0x2a] sm:$0xff] }
 0x2be   : > { %14397 = vmatprep.mubr.msk.f32.mxu1 %vm17474_vm2, %v17473_v1  ;;  %14661 = vmatprep.mubr.msk.f32.mxu0 %vm17474_vm2, %v17473_v1 }
 0x2c1   : > { %14398 = vmatmul.mubr.msk.f32.gmra.mrb[12].mxu1 %vm435_vm1, %v18285_v20  ;;  %14662 = vmatmul.mubr.msk.f32.gmra.mrb[16].mxu0 %vm435_vm1, %v18873_v34  ;;  %v18893_v20 = vld [vmem:[#allocation2 + $0x32] sm:$0xff] }
 0x2c2   : > { %14400 = vmatprep.mubr.msk.f32.mxu1 %vm17474_vm2, %v17473_v1  ;;  %14664 = vmatprep.mubr.msk.f32.mxu0 %vm17474_vm2, %v17473_v1 }
 0x2c5   : > { %14401 = vmatmul.mubr.msk.f32.gmra.mrb[14].mxu1 %vm435_vm1, %v18298_v55  ;;  %14665 = vmatmul.mubr.msk.f32.gmra.mrb[18].mxu0 %vm435_vm1, %v18883_v62  ;;  %v18903_v55 = vld [vmem:[#allocation2 + $0x3a] sm:$0xff] }
 0x2c6   : > { %14403 = vmatprep.mubr.msk.f32.mxu1 %vm17474_vm2, %v17473_v1  ;;  %14667 = vmatprep.mubr.msk.f32.mxu0 %vm17474_vm2, %v17473_v1 }
 0x2c9   : > { %14404 = vmatmul.mubr.msk.f32.gmra.mrb[16].mxu1 %vm435_vm1, %v18308_v28  ;;  %14668 = vmatmul.mubr.msk.f32.gmra.mrb[20].mxu0 %vm435_vm1, %v18893_v20  ;;  %v18913_v28 = vld [vmem:[#allocation2 + $0x42] sm:$0xff] }
 0x2ca   : > { %14406 = vmatprep.mubr.msk.f32.mxu1 %vm17474_vm2, %v17473_v1  ;;  %14670 = vmatprep.mubr.msk.f32.mxu0 %vm17474_vm2, %v17473_v1 }
 0x2cd   : > { %14407 = vmatmul.mubr.msk.f32.gmra.mrb[18].mxu1 %vm435_vm1, %v18318_v36  ;;  %14671 = vmatmul.mubr.msk.f32.gmra.mrb[22].mxu0 %vm435_vm1, %v18903_v55  ;;  %v18923_v36 = vld [vmem:[#allocation2 + $0x4a] sm:$0xff] }
 0x2ce   : > { %14409 = vmatprep.mubr.msk.f32.mxu1 %vm17474_vm2, %v17473_v1  ;;  %14673 = vmatprep.mubr.msk.f32.mxu0 %vm17474_vm2, %v17473_v1 }
 0x2d1   : > { %14410 = vmatmul.mubr.msk.f32.gmra.mrb[20].mxu1 %vm435_vm1, %v18328_v44  ;;  %14674 = vmatmul.mubr.msk.f32.gmra.mrb[24].mxu0 %vm435_vm1, %v18913_v28  ;;  %v18933_v44 = vld [vmem:[#allocation2 + $0x62] sm:$0xff] }
 0x2d2   : > { %14412 = vmatprep.mubr.msk.f32.mxu1 %vm17474_vm2, %v17473_v1  ;;  %14676 = vmatprep.mubr.msk.f32.mxu0 %vm17474_vm2, %v17473_v1 }
 0x2d5   : > { %14413 = vmatmul.mubr.msk.f32.gmra.mrb[22].mxu1 %vm435_vm1, %v18338_v48  ;;  %14677 = vmatmul.mubr.msk.f32.gmra.mrb[26].mxu0 %vm435_vm1, %v18923_v36  ;;  %v3977_v48 = vld [vmem:[%s21452_s4 + $0x4] sm:$0xf] }
 0x2d6   : > { %14415 = vmatprep.mubr.msk.f32.mxu1 %vm17474_vm2, %v17473_v1  ;;  %14681 = vmatprep.mubr.msk.f32.mxu0 %vm17474_vm2, %v17473_v1 }
 0x2d9   : > { %14416 = vmatmul.mubr.msk.f32.gmra.mrb[24].mxu1 %vm435_vm1, %v18821_v42  ;;  %14682 = vmatmul.mubr.msk.f32.vlgmr.msra.gmra.mrb[10].mxu0 %vm435_vm1, %v18933_v44 }
 0x2da   : > { %14420 = vmatprep.mubr.msk.f32.mxu1 %vm17474_vm2, %v17473_v1  ;;  %14684 = vmatprep.mubr.msk.f32.mxu0 %vm17474_vm2, %v17473_v1 }
 0x2db   : > { %14970 = vmatpush3.msk.msra.mxu0 %vm494_vm0, %v5417_v0  ;;  %v18963_v0 = vld [vmem:[#allocation2 + $0x72] sm:$0xff] }
 0x2dc   : > { %14998 = vmatprep.subr.mxu0 %v17473_v1 }
 0x2dd   : > { %14421 = vmatmul.mubr.msk.f32.vlgmr.msra.gmra.mrb[8].mxu1 %vm435_vm1, %v18833_v46  ;;  %14685 = vmatmul.mubr.msk.f32.gmra.mrb[12].mxu0 %vm435_vm1, %v18950_v14 }
 0x2de   : > { %14709 = vmatpush3.msk.msra.mxu1 %vm494_vm0, %v3977_v48  ;;  %14423 = vmatprep.mubr.msk.f32.mxu1 %vm17474_vm2, %v17473_v1  ;;  %v18973_v48 = vld [vmem:[#allocation2 + $0x7a] sm:$0xff] }
 0x2df   : > { %14687 = vmatprep.mubr.msk.f32.mxu0 %vm17474_vm2, %v17473_v1  ;;  %14737 = vmatprep.subr.mxu1 %v17473_v1  ;;  %21508 = vst [vmem:[#allocation9_spill] sm:$0xff] %v18973_v48 }
 0x2e1   : > { %14424 = vmatmul.mubr.msk.f32.gmra.mrb[10].mxu1 %vm435_vm1, %v18850_v6  ;;  %14688 = vmatmul.mubr.msk.f32.gmra.mrb[14].mxu0 %vm435_vm1, %v18963_v0 }
 0x2e2   : > { %14426 = vmatprep.mubr.msk.f32.mxu1 %vm17474_vm2, %v17473_v1  ;;  %14690 = vmatprep.mubr.msk.f32.mxu0 %vm17474_vm2, %v17473_v1 }
 0x2e5   : > { %14427 = vmatmul.mubr.msk.f32.gmra.mrb[12].mxu1 %vm435_vm1, %v18863_v63  ;;  %14691 = vmatmul.mubr.msk.f32.gmra.mrb[16].mxu0 %vm435_vm1, %v18973_v48  ;;  %v18993_v48 = vld [vmem:[#allocation2 + $0x8a] sm:$0xff] }
 0x2e6   : > { %14429 = vmatprep.mubr.msk.f32.mxu1 %vm17474_vm2, %v17473_v1  ;;  %14693 = vmatprep.mubr.msk.f32.mxu0 %vm17474_vm2, %v17473_v1  ;;  %21510 = vst [vmem:[#allocation11_spill] sm:$0xff] %v18993_v48 }
 0x2e9   : > { %14430 = vmatmul.mubr.msk.f32.gmra.mrb[14].mxu1 %vm435_vm1, %v18873_v34  ;;  %14694 = vmatmul.mubr.msk.f32.gmra.mrb[18].mxu0 %vm435_vm1, %v18983_v45  ;;  %v19003_v45 = vld [vmem:[#allocation2 + $0x92] sm:$0xff] }
 0x2ea   : > { %14432 = vmatprep.mubr.msk.f32.mxu1 %vm17474_vm2, %v17473_v1  ;;  %14696 = vmatprep.mubr.msk.f32.mxu0 %vm17474_vm2, %v17473_v1  ;;  %21511 = vst [vmem:[#allocation12_spill] sm:$0xff] %v19003_v45 }
 0x2ed   : > { %14433 = vmatmul.mubr.msk.f32.gmra.mrb[16].mxu1 %vm435_vm1, %v18883_v62  ;;  %14697 = vmatmul.mubr.msk.f32.gmra.mrb[20].mxu0 %vm435_vm1, %v18993_v48  ;;  %v19013_v48 = vld [vmem:[#allocation2 + $0x9a] sm:$0xff] }
 0x2ee   : > { %14435 = vmatprep.mubr.msk.f32.mxu1 %vm17474_vm2, %v17473_v1  ;;  %14699 = vmatprep.mubr.msk.f32.mxu0 %vm17474_vm2, %v17473_v1  ;;  %21512 = vst [vmem:[#allocation13_spill] sm:$0xff] %v19013_v48 }
 0x2f1   : > { %14436 = vmatmul.mubr.msk.f32.gmra.mrb[18].mxu1 %vm435_vm1, %v18893_v20  ;;  %14700 = vmatmul.mubr.msk.f32.gmra.mrb[22].mxu0 %vm435_vm1, %v19003_v45  ;;  %v19023_v45 = vld [vmem:[#allocation2 + $0xa2] sm:$0xff] }
 0x2f2   : > { %14438 = vmatprep.mubr.msk.f32.mxu1 %vm17474_vm2, %v17473_v1  ;;  %14702 = vmatprep.mubr.msk.f32.mxu0 %vm17474_vm2, %v17473_v1  ;;  %21513 = vst [vmem:[#allocation14_spill] sm:$0xff] %v19023_v45 }
 0x2f5   : > { %14439 = vmatmul.mubr.msk.f32.gmra.mrb[20].mxu1 %vm435_vm1, %v18903_v55  ;;  %14703 = vmatmul.mubr.msk.f32.gmra.mrb[24].mxu0 %vm435_vm1, %v19013_v48  ;;  %v5407_v48 = vld [vmem:[%s21452_s4] sm:$0xf] }
 0x2f6   : > { %14441 = vmatprep.mubr.msk.f32.mxu1 %vm17474_vm2, %v17473_v1  ;;  %14705 = vmatprep.mubr.msk.f32.mxu0 %vm17474_vm2, %v17473_v1 }
 0x2f9   : > { %14442 = vmatmul.mubr.msk.f32.gmra.mrb[22].mxu1 %vm435_vm1, %v18913_v28  ;;  %14706 = vmatmul.mubr.msk.f32.gmra.mrb[26].mxu0 %vm435_vm1, %v19023_v45  ;;  %v3967_v45 = vld [vmem:[%s21452_s4] sm:$0xf] }
 0x2fa   : > { %14444 = vmatprep.mubr.msk.f32.mxu1 %vm17474_vm2, %v17473_v1  ;;  %14971 = vmatprep.mubr.msk.f32.mxu0 %vm17474_vm2, %v17473_v1 }
 0x2fd   : > { %14445 = vmatmul.mubr.msk.f32.gmra.mrb[24].mxu1 %vm435_vm1, %v18923_v36  ;;  %14972 = vmatmul.mubr.msk.f32.vlgmr.msra.gmra.mrb[28].mxu0 %vm435_vm1, %v18532_v57 }
 0x2fe   : > { %14710 = vmatprep.mubr.msk.f32.mxu1 %vm17474_vm2, %v17473_v1  ;;  %14974 = vmatprep.mubr.msk.f32.mxu0 %vm17474_vm2, %v17473_v1 }
 0x2ff   : > { %14999 = vmatpush3.msk.msra.mxu0 %vm494_vm0, %v5407_v48  ;;  %v4267_v48 = vld [vmem:[%s21452_s4 + $0x8] sm:$0xf] }
 0x300   : > { %15027 = vmatprep.subr.mxu0 %v17473_v1 }
 0x301   : > { %14711 = vmatmul.mubr.msk.f32.vlgmr.msra.gmra.mrb[26].mxu1 %vm435_vm1, %v18347_v37  ;;  %14975 = vmatmul.mubr.msk.f32.gmra.mrb[30].mxu0 %vm435_vm1, %v18550_v31 }
 0x302   : > { %14738 = vmatpush3.msk.msra.mxu1 %vm494_vm0, %v3967_v45  ;;  %14713 = vmatprep.mubr.msk.f32.mxu1 %vm17474_vm2, %v17473_v1  ;;  %v5707_v45 = vld [vmem:[%s21452_s4 + $0x8] sm:$0xf] }
 0x303   : > { %14977 = vmatprep.mubr.msk.f32.mxu0 %vm17474_vm2, %v17473_v1  ;;  %14766 = vmatprep.subr.mxu1 %v17473_v1 }
 0x305   : > { %14714 = vmatmul.mubr.msk.f32.gmra.mrb[28].mxu1 %vm435_vm1, %v18392_v15  ;;  %14978 = vmatmul.mubr.msk.f32.gmra.mrb[32].mxu0 %vm435_vm1, %v18563_v5 }
 0x306   : > { %14716 = vmatprep.mubr.msk.f32.mxu1 %vm17474_vm2, %v17473_v1  ;;  %14980 = vmatprep.mubr.msk.f32.mxu0 %vm17474_vm2, %v17473_v1 }
 0x309   : > { %14717 = vmatmul.mubr.msk.f32.gmra.mrb[30].mxu1 %vm435_vm1, %v18407_v18  ;;  %14981 = vmatmul.mubr.msk.f32.gmra.mrb[34].mxu0 %vm435_vm1, %v18573_v27 }
 0x30a   : > { %14719 = vmatprep.mubr.msk.f32.mxu1 %vm17474_vm2, %v17473_v1  ;;  %14983 = vmatprep.mubr.msk.f32.mxu0 %vm17474_vm2, %v17473_v1 }
 0x30d   : > { %14720 = vmatmul.mubr.msk.f32.gmra.mrb[32].mxu1 %vm435_vm1, %v18434_v49  ;;  %14984 = vmatmul.mubr.msk.f32.gmra.mrb[36].mxu0 %vm435_vm1, %v18583_v58 }
 0x30e   : > { %14722 = vmatprep.mubr.msk.f32.mxu1 %vm17474_vm2, %v17473_v1  ;;  %14986 = vmatprep.mubr.msk.f32.mxu0 %vm17474_vm2, %v17473_v1 }
 0x311   : > { %14723 = vmatmul.mubr.msk.f32.gmra.mrb[34].mxu1 %vm435_vm1, %v18447_v3  ;;  %14987 = vmatmul.mubr.msk.f32.gmra.mrb[38].mxu0 %vm435_vm1, %v18593_v35 }
 0x312   : > { %14725 = vmatprep.mubr.msk.f32.mxu1 %vm17474_vm2, %v17473_v1  ;;  %14989 = vmatprep.mubr.msk.f32.mxu0 %vm17474_vm2, %v17473_v1 }
 0x315   : > { %14726 = vmatmul.mubr.msk.f32.gmra.mrb[36].mxu1 %vm435_vm1, %v18460_v13  ;;  %14990 = vmatmul.mubr.msk.f32.gmra.mrb[40].mxu0 %vm435_vm1, %v18603_v7 }
 0x316   : > { %14728 = vmatprep.mubr.msk.f32.mxu1 %vm17474_vm2, %v17473_v1  ;;  %14992 = vmatprep.mubr.msk.f32.mxu0 %vm17474_vm2, %v17473_v1 }
 0x319   : > { %14729 = vmatmul.mubr.msk.f32.gmra.mrb[38].mxu1 %vm435_vm1, %v18472_v10  ;;  %14993 = vmatmul.mubr.msk.f32.gmra.mrb[42].mxu0 %vm435_vm1, %v18613_v9 }
 0x31a   : > { %14731 = vmatprep.mubr.msk.f32.mxu1 %vm17474_vm2, %v17473_v1  ;;  %14995 = vmatprep.mubr.msk.f32.mxu0 %vm17474_vm2, %v17473_v1 }
 0x31d   : > { %14732 = vmatmul.mubr.msk.f32.gmra.mrb[40].mxu1 %vm435_vm1, %v18504_v30  ;;  %14996 = vmatmul.mubr.msk.f32.gmra.mrb[44].mxu0 %vm435_vm1, %v18623_v26 }
 0x31e   : > { %14734 = vmatprep.mubr.msk.f32.mxu1 %vm17474_vm2, %v17473_v1  ;;  %15000 = vmatprep.mubr.msk.f32.mxu0 %vm17474_vm2, %v17473_v1 }
 0x321   : > { %14735 = vmatmul.mubr.msk.f32.gmra.mrb[42].mxu1 %vm435_vm1, %v18518_v53  ;;  %15001 = vmatmul.mubr.msk.f32.vlgmr.msra.gmra.mrb[28].mxu0 %vm435_vm1, %v18347_v37  ;;  %v5866_v37 = vld [vmem:[%s21452_s4 + $0xc] sm:$0xf] }
 0x322   : > { %14739 = vmatprep.mubr.msk.f32.mxu1 %vm17474_vm2, %v17473_v1  ;;  %15003 = vmatprep.mubr.msk.f32.mxu0 %vm17474_vm2, %v17473_v1 }
 0x323   : > { %15028 = vmatpush3.msk.msra.mxu0 %vm494_vm0, %v5707_v45 }
 0x324   : > { %15056 = vmatprep.subr.mxu0 %v17473_v1 }
 0x325   : > { %14740 = vmatmul.mubr.msk.f32.vlgmr.msra.gmra.mrb[26].mxu1 %vm435_vm1, %v18378_v8  ;;  %15004 = vmatmul.mubr.msk.f32.gmra.mrb[30].mxu0 %vm435_vm1, %v18392_v15  ;;  %v4426_v8 = vld [vmem:[%s21452_s4 + $0xc] sm:$0xf]  ;;  %v5857_v15 = vld [vmem:[#allocation2 + $0x61] sm:$0xff] }
 0x326   : > { %14767 = vmatpush3.msk.msra.mxu1 %vm494_vm0, %v4267_v48  ;;  %14742 = vmatprep.mubr.msk.f32.mxu1 %vm17474_vm2, %v17473_v1 }
 0x327   : > { %15006 = vmatprep.mubr.msk.f32.mxu0 %vm17474_vm2, %v17473_v1  ;;  %14795 = vmatprep.subr.mxu1 %v17473_v1 }
 0x329   : > { %14743 = vmatmul.mubr.msk.f32.gmra.mrb[28].mxu1 %vm435_vm1, %v18405_v33  ;;  %15007 = vmatmul.mubr.msk.f32.gmra.mrb[32].mxu0 %vm435_vm1, %v18407_v18  ;;  %v6025_v33 = vld [vmem:[%s21452_s4 + $0x10] sm:$0xf] }
 0x32a   : > { %14745 = vmatprep.mubr.msk.f32.mxu1 %vm17474_vm2, %v17473_v1  ;;  %15009 = vmatprep.mubr.msk.f32.mxu0 %vm17474_vm2, %v17473_v1  ;;  %v4585_v18 = vld [vmem:[%s21452_s4 + $0x10] sm:$0xf] }
 0x32d   : > { %14746 = vmatmul.mubr.msk.f32.gmra.mrb[30].mxu1 %vm435_vm1, %v18422_v29  ;;  %15010 = vmatmul.mubr.msk.f32.gmra.mrb[34].mxu0 %vm435_vm1, %v18434_v49  ;;  %v5858_v29 = vld [vmem:[#allocation2 + $0x69] sm:$0xff]  ;;  %v5859_v49 = vld [vmem:[#allocation2 + $0x71] sm:$0xff] }
 0x32e   : > { %14748 = vmatprep.mubr.msk.f32.mxu1 %vm17474_vm2, %v17473_v1  ;;  %15012 = vmatprep.mubr.msk.f32.mxu0 %vm17474_vm2, %v17473_v1 }
 0x331   : > { %14749 = vmatmul.mubr.msk.f32.gmra.mrb[32].mxu1 %vm435_vm1, %v18445_v59  ;;  %15013 = vmatmul.mubr.msk.f32.gmra.mrb[36].mxu0 %vm435_vm1, %v18447_v3  ;;  %v5860_v59 = vld [vmem:[#allocation2 + $0x79] sm:$0xff]  ;;  %v5861_v3 = vld [vmem:[#allocation2 + $0x81] sm:$0xff] }
 0x332   : > { %14751 = vmatprep.mubr.msk.f32.mxu1 %vm17474_vm2, %v17473_v1  ;;  %15015 = vmatprep.mubr.msk.f32.mxu0 %vm17474_vm2, %v17473_v1 }
 0x335   : > { %14752 = vmatmul.mubr.msk.f32.gmra.mrb[34].mxu1 %vm435_vm1, %v18485_v39  ;;  %15016 = vmatmul.mubr.msk.f32.gmra.mrb[38].mxu0 %vm435_vm1, %v18460_v13  ;;  %v5862_v13 = vld [vmem:[#allocation2 + $0x89] sm:$0xff]  ;;  %v5864_v39 = vld [vmem:[#allocation2 + $0x99] sm:$0xff] }
 0x336   : > { %14754 = vmatprep.mubr.msk.f32.mxu1 %vm17474_vm2, %v17473_v1  ;;  %15018 = vmatprep.mubr.msk.f32.mxu0 %vm17474_vm2, %v17473_v1 }
 0x339   : > { %14755 = vmatmul.mubr.msk.f32.gmra.mrb[36].mxu1 %vm435_vm1, %v18494_v17  ;;  %15019 = vmatmul.mubr.msk.f32.gmra.mrb[40].mxu0 %vm435_vm1, %v18472_v10  ;;  %v5863_v10 = vld [vmem:[#allocation2 + $0x91] sm:$0xff]  ;;  %v4424_v17 = vld [vmem:[#allocation2 + $0x41] sm:$0xff] }
 0x33a   : > { %14757 = vmatprep.mubr.msk.f32.mxu1 %vm17474_vm2, %v17473_v1  ;;  %15021 = vmatprep.mubr.msk.f32.mxu0 %vm17474_vm2, %v17473_v1 }
 0x33d   : > { %14758 = vmatmul.mubr.msk.f32.gmra.mrb[38].mxu1 %vm435_vm1, %v18502_v22  ;;  %15022 = vmatmul.mubr.msk.f32.gmra.mrb[42].mxu0 %vm435_vm1, %v18504_v30  ;;  %v6184_v22 = vld [vmem:[%s21452_s4 + $0x14] sm:$0xf] }
 0x33e   : > { %14760 = vmatprep.mubr.msk.f32.mxu1 %vm17474_vm2, %v17473_v1  ;;  %15024 = vmatprep.mubr.msk.f32.mxu0 %vm17474_vm2, %v17473_v1  ;;  %v4744_v30 = vld [vmem:[%s21452_s4 + $0x14] sm:$0xf] }
 0x341   : > { %14761 = vmatmul.mubr.msk.f32.gmra.mrb[40].mxu1 %vm435_vm1, %v18516_v60  ;;  %15025 = vmatmul.mubr.msk.f32.gmra.mrb[44].mxu0 %vm435_vm1, %v18518_v53 }
 0x342   : > { %14763 = vmatprep.mubr.msk.f32.mxu1 %vm17474_vm2, %v17473_v1  ;;  %15029 = vmatprep.mubr.msk.f32.mxu0 %vm17474_vm2, %v17473_v1 }
 0x345   : > { %14764 = vmatmul.mubr.msk.f32.gmra.mrb[42].mxu1 %vm435_vm1, %v18530_v56  ;;  %15030 = vmatmul.mubr.msk.f32.vlgmr.msra.gmra.mrb[28].mxu0 %vm435_vm1, %v18633_v43 }
 0x346   : > { %14768 = vmatprep.mubr.msk.f32.mxu1 %vm17474_vm2, %v17473_v1  ;;  %15032 = vmatprep.mubr.msk.f32.mxu0 %vm17474_vm2, %v17473_v1 }
 0x347   : > { %15057 = vmatpush3.msk.msra.mxu0 %vm494_vm0, %v5866_v37 }
 0x348   : > { %15085 = vmatprep.subr.mxu0 %v17473_v1 }
 0x349   : > { %14769 = vmatmul.mubr.msk.f32.vlgmr.msra.gmra.mrb[26].mxu1 %vm435_vm1, %v18532_v57  ;;  %15033 = vmatmul.mubr.msk.f32.gmra.mrb[30].mxu0 %vm435_vm1, %v18650_v2  ;;  %v4903_v2 = vld [vmem:[%s21452_s4 + $0x18] sm:$0xf] }
 0x34a   : > { %14796 = vmatpush3.msk.msra.mxu1 %vm494_vm0, %v4426_v8  ;;  %14771 = vmatprep.mubr.msk.f32.mxu1 %vm17474_vm2, %v17473_v1 }
 0x34b   : > { %15035 = vmatprep.mubr.msk.f32.mxu0 %vm17474_vm2, %v17473_v1  ;;  %14824 = vmatprep.subr.mxu1 %v17473_v1 }
 0x34d   : > { %14772 = vmatmul.mubr.msk.f32.gmra.mrb[28].mxu1 %vm435_vm1, %v18550_v31  ;;  %15036 = vmatmul.mubr.msk.f32.gmra.mrb[32].mxu0 %vm435_vm1, %v18663_v50 }
 0x34e   : > { %14774 = vmatprep.mubr.msk.f32.mxu1 %vm17474_vm2, %v17473_v1  ;;  %15038 = vmatprep.mubr.msk.f32.mxu0 %vm17474_vm2, %v17473_v1 }
 0x351   : > { %14775 = vmatmul.mubr.msk.f32.gmra.mrb[30].mxu1 %vm435_vm1, %v18563_v5  ;;  %15039 = vmatmul.mubr.msk.f32.gmra.mrb[34].mxu0 %vm435_vm1, %v18673_v52 }
 0x352   : > { %14777 = vmatprep.mubr.msk.f32.mxu1 %vm17474_vm2, %v17473_v1  ;;  %15041 = vmatprep.mubr.msk.f32.mxu0 %vm17474_vm2, %v17473_v1 }
 0x355   : > { %14778 = vmatmul.mubr.msk.f32.gmra.mrb[32].mxu1 %vm435_vm1, %v18573_v27  ;;  %15042 = vmatmul.mubr.msk.f32.gmra.mrb[36].mxu0 %vm435_vm1, %v18683_v51  ;;  %v6343_v27 = vld [vmem:[%s21452_s4 + $0x18] sm:$0xf] }
 0x356   : > { %14780 = vmatprep.mubr.msk.f32.mxu1 %vm17474_vm2, %v17473_v1  ;;  %15044 = vmatprep.mubr.msk.f32.mxu0 %vm17474_vm2, %v17473_v1 }
 0x359   : > { %14781 = vmatmul.mubr.msk.f32.gmra.mrb[34].mxu1 %vm435_vm1, %v18583_v58  ;;  %15045 = vmatmul.mubr.msk.f32.gmra.mrb[38].mxu0 %vm435_vm1, %v18693_v47 }
 0x35a   : > { %14783 = vmatprep.mubr.msk.f32.mxu1 %vm17474_vm2, %v17473_v1  ;;  %15047 = vmatprep.mubr.msk.f32.mxu0 %vm17474_vm2, %v17473_v1 }
 0x35d   : > { %14784 = vmatmul.mubr.msk.f32.gmra.mrb[36].mxu1 %vm435_vm1, %v18593_v35  ;;  %15048 = vmatmul.mubr.msk.f32.gmra.mrb[40].mxu0 %vm435_vm1, %v18703_v21 }
 0x35e   : > { %14786 = vmatprep.mubr.msk.f32.mxu1 %vm17474_vm2, %v17473_v1  ;;  %15050 = vmatprep.mubr.msk.f32.mxu0 %vm17474_vm2, %v17473_v1 }
 0x361   : > { %14787 = vmatmul.mubr.msk.f32.gmra.mrb[38].mxu1 %vm435_vm1, %v18603_v7  ;;  %15051 = vmatmul.mubr.msk.f32.gmra.mrb[42].mxu0 %vm435_vm1, %v18713_v24 }
 0x362   : > { %14789 = vmatprep.mubr.msk.f32.mxu1 %vm17474_vm2, %v17473_v1  ;;  %15053 = vmatprep.mubr.msk.f32.mxu0 %vm17474_vm2, %v17473_v1 }
 0x365   : > { %14790 = vmatmul.mubr.msk.f32.gmra.mrb[40].mxu1 %vm435_vm1, %v18613_v9  ;;  %15054 = vmatmul.mubr.msk.f32.gmra.mrb[44].mxu0 %vm435_vm1, %v18723_v19 }
 0x366   : > { %14792 = vmatprep.mubr.msk.f32.mxu1 %vm17474_vm2, %v17473_v1  ;;  %15058 = vmatprep.mubr.msk.f32.mxu0 %vm17474_vm2, %v17473_v1 }
 0x369   : > { %14793 = vmatmul.mubr.msk.f32.gmra.mrb[42].mxu1 %vm435_vm1, %v18623_v26  ;;  %15059 = vmatmul.mubr.msk.f32.vlgmr.msra.gmra.mrb[28].mxu0 %vm435_vm1, %v5857_v15 }
 0x36a   : > { %14797 = vmatprep.mubr.msk.f32.mxu1 %vm17474_vm2, %v17473_v1  ;;  %15061 = vmatprep.mubr.msk.f32.mxu0 %vm17474_vm2, %v17473_v1 }
 0x36b   : > { %15086 = vmatpush3.msk.msra.mxu0 %vm494_vm0, %v6025_v33 }
 0x36c   : > { %15114 = vmatprep.subr.mxu0 %v17473_v1 }
 0x36d   : > { %14798 = vmatmul.mubr.msk.f32.vlgmr.msra.gmra.mrb[26].mxu1 %vm435_vm1, %v18748_v41  ;;  %15062 = vmatmul.mubr.msk.f32.gmra.mrb[30].mxu0 %vm435_vm1, %v5858_v29 }
 0x36e   : > { %14825 = vmatpush3.msk.msra.mxu1 %vm494_vm0, %v4585_v18  ;;  %14800 = vmatprep.mubr.msk.f32.mxu1 %vm17474_vm2, %v17473_v1 }
 0x36f   : > { %15064 = vmatprep.mubr.msk.f32.mxu0 %vm17474_vm2, %v17473_v1  ;;  %14853 = vmatprep.subr.mxu1 %v17473_v1 }
 0x371   : > { %14801 = vmatmul.mubr.msk.f32.gmra.mrb[28].mxu1 %vm435_vm1, %v18761_v12  ;;  %15065 = vmatmul.mubr.msk.f32.gmra.mrb[32].mxu0 %vm435_vm1, %v5859_v49 }
 0x372   : > { %14803 = vmatprep.mubr.msk.f32.mxu1 %vm17474_vm2, %v17473_v1  ;;  %15067 = vmatprep.mubr.msk.f32.mxu0 %vm17474_vm2, %v17473_v1 }
 0x375   : > { %14804 = vmatmul.mubr.msk.f32.gmra.mrb[30].mxu1 %vm435_vm1, %v18771_v54  ;;  %15068 = vmatmul.mubr.msk.f32.gmra.mrb[34].mxu0 %vm435_vm1, %v5860_v59 }
 0x376   : > { %14806 = vmatprep.mubr.msk.f32.mxu1 %vm17474_vm2, %v17473_v1  ;;  %15070 = vmatprep.mubr.msk.f32.mxu0 %vm17474_vm2, %v17473_v1 }
 0x379   : > { %14807 = vmatmul.mubr.msk.f32.gmra.mrb[32].mxu1 %vm435_vm1, %v18781_v23  ;;  %15071 = vmatmul.mubr.msk.f32.gmra.mrb[36].mxu0 %vm435_vm1, %v5861_v3 }
 0x37a   : > { %14809 = vmatprep.mubr.msk.f32.mxu1 %vm17474_vm2, %v17473_v1  ;;  %15073 = vmatprep.mubr.msk.f32.mxu0 %vm17474_vm2, %v17473_v1 }
 0x37d   : > { %14810 = vmatmul.mubr.msk.f32.gmra.mrb[34].mxu1 %vm435_vm1, %v18791_v4  ;;  %15074 = vmatmul.mubr.msk.f32.gmra.mrb[38].mxu0 %vm435_vm1, %v5862_v13 }
 0x37e   : > { %14812 = vmatprep.mubr.msk.f32.mxu1 %vm17474_vm2, %v17473_v1  ;;  %15076 = vmatprep.mubr.msk.f32.mxu0 %vm17474_vm2, %v17473_v1 }
 0x381   : > { %14813 = vmatmul.mubr.msk.f32.gmra.mrb[36].mxu1 %vm435_vm1, %v18801_v38  ;;  %15077 = vmatmul.mubr.msk.f32.gmra.mrb[40].mxu0 %vm435_vm1, %v5863_v10 }
 0x382   : > { %14815 = vmatprep.mubr.msk.f32.mxu1 %vm17474_vm2, %v17473_v1  ;;  %15079 = vmatprep.mubr.msk.f32.mxu0 %vm17474_vm2, %v17473_v1 }
 0x385   : > { %14816 = vmatmul.mubr.msk.f32.gmra.mrb[38].mxu1 %vm435_vm1, %v18811_v11  ;;  %15080 = vmatmul.mubr.msk.f32.gmra.mrb[42].mxu0 %vm435_vm1, %v5864_v39 }
 0x386   : > { %14818 = vmatprep.mubr.msk.f32.mxu1 %vm17474_vm2, %v17473_v1  ;;  %15082 = vmatprep.mubr.msk.f32.mxu0 %vm17474_vm2, %v17473_v1 }
 0x389   : > { %14819 = vmatmul.mubr.msk.f32.gmra.mrb[40].mxu1 %vm435_vm1, %v4424_v17  ;;  %15083 = vmatmul.mubr.msk.f32.gmra.mrb[44].mxu0 %vm435_vm1, %v18821_v42 }
 0x38a   : > { %14821 = vmatprep.mubr.msk.f32.mxu1 %vm17474_vm2, %v17473_v1  ;;  %15087 = vmatprep.mubr.msk.f32.mxu0 %vm17474_vm2, %v17473_v1 }
 0x38d   : > { %14822 = vmatmul.mubr.msk.f32.gmra.mrb[42].mxu1 %vm435_vm1, %v18831_v32  ;;  %15088 = vmatmul.mubr.msk.f32.vlgmr.msra.gmra.mrb[28].mxu0 %vm435_vm1, %v18833_v46 }
 0x38e   : > { %14826 = vmatprep.mubr.msk.f32.mxu1 %vm17474_vm2, %v17473_v1  ;;  %15090 = vmatprep.mubr.msk.f32.mxu0 %vm17474_vm2, %v17473_v1 }
 0x38f   : > { %15115 = vmatpush3.msk.msra.mxu0 %vm494_vm0, %v6184_v22 }
 0x390   : > { %15143 = vmatprep.subr.mxu0 %v17473_v1 }
 0x391   : > { %14827 = vmatmul.mubr.msk.f32.vlgmr.msra.gmra.mrb[26].mxu1 %vm435_vm1, %v5857_v15  ;;  %15091 = vmatmul.mubr.msk.f32.gmra.mrb[30].mxu0 %vm435_vm1, %v18850_v6 }
 0x392   : > { %14854 = vmatpush3.msk.msra.mxu1 %vm494_vm0, %v4744_v30  ;;  %14829 = vmatprep.mubr.msk.f32.mxu1 %vm17474_vm2, %v17473_v1 }
 0x393   : > { %15093 = vmatprep.mubr.msk.f32.mxu0 %vm17474_vm2, %v17473_v1  ;;  %14882 = vmatprep.subr.mxu1 %v17473_v1 }
 0x395   : > { %14830 = vmatmul.mubr.msk.f32.gmra.mrb[28].mxu1 %vm435_vm1, %v5858_v29  ;;  %15094 = vmatmul.mubr.msk.f32.gmra.mrb[32].mxu0 %vm435_vm1, %v18863_v63 }
 0x396   : > { %14832 = vmatprep.mubr.msk.f32.mxu1 %vm17474_vm2, %v17473_v1  ;;  %15096 = vmatprep.mubr.msk.f32.mxu0 %vm17474_vm2, %v17473_v1 }
 0x399   : > { %14833 = vmatmul.mubr.msk.f32.gmra.mrb[30].mxu1 %vm435_vm1, %v5859_v49  ;;  %15097 = vmatmul.mubr.msk.f32.gmra.mrb[34].mxu0 %vm435_vm1, %v18873_v34  ;;  %v21516_v49 = vld [vmem:[#allocation10_spill] sm:$0xff] }
 0x39a   : > { %14835 = vmatprep.mubr.msk.f32.mxu1 %vm17474_vm2, %v17473_v1  ;;  %15099 = vmatprep.mubr.msk.f32.mxu0 %vm17474_vm2, %v17473_v1 }
 0x39d   : > { %14836 = vmatmul.mubr.msk.f32.gmra.mrb[32].mxu1 %vm435_vm1, %v5860_v59  ;;  %15100 = vmatmul.mubr.msk.f32.gmra.mrb[36].mxu0 %vm435_vm1, %v18883_v62 }
 0x39e   : > { %14838 = vmatprep.mubr.msk.f32.mxu1 %vm17474_vm2, %v17473_v1  ;;  %15102 = vmatprep.mubr.msk.f32.mxu0 %vm17474_vm2, %v17473_v1 }
 0x3a1   : > { %14839 = vmatmul.mubr.msk.f32.gmra.mrb[34].mxu1 %vm435_vm1, %v5861_v3  ;;  %15103 = vmatmul.mubr.msk.f32.gmra.mrb[38].mxu0 %vm435_vm1, %v18893_v20 }
 0x3a2   : > { %14841 = vmatprep.mubr.msk.f32.mxu1 %vm17474_vm2, %v17473_v1  ;;  %15105 = vmatprep.mubr.msk.f32.mxu0 %vm17474_vm2, %v17473_v1 }
 0x3a5   : > { %14842 = vmatmul.mubr.msk.f32.gmra.mrb[36].mxu1 %vm435_vm1, %v5862_v13  ;;  %15106 = vmatmul.mubr.msk.f32.gmra.mrb[40].mxu0 %vm435_vm1, %v18903_v55 }
 0x3a6   : > { %14844 = vmatprep.mubr.msk.f32.mxu1 %vm17474_vm2, %v17473_v1  ;;  %15108 = vmatprep.mubr.msk.f32.mxu0 %vm17474_vm2, %v17473_v1 }
 0x3a9   : > { %14845 = vmatmul.mubr.msk.f32.gmra.mrb[38].mxu1 %vm435_vm1, %v5863_v10  ;;  %15109 = vmatmul.mubr.msk.f32.gmra.mrb[42].mxu0 %vm435_vm1, %v18913_v28 }
 0x3aa   : > { %14847 = vmatprep.mubr.msk.f32.mxu1 %vm17474_vm2, %v17473_v1  ;;  %15111 = vmatprep.mubr.msk.f32.mxu0 %vm17474_vm2, %v17473_v1 }
 0x3ac   : > { %v3878_v60 = vpop.f32.mrb[10].mxu0 }
 0x3ad   : > { %v3931_v53 = vmax.f32 %v3878_v60, 0.0  ;;  %v14683_v56 = vpop.f32.mrb[11].mxu0  ;;  %14848 = vmatmul.mubr.msk.f32.gmra.mrb[40].mxu1 %vm435_vm1, %v5864_v39  ;;  %15112 = vmatmul.mubr.msk.f32.gmra.mrb[44].mxu0 %vm435_vm1, %v18923_v36  ;;  %v21518_v60 = vld [vmem:[#allocation11_spill] sm:$0xff] }
 0x3ae   : > { %14850 = vmatprep.mubr.msk.f32.mxu1 %vm17474_vm2, %v17473_v1  ;;  %15116 = vmatprep.mubr.msk.f32.mxu0 %vm17474_vm2, %v17473_v1 }
 0x3af   : > { %v3940_v57 = vsel %vm17718_vm10, %v3931_v53, 0.0 }
 0x3b0   : > { %3949 = vst.msk [vmem:[#allocation3 + $0xb1] sm:$0xff] %vm435_vm1, %v3940_v57  ;;  %v2438_v31 = vpop.f32.mrb[8].mxu1  ;;  %v3883_v5 = vpop.f32.mrb[12].mxu0 }
 0x3b1   : > { %v2491_v58 = vmax.f32 %v2438_v31, 0.0  ;;  %v3932_v35 = vmax.f32 %v3883_v5, 0.0  ;;  %v14422_v7 = vpop.f32.mrb[9].mxu1  ;;  %v14686_v9 = vpop.f32.mrb[13].mxu0  ;;  %14851 = vmatmul.mubr.msk.f32.gmra.mrb[42].mxu1 %vm435_vm1, %v18821_v42  ;;  %15117 = vmatmul.mubr.msk.f32.vlgmr.msra.gmra.mrb[28].mxu0 %vm435_vm1, %v18933_v44 }
 0x3b2   : > { %14855 = vmatprep.mubr.msk.f32.mxu1 %vm17474_vm2, %v17473_v1  ;;  %15119 = vmatprep.mubr.msk.f32.mxu0 %vm17474_vm2, %v17473_v1  ;;  %v21520_v7 = vld [vmem:[#allocation12_spill] sm:$0xff] }
 0x3b3   : > { %v2500_v26 = vsel %vm17718_vm10, %v2491_v58, 0.0  ;;  %v3941_v43 = vsel %vm17788_vm4, %v3932_v35, 0.0  ;;  %15144 = vmatpush3.msk.msra.mxu0 %vm494_vm0, %v6343_v27 }
 0x3b4   : > { %2509 = vst.msk [vmem:[#allocation3 + $0x108] sm:$0xff] %vm435_vm1, %v2500_v26  ;;  %3950 = vst.msk [vmem:[#allocation3 + $0xb9] sm:$0xff] %vm435_vm1, %v3941_v43  ;;  %v2443_v50 = vpop.f32.mrb[10].mxu1  ;;  %v3888_v52 = vpop.f32.mrb[14].mxu0  ;;  %15172 = vmatprep.subr.mxu0 %v17473_v1 }
 0x3b5   : > { %v2492_v51 = vmax.f32 %v2443_v50, 0.0  ;;  %v3933_v47 = vmax.f32 %v3888_v52, 0.0  ;;  %v14425_v21 = vpop.f32.mrb[11].mxu1  ;;  %v14689_v24 = vpop.f32.mrb[15].mxu0  ;;  %14856 = vmatmul.mubr.msk.f32.vlgmr.msra.gmra.mrb[26].mxu1 %vm435_vm1, %v18833_v46  ;;  %15120 = vmatmul.mubr.msk.f32.gmra.mrb[30].mxu0 %vm435_vm1, %v18950_v14 }
 0x3b6   : > { %14883 = vmatpush3.msk.msra.mxu1 %vm494_vm0, %v4903_v2  ;;  %14858 = vmatprep.mubr.msk.f32.mxu1 %vm17474_vm2, %v17473_v1  ;;  %v21522_v21 = vld [vmem:[#allocation13_spill] sm:$0xff] }
 0x3b7   : > { %v2501_v19 = vsel %vm17788_vm4, %v2492_v51, 0.0  ;;  %v3942_v41 = vsel %vm17839_vm14, %v3933_v47, 0.0  ;;  %15122 = vmatprep.mubr.msk.f32.mxu0 %vm17474_vm2, %v17473_v1  ;;  %14911 = vmatprep.subr.mxu1 %v17473_v1 }
 0x3b8   : > { %2510 = vst.msk [vmem:[#allocation3 + $0x110] sm:$0xff] %vm435_vm1, %v2501_v19  ;;  %3951 = vst.msk [vmem:[#allocation3 + $0xc1] sm:$0xff] %vm435_vm1, %v3942_v41  ;;  %v2448_v14 = vpop.f32.mrb[12].mxu1  ;;  %v3893_v46 = vpop.f32.mrb[16].mxu0  ;;  %v8578_v19 = vld [vmem:[%s21453_s5 + $0x8] sm:$0xf] }
 0x3b9   : > { %v2493_v12 = vmax.f32 %v2448_v14, 0.0  ;;  %v3934_v54 = vmax.f32 %v3893_v46, 0.0  ;;  %v14428_v23 = vpop.f32.mrb[13].mxu1  ;;  %v14692_v4 = vpop.f32.mrb[17].mxu0  ;;  %14859 = vmatmul.mubr.msk.f32.gmra.mrb[28].mxu1 %vm435_vm1, %v18850_v6  ;;  %15123 = vmatmul.mubr.msk.f32.gmra.mrb[32].mxu0 %vm435_vm1, %v18963_v0  ;;  %v21514_v0 = vld [vmem:[#allocation9_spill] sm:$0xff] }
 0x3ba   : > { %14861 = vmatprep.mubr.msk.f32.mxu1 %vm17474_vm2, %v17473_v1  ;;  %15125 = vmatprep.mubr.msk.f32.mxu0 %vm17474_vm2, %v17473_v1  ;;  %v4742_v14 = vld [vmem:[#allocation2 + $0x42] sm:$0xff]  ;;  %v4743_v4 = vld [vmem:[#allocation2 + $0x4a] sm:$0xff] }
 0x3bb   : > { %v2502_v38 = vsel %vm17839_vm14, %v2493_v12, 0.0  ;;  %v3943_v11 = vsel %vm17865_vm6, %v3934_v54, 0.0  ;;  %v21524_v54 = vld [vmem:[#allocation14_spill] sm:$0xff] }
 0x3bc   : > { %2511 = vst.msk [vmem:[#allocation3 + $0x118] sm:$0xff] %vm435_vm1, %v2502_v38  ;;  %3952 = vst.msk [vmem:[#allocation3 + $0xc9] sm:$0xff] %vm435_vm1, %v3943_v11  ;;  %v2453_v6 = vpop.f32.mrb[14].mxu1  ;;  %v3898_v42 = vpop.f32.mrb[18].mxu0  ;;  %v19561_v38 = vld [vmem:[#allocation2 + $0x111] sm:$0xff] }
 0x3bd   : > { %v2494_v32 = vmax.f32 %v2453_v6, 0.0  ;;  %v3935_v28 = vmax.f32 %v3898_v42, 0.0  ;;  %v14431_v36 = vpop.f32.mrb[15].mxu1  ;;  %v14695_v44 = vpop.f32.mrb[19].mxu0  ;;  %14862 = vmatmul.mubr.msk.f32.gmra.mrb[30].mxu1 %vm435_vm1, %v18863_v63  ;;  %15126 = vmatmul.mubr.msk.f32.gmra.mrb[34].mxu0 %vm435_vm1, %v21514_v0  ;;  %v6502_v11 = vld [vmem:[%s21452_s4 + $0x1c] sm:$0xf] }
 0x3be   : > { %14864 = vmatprep.mubr.msk.f32.mxu1 %vm17474_vm2, %v17473_v1  ;;  %15128 = vmatprep.mubr.msk.f32.mxu0 %vm17474_vm2, %v17473_v1  ;;  %v5062_v6 = vld [vmem:[%s21452_s4 + $0x1c] sm:$0xf]  ;;  %v19589_v36 = vld [vmem:[#allocation2 + $0x121] sm:$0xff]  ;;  %v4896_v44 = vld [vmem:[#allocation2 + $0xc9] sm:$0xff] }
 0x3bf   : > { %v2503_v45 = vsel %vm17865_vm6, %v2494_v32, 0.0  ;;  %v3944_v37 = vsel %vm17881_vm8, %v3935_v28, 0.0  ;;  %v4894_v42 = vld [vmem:[#allocation2 + $0xb9] sm:$0xff]  ;;  %v4895_v28 = vld [vmem:[#allocation2 + $0xc1] sm:$0xff]  ;;  %v19598_v0 = vld [vmem:[#allocation2 + $0x129] sm:$0xff] }
 0x3c0   : > { %2512 = vst.msk [vmem:[#allocation3 + $0x120] sm:$0xff] %vm435_vm1, %v2503_v45  ;;  %3953 = vst.msk [vmem:[#allocation3 + $0xd1] sm:$0xff] %vm435_vm1, %v3944_v37  ;;  %v2458_v63 = vpop.f32.mrb[16].mxu1  ;;  %v3903_v8 = vpop.f32.mrb[20].mxu0  ;;  %v19577_v32 = vld [vmem:[#allocation2 + $0x119] sm:$0xff]  ;;  %v4897_v45 = vld [vmem:[#allocation2 + $0xd1] sm:$0xff] }
 0x3c1   : > { %v2495_v15 = vmax.f32 %v2458_v63, 0.0  ;;  %v3936_v33 = vmax.f32 %v3903_v8, 0.0  ;;  %v14434_v18 = vpop.f32.mrb[17].mxu1  ;;  %v14698_v29 = vpop.f32.mrb[21].mxu0  ;;  %14865 = vmatmul.mubr.msk.f32.gmra.mrb[32].mxu1 %vm435_vm1, %v18873_v34  ;;  %15129 = vmatmul.mubr.msk.f32.gmra.mrb[36].mxu0 %vm435_vm1, %v21516_v49  ;;  %v6338_v37 = vld [vmem:[#allocation2 + $0x131] sm:$0xff]  ;;  %v4898_v63 = vld [vmem:[#allocation2 + $0xd9] sm:$0xff] }
 0x3c2   : > { %14867 = vmatprep.mubr.msk.f32.mxu1 %vm17474_vm2, %v17473_v1  ;;  %15131 = vmatprep.mubr.msk.f32.mxu0 %vm17474_vm2, %v17473_v1  ;;  %v6339_v8 = vld [vmem:[#allocation2 + $0x139] sm:$0xff]  ;;  %v4900_v18 = vld [vmem:[#allocation2 + $0xe9] sm:$0xff]  ;;  %v6342_v49 = vld [vmem:[#allocation2 + $0x151] sm:$0xff] }
 0x3c3   : > { %v2504_v59 = vsel %vm17881_vm8, %v2495_v15, 0.0  ;;  %v3945_v13 = vsel %vm17745_vm13, %v3936_v33, 0.0  ;;  %v4899_v15 = vld [vmem:[#allocation2 + $0xe1] sm:$0xff]  ;;  %v6341_v29 = vld [vmem:[#allocation2 + $0x149] sm:$0xff] }
 0x3c4   : > { %2513 = vst.msk [vmem:[#allocation3 + $0x128] sm:$0xff] %vm435_vm1, %v2504_v59  ;;  %3954 = vst.msk [vmem:[#allocation3 + $0xd9] sm:$0xff] %vm435_vm1, %v3945_v13  ;;  %v2463_v34 = vpop.f32.mrb[18].mxu1  ;;  %v3908_v10 = vpop.f32.mrb[22].mxu0  ;;  %v6340_v33 = vld [vmem:[#allocation2 + $0x141] sm:$0xff]  ;;  %v4901_v59 = vld [vmem:[#allocation2 + $0xf1] sm:$0xff] }
 0x3c5   : > { %v2496_v39 = vmax.f32 %v2463_v34, 0.0  ;;  %v3937_v17 = vmax.f32 %v3908_v10, 0.0  ;;  %v14437_v22 = vpop.f32.mrb[19].mxu1  ;;  %v14701_v30 = vpop.f32.mrb[23].mxu0  ;;  %14868 = vmatmul.mubr.msk.f32.gmra.mrb[34].mxu1 %vm435_vm1, %v18883_v62  ;;  %15132 = vmatmul.mubr.msk.f32.gmra.mrb[38].mxu0 %vm435_vm1, %v21518_v60  ;;  %v4902_v13 = vld [vmem:[#allocation2 + $0xf9] sm:$0xff] }
 0x3c6   : > { %14870 = vmatprep.mubr.msk.f32.mxu1 %vm17474_vm2, %v17473_v1  ;;  %15134 = vmatprep.mubr.msk.f32.mxu0 %vm17474_vm2, %v17473_v1  ;;  %v6493_v34 = vld [vmem:[#allocation2 + $0xba] sm:$0xff]  ;;  %v6495_v22 = vld [vmem:[#allocation2 + $0xca] sm:$0xff]  ;;  %v6496_v30 = vld [vmem:[#allocation2 + $0xd2] sm:$0xff] }
 0x3c7   : > { %v2505_v53 = vsel %vm17745_vm13, %v2496_v39, 0.0  ;;  %v3946_v57 = vsel %vm17823_vm9, %v3937_v17, 0.0  ;;  %v6661_v10 = vld [vmem:[%s21452_s4 + $0x20] sm:$0xf] }
 0x3c8   : > { %2514 = vst.msk [vmem:[#allocation3 + $0x130] sm:$0xff] %vm435_vm1, %v2505_v53  ;;  %3955 = vst.msk [vmem:[#allocation3 + $0xe1] sm:$0xff] %vm435_vm1, %v3946_v57  ;;  %v2468_v62 = vpop.f32.mrb[20].mxu1  ;;  %v3913_v31 = vpop.f32.mrb[24].mxu0  ;;  %v5221_v39 = vld [vmem:[%s21452_s4 + $0x20] sm:$0xf] }
 0x3c9   : > { %v2497_v5 = vmax.f32 %v2468_v62, 0.0  ;;  %v3938_v27 = vmax.f32 %v3913_v31, 0.0  ;;  %v14440_v58 = vpop.f32.mrb[21].mxu1  ;;  %v14704_v35 = vpop.f32.mrb[25].mxu0  ;;  %14871 = vmatmul.mubr.msk.f32.gmra.mrb[36].mxu1 %vm435_vm1, %v18893_v20  ;;  %15135 = vmatmul.mubr.msk.f32.gmra.mrb[40].mxu0 %vm435_vm1, %v21520_v7  ;;  %v6494_v17 = vld [vmem:[#allocation2 + $0xc2] sm:$0xff]  ;;  %v6497_v60 = vld [vmem:[#allocation2 + $0xda] sm:$0xff] }
 0x3ca   : > { %14873 = vmatprep.mubr.msk.f32.mxu1 %vm17474_vm2, %v17473_v1  ;;  %15137 = vmatprep.mubr.msk.f32.mxu0 %vm17474_vm2, %v17473_v1  ;;  %v6498_v53 = vld [vmem:[#allocation2 + $0xe2] sm:$0xff]  ;;  %v6499_v57 = vld [vmem:[#allocation2 + $0xea] sm:$0xff]  ;;  %v6500_v62 = vld [vmem:[#allocation2 + $0xf2] sm:$0xff] }
 0x3cb   : > { %v2506_v9 = vsel %vm17823_vm9, %v2497_v5, 0.0  ;;  %v3947_v43 = vsel %vm17902_vm3, %v3938_v27, 0.0  ;;  %v6501_v31 = vld [vmem:[#allocation2 + $0xfa] sm:$0xff]  ;;  %v6652_v5 = vld [vmem:[#allocation2 + $0x112] sm:$0xff]  ;;  %v8288_v27 = vld [vmem:[%s21453_s5 + $0x4] sm:$0xf] }
 0x3cc   : > { %2515 = vst.msk [vmem:[#allocation3 + $0x138] sm:$0xff] %vm435_vm1, %v2506_v9  ;;  %3956 = vst.msk [vmem:[#allocation3 + $0xe9] sm:$0xff] %vm435_vm1, %v3947_v43  ;;  %v2473_v20 = vpop.f32.mrb[22].mxu1  ;;  %v3918_v2 = vpop.f32.mrb[26].mxu0  ;;  %v6653_v58 = vld [vmem:[#allocation2 + $0x11a] sm:$0xff]  ;;  %v6654_v7 = vld [vmem:[#allocation2 + $0x122] sm:$0xff] }
 0x3cd   : > { %v2498_v50 = vmax.f32 %v2473_v20, 0.0  ;;  %v3939_v52 = vmax.f32 %v3918_v2, 0.0  ;;  %v14443_v51 = vpop.f32.mrb[23].mxu1  ;;  %v14707_v47 = vpop.f32.mrb[27].mxu0  ;;  %14874 = vmatmul.mubr.msk.f32.gmra.mrb[38].mxu1 %vm435_vm1, %v18903_v55  ;;  %15138 = vmatmul.mubr.msk.f32.gmra.mrb[42].mxu0 %vm435_vm1, %v21522_v21  ;;  %v6857_v35 = vld [vmem:[%s21453_s5 + $0x4] sm:$0xf] }
 0x3ce   : > { %14876 = vmatprep.mubr.msk.f32.mxu1 %vm17474_vm2, %v17473_v1  ;;  %15140 = vmatprep.mubr.msk.f32.mxu0 %vm17474_vm2, %v17473_v1  ;;  %v6655_v9 = vld [vmem:[#allocation2 + $0x12a] sm:$0xff]  ;;  %v6656_v43 = vld [vmem:[#allocation2 + $0x132] sm:$0xff]  ;;  %v6657_v20 = vld [vmem:[#allocation2 + $0x13a] sm:$0xff] }
 0x3cf   : > { %v2507_v24 = vsel %vm17902_vm3, %v2498_v50, 0.0  ;;  %v3948_v41 = vsel %vm18253_vm15, %v3939_v52, 0.0  ;;  %v6658_v2 = vld [vmem:[#allocation2 + $0x142] sm:$0xff]  ;;  %v6659_v50 = vld [vmem:[#allocation2 + $0x14a] sm:$0xff]  ;;  %v6660_v52 = vld [vmem:[#allocation2 + $0x152] sm:$0xff] }
 0x3d0   : > { %2516 = vst.msk [vmem:[#allocation3 + $0x140] sm:$0xff] %vm435_vm1, %v2507_v24  ;;  %3957 = vst.msk [vmem:[#allocation3 + $0xf1] sm:$0xff] %vm435_vm1, %v3948_v41  ;;  %v2478_v55 = vpop.f32.mrb[24].mxu1  ;;  %v19772_v51 = vld [vmem:[#allocation3 + $0x1] sm:$0xff]  ;;  %v19778_v47 = vld [vmem:[#allocation3 + $0x58] sm:$0xff] }
 0x3d1   : > { %v2499_v46 = vmax.f32 %v2478_v55, 0.0  ;;  %v14446_v12 = vpop.f32.mrb[25].mxu1  ;;  %14877 = vmatmul.mubr.msk.f32.gmra.mrb[40].mxu1 %vm435_vm1, %v4742_v14  ;;  %15141 = vmatmul.mubr.msk.f32.gmra.mrb[44].mxu0 %vm435_vm1, %v21524_v54  ;;  %v6847_v21 = vld [vmem:[%s21453_s5] sm:$0xf] }
 0x3d2   : > { %14879 = vmatprep.mubr.msk.f32.mxu1 %vm17474_vm2, %v17473_v1  ;;  %15145 = vmatprep.mubr.msk.f32.mxu0 %vm17474_vm2, %v17473_v1  ;;  %v8278_v24 = vld [vmem:[%s21453_s5] sm:$0xf] }
 0x3d3   : > { %v2508_v23 = vsel %vm18253_vm15, %v2499_v46, 0.0 }
 0x3d4   : > { %2517 = vst.msk [vmem:[#allocation3 + $0x148] sm:$0xff] %vm435_vm1, %v2508_v23 }
 0x3d5   : > { %14880 = vmatmul.mubr.msk.f32.gmra.mrb[42].mxu1 %vm435_vm1, %v4743_v4  ;;  %15146 = vmatmul.mubr.msk.f32.vlgmr.msra.gmra.mrb[28].mxu0 %vm435_vm1, %v19561_v38 }
 0x3d6   : > { %14884 = vmatprep.mubr.msk.f32.mxu1 %vm17474_vm2, %v17473_v1  ;;  %15148 = vmatprep.mubr.msk.f32.mxu0 %vm17474_vm2, %v17473_v1 }
 0x3d7   : > { %15173 = vmatpush3.msk.msra.mxu0 %vm494_vm0, %v6502_v11 }
 0x3d8   : > { %15201 = vmatprep.subr.mxu0 %v17473_v1 }
 0x3d9   : > { %14885 = vmatmul.mubr.msk.f32.vlgmr.msra.gmra.mrb[26].mxu1 %vm435_vm1, %v4894_v42  ;;  %15149 = vmatmul.mubr.msk.f32.gmra.mrb[30].mxu0 %vm435_vm1, %v19577_v32 }
 0x3da   : > { %14912 = vmatpush3.msk.msra.mxu1 %vm494_vm0, %v5062_v6  ;;  %14887 = vmatprep.mubr.msk.f32.mxu1 %vm17474_vm2, %v17473_v1 }
 0x3db   : > { %15151 = vmatprep.mubr.msk.f32.mxu0 %vm17474_vm2, %v17473_v1  ;;  %14940 = vmatprep.subr.mxu1 %v17473_v1 }
 0x3dd   : > { %14888 = vmatmul.mubr.msk.f32.gmra.mrb[28].mxu1 %vm435_vm1, %v4895_v28  ;;  %15152 = vmatmul.mubr.msk.f32.gmra.mrb[32].mxu0 %vm435_vm1, %v19589_v36 }
 0x3de   : > { %14890 = vmatprep.mubr.msk.f32.mxu1 %vm17474_vm2, %v17473_v1  ;;  %15154 = vmatprep.mubr.msk.f32.mxu0 %vm17474_vm2, %v17473_v1 }
 0x3e1   : > { %14891 = vmatmul.mubr.msk.f32.gmra.mrb[30].mxu1 %vm435_vm1, %v4896_v44  ;;  %15155 = vmatmul.mubr.msk.f32.gmra.mrb[34].mxu0 %vm435_vm1, %v19598_v0 }
 0x3e2   : > { %14893 = vmatprep.mubr.msk.f32.mxu1 %vm17474_vm2, %v17473_v1  ;;  %15157 = vmatprep.mubr.msk.f32.mxu0 %vm17474_vm2, %v17473_v1 }
 0x3e5   : > { %14894 = vmatmul.mubr.msk.f32.gmra.mrb[32].mxu1 %vm435_vm1, %v4897_v45  ;;  %15158 = vmatmul.mubr.msk.f32.gmra.mrb[36].mxu0 %vm435_vm1, %v6338_v37 }
 0x3e6   : > { %14896 = vmatprep.mubr.msk.f32.mxu1 %vm17474_vm2, %v17473_v1  ;;  %15160 = vmatprep.mubr.msk.f32.mxu0 %vm17474_vm2, %v17473_v1 }
 0x3e9   : > { %14897 = vmatmul.mubr.msk.f32.gmra.mrb[34].mxu1 %vm435_vm1, %v4898_v63  ;;  %15161 = vmatmul.mubr.msk.f32.gmra.mrb[38].mxu0 %vm435_vm1, %v6339_v8 }
 0x3ea   : > { %14899 = vmatprep.mubr.msk.f32.mxu1 %vm17474_vm2, %v17473_v1  ;;  %15163 = vmatprep.mubr.msk.f32.mxu0 %vm17474_vm2, %v17473_v1 }
 0x3ed   : > { %14900 = vmatmul.mubr.msk.f32.gmra.mrb[36].mxu1 %vm435_vm1, %v4899_v15  ;;  %15164 = vmatmul.mubr.msk.f32.gmra.mrb[40].mxu0 %vm435_vm1, %v6340_v33 }
 0x3ee   : > { %14902 = vmatprep.mubr.msk.f32.mxu1 %vm17474_vm2, %v17473_v1  ;;  %15166 = vmatprep.mubr.msk.f32.mxu0 %vm17474_vm2, %v17473_v1 }
 0x3f1   : > { %14903 = vmatmul.mubr.msk.f32.gmra.mrb[38].mxu1 %vm435_vm1, %v4900_v18  ;;  %15167 = vmatmul.mubr.msk.f32.gmra.mrb[42].mxu0 %vm435_vm1, %v6341_v29 }
 0x3f2   : > { %14905 = vmatprep.mubr.msk.f32.mxu1 %vm17474_vm2, %v17473_v1  ;;  %15169 = vmatprep.mubr.msk.f32.mxu0 %vm17474_vm2, %v17473_v1 }
 0x3f5   : > { %14906 = vmatmul.mubr.msk.f32.gmra.mrb[40].mxu1 %vm435_vm1, %v4901_v59  ;;  %15170 = vmatmul.mubr.msk.f32.gmra.mrb[44].mxu0 %vm435_vm1, %v6342_v49 }
 0x3f6   : > { %14908 = vmatprep.mubr.msk.f32.mxu1 %vm17474_vm2, %v17473_v1  ;;  %15174 = vmatprep.mubr.msk.f32.mxu0 %vm17474_vm2, %v17473_v1 }
 0x3f9   : > { %14909 = vmatmul.mubr.msk.f32.gmra.mrb[42].mxu1 %vm435_vm1, %v4902_v13  ;;  %15175 = vmatmul.mubr.msk.f32.vlgmr.msra.gmra.mrb[28].mxu0 %vm435_vm1, %v6493_v34 }
 0x3fa   : > { %14913 = vmatprep.mubr.msk.f32.mxu1 %vm17474_vm2, %v17473_v1  ;;  %15177 = vmatprep.mubr.msk.f32.mxu0 %vm17474_vm2, %v17473_v1 }
 0x3fb   : > { %15202 = vmatpush3.msk.msra.mxu0 %vm494_vm0, %v6661_v10 }
 0x3fc   : > { %15491 = vmatprep.subr.mxu0 %v17473_v1 }
 0x3fd   : > { %14914 = vmatmul.mubr.msk.f32.vlgmr.msra.gmra.mrb[26].mxu1 %vm435_vm1, %v19561_v38  ;;  %15178 = vmatmul.mubr.msk.f32.gmra.mrb[30].mxu0 %vm435_vm1, %v6494_v17 }
 0x3fe   : > { %14941 = vmatpush3.msk.msra.mxu1 %vm494_vm0, %v5221_v39  ;;  %14916 = vmatprep.mubr.msk.f32.mxu1 %vm17474_vm2, %v17473_v1 }
 0x3ff   : > { %15180 = vmatprep.mubr.msk.f32.mxu0 %vm17474_vm2, %v17473_v1  ;;  %15230 = vmatprep.subr.mxu1 %v17473_v1 }
 0x401   : > { %14917 = vmatmul.mubr.msk.f32.gmra.mrb[28].mxu1 %vm435_vm1, %v19577_v32  ;;  %15181 = vmatmul.mubr.msk.f32.gmra.mrb[32].mxu0 %vm435_vm1, %v6495_v22 }
 0x402   : > { %14919 = vmatprep.mubr.msk.f32.mxu1 %vm17474_vm2, %v17473_v1  ;;  %15183 = vmatprep.mubr.msk.f32.mxu0 %vm17474_vm2, %v17473_v1 }
 0x405   : > { %14920 = vmatmul.mubr.msk.f32.gmra.mrb[30].mxu1 %vm435_vm1, %v19589_v36  ;;  %15184 = vmatmul.mubr.msk.f32.gmra.mrb[34].mxu0 %vm435_vm1, %v6496_v30 }
 0x406   : > { %14922 = vmatprep.mubr.msk.f32.mxu1 %vm17474_vm2, %v17473_v1  ;;  %15186 = vmatprep.mubr.msk.f32.mxu0 %vm17474_vm2, %v17473_v1 }
 0x409   : > { %14923 = vmatmul.mubr.msk.f32.gmra.mrb[32].mxu1 %vm435_vm1, %v19598_v0  ;;  %15187 = vmatmul.mubr.msk.f32.gmra.mrb[36].mxu0 %vm435_vm1, %v6497_v60 }
 0x40a   : > { %14925 = vmatprep.mubr.msk.f32.mxu1 %vm17474_vm2, %v17473_v1  ;;  %15189 = vmatprep.mubr.msk.f32.mxu0 %vm17474_vm2, %v17473_v1 }
 0x40d   : > { %14926 = vmatmul.mubr.msk.f32.gmra.mrb[34].mxu1 %vm435_vm1, %v6338_v37  ;;  %15190 = vmatmul.mubr.msk.f32.gmra.mrb[38].mxu0 %vm435_vm1, %v6498_v53 }
 0x40e   : > { %14928 = vmatprep.mubr.msk.f32.mxu1 %vm17474_vm2, %v17473_v1  ;;  %15192 = vmatprep.mubr.msk.f32.mxu0 %vm17474_vm2, %v17473_v1 }
 0x411   : > { %14929 = vmatmul.mubr.msk.f32.gmra.mrb[36].mxu1 %vm435_vm1, %v6339_v8  ;;  %15193 = vmatmul.mubr.msk.f32.gmra.mrb[40].mxu0 %vm435_vm1, %v6499_v57 }
 0x412   : > { %14931 = vmatprep.mubr.msk.f32.mxu1 %vm17474_vm2, %v17473_v1  ;;  %15195 = vmatprep.mubr.msk.f32.mxu0 %vm17474_vm2, %v17473_v1 }
 0x415   : > { %14932 = vmatmul.mubr.msk.f32.gmra.mrb[38].mxu1 %vm435_vm1, %v6340_v33  ;;  %15196 = vmatmul.mubr.msk.f32.gmra.mrb[42].mxu0 %vm435_vm1, %v6500_v62 }
 0x416   : > { %14934 = vmatprep.mubr.msk.f32.mxu1 %vm17474_vm2, %v17473_v1  ;;  %15198 = vmatprep.mubr.msk.f32.mxu0 %vm17474_vm2, %v17473_v1 }
 0x419   : > { %14935 = vmatmul.mubr.msk.f32.gmra.mrb[40].mxu1 %vm435_vm1, %v6341_v29  ;;  %15199 = vmatmul.mubr.msk.f32.gmra.mrb[44].mxu0 %vm435_vm1, %v6501_v31 }
 0x41a   : > { %14937 = vmatprep.mubr.msk.f32.mxu1 %vm17474_vm2, %v17473_v1  ;;  %15203 = vmatprep.mubr.msk.f32.mxu0 %vm17474_vm2, %v17473_v1 }
 0x41d   : > { %14938 = vmatmul.mubr.msk.f32.gmra.mrb[42].mxu1 %vm435_vm1, %v6342_v49  ;;  %15204 = vmatmul.mubr.msk.f32.vlgmr.msra.gmra.mrb[28].mxu0 %vm435_vm1, %v6652_v5 }
 0x41e   : > { %14942 = vmatprep.mubr.msk.f32.mxu1 %vm17474_vm2, %v17473_v1  ;;  %15206 = vmatprep.mubr.msk.f32.mxu0 %vm17474_vm2, %v17473_v1 }
 0x41f   : > { %15492 = vmatpush3.msk.msra.mxu0 %vm494_vm0, %v8288_v27 }
 0x420   : > { %15520 = vmatprep.subr.mxu0 %v17473_v1 }
 0x421   : > { %14943 = vmatmul.mubr.msk.f32.vlgmr.msra.gmra.mrb[26].mxu1 %vm435_vm1, %v6493_v34  ;;  %15207 = vmatmul.mubr.msk.f32.gmra.mrb[30].mxu0 %vm435_vm1, %v6653_v58 }
 0x422   : > { %14945 = vmatprep.mubr.msk.f32.mxu1 %vm17474_vm2, %v17473_v1  ;;  %15209 = vmatprep.mubr.msk.f32.mxu0 %vm17474_vm2, %v17473_v1 }
 0x423   : > { %15231 = vmatpush3.msk.msra.mxu1 %vm494_vm0, %v6857_v35 }
 0x424   : > { %15259 = vmatprep.subr.mxu1 %v17473_v1 }
 0x425   : > { %14946 = vmatmul.mubr.msk.f32.gmra.mrb[28].mxu1 %vm435_vm1, %v6494_v17  ;;  %15210 = vmatmul.mubr.msk.f32.gmra.mrb[32].mxu0 %vm435_vm1, %v6654_v7 }
 0x426   : > { %14948 = vmatprep.mubr.msk.f32.mxu1 %vm17474_vm2, %v17473_v1  ;;  %15212 = vmatprep.mubr.msk.f32.mxu0 %vm17474_vm2, %v17473_v1 }
 0x429   : > { %14949 = vmatmul.mubr.msk.f32.gmra.mrb[30].mxu1 %vm435_vm1, %v6495_v22  ;;  %15213 = vmatmul.mubr.msk.f32.gmra.mrb[34].mxu0 %vm435_vm1, %v6655_v9 }
 0x42a   : > { %14951 = vmatprep.mubr.msk.f32.mxu1 %vm17474_vm2, %v17473_v1  ;;  %15215 = vmatprep.mubr.msk.f32.mxu0 %vm17474_vm2, %v17473_v1 }
 0x42d   : > { %14952 = vmatmul.mubr.msk.f32.gmra.mrb[32].mxu1 %vm435_vm1, %v6496_v30  ;;  %15216 = vmatmul.mubr.msk.f32.gmra.mrb[36].mxu0 %vm435_vm1, %v6656_v43 }
 0x42e   : > { %14954 = vmatprep.mubr.msk.f32.mxu1 %vm17474_vm2, %v17473_v1  ;;  %15218 = vmatprep.mubr.msk.f32.mxu0 %vm17474_vm2, %v17473_v1 }
 0x431   : > { %14955 = vmatmul.mubr.msk.f32.gmra.mrb[34].mxu1 %vm435_vm1, %v6497_v60  ;;  %15219 = vmatmul.mubr.msk.f32.gmra.mrb[38].mxu0 %vm435_vm1, %v6657_v20 }
 0x432   : > { %14957 = vmatprep.mubr.msk.f32.mxu1 %vm17474_vm2, %v17473_v1  ;;  %15221 = vmatprep.mubr.msk.f32.mxu0 %vm17474_vm2, %v17473_v1 }
 0x435   : > { %14958 = vmatmul.mubr.msk.f32.gmra.mrb[36].mxu1 %vm435_vm1, %v6498_v53  ;;  %15222 = vmatmul.mubr.msk.f32.gmra.mrb[40].mxu0 %vm435_vm1, %v6658_v2 }
 0x436   : > { %14960 = vmatprep.mubr.msk.f32.mxu1 %vm17474_vm2, %v17473_v1  ;;  %15224 = vmatprep.mubr.msk.f32.mxu0 %vm17474_vm2, %v17473_v1 }
 0x439   : > { %14961 = vmatmul.mubr.msk.f32.gmra.mrb[38].mxu1 %vm435_vm1, %v6499_v57  ;;  %15225 = vmatmul.mubr.msk.f32.gmra.mrb[42].mxu0 %vm435_vm1, %v6659_v50 }
 0x43a   : > { %14963 = vmatprep.mubr.msk.f32.mxu1 %vm17474_vm2, %v17473_v1  ;;  %15227 = vmatprep.mubr.msk.f32.mxu0 %vm17474_vm2, %v17473_v1 }
 0x43d   : > { %14964 = vmatmul.mubr.msk.f32.gmra.mrb[40].mxu1 %vm435_vm1, %v6500_v62  ;;  %15228 = vmatmul.mubr.msk.f32.gmra.mrb[44].mxu0 %vm435_vm1, %v6660_v52 }
 0x43e   : > { %14966 = vmatprep.mubr.msk.f32.mxu1 %vm17474_vm2, %v17473_v1  ;;  %15493 = vmatprep.mubr.msk.f32.mxu0 %vm17474_vm2, %v17473_v1 }
 0x441   : > { %14967 = vmatmul.mubr.msk.f32.gmra.mrb[42].mxu1 %vm435_vm1, %v6501_v31  ;;  %15494 = vmatmul.mubr.msk.f32.vlgmr.msra.gmra.mrb[46].mxu0 %vm435_vm1, %v19772_v51 }
 0x442   : > { %15232 = vmatprep.mubr.msk.f32.mxu1 %vm17474_vm2, %v17473_v1  ;;  %15496 = vmatprep.mubr.msk.f32.mxu0 %vm17474_vm2, %v17473_v1 }
 0x443   : > { %15521 = vmatpush3.msk.msra.mxu0 %vm494_vm0, %v8278_v24 }
 0x444   : > { %15549 = vmatprep.subr.mxu0 %v17473_v1 }
 0x445   : > { %15233 = vmatmul.mubr.msk.f32.vlgmr.msra.gmra.mrb[44].mxu1 %vm435_vm1, %v19778_v47 }
 0x446   : > { %15260 = vmatpush3.msk.msra.mxu1 %vm494_vm0, %v6847_v21  ;;  %15235 = vmatprep.mubr.msk.f32.mxu1 %vm17474_vm2, %v17473_v1 }
 0x447   : > { %15288 = vmatprep.subr.mxu1 %v17473_v1 }
 0x4f0   : > { %v6758_v41 = vpop.f32.mrb[28].mxu0 }
 0x4f1   : > { %v6811_v55 = vmax.f32 %v6758_v41, 0.0  ;;  %v15205_v14 = vpop.f32.mrb[29].mxu0 }
 0x4f3   : > { %v6820_v46 = vsel %vm17718_vm10, %v6811_v55, 0.0 }
 0x4f4   : > { %6829 = vst.msk [vmem:[#allocation3 + $0xa] sm:$0xff] %vm435_vm1, %v6820_v46  ;;  %v5318_v12 = vpop.f32.mrb[26].mxu1  ;;  %v6763_v54 = vpop.f32.mrb[30].mxu0 }
 0x4f5   : > { %v5371_v23 = vmax.f32 %v5318_v12, 0.0  ;;  %v6812_v4 = vmax.f32 %v6763_v54, 0.0  ;;  %v14944_v38 = vpop.f32.mrb[27].mxu1  ;;  %v15208_v11 = vpop.f32.mrb[31].mxu0 }
 0x4f7   : > { %v5380_v6 = vsel %vm17718_vm10, %v5371_v23, 0.0  ;;  %v6821_v42 = vsel %vm17788_vm4, %v6812_v4, 0.0 }
 0x4f8   : > { %5389 = vst.msk [vmem:[#allocation3 + $0x61] sm:$0xff] %vm435_vm1, %v5380_v6  ;;  %6830 = vst.msk [vmem:[#allocation3 + $0x12] sm:$0xff] %vm435_vm1, %v6821_v42  ;;  %v5323_v32 = vpop.f32.mrb[28].mxu1  ;;  %v6768_v28 = vpop.f32.mrb[32].mxu0 }
 0x4f9   : > { %v5372_v36 = vmax.f32 %v5323_v32, 0.0  ;;  %v6813_v44 = vmax.f32 %v6768_v28, 0.0  ;;  %v14947_v0 = vpop.f32.mrb[29].mxu1  ;;  %v15211_v45 = vpop.f32.mrb[33].mxu0 }
 0x4fb   : > { %v5381_v37 = vsel %vm17788_vm4, %v5372_v36, 0.0  ;;  %v6822_v61 = vsel %vm17839_vm14, %v6813_v44, 0.0  ;;  %v19807_v63 = vld [vmem:[#allocation3 + $0x9] sm:$0xff] }
 0x4fc   : > { %5390 = vst.msk [vmem:[#allocation3 + $0x69] sm:$0xff] %vm435_vm1, %v5381_v37  ;;  %6831 = vst.msk [vmem:[#allocation3 + $0x1a] sm:$0xff] %vm435_vm1, %v6822_v61  ;;  %v5328_v8 = vpop.f32.mrb[30].mxu1  ;;  %v6773_v15 = vpop.f32.mrb[34].mxu0  ;;  %15497 = vmatmul.mubr.msk.f32.gmra.mrb[48].mxu0 %vm435_vm1, %v19807_v63 }
 0x4fd   : > { %v5373_v33 = vmax.f32 %v5328_v8, 0.0  ;;  %v6814_v18 = vmax.f32 %v6773_v15, 0.0  ;;  %v14950_v29 = vpop.f32.mrb[31].mxu1  ;;  %v15214_v49 = vpop.f32.mrb[35].mxu0  ;;  %15499 = vmatprep.mubr.msk.f32.mxu0 %vm17474_vm2, %v17473_v1 }
 0x4ff   : > { %v5382_v40 = vsel %vm17839_vm14, %v5373_v33, 0.0  ;;  %v6823_v59 = vsel %vm17865_vm6, %v6814_v18, 0.0  ;;  %v19819_v13 = vld [vmem:[#allocation3 + $0x60] sm:$0xff]  ;;  %v19821_v34 = vld [vmem:[#allocation3 + $0x11] sm:$0xff] }
 0x500   : > { %5391 = vst.msk [vmem:[#allocation3 + $0x71] sm:$0xff] %vm435_vm1, %v5382_v40  ;;  %6832 = vst.msk [vmem:[#allocation3 + $0x22] sm:$0xff] %vm435_vm1, %v6823_v59  ;;  %v5333_v10 = vpop.f32.mrb[32].mxu1  ;;  %v6778_v39 = vpop.f32.mrb[36].mxu0  ;;  %15236 = vmatmul.mubr.msk.f32.gmra.mrb[46].mxu1 %vm435_vm1, %v19819_v13  ;;  %15500 = vmatmul.mubr.msk.f32.gmra.mrb[50].mxu0 %vm435_vm1, %v19821_v34 }
 0x501   : > { %v5374_v16 = vmax.f32 %v5333_v10, 0.0  ;;  %v6815_v17 = vmax.f32 %v6778_v39, 0.0  ;;  %v14953_v22 = vpop.f32.mrb[33].mxu1  ;;  %v15217_v30 = vpop.f32.mrb[37].mxu0  ;;  %15238 = vmatprep.mubr.msk.f32.mxu1 %vm17474_vm2, %v17473_v1  ;;  %15502 = vmatprep.mubr.msk.f32.mxu0 %vm17474_vm2, %v17473_v1  ;;  %v6838_v10 = vld [vmem:[#allocation3] sm:$0xff] }
 0x502   : > { %v7147_v39 = vld [vmem:[%s21453_s5 + $0x8] sm:$0xf] }
 0x503   : > { %v5383_v60 = vsel %vm17865_vm6, %v5374_v16, 0.0  ;;  %v6824_v53 = vsel %vm17881_vm8, %v6815_v17, 0.0  ;;  %v19837_v57 = vld [vmem:[#allocation3 + $0x68] sm:$0xff]  ;;  %v19839_v62 = vld [vmem:[#allocation3 + $0x19] sm:$0xff] }
 0x504   : > { %5392 = vst.msk [vmem:[#allocation3 + $0x79] sm:$0xff] %vm435_vm1, %v5383_v60  ;;  %6833 = vst.msk [vmem:[#allocation3 + $0x2a] sm:$0xff] %vm435_vm1, %v6824_v53  ;;  %v5338_v31 = vpop.f32.mrb[34].mxu1  ;;  %v6783_v5 = vpop.f32.mrb[38].mxu0  ;;  %15239 = vmatmul.mubr.msk.f32.gmra.mrb[48].mxu1 %vm435_vm1, %v19837_v57  ;;  %15503 = vmatmul.mubr.msk.f32.gmra.mrb[52].mxu0 %vm435_vm1, %v19839_v62  ;;  %v6841_v16 = vld [vmem:[#allocation3 + $0x18] sm:$0xff] }
 0x505   : > { %v5375_v25 = vmax.f32 %v5338_v31, 0.0  ;;  %v6816_v27 = vmax.f32 %v6783_v5, 0.0  ;;  %v14956_v58 = vpop.f32.mrb[35].mxu1  ;;  %v15220_v35 = vpop.f32.mrb[39].mxu0  ;;  %15241 = vmatprep.mubr.msk.f32.mxu1 %vm17474_vm2, %v17473_v1  ;;  %15505 = vmatprep.mubr.msk.f32.mxu0 %vm17474_vm2, %v17473_v1  ;;  %v8569_v53 = vld [vmem:[#allocation3 + $0x59] sm:$0xff] }
 0x506   : > { %v8737_v31 = vld [vmem:[%s21453_s5 + $0xc] sm:$0xf] }
 0x507   : > { %v5384_v7 = vsel %vm17881_vm8, %v5375_v25, 0.0  ;;  %v6825_v9 = vsel %vm17745_vm13, %v6816_v27, 0.0  ;;  %v19855_v43 = vld [vmem:[#allocation3 + $0x70] sm:$0xff]  ;;  %v19857_v20 = vld [vmem:[#allocation3 + $0x21] sm:$0xff]  ;;  %v7306_v5 = vld [vmem:[%s21453_s5 + $0xc] sm:$0xf] }
 0x508   : > { %5393 = vst.msk [vmem:[#allocation3 + $0x81] sm:$0xff] %vm435_vm1, %v5384_v7  ;;  %6834 = vst.msk [vmem:[#allocation3 + $0x32] sm:$0xff] %vm435_vm1, %v6825_v9  ;;  %v5343_v2 = vpop.f32.mrb[36].mxu1  ;;  %v6788_v50 = vpop.f32.mrb[40].mxu0  ;;  %15242 = vmatmul.mubr.msk.f32.gmra.mrb[50].mxu1 %vm435_vm1, %v19855_v43  ;;  %15506 = vmatmul.mubr.msk.f32.gmra.mrb[54].mxu0 %vm435_vm1, %v19857_v20  ;;  %v6842_v17 = vld [vmem:[#allocation3 + $0x20] sm:$0xff]  ;;  %v20028_v27 = vld [vmem:[#allocation3 + $0x69] sm:$0xff] }
 0x509   : > { %v5376_v48 = vmax.f32 %v5343_v2, 0.0  ;;  %v6817_v52 = vmax.f32 %v6788_v50, 0.0  ;;  %v14959_v21 = vpop.f32.mrb[37].mxu1  ;;  %v15223_v24 = vpop.f32.mrb[41].mxu0  ;;  %15244 = vmatprep.mubr.msk.f32.mxu1 %vm17474_vm2, %v17473_v1  ;;  %15508 = vmatprep.mubr.msk.f32.mxu0 %vm17474_vm2, %v17473_v1  ;;  %v20015_v25 = vld [vmem:[#allocation3 + $0x61] sm:$0xff] }
 0x50a   : > { %v20098_v2 = vld [vmem:[#allocation3 + $0x108] sm:$0xff]  ;;  %v8896_v50 = vld [vmem:[%s21453_s5 + $0x10] sm:$0xf]  ;;  %v20130_v24 = vld [vmem:[#allocation3 + $0xb8] sm:$0xff] }
 0x50b   : > { %v5385_v41 = vsel %vm17745_vm13, %v5376_v48, 0.0  ;;  %v6826_v55 = vsel %vm17823_vm9, %v6817_v52, 0.0  ;;  %v19873_v14 = vld [vmem:[#allocation3 + $0x78] sm:$0xff]  ;;  %v19875_v46 = vld [vmem:[#allocation3 + $0x29] sm:$0xff] }
 0x50c   : > { %5394 = vst.msk [vmem:[#allocation3 + $0x89] sm:$0xff] %vm435_vm1, %v5385_v41  ;;  %6835 = vst.msk [vmem:[#allocation3 + $0x3a] sm:$0xff] %vm435_vm1, %v6826_v55  ;;  %v5348_v12 = vpop.f32.mrb[38].mxu1  ;;  %v6793_v54 = vpop.f32.mrb[42].mxu0  ;;  %15245 = vmatmul.mubr.msk.f32.gmra.mrb[52].mxu1 %vm435_vm1, %v19873_v14  ;;  %15509 = vmatmul.mubr.msk.f32.gmra.mrb[56].mxu0 %vm435_vm1, %v19875_v46  ;;  %v6843_v22 = vld [vmem:[#allocation3 + $0x28] sm:$0xff]  ;;  %v20048_v58 = vld [vmem:[#allocation3 + $0x79] sm:$0xff] }
 0x50d   : > { %v5377_v3 = vmax.f32 %v5348_v12, 0.0  ;;  %v6818_v23 = vmax.f32 %v6793_v54, 0.0  ;;  %v14962_v4 = vpop.f32.mrb[39].mxu1  ;;  %v15226_v38 = vpop.f32.mrb[43].mxu0  ;;  %15247 = vmatprep.mubr.msk.f32.mxu1 %vm17474_vm2, %v17473_v1  ;;  %15511 = vmatprep.mubr.msk.f32.mxu0 %vm17474_vm2, %v17473_v1  ;;  %v7465_v48 = vld [vmem:[%s21453_s5 + $0x10] sm:$0xf] }
 0x50e   : > { %v20115_v52 = vld [vmem:[#allocation3 + $0xb0] sm:$0xff]  ;;  %v20132_v41 = vld [vmem:[#allocation3 + $0x118] sm:$0xff]  ;;  %v20142_v55 = vld [vmem:[#allocation3 + $0xc0] sm:$0xff] }
 0x50f   : > { %v5386_v11 = vsel %vm17823_vm9, %v5377_v3, 0.0  ;;  %v6827_v6 = vsel %vm17902_vm3, %v6818_v23, 0.0  ;;  %v19891_v42 = vld [vmem:[#allocation3 + $0x80] sm:$0xff]  ;;  %v19893_v32 = vld [vmem:[#allocation3 + $0x31] sm:$0xff]  ;;  %v20154_v12 = vld [vmem:[#allocation3 + $0xc8] sm:$0xff] }
 0x510   : > { %5395 = vst.msk [vmem:[#allocation3 + $0x91] sm:$0xff] %vm435_vm1, %v5386_v11  ;;  %6836 = vst.msk [vmem:[#allocation3 + $0x42] sm:$0xff] %vm435_vm1, %v6827_v6  ;;  %v5353_v28 = vpop.f32.mrb[40].mxu1  ;;  %v6798_v36 = vpop.f32.mrb[44].mxu0  ;;  %15248 = vmatmul.mubr.msk.f32.gmra.mrb[54].mxu1 %vm435_vm1, %v19891_v42  ;;  %15512 = vmatmul.mubr.msk.f32.gmra.mrb[58].mxu0 %vm435_vm1, %v19893_v32  ;;  %v6844_v30 = vld [vmem:[#allocation3 + $0x30] sm:$0xff]  ;;  %v20058_v35 = vld [vmem:[#allocation3 + $0x81] sm:$0xff] }
 0x511   : > { %v5378_v56 = vmax.f32 %v5353_v28, 0.0  ;;  %v6819_v44 = vmax.f32 %v6798_v36, 0.0  ;;  %v14965_v0 = vpop.f32.mrb[41].mxu1  ;;  %v15229_v45 = vpop.f32.mrb[45].mxu0  ;;  %15250 = vmatprep.mubr.msk.f32.mxu1 %vm17474_vm2, %v17473_v1  ;;  %15514 = vmatprep.mubr.msk.f32.mxu0 %vm17474_vm2, %v17473_v1  ;;  %v20117_v21 = vld [vmem:[#allocation3 + $0x110] sm:$0xff]  ;;  %v20156_v54 = vld [vmem:[#allocation3 + $0x128] sm:$0xff] }
 0x512   : > { %v20166_v3 = vld [vmem:[#allocation3 + $0xd0] sm:$0xff]  ;;  %v20178_v4 = vld [vmem:[#allocation3 + $0xd8] sm:$0xff]  ;;  %v20190_v11 = vld [vmem:[#allocation3 + $0xe0] sm:$0xff] }
 0x513   : > { %v5387_v37 = vsel %vm17902_vm3, %v5378_v56, 0.0  ;;  %v6828_v61 = vsel %vm18253_vm15, %v6819_v44, 0.0  ;;  %v6854_v8 = vld [vmem:[#allocation3 + $0x88] sm:$0xff]  ;;  %v19909_v15 = vld [vmem:[#allocation3 + $0x39] sm:$0xff]  ;;  %v20168_v23 = vld [vmem:[#allocation3 + $0x130] sm:$0xff] }
 0x514   : > { %5396 = vst.msk [vmem:[#allocation3 + $0x99] sm:$0xff] %vm435_vm1, %v5387_v37  ;;  %6837 = vst.msk [vmem:[#allocation3 + $0x4a] sm:$0xff] %vm435_vm1, %v6828_v61  ;;  %v5358_v33 = vpop.f32.mrb[42].mxu1  ;;  %15251 = vmatmul.mubr.msk.f32.gmra.mrb[56].mxu1 %vm435_vm1, %v6854_v8  ;;  %15515 = vmatmul.mubr.msk.f32.gmra.mrb[60].mxu0 %vm435_vm1, %v19909_v15  ;;  %v6845_v60 = vld [vmem:[#allocation3 + $0x38] sm:$0xff]  ;;  %v20068_v7 = vld [vmem:[#allocation3 + $0x89] sm:$0xff] }
 0x515   : > { %v5379_v18 = vmax.f32 %v5358_v33, 0.0  ;;  %v14968_v29 = vpop.f32.mrb[43].mxu1  ;;  %15253 = vmatprep.mubr.msk.f32.mxu1 %vm17474_vm2, %v17473_v1  ;;  %15517 = vmatprep.mubr.msk.f32.mxu0 %vm17474_vm2, %v17473_v1  ;;  %v20180_v38 = vld [vmem:[#allocation3 + $0x138] sm:$0xff]  ;;  %v20192_v6 = vld [vmem:[#allocation3 + $0x140] sm:$0xff]  ;;  %v20204_v28 = vld [vmem:[#allocation3 + $0x148] sm:$0xff] }
 0x516   : > { %v20214_v36 = vld [vmem:[#allocation3 + $0xf0] sm:$0xff]  ;;  %v20233_v45 = vld [vmem:[#allocation3 + $0xb9] sm:$0xff]  ;;  %v20246_v37 = vld [vmem:[#allocation3 + $0xc1] sm:$0xff] }
 0x517   : > { %v5388_v26 = vsel %vm18253_vm15, %v5379_v18, 0.0  ;;  %v6855_v49 = vld [vmem:[#allocation3 + $0x90] sm:$0xff]  ;;  %v19922_v40 = vld [vmem:[#allocation3 + $0x41] sm:$0xff]  ;;  %v20276_v33 = vld [vmem:[#allocation3 + $0xd9] sm:$0xff] }
 0x518   : > { %5397 = vst.msk [vmem:[#allocation3 + $0xa1] sm:$0xff] %vm435_vm1, %v5388_v26  ;;  %15254 = vmatmul.mubr.msk.f32.gmra.mrb[58].mxu1 %vm435_vm1, %v6855_v49  ;;  %15518 = vmatmul.mubr.msk.f32.gmra.mrb[62].mxu0 %vm435_vm1, %v19922_v40  ;;  %v20078_v9 = vld [vmem:[#allocation3 + $0x91] sm:$0xff]  ;;  %v20256_v61 = vld [vmem:[#allocation3 + $0xc9] sm:$0xff]  ;;  %v20286_v18 = vld [vmem:[#allocation3 + $0xe1] sm:$0xff] }
 0x519   : > { %15256 = vmatprep.mubr.msk.f32.mxu1 %vm17474_vm2, %v17473_v1  ;;  %15522 = vmatprep.mubr.msk.f32.mxu0 %vm17474_vm2, %v17473_v1  ;;  %v20216_v56 = vld [vmem:[#allocation3 + $0xb1] sm:$0xff]  ;;  %v20296_v29 = vld [vmem:[#allocation3 + $0xe9] sm:$0xff] }
 0x51a   : > { %v9055_v44 = vld [vmem:[%s21453_s5 + $0x14] sm:$0xf] }
 0x51b   : > { %v6856_v59 = vld [vmem:[#allocation3 + $0x98] sm:$0xff]  ;;  %v7624_v0 = vld [vmem:[%s21453_s5 + $0x14] sm:$0xf] }
 0x51c   : > { %15257 = vmatmul.mubr.msk.f32.gmra.mrb[60].mxu1 %vm435_vm1, %v6856_v59  ;;  %15523 = vmatmul.mubr.msk.f32.vlgmr.msra.gmra.mrb[46].mxu0 %vm435_vm1, %v19778_v47  ;;  %v6839_v47 = vld [vmem:[#allocation3 + $0x8] sm:$0xff]  ;;  %v20306_v26 = vld [vmem:[#allocation3 + $0xf1] sm:$0xff] }
 0x51d   : > { %15261 = vmatprep.mubr.msk.f32.mxu1 %vm17474_vm2, %v17473_v1  ;;  %15525 = vmatprep.mubr.msk.f32.mxu0 %vm17474_vm2, %v17473_v1 }
 0x51e   : > { %15550 = vmatpush3.msk.msra.mxu0 %vm494_vm0, %v8578_v19  ;;  %v7783_v19 = vld [vmem:[%s21453_s5 + $0x18] sm:$0xf] }
 0x51f   : > { %15578 = vmatprep.subr.mxu0 %v17473_v1 }
 0x520   : > { %15262 = vmatmul.mubr.msk.f32.vlgmr.msra.gmra.mrb[44].mxu1 %vm435_vm1, %v6838_v10  ;;  %15526 = vmatmul.mubr.msk.f32.gmra.mrb[48].mxu0 %vm435_vm1, %v19819_v13  ;;  %v6840_v13 = vld [vmem:[#allocation3 + $0x10] sm:$0xff] }
 0x521   : > { %15289 = vmatpush3.msk.msra.mxu1 %vm494_vm0, %v7147_v39  ;;  %15264 = vmatprep.mubr.msk.f32.mxu1 %vm17474_vm2, %v17473_v1  ;;  %v20333_v10 = vld [vmem:[#allocation3 + $0x111] sm:$0xff]  ;;  %v20346_v39 = vld [vmem:[#allocation3 + $0x119] sm:$0xff] }
 0x522   : > { %15528 = vmatprep.mubr.msk.f32.mxu0 %vm17474_vm2, %v17473_v1  ;;  %15317 = vmatprep.subr.mxu1 %v17473_v1 }
 0x524   : > { %15265 = vmatmul.mubr.msk.f32.gmra.mrb[46].mxu1 %vm435_vm1, %v6839_v47  ;;  %15529 = vmatmul.mubr.msk.f32.gmra.mrb[50].mxu0 %vm435_vm1, %v19837_v57  ;;  %v6846_v57 = vld [vmem:[#allocation3 + $0x40] sm:$0xff] }
 0x525   : > { %15267 = vmatprep.mubr.msk.f32.mxu1 %vm17474_vm2, %v17473_v1  ;;  %15531 = vmatprep.mubr.msk.f32.mxu0 %vm17474_vm2, %v17473_v1  ;;  %v20356_v47 = vld [vmem:[#allocation3 + $0x121] sm:$0xff] }
 0x528   : > { %15268 = vmatmul.mubr.msk.f32.gmra.mrb[48].mxu1 %vm435_vm1, %v6840_v13  ;;  %15532 = vmatmul.mubr.msk.f32.gmra.mrb[52].mxu0 %vm435_vm1, %v19855_v43  ;;  %v20088_v43 = vld [vmem:[#allocation3 + $0x99] sm:$0xff]  ;;  %v20366_v13 = vld [vmem:[#allocation3 + $0x129] sm:$0xff] }
 0x529   : > { %15270 = vmatprep.mubr.msk.f32.mxu1 %vm17474_vm2, %v17473_v1  ;;  %15534 = vmatprep.mubr.msk.f32.mxu0 %vm17474_vm2, %v17473_v1 }
 0x52c   : > { %15271 = vmatmul.mubr.msk.f32.gmra.mrb[50].mxu1 %vm435_vm1, %v6841_v16  ;;  %15535 = vmatmul.mubr.msk.f32.gmra.mrb[54].mxu0 %vm435_vm1, %v19873_v14  ;;  %v20144_v14 = vld [vmem:[#allocation3 + $0x120] sm:$0xff]  ;;  %v20376_v16 = vld [vmem:[#allocation3 + $0x131] sm:$0xff] }
 0x52d   : > { %15273 = vmatprep.mubr.msk.f32.mxu1 %vm17474_vm2, %v17473_v1  ;;  %15537 = vmatprep.mubr.msk.f32.mxu0 %vm17474_vm2, %v17473_v1 }
 0x530   : > { %15274 = vmatmul.mubr.msk.f32.gmra.mrb[52].mxu1 %vm435_vm1, %v6842_v17  ;;  %15538 = vmatmul.mubr.msk.f32.gmra.mrb[56].mxu0 %vm435_vm1, %v19891_v42  ;;  %v20202_v42 = vld [vmem:[#allocation3 + $0xe8] sm:$0xff]  ;;  %v20386_v17 = vld [vmem:[#allocation3 + $0x139] sm:$0xff] }
 0x531   : > { %15276 = vmatprep.mubr.msk.f32.mxu1 %vm17474_vm2, %v17473_v1  ;;  %15540 = vmatprep.mubr.msk.f32.mxu0 %vm17474_vm2, %v17473_v1 }
 0x534   : > { %15277 = vmatmul.mubr.msk.f32.gmra.mrb[54].mxu1 %vm435_vm1, %v6843_v22  ;;  %15541 = vmatmul.mubr.msk.f32.gmra.mrb[58].mxu0 %vm435_vm1, %v6854_v8  ;;  %v20266_v8 = vld [vmem:[#allocation3 + $0xd1] sm:$0xff]  ;;  %v20396_v22 = vld [vmem:[#allocation3 + $0x141] sm:$0xff] }
 0x535   : > { %15279 = vmatprep.mubr.msk.f32.mxu1 %vm17474_vm2, %v17473_v1  ;;  %15543 = vmatprep.mubr.msk.f32.mxu0 %vm17474_vm2, %v17473_v1 }
 0x538   : > { %15280 = vmatmul.mubr.msk.f32.gmra.mrb[56].mxu1 %vm435_vm1, %v6844_v30  ;;  %15544 = vmatmul.mubr.msk.f32.gmra.mrb[60].mxu0 %vm435_vm1, %v6855_v49  ;;  %v20316_v49 = vld [vmem:[#allocation3 + $0x109] sm:$0xff] }
 0x539   : > { %15282 = vmatprep.mubr.msk.f32.mxu1 %vm17474_vm2, %v17473_v1  ;;  %15546 = vmatprep.mubr.msk.f32.mxu0 %vm17474_vm2, %v17473_v1  ;;  %v20406_v30 = vld [vmem:[#allocation3 + $0x149] sm:$0xff] }
 0x53c   : > { %15283 = vmatmul.mubr.msk.f32.gmra.mrb[58].mxu1 %vm435_vm1, %v6845_v60  ;;  %15547 = vmatmul.mubr.msk.f32.gmra.mrb[62].mxu0 %vm435_vm1, %v6856_v59  ;;  %v9214_v59 = vld [vmem:[%s21453_s5 + $0x18] sm:$0xf]  ;;  %v9373_v60 = vld [vmem:[%s21453_s5 + $0x1c] sm:$0xf] }
 0x53d   : > { %15285 = vmatprep.mubr.msk.f32.mxu1 %vm17474_vm2, %v17473_v1  ;;  %15551 = vmatprep.mubr.msk.f32.mxu0 %vm17474_vm2, %v17473_v1 }
 0x540   : > { %15286 = vmatmul.mubr.msk.f32.gmra.mrb[60].mxu1 %vm435_vm1, %v6846_v57  ;;  %15552 = vmatmul.mubr.msk.f32.vlgmr.msra.gmra.mrb[46].mxu0 %vm435_vm1, %v8569_v53  ;;  %v7942_v53 = vld [vmem:[%s21453_s5 + $0x1c] sm:$0xf]  ;;  %v20552_v57 = vld [vmem:[#allocation3 + $0x2a] sm:$0xff] }
 0x541   : > { %15290 = vmatprep.mubr.msk.f32.mxu1 %vm17474_vm2, %v17473_v1  ;;  %15554 = vmatprep.mubr.msk.f32.mxu0 %vm17474_vm2, %v17473_v1 }
 0x542   : > { %15579 = vmatpush3.msk.msra.mxu0 %vm494_vm0, %v8737_v31  ;;  %v20562_v31 = vld [vmem:[#allocation3 + $0x32] sm:$0xff] }
 0x543   : > { %15607 = vmatprep.subr.mxu0 %v17473_v1 }
 0x544   : > { %15291 = vmatmul.mubr.msk.f32.vlgmr.msra.gmra.mrb[44].mxu1 %vm435_vm1, %v19772_v51  ;;  %15555 = vmatmul.mubr.msk.f32.gmra.mrb[48].mxu0 %vm435_vm1, %v20015_v25  ;;  %v20038_v51 = vld [vmem:[#allocation3 + $0x71] sm:$0xff] }
 0x545   : > { %15318 = vmatpush3.msk.msra.mxu1 %vm494_vm0, %v7306_v5  ;;  %15293 = vmatprep.mubr.msk.f32.mxu1 %vm17474_vm2, %v17473_v1  ;;  %v20572_v5 = vld [vmem:[#allocation3 + $0x3a] sm:$0xff] }
 0x546   : > { %15557 = vmatprep.mubr.msk.f32.mxu0 %vm17474_vm2, %v17473_v1  ;;  %15346 = vmatprep.subr.mxu1 %v17473_v1 }
 0x548   : > { %15294 = vmatmul.mubr.msk.f32.gmra.mrb[46].mxu1 %vm435_vm1, %v19807_v63  ;;  %15558 = vmatmul.mubr.msk.f32.gmra.mrb[50].mxu0 %vm435_vm1, %v20028_v27 }
 0x549   : > { %15296 = vmatprep.mubr.msk.f32.mxu1 %vm17474_vm2, %v17473_v1  ;;  %15560 = vmatprep.mubr.msk.f32.mxu0 %vm17474_vm2, %v17473_v1 }
 0x54c   : > { %15297 = vmatmul.mubr.msk.f32.gmra.mrb[48].mxu1 %vm435_vm1, %v19821_v34  ;;  %15561 = vmatmul.mubr.msk.f32.gmra.mrb[52].mxu0 %vm435_vm1, %v20038_v51 }
 0x54d   : > { %15299 = vmatprep.mubr.msk.f32.mxu1 %vm17474_vm2, %v17473_v1  ;;  %15563 = vmatprep.mubr.msk.f32.mxu0 %vm17474_vm2, %v17473_v1 }
 0x550   : > { %15300 = vmatmul.mubr.msk.f32.gmra.mrb[50].mxu1 %vm435_vm1, %v19839_v62  ;;  %15564 = vmatmul.mubr.msk.f32.gmra.mrb[54].mxu0 %vm435_vm1, %v20048_v58 }
 0x551   : > { %15302 = vmatprep.mubr.msk.f32.mxu1 %vm17474_vm2, %v17473_v1  ;;  %15566 = vmatprep.mubr.msk.f32.mxu0 %vm17474_vm2, %v17473_v1 }
 0x554   : > { %15303 = vmatmul.mubr.msk.f32.gmra.mrb[52].mxu1 %vm435_vm1, %v19857_v20  ;;  %15567 = vmatmul.mubr.msk.f32.gmra.mrb[56].mxu0 %vm435_vm1, %v20058_v35 }
 0x555   : > { %15305 = vmatprep.mubr.msk.f32.mxu1 %vm17474_vm2, %v17473_v1  ;;  %15569 = vmatprep.mubr.msk.f32.mxu0 %vm17474_vm2, %v17473_v1 }
 0x558   : > { %15306 = vmatmul.mubr.msk.f32.gmra.mrb[54].mxu1 %vm435_vm1, %v19875_v46  ;;  %15570 = vmatmul.mubr.msk.f32.gmra.mrb[58].mxu0 %vm435_vm1, %v20068_v7 }
 0x559   : > { %15308 = vmatprep.mubr.msk.f32.mxu1 %vm17474_vm2, %v17473_v1  ;;  %15572 = vmatprep.mubr.msk.f32.mxu0 %vm17474_vm2, %v17473_v1 }
 0x55c   : > { %15309 = vmatmul.mubr.msk.f32.gmra.mrb[56].mxu1 %vm435_vm1, %v19893_v32  ;;  %15573 = vmatmul.mubr.msk.f32.gmra.mrb[60].mxu0 %vm435_vm1, %v20078_v9 }
 0x55d   : > { %15311 = vmatprep.mubr.msk.f32.mxu1 %vm17474_vm2, %v17473_v1  ;;  %15575 = vmatprep.mubr.msk.f32.mxu0 %vm17474_vm2, %v17473_v1 }
 0x560   : > { %15312 = vmatmul.mubr.msk.f32.gmra.mrb[58].mxu1 %vm435_vm1, %v19909_v15  ;;  %15576 = vmatmul.mubr.msk.f32.gmra.mrb[62].mxu0 %vm435_vm1, %v20088_v43 }
 0x561   : > { %15314 = vmatprep.mubr.msk.f32.mxu1 %vm17474_vm2, %v17473_v1  ;;  %15580 = vmatprep.mubr.msk.f32.mxu0 %vm17474_vm2, %v17473_v1 }
 0x564   : > { %15315 = vmatmul.mubr.msk.f32.gmra.mrb[60].mxu1 %vm435_vm1, %v19922_v40  ;;  %15581 = vmatmul.mubr.msk.f32.vlgmr.msra.gmra.mrb[46].mxu0 %vm435_vm1, %v20098_v2 }
 0x565   : > { %15319 = vmatprep.mubr.msk.f32.mxu1 %vm17474_vm2, %v17473_v1  ;;  %15583 = vmatprep.mubr.msk.f32.mxu0 %vm17474_vm2, %v17473_v1 }
 0x566   : > { %15608 = vmatpush3.msk.msra.mxu0 %vm494_vm0, %v8896_v50  ;;  %v20652_v50 = vld [vmem:[#allocation3 + $0x82] sm:$0xff] }
 0x567   : > { %15636 = vmatprep.subr.mxu0 %v17473_v1 }
 0x568   : > { %15320 = vmatmul.mubr.msk.f32.vlgmr.msra.gmra.mrb[44].mxu1 %vm435_vm1, %v20115_v52  ;;  %15584 = vmatmul.mubr.msk.f32.gmra.mrb[48].mxu0 %vm435_vm1, %v20117_v21 }
 0x569   : > { %15347 = vmatpush3.msk.msra.mxu1 %vm494_vm0, %v7465_v48  ;;  %15322 = vmatprep.mubr.msk.f32.mxu1 %vm17474_vm2, %v17473_v1  ;;  %v20662_v48 = vld [vmem:[#allocation3 + $0x8a] sm:$0xff] }
 0x56a   : > { %15586 = vmatprep.mubr.msk.f32.mxu0 %vm17474_vm2, %v17473_v1  ;;  %15375 = vmatprep.subr.mxu1 %v17473_v1 }
 0x56c   : > { %15323 = vmatmul.mubr.msk.f32.gmra.mrb[46].mxu1 %vm435_vm1, %v20130_v24  ;;  %15587 = vmatmul.mubr.msk.f32.gmra.mrb[50].mxu0 %vm435_vm1, %v20132_v41 }
 0x56d   : > { %15325 = vmatprep.mubr.msk.f32.mxu1 %vm17474_vm2, %v17473_v1  ;;  %15589 = vmatprep.mubr.msk.f32.mxu0 %vm17474_vm2, %v17473_v1 }
 0x570   : > { %15326 = vmatmul.mubr.msk.f32.gmra.mrb[48].mxu1 %vm435_vm1, %v20142_v55  ;;  %15590 = vmatmul.mubr.msk.f32.gmra.mrb[52].mxu0 %vm435_vm1, %v20144_v14 }
 0x571   : > { %15328 = vmatprep.mubr.msk.f32.mxu1 %vm17474_vm2, %v17473_v1  ;;  %15592 = vmatprep.mubr.msk.f32.mxu0 %vm17474_vm2, %v17473_v1 }
 0x574   : > { %15329 = vmatmul.mubr.msk.f32.gmra.mrb[50].mxu1 %vm435_vm1, %v20154_v12  ;;  %15593 = vmatmul.mubr.msk.f32.gmra.mrb[54].mxu0 %vm435_vm1, %v20156_v54 }
 0x575   : > { %15331 = vmatprep.mubr.msk.f32.mxu1 %vm17474_vm2, %v17473_v1  ;;  %15595 = vmatprep.mubr.msk.f32.mxu0 %vm17474_vm2, %v17473_v1 }
 0x578   : > { %15332 = vmatmul.mubr.msk.f32.gmra.mrb[52].mxu1 %vm435_vm1, %v20166_v3  ;;  %15596 = vmatmul.mubr.msk.f32.gmra.mrb[56].mxu0 %vm435_vm1, %v20168_v23 }
 0x579   : > { %15334 = vmatprep.mubr.msk.f32.mxu1 %vm17474_vm2, %v17473_v1  ;;  %15598 = vmatprep.mubr.msk.f32.mxu0 %vm17474_vm2, %v17473_v1 }
 0x57c   : > { %15335 = vmatmul.mubr.msk.f32.gmra.mrb[54].mxu1 %vm435_vm1, %v20178_v4  ;;  %15599 = vmatmul.mubr.msk.f32.gmra.mrb[58].mxu0 %vm435_vm1, %v20180_v38 }
 0x57d   : > { %15337 = vmatprep.mubr.msk.f32.mxu1 %vm17474_vm2, %v17473_v1  ;;  %15601 = vmatprep.mubr.msk.f32.mxu0 %vm17474_vm2, %v17473_v1 }
 0x580   : > { %15338 = vmatmul.mubr.msk.f32.gmra.mrb[56].mxu1 %vm435_vm1, %v20190_v11  ;;  %15602 = vmatmul.mubr.msk.f32.gmra.mrb[60].mxu0 %vm435_vm1, %v20192_v6 }
 0x581   : > { %15340 = vmatprep.mubr.msk.f32.mxu1 %vm17474_vm2, %v17473_v1  ;;  %15604 = vmatprep.mubr.msk.f32.mxu0 %vm17474_vm2, %v17473_v1 }
 0x584   : > { %15341 = vmatmul.mubr.msk.f32.gmra.mrb[58].mxu1 %vm435_vm1, %v20202_v42  ;;  %15605 = vmatmul.mubr.msk.f32.gmra.mrb[62].mxu0 %vm435_vm1, %v20204_v28 }
 0x585   : > { %15343 = vmatprep.mubr.msk.f32.mxu1 %vm17474_vm2, %v17473_v1  ;;  %15609 = vmatprep.mubr.msk.f32.mxu0 %vm17474_vm2, %v17473_v1 }
 0x588   : > { %15344 = vmatmul.mubr.msk.f32.gmra.mrb[60].mxu1 %vm435_vm1, %v20214_v36  ;;  %15610 = vmatmul.mubr.msk.f32.vlgmr.msra.gmra.mrb[46].mxu0 %vm435_vm1, %v20216_v56 }
 0x589   : > { %15348 = vmatprep.mubr.msk.f32.mxu1 %vm17474_vm2, %v17473_v1  ;;  %15612 = vmatprep.mubr.msk.f32.mxu0 %vm17474_vm2, %v17473_v1 }
 0x58a   : > { %15637 = vmatpush3.msk.msra.mxu0 %vm494_vm0, %v9055_v44  ;;  %v20672_v44 = vld [vmem:[#allocation3 + $0x92] sm:$0xff] }
 0x58b   : > { %15665 = vmatprep.subr.mxu0 %v17473_v1 }
 0x58c   : > { %15349 = vmatmul.mubr.msk.f32.vlgmr.msra.gmra.mrb[44].mxu1 %vm435_vm1, %v20098_v2  ;;  %15613 = vmatmul.mubr.msk.f32.gmra.mrb[48].mxu0 %vm435_vm1, %v20233_v45 }
 0x58d   : > { %15376 = vmatpush3.msk.msra.mxu1 %vm494_vm0, %v7624_v0  ;;  %15351 = vmatprep.mubr.msk.f32.mxu1 %vm17474_vm2, %v17473_v1  ;;  %v20682_v0 = vld [vmem:[#allocation3 + $0x9a] sm:$0xff] }
 0x58e   : > { %15615 = vmatprep.mubr.msk.f32.mxu0 %vm17474_vm2, %v17473_v1  ;;  %15404 = vmatprep.subr.mxu1 %v17473_v1 }
 0x590   : > { %15352 = vmatmul.mubr.msk.f32.gmra.mrb[46].mxu1 %vm435_vm1, %v20117_v21  ;;  %15616 = vmatmul.mubr.msk.f32.gmra.mrb[50].mxu0 %vm435_vm1, %v20246_v37 }
 0x591   : > { %15354 = vmatprep.mubr.msk.f32.mxu1 %vm17474_vm2, %v17473_v1  ;;  %15618 = vmatprep.mubr.msk.f32.mxu0 %vm17474_vm2, %v17473_v1 }
 0x594   : > { %15355 = vmatmul.mubr.msk.f32.gmra.mrb[48].mxu1 %vm435_vm1, %v20132_v41  ;;  %15619 = vmatmul.mubr.msk.f32.gmra.mrb[52].mxu0 %vm435_vm1, %v20256_v61 }
 0x595   : > { %15357 = vmatprep.mubr.msk.f32.mxu1 %vm17474_vm2, %v17473_v1  ;;  %15621 = vmatprep.mubr.msk.f32.mxu0 %vm17474_vm2, %v17473_v1 }
 0x598   : > { %15358 = vmatmul.mubr.msk.f32.gmra.mrb[50].mxu1 %vm435_vm1, %v20144_v14  ;;  %15622 = vmatmul.mubr.msk.f32.gmra.mrb[54].mxu0 %vm435_vm1, %v20266_v8 }
 0x599   : > { %15360 = vmatprep.mubr.msk.f32.mxu1 %vm17474_vm2, %v17473_v1  ;;  %15624 = vmatprep.mubr.msk.f32.mxu0 %vm17474_vm2, %v17473_v1 }
 0x59c   : > { %15361 = vmatmul.mubr.msk.f32.gmra.mrb[52].mxu1 %vm435_vm1, %v20156_v54  ;;  %15625 = vmatmul.mubr.msk.f32.gmra.mrb[56].mxu0 %vm435_vm1, %v20276_v33 }
 0x59d   : > { %15363 = vmatprep.mubr.msk.f32.mxu1 %vm17474_vm2, %v17473_v1  ;;  %15627 = vmatprep.mubr.msk.f32.mxu0 %vm17474_vm2, %v17473_v1 }
 0x5a0   : > { %15364 = vmatmul.mubr.msk.f32.gmra.mrb[54].mxu1 %vm435_vm1, %v20168_v23  ;;  %15628 = vmatmul.mubr.msk.f32.gmra.mrb[58].mxu0 %vm435_vm1, %v20286_v18 }
 0x5a1   : > { %15366 = vmatprep.mubr.msk.f32.mxu1 %vm17474_vm2, %v17473_v1  ;;  %15630 = vmatprep.mubr.msk.f32.mxu0 %vm17474_vm2, %v17473_v1 }
 0x5a4   : > { %15367 = vmatmul.mubr.msk.f32.gmra.mrb[56].mxu1 %vm435_vm1, %v20180_v38  ;;  %15631 = vmatmul.mubr.msk.f32.gmra.mrb[60].mxu0 %vm435_vm1, %v20296_v29 }
 0x5a5   : > { %15369 = vmatprep.mubr.msk.f32.mxu1 %vm17474_vm2, %v17473_v1  ;;  %15633 = vmatprep.mubr.msk.f32.mxu0 %vm17474_vm2, %v17473_v1 }
 0x5a8   : > { %15370 = vmatmul.mubr.msk.f32.gmra.mrb[58].mxu1 %vm435_vm1, %v20192_v6  ;;  %15634 = vmatmul.mubr.msk.f32.gmra.mrb[62].mxu0 %vm435_vm1, %v20306_v26 }
 0x5a9   : > { %15372 = vmatprep.mubr.msk.f32.mxu1 %vm17474_vm2, %v17473_v1  ;;  %15638 = vmatprep.mubr.msk.f32.mxu0 %vm17474_vm2, %v17473_v1 }
 0x5ac   : > { %15373 = vmatmul.mubr.msk.f32.gmra.mrb[60].mxu1 %vm435_vm1, %v20204_v28  ;;  %15639 = vmatmul.mubr.msk.f32.vlgmr.msra.gmra.mrb[46].mxu0 %vm435_vm1, %v20316_v49 }
 0x5ad   : > { %15377 = vmatprep.mubr.msk.f32.mxu1 %vm17474_vm2, %v17473_v1  ;;  %15641 = vmatprep.mubr.msk.f32.mxu0 %vm17474_vm2, %v17473_v1 }
 0x5ae   : > { %15666 = vmatpush3.msk.msra.mxu0 %vm494_vm0, %v9214_v59  ;;  %v20692_v59 = vld [vmem:[#allocation3 + $0xa2] sm:$0xff] }
 0x5af   : > { %15694 = vmatprep.subr.mxu0 %v17473_v1 }
 0x5b0   : > { %15378 = vmatmul.mubr.msk.f32.vlgmr.msra.gmra.mrb[44].mxu1 %vm435_vm1, %v20216_v56  ;;  %15642 = vmatmul.mubr.msk.f32.gmra.mrb[48].mxu0 %vm435_vm1, %v20333_v10 }
 0x5b1   : > { %15405 = vmatpush3.msk.msra.mxu1 %vm494_vm0, %v7783_v19  ;;  %15380 = vmatprep.mubr.msk.f32.mxu1 %vm17474_vm2, %v17473_v1  ;;  %v11142_v19 = vld [vmem:[%s21453_s5] sm:$0xf] }
 0x5b2   : > { %15644 = vmatprep.mubr.msk.f32.mxu0 %vm17474_vm2, %v17473_v1  ;;  %15433 = vmatprep.subr.mxu1 %v17473_v1 }
 0x5b4   : > { %15381 = vmatmul.mubr.msk.f32.gmra.mrb[46].mxu1 %vm435_vm1, %v20233_v45  ;;  %15645 = vmatmul.mubr.msk.f32.gmra.mrb[50].mxu0 %vm435_vm1, %v20346_v39 }
 0x5b5   : > { %15383 = vmatprep.mubr.msk.f32.mxu1 %vm17474_vm2, %v17473_v1  ;;  %15647 = vmatprep.mubr.msk.f32.mxu0 %vm17474_vm2, %v17473_v1 }
 0x5b8   : > { %15384 = vmatmul.mubr.msk.f32.gmra.mrb[48].mxu1 %vm435_vm1, %v20246_v37  ;;  %15648 = vmatmul.mubr.msk.f32.gmra.mrb[52].mxu0 %vm435_vm1, %v20356_v47 }
 0x5b9   : > { %15386 = vmatprep.mubr.msk.f32.mxu1 %vm17474_vm2, %v17473_v1  ;;  %15650 = vmatprep.mubr.msk.f32.mxu0 %vm17474_vm2, %v17473_v1 }
 0x5bc   : > { %15387 = vmatmul.mubr.msk.f32.gmra.mrb[50].mxu1 %vm435_vm1, %v20256_v61  ;;  %15651 = vmatmul.mubr.msk.f32.gmra.mrb[54].mxu0 %vm435_vm1, %v20366_v13 }
 0x5bd   : > { %15389 = vmatprep.mubr.msk.f32.mxu1 %vm17474_vm2, %v17473_v1  ;;  %15653 = vmatprep.mubr.msk.f32.mxu0 %vm17474_vm2, %v17473_v1 }
 0x5c0   : > { %15390 = vmatmul.mubr.msk.f32.gmra.mrb[52].mxu1 %vm435_vm1, %v20266_v8  ;;  %15654 = vmatmul.mubr.msk.f32.gmra.mrb[56].mxu0 %vm435_vm1, %v20376_v16 }
 0x5c1   : > { %15392 = vmatprep.mubr.msk.f32.mxu1 %vm17474_vm2, %v17473_v1  ;;  %15656 = vmatprep.mubr.msk.f32.mxu0 %vm17474_vm2, %v17473_v1 }
 0x5c4   : > { %15393 = vmatmul.mubr.msk.f32.gmra.mrb[54].mxu1 %vm435_vm1, %v20276_v33  ;;  %15657 = vmatmul.mubr.msk.f32.gmra.mrb[58].mxu0 %vm435_vm1, %v20386_v17 }
 0x5c5   : > { %15395 = vmatprep.mubr.msk.f32.mxu1 %vm17474_vm2, %v17473_v1  ;;  %15659 = vmatprep.mubr.msk.f32.mxu0 %vm17474_vm2, %v17473_v1 }
 0x5c8   : > { %15396 = vmatmul.mubr.msk.f32.gmra.mrb[56].mxu1 %vm435_vm1, %v20286_v18  ;;  %15660 = vmatmul.mubr.msk.f32.gmra.mrb[60].mxu0 %vm435_vm1, %v20396_v22 }
 0x5c9   : > { %15398 = vmatprep.mubr.msk.f32.mxu1 %vm17474_vm2, %v17473_v1  ;;  %15662 = vmatprep.mubr.msk.f32.mxu0 %vm17474_vm2, %v17473_v1 }
 0x5cc   : > { %15399 = vmatmul.mubr.msk.f32.gmra.mrb[58].mxu1 %vm435_vm1, %v20296_v29  ;;  %15663 = vmatmul.mubr.msk.f32.gmra.mrb[62].mxu0 %vm435_vm1, %v20406_v30 }
 0x5cd   : > { %15401 = vmatprep.mubr.msk.f32.mxu1 %vm17474_vm2, %v17473_v1  ;;  %15667 = vmatprep.mubr.msk.f32.mxu0 %vm17474_vm2, %v17473_v1 }
 0x5d0   : > { %15402 = vmatmul.mubr.msk.f32.gmra.mrb[60].mxu1 %vm435_vm1, %v20306_v26  ;;  %15668 = vmatmul.mubr.msk.f32.vlgmr.msra.gmra.mrb[46].mxu0 %vm435_vm1, %v20015_v25 }
 0x5d1   : > { %15406 = vmatprep.mubr.msk.f32.mxu1 %vm17474_vm2, %v17473_v1  ;;  %15670 = vmatprep.mubr.msk.f32.mxu0 %vm17474_vm2, %v17473_v1 }
 0x5d2   : > { %15695 = vmatpush3.msk.msra.mxu0 %vm494_vm0, %v9373_v60  ;;  %v9710_v60 = vld [vmem:[%s21453_s5] sm:$0xf] }
 0x5d3   : > { %15723 = vmatprep.subr.mxu0 %v17473_v1 }
 0x5d4   : > { %15407 = vmatmul.mubr.msk.f32.vlgmr.msra.gmra.mrb[44].mxu1 %vm435_vm1, %v19807_v63  ;;  %15671 = vmatmul.mubr.msk.f32.gmra.mrb[48].mxu0 %vm435_vm1, %v20028_v27  ;;  %v20490_v63 = vld [vmem:[#allocation3 + $0xa1] sm:$0xff] }
 0x5d5   : > { %15434 = vmatpush3.msk.msra.mxu1 %vm494_vm0, %v7942_v53  ;;  %15409 = vmatprep.mubr.msk.f32.mxu1 %vm17474_vm2, %v17473_v1  ;;  %v11442_v53 = vld [vmem:[%s21453_s5 + $0x8] sm:$0xf] }
 0x5d6   : > { %15673 = vmatprep.mubr.msk.f32.mxu0 %vm17474_vm2, %v17473_v1  ;;  %15462 = vmatprep.subr.mxu1 %v17473_v1 }
 0x5d8   : > { %15410 = vmatmul.mubr.msk.f32.gmra.mrb[46].mxu1 %vm435_vm1, %v19821_v34  ;;  %15674 = vmatmul.mubr.msk.f32.gmra.mrb[50].mxu0 %vm435_vm1, %v20038_v51  ;;  %v20500_v34 = vld [vmem:[#allocation3 + $0x49] sm:$0xff] }
 0x5d9   : > { %15412 = vmatprep.mubr.msk.f32.mxu1 %vm17474_vm2, %v17473_v1  ;;  %15676 = vmatprep.mubr.msk.f32.mxu0 %vm17474_vm2, %v17473_v1 }
 0x5dc   : > { %15413 = vmatmul.mubr.msk.f32.gmra.mrb[48].mxu1 %vm435_vm1, %v19839_v62  ;;  %15677 = vmatmul.mubr.msk.f32.gmra.mrb[52].mxu0 %vm435_vm1, %v20048_v58  ;;  %v20502_v62 = vld [vmem:[#allocation3 + $0xa] sm:$0xff] }
 0x5dd   : > { %15415 = vmatprep.mubr.msk.f32.mxu1 %vm17474_vm2, %v17473_v1  ;;  %15679 = vmatprep.mubr.msk.f32.mxu0 %vm17474_vm2, %v17473_v1 }
 0x5e0   : > { %15416 = vmatmul.mubr.msk.f32.gmra.mrb[50].mxu1 %vm435_vm1, %v19857_v20  ;;  %15680 = vmatmul.mubr.msk.f32.gmra.mrb[54].mxu0 %vm435_vm1, %v20058_v35  ;;  %v9532_v20 = vld [vmem:[%s21453_s5 + $0x20] sm:$0xf] }
 0x5e1   : > { %15418 = vmatprep.mubr.msk.f32.mxu1 %vm17474_vm2, %v17473_v1  ;;  %15682 = vmatprep.mubr.msk.f32.mxu0 %vm17474_vm2, %v17473_v1 }
 0x5e4   : > { %15419 = vmatmul.mubr.msk.f32.gmra.mrb[52].mxu1 %vm435_vm1, %v19875_v46  ;;  %15683 = vmatmul.mubr.msk.f32.gmra.mrb[56].mxu0 %vm435_vm1, %v20068_v7  ;;  %v8101_v46 = vld [vmem:[%s21453_s5 + $0x20] sm:$0xf] }
 0x5e5   : > { %15421 = vmatprep.mubr.msk.f32.mxu1 %vm17474_vm2, %v17473_v1  ;;  %15685 = vmatprep.mubr.msk.f32.mxu0 %vm17474_vm2, %v17473_v1 }
 0x5e8   : > { %15422 = vmatmul.mubr.msk.f32.gmra.mrb[54].mxu1 %vm435_vm1, %v19893_v32  ;;  %15686 = vmatmul.mubr.msk.f32.gmra.mrb[58].mxu0 %vm435_vm1, %v20078_v9  ;;  %v20519_v32 = vld [vmem:[#allocation3 + $0x12] sm:$0xff] }
 0x5e9   : > { %15424 = vmatprep.mubr.msk.f32.mxu1 %vm17474_vm2, %v17473_v1  ;;  %15688 = vmatprep.mubr.msk.f32.mxu0 %vm17474_vm2, %v17473_v1 }
 0x5ec   : > { %15425 = vmatmul.mubr.msk.f32.gmra.mrb[56].mxu1 %vm435_vm1, %v19909_v15  ;;  %15689 = vmatmul.mubr.msk.f32.gmra.mrb[60].mxu0 %vm435_vm1, %v20088_v43  ;;  %v20532_v15 = vld [vmem:[#allocation3 + $0x1a] sm:$0xff] }
 0x5ed   : > { %15427 = vmatprep.mubr.msk.f32.mxu1 %vm17474_vm2, %v17473_v1  ;;  %15691 = vmatprep.mubr.msk.f32.mxu0 %vm17474_vm2, %v17473_v1 }
 0x5f0   : > { %15428 = vmatmul.mubr.msk.f32.gmra.mrb[58].mxu1 %vm435_vm1, %v19922_v40  ;;  %15692 = vmatmul.mubr.msk.f32.gmra.mrb[62].mxu0 %vm435_vm1, %v20490_v63  ;;  %v20542_v40 = vld [vmem:[#allocation3 + $0x22] sm:$0xff] }
 0x5f1   : > { %15430 = vmatprep.mubr.msk.f32.mxu1 %vm17474_vm2, %v17473_v1  ;;  %15696 = vmatprep.mubr.msk.f32.mxu0 %vm17474_vm2, %v17473_v1 }
 0x5f4   : > { %15431 = vmatmul.mubr.msk.f32.gmra.mrb[60].mxu1 %vm435_vm1, %v20500_v34  ;;  %15697 = vmatmul.mubr.msk.f32.vlgmr.msra.gmra.mrb[46].mxu0 %vm435_vm1, %v20502_v62 }
 0x5f5   : > { %15435 = vmatprep.mubr.msk.f32.mxu1 %vm17474_vm2, %v17473_v1  ;;  %15699 = vmatprep.mubr.msk.f32.mxu0 %vm17474_vm2, %v17473_v1 }
 0x5f6   : > { %15724 = vmatpush3.msk.msra.mxu0 %vm494_vm0, %v9532_v20  ;;  %v10010_v20 = vld [vmem:[%s21453_s5 + $0x8] sm:$0xf] }
 0x5f7   : > { %16013 = vmatprep.subr.mxu0 %v17473_v1 }
 0x5f8   : > { %15436 = vmatmul.mubr.msk.f32.vlgmr.msra.gmra.mrb[44].mxu1 %vm435_vm1, %v20015_v25  ;;  %15700 = vmatmul.mubr.msk.f32.gmra.mrb[48].mxu0 %vm435_vm1, %v20519_v32  ;;  %v20582_v25 = vld [vmem:[#allocation3 + $0x42] sm:$0xff] }
 0x5f9   : > { %15463 = vmatpush3.msk.msra.mxu1 %vm494_vm0, %v8101_v46  ;;  %15438 = vmatprep.mubr.msk.f32.mxu1 %vm17474_vm2, %v17473_v1 }
 0x5fa   : > { %15702 = vmatprep.mubr.msk.f32.mxu0 %vm17474_vm2, %v17473_v1  ;;  %15752 = vmatprep.subr.mxu1 %v17473_v1 }
 0x5fc   : > { %15439 = vmatmul.mubr.msk.f32.gmra.mrb[46].mxu1 %vm435_vm1, %v20028_v27  ;;  %15703 = vmatmul.mubr.msk.f32.gmra.mrb[50].mxu0 %vm435_vm1, %v20532_v15  ;;  %v20592_v27 = vld [vmem:[#allocation3 + $0x4a] sm:$0xff] }
 0x5fd   : > { %15441 = vmatprep.mubr.msk.f32.mxu1 %vm17474_vm2, %v17473_v1  ;;  %15705 = vmatprep.mubr.msk.f32.mxu0 %vm17474_vm2, %v17473_v1 }
 0x600   : > { %15442 = vmatmul.mubr.msk.f32.gmra.mrb[48].mxu1 %vm435_vm1, %v20038_v51  ;;  %15706 = vmatmul.mubr.msk.f32.gmra.mrb[52].mxu0 %vm435_vm1, %v20542_v40  ;;  %v20602_v51 = vld [vmem:[#allocation3 + $0x62] sm:$0xff] }
 0x601   : > { %15444 = vmatprep.mubr.msk.f32.mxu1 %vm17474_vm2, %v17473_v1  ;;  %15708 = vmatprep.mubr.msk.f32.mxu0 %vm17474_vm2, %v17473_v1 }
 0x604   : > { %15445 = vmatmul.mubr.msk.f32.gmra.mrb[50].mxu1 %vm435_vm1, %v20048_v58  ;;  %15709 = vmatmul.mubr.msk.f32.gmra.mrb[54].mxu0 %vm435_vm1, %v20552_v57  ;;  %v11152_v58 = vld [vmem:[%s21453_s5 + $0x4] sm:$0xf] }
 0x605   : > { %15447 = vmatprep.mubr.msk.f32.mxu1 %vm17474_vm2, %v17473_v1  ;;  %15711 = vmatprep.mubr.msk.f32.mxu0 %vm17474_vm2, %v17473_v1 }
 0x608   : > { %15448 = vmatmul.mubr.msk.f32.gmra.mrb[52].mxu1 %vm435_vm1, %v20058_v35  ;;  %15712 = vmatmul.mubr.msk.f32.gmra.mrb[56].mxu0 %vm435_vm1, %v20562_v31  ;;  %v9720_v35 = vld [vmem:[%s21453_s5 + $0x4] sm:$0xf] }
 0x609   : > { %15450 = vmatprep.mubr.msk.f32.mxu1 %vm17474_vm2, %v17473_v1  ;;  %15714 = vmatprep.mubr.msk.f32.mxu0 %vm17474_vm2, %v17473_v1 }
 0x60c   : > { %15451 = vmatmul.mubr.msk.f32.gmra.mrb[54].mxu1 %vm435_vm1, %v20068_v7  ;;  %15715 = vmatmul.mubr.msk.f32.gmra.mrb[58].mxu0 %vm435_vm1, %v20572_v5  ;;  %v20619_v7 = vld [vmem:[#allocation3 + $0x6a] sm:$0xff] }
 0x60d   : > { %15453 = vmatprep.mubr.msk.f32.mxu1 %vm17474_vm2, %v17473_v1  ;;  %15717 = vmatprep.mubr.msk.f32.mxu0 %vm17474_vm2, %v17473_v1 }
 0x610   : > { %15454 = vmatmul.mubr.msk.f32.gmra.mrb[56].mxu1 %vm435_vm1, %v20078_v9  ;;  %15718 = vmatmul.mubr.msk.f32.gmra.mrb[60].mxu0 %vm435_vm1, %v20582_v25  ;;  %v20632_v9 = vld [vmem:[#allocation3 + $0x72] sm:$0xff] }
 0x611   : > { %15456 = vmatprep.mubr.msk.f32.mxu1 %vm17474_vm2, %v17473_v1  ;;  %15720 = vmatprep.mubr.msk.f32.mxu0 %vm17474_vm2, %v17473_v1 }
 0x614   : > { %15457 = vmatmul.mubr.msk.f32.gmra.mrb[58].mxu1 %vm435_vm1, %v20088_v43  ;;  %15721 = vmatmul.mubr.msk.f32.gmra.mrb[62].mxu0 %vm435_vm1, %v20592_v27  ;;  %v20642_v43 = vld [vmem:[#allocation3 + $0x7a] sm:$0xff] }
 0x615   : > { %15459 = vmatprep.mubr.msk.f32.mxu1 %vm17474_vm2, %v17473_v1  ;;  %15725 = vmatprep.mubr.msk.f32.mxu0 %vm17474_vm2, %v17473_v1 }
 0x618   : > { %15460 = vmatmul.mubr.msk.f32.gmra.mrb[60].mxu1 %vm435_vm1, %v20490_v63  ;;  %15726 = vmatmul.mubr.msk.f32.vlgmr.msra.gmra.mrb[46].mxu0 %vm435_vm1, %v20602_v51 }
 0x619   : > { %15464 = vmatprep.mubr.msk.f32.mxu1 %vm17474_vm2, %v17473_v1  ;;  %15728 = vmatprep.mubr.msk.f32.mxu0 %vm17474_vm2, %v17473_v1 }
 0x61a   : > { %16014 = vmatpush3.msk.msra.mxu0 %vm494_vm0, %v11152_v58 }
 0x61b   : > { %16042 = vmatprep.subr.mxu0 %v17473_v1 }
 0x61c   : > { %15465 = vmatmul.mubr.msk.f32.vlgmr.msra.gmra.mrb[44].mxu1 %vm435_vm1, %v20502_v62  ;;  %15729 = vmatmul.mubr.msk.f32.gmra.mrb[48].mxu0 %vm435_vm1, %v20619_v7 }
 0x61d   : > { %15753 = vmatpush3.msk.msra.mxu1 %vm494_vm0, %v9720_v35  ;;  %15467 = vmatprep.mubr.msk.f32.mxu1 %vm17474_vm2, %v17473_v1 }
 0x61e   : > { %15731 = vmatprep.mubr.msk.f32.mxu0 %vm17474_vm2, %v17473_v1  ;;  %15781 = vmatprep.subr.mxu1 %v17473_v1 }
 0x620   : > { %15468 = vmatmul.mubr.msk.f32.gmra.mrb[46].mxu1 %vm435_vm1, %v20519_v32  ;;  %15732 = vmatmul.mubr.msk.f32.gmra.mrb[50].mxu0 %vm435_vm1, %v20632_v9 }
 0x621   : > { %15470 = vmatprep.mubr.msk.f32.mxu1 %vm17474_vm2, %v17473_v1  ;;  %15734 = vmatprep.mubr.msk.f32.mxu0 %vm17474_vm2, %v17473_v1 }
 0x624   : > { %15471 = vmatmul.mubr.msk.f32.gmra.mrb[48].mxu1 %vm435_vm1, %v20532_v15  ;;  %15735 = vmatmul.mubr.msk.f32.gmra.mrb[52].mxu0 %vm435_vm1, %v20642_v43 }
 0x625   : > { %15473 = vmatprep.mubr.msk.f32.mxu1 %vm17474_vm2, %v17473_v1  ;;  %15737 = vmatprep.mubr.msk.f32.mxu0 %vm17474_vm2, %v17473_v1 }
 0x628   : > { %15474 = vmatmul.mubr.msk.f32.gmra.mrb[50].mxu1 %vm435_vm1, %v20542_v40  ;;  %15738 = vmatmul.mubr.msk.f32.gmra.mrb[54].mxu0 %vm435_vm1, %v20652_v50 }
 0x629   : > { %15476 = vmatprep.mubr.msk.f32.mxu1 %vm17474_vm2, %v17473_v1  ;;  %15740 = vmatprep.mubr.msk.f32.mxu0 %vm17474_vm2, %v17473_v1 }
 0x62c   : > { %15477 = vmatmul.mubr.msk.f32.gmra.mrb[52].mxu1 %vm435_vm1, %v20552_v57  ;;  %15741 = vmatmul.mubr.msk.f32.gmra.mrb[56].mxu0 %vm435_vm1, %v20662_v48 }
 0x62d   : > { %15479 = vmatprep.mubr.msk.f32.mxu1 %vm17474_vm2, %v17473_v1  ;;  %15743 = vmatprep.mubr.msk.f32.mxu0 %vm17474_vm2, %v17473_v1 }
 0x630   : > { %15480 = vmatmul.mubr.msk.f32.gmra.mrb[54].mxu1 %vm435_vm1, %v20562_v31  ;;  %15744 = vmatmul.mubr.msk.f32.gmra.mrb[58].mxu0 %vm435_vm1, %v20672_v44 }
 0x631   : > { %15482 = vmatprep.mubr.msk.f32.mxu1 %vm17474_vm2, %v17473_v1  ;;  %15746 = vmatprep.mubr.msk.f32.mxu0 %vm17474_vm2, %v17473_v1 }
 0x634   : > { %15483 = vmatmul.mubr.msk.f32.gmra.mrb[56].mxu1 %vm435_vm1, %v20572_v5  ;;  %15747 = vmatmul.mubr.msk.f32.gmra.mrb[60].mxu0 %vm435_vm1, %v20682_v0 }
 0x635   : > { %15485 = vmatprep.mubr.msk.f32.mxu1 %vm17474_vm2, %v17473_v1  ;;  %15749 = vmatprep.mubr.msk.f32.mxu0 %vm17474_vm2, %v17473_v1 }
 0x638   : > { %15486 = vmatmul.mubr.msk.f32.gmra.mrb[58].mxu1 %vm435_vm1, %v20582_v25  ;;  %15750 = vmatmul.mubr.msk.f32.gmra.mrb[62].mxu0 %vm435_vm1, %v20692_v59 }
 0x639   : > { %15488 = vmatprep.mubr.msk.f32.mxu1 %vm17474_vm2, %v17473_v1  ;;  %16015 = vmatprep.mubr.msk.f32.mxu0 %vm17474_vm2, %v17473_v1 }
 0x63c   : > { %15489 = vmatmul.mubr.msk.f32.gmra.mrb[60].mxu1 %vm435_vm1, %v20592_v27  ;;  %16016 = vmatmul.mubr.msk.f32.vlgmr.msra.gmra.mrb[64].mxu0 %vm435_vm1, %v20216_v56 }
 0x63d   : > { %15754 = vmatprep.mubr.msk.f32.mxu1 %vm17474_vm2, %v17473_v1  ;;  %16018 = vmatprep.mubr.msk.f32.mxu0 %vm17474_vm2, %v17473_v1 }
 0x63e   : > { %16043 = vmatpush3.msk.msra.mxu0 %vm494_vm0, %v11142_v19 }
 0x63f   : > { %16071 = vmatprep.subr.mxu0 %v17473_v1 }
 0x640   : > { %15755 = vmatmul.mubr.msk.f32.vlgmr.msra.gmra.mrb[62].mxu1 %vm435_vm1, %v20098_v2  ;;  %16019 = vmatmul.mubr.msk.f32.gmra.mrb[66].mxu0 %vm435_vm1, %v20233_v45 }
 0x641   : > { %15782 = vmatpush3.msk.msra.mxu1 %vm494_vm0, %v9710_v60  ;;  %15757 = vmatprep.mubr.msk.f32.mxu1 %vm17474_vm2, %v17473_v1 }
 0x642   : > { %16021 = vmatprep.mubr.msk.f32.mxu0 %vm17474_vm2, %v17473_v1  ;;  %15810 = vmatprep.subr.mxu1 %v17473_v1 }
 0x644   : > { %15758 = vmatmul.mubr.msk.f32.gmra.mrb[64].mxu1 %vm435_vm1, %v20117_v21  ;;  %16022 = vmatmul.mubr.msk.f32.gmra.mrb[68].mxu0 %vm435_vm1, %v20246_v37 }
 0x645   : > { %15760 = vmatprep.mubr.msk.f32.mxu1 %vm17474_vm2, %v17473_v1  ;;  %16024 = vmatprep.mubr.msk.f32.mxu0 %vm17474_vm2, %v17473_v1 }
 0x648   : > { %15761 = vmatmul.mubr.msk.f32.gmra.mrb[66].mxu1 %vm435_vm1, %v20132_v41  ;;  %16025 = vmatmul.mubr.msk.f32.gmra.mrb[70].mxu0 %vm435_vm1, %v20256_v61 }
 0x649   : > { %15763 = vmatprep.mubr.msk.f32.mxu1 %vm17474_vm2, %v17473_v1  ;;  %16027 = vmatprep.mubr.msk.f32.mxu0 %vm17474_vm2, %v17473_v1 }
 0x64c   : > { %15764 = vmatmul.mubr.msk.f32.gmra.mrb[68].mxu1 %vm435_vm1, %v20144_v14  ;;  %16028 = vmatmul.mubr.msk.f32.gmra.mrb[72].mxu0 %vm435_vm1, %v20266_v8 }
 0x64d   : > { %15766 = vmatprep.mubr.msk.f32.mxu1 %vm17474_vm2, %v17473_v1  ;;  %16030 = vmatprep.mubr.msk.f32.mxu0 %vm17474_vm2, %v17473_v1 }
 0x650   : > { %15767 = vmatmul.mubr.msk.f32.gmra.mrb[70].mxu1 %vm435_vm1, %v20156_v54  ;;  %16031 = vmatmul.mubr.msk.f32.gmra.mrb[74].mxu0 %vm435_vm1, %v20276_v33 }
 0x651   : > { %15769 = vmatprep.mubr.msk.f32.mxu1 %vm17474_vm2, %v17473_v1  ;;  %16033 = vmatprep.mubr.msk.f32.mxu0 %vm17474_vm2, %v17473_v1 }
 0x654   : > { %15770 = vmatmul.mubr.msk.f32.gmra.mrb[72].mxu1 %vm435_vm1, %v20168_v23  ;;  %16034 = vmatmul.mubr.msk.f32.gmra.mrb[76].mxu0 %vm435_vm1, %v20286_v18 }
 0x655   : > { %15772 = vmatprep.mubr.msk.f32.mxu1 %vm17474_vm2, %v17473_v1  ;;  %16036 = vmatprep.mubr.msk.f32.mxu0 %vm17474_vm2, %v17473_v1 }
 0x658   : > { %15773 = vmatmul.mubr.msk.f32.gmra.mrb[74].mxu1 %vm435_vm1, %v20180_v38  ;;  %16037 = vmatmul.mubr.msk.f32.gmra.mrb[78].mxu0 %vm435_vm1, %v20296_v29 }
 0x659   : > { %15775 = vmatprep.mubr.msk.f32.mxu1 %vm17474_vm2, %v17473_v1  ;;  %16039 = vmatprep.mubr.msk.f32.mxu0 %vm17474_vm2, %v17473_v1 }
 0x65c   : > { %15776 = vmatmul.mubr.msk.f32.gmra.mrb[76].mxu1 %vm435_vm1, %v20192_v6  ;;  %16040 = vmatmul.mubr.msk.f32.gmra.mrb[80].mxu0 %vm435_vm1, %v20306_v26 }
 0x65d   : > { %15778 = vmatprep.mubr.msk.f32.mxu1 %vm17474_vm2, %v17473_v1  ;;  %16044 = vmatprep.mubr.msk.f32.mxu0 %vm17474_vm2, %v17473_v1 }
 0x660   : > { %15779 = vmatmul.mubr.msk.f32.gmra.mrb[78].mxu1 %vm435_vm1, %v20204_v28  ;;  %16045 = vmatmul.mubr.msk.f32.vlgmr.msra.gmra.mrb[64].mxu0 %vm435_vm1, %v20098_v2  ;;  %v11601_v2 = vld [vmem:[%s21453_s5 + $0xc] sm:$0xf] }
 0x661   : > { %15783 = vmatprep.mubr.msk.f32.mxu1 %vm17474_vm2, %v17473_v1  ;;  %16047 = vmatprep.mubr.msk.f32.mxu0 %vm17474_vm2, %v17473_v1 }
 0x662   : > { %16072 = vmatpush3.msk.msra.mxu0 %vm494_vm0, %v11442_v53 }
 0x663   : > { %16100 = vmatprep.subr.mxu0 %v17473_v1 }
 0x664   : > { %15784 = vmatmul.mubr.msk.f32.vlgmr.msra.gmra.mrb[62].mxu1 %vm435_vm1, %v20115_v52  ;;  %16048 = vmatmul.mubr.msk.f32.gmra.mrb[66].mxu0 %vm435_vm1, %v20117_v21  ;;  %v10169_v52 = vld [vmem:[%s21453_s5 + $0xc] sm:$0xf]  ;;  %v20948_v21 = vld [vmem:[#allocation3 + $0x61] sm:$0xff] }
 0x665   : > { %15811 = vmatpush3.msk.msra.mxu1 %vm494_vm0, %v10010_v20  ;;  %15786 = vmatprep.mubr.msk.f32.mxu1 %vm17474_vm2, %v17473_v1 }
 0x666   : > { %16050 = vmatprep.mubr.msk.f32.mxu0 %vm17474_vm2, %v17473_v1  ;;  %15839 = vmatprep.subr.mxu1 %v17473_v1 }
 0x668   : > { %15787 = vmatmul.mubr.msk.f32.gmra.mrb[64].mxu1 %vm435_vm1, %v20130_v24  ;;  %16051 = vmatmul.mubr.msk.f32.gmra.mrb[68].mxu0 %vm435_vm1, %v20132_v41  ;;  %v11760_v24 = vld [vmem:[%s21453_s5 + $0x10] sm:$0xf] }
 0x669   : > { %15789 = vmatprep.mubr.msk.f32.mxu1 %vm17474_vm2, %v17473_v1  ;;  %16053 = vmatprep.mubr.msk.f32.mxu0 %vm17474_vm2, %v17473_v1  ;;  %v10328_v41 = vld [vmem:[%s21453_s5 + $0x10] sm:$0xf] }
 0x66c   : > { %15790 = vmatmul.mubr.msk.f32.gmra.mrb[66].mxu1 %vm435_vm1, %v20142_v55  ;;  %16054 = vmatmul.mubr.msk.f32.gmra.mrb[70].mxu0 %vm435_vm1, %v20144_v14  ;;  %v10160_v55 = vld [vmem:[#allocation3 + $0x9] sm:$0xff] }
 0x66d   : > { %15792 = vmatprep.mubr.msk.f32.mxu1 %vm17474_vm2, %v17473_v1  ;;  %16056 = vmatprep.mubr.msk.f32.mxu0 %vm17474_vm2, %v17473_v1  ;;  %v20965_v14 = vld [vmem:[#allocation3 + $0x69] sm:$0xff] }
 0x670   : > { %15793 = vmatmul.mubr.msk.f32.gmra.mrb[68].mxu1 %vm435_vm1, %v20154_v12  ;;  %16057 = vmatmul.mubr.msk.f32.gmra.mrb[72].mxu0 %vm435_vm1, %v20156_v54  ;;  %v10161_v12 = vld [vmem:[#allocation3 + $0x11] sm:$0xff] }
 0x671   : > { %15795 = vmatprep.mubr.msk.f32.mxu1 %vm17474_vm2, %v17473_v1  ;;  %16059 = vmatprep.mubr.msk.f32.mxu0 %vm17474_vm2, %v17473_v1  ;;  %v11594_v54 = vld [vmem:[#allocation3 + $0x71] sm:$0xff] }
 0x674   : > { %15796 = vmatmul.mubr.msk.f32.gmra.mrb[70].mxu1 %vm435_vm1, %v20166_v3  ;;  %16060 = vmatmul.mubr.msk.f32.gmra.mrb[74].mxu0 %vm435_vm1, %v20168_v23  ;;  %v10162_v3 = vld [vmem:[#allocation3 + $0x19] sm:$0xff] }
 0x675   : > { %15798 = vmatprep.mubr.msk.f32.mxu1 %vm17474_vm2, %v17473_v1  ;;  %16062 = vmatprep.mubr.msk.f32.mxu0 %vm17474_vm2, %v17473_v1  ;;  %v11595_v23 = vld [vmem:[#allocation3 + $0x79] sm:$0xff] }
 0x678   : > { %15799 = vmatmul.mubr.msk.f32.gmra.mrb[72].mxu1 %vm435_vm1, %v20178_v4  ;;  %16063 = vmatmul.mubr.msk.f32.gmra.mrb[76].mxu0 %vm435_vm1, %v20180_v38  ;;  %v10163_v4 = vld [vmem:[#allocation3 + $0x21] sm:$0xff] }
 0x679   : > { %15801 = vmatprep.mubr.msk.f32.mxu1 %vm17474_vm2, %v17473_v1  ;;  %16065 = vmatprep.mubr.msk.f32.mxu0 %vm17474_vm2, %v17473_v1  ;;  %v11596_v38 = vld [vmem:[#allocation3 + $0x81] sm:$0xff] }
 0x67c   : > { %15802 = vmatmul.mubr.msk.f32.gmra.mrb[74].mxu1 %vm435_vm1, %v20190_v11  ;;  %16066 = vmatmul.mubr.msk.f32.gmra.mrb[78].mxu0 %vm435_vm1, %v20192_v6  ;;  %v10164_v11 = vld [vmem:[#allocation3 + $0x29] sm:$0xff] }
 0x67d   : > { %15804 = vmatprep.mubr.msk.f32.mxu1 %vm17474_vm2, %v17473_v1  ;;  %16068 = vmatprep.mubr.msk.f32.mxu0 %vm17474_vm2, %v17473_v1  ;;  %v11597_v6 = vld [vmem:[#allocation3 + $0x89] sm:$0xff] }
 0x680   : > { %15805 = vmatmul.mubr.msk.f32.gmra.mrb[76].mxu1 %vm435_vm1, %v20202_v42  ;;  %16069 = vmatmul.mubr.msk.f32.gmra.mrb[80].mxu0 %vm435_vm1, %v20204_v28  ;;  %v10165_v42 = vld [vmem:[#allocation3 + $0x31] sm:$0xff] }
 0x681   : > { %15807 = vmatprep.mubr.msk.f32.mxu1 %vm17474_vm2, %v17473_v1  ;;  %16073 = vmatprep.mubr.msk.f32.mxu0 %vm17474_vm2, %v17473_v1  ;;  %v11598_v28 = vld [vmem:[#allocation3 + $0x91] sm:$0xff] }
 0x684   : > { %15808 = vmatmul.mubr.msk.f32.gmra.mrb[78].mxu1 %vm435_vm1, %v20214_v36  ;;  %16074 = vmatmul.mubr.msk.f32.vlgmr.msra.gmra.mrb[64].mxu0 %vm435_vm1, %v20316_v49  ;;  %v10166_v36 = vld [vmem:[#allocation3 + $0x39] sm:$0xff] }
 0x685   : > { %15812 = vmatprep.mubr.msk.f32.mxu1 %vm17474_vm2, %v17473_v1  ;;  %16076 = vmatprep.mubr.msk.f32.mxu0 %vm17474_vm2, %v17473_v1  ;;  %v12078_v49 = vld [vmem:[%s21453_s5 + $0x18] sm:$0xf] }
 0x686   : > { %16101 = vmatpush3.msk.msra.mxu0 %vm494_vm0, %v11601_v2 }
 0x687   : > { %16129 = vmatprep.subr.mxu0 %v17473_v1 }
 0x688   : > { %15813 = vmatmul.mubr.msk.f32.vlgmr.msra.gmra.mrb[62].mxu1 %vm435_vm1, %v20216_v56  ;;  %16077 = vmatmul.mubr.msk.f32.gmra.mrb[66].mxu0 %vm435_vm1, %v20333_v10  ;;  %v11599_v56 = vld [vmem:[#allocation3 + $0x99] sm:$0xff] }
 0x689   : > { %15840 = vmatpush3.msk.msra.mxu1 %vm494_vm0, %v10169_v52  ;;  %15815 = vmatprep.mubr.msk.f32.mxu1 %vm17474_vm2, %v17473_v1 }
 0x68a   : > { %16079 = vmatprep.mubr.msk.f32.mxu0 %vm17474_vm2, %v17473_v1  ;;  %15868 = vmatprep.subr.mxu1 %v17473_v1 }
 0x68c   : > { %15816 = vmatmul.mubr.msk.f32.gmra.mrb[64].mxu1 %vm435_vm1, %v20233_v45  ;;  %16080 = vmatmul.mubr.msk.f32.gmra.mrb[68].mxu0 %vm435_vm1, %v20346_v39  ;;  %v10167_v45 = vld [vmem:[#allocation3 + $0x41] sm:$0xff] }
 0x68d   : > { %15818 = vmatprep.mubr.msk.f32.mxu1 %vm17474_vm2, %v17473_v1  ;;  %16082 = vmatprep.mubr.msk.f32.mxu0 %vm17474_vm2, %v17473_v1 }
 0x690   : > { %15819 = vmatmul.mubr.msk.f32.gmra.mrb[66].mxu1 %vm435_vm1, %v20246_v37  ;;  %16083 = vmatmul.mubr.msk.f32.gmra.mrb[70].mxu0 %vm435_vm1, %v20356_v47  ;;  %v11919_v37 = vld [vmem:[%s21453_s5 + $0x14] sm:$0xf] }
 0x691   : > { %15821 = vmatprep.mubr.msk.f32.mxu1 %vm17474_vm2, %v17473_v1  ;;  %16085 = vmatprep.mubr.msk.f32.mxu0 %vm17474_vm2, %v17473_v1 }
 0x694   : > { %15822 = vmatmul.mubr.msk.f32.gmra.mrb[68].mxu1 %vm435_vm1, %v20256_v61  ;;  %16086 = vmatmul.mubr.msk.f32.gmra.mrb[72].mxu0 %vm435_vm1, %v20366_v13  ;;  %v10487_v61 = vld [vmem:[%s21453_s5 + $0x14] sm:$0xf] }
 0x695   : > { %15824 = vmatprep.mubr.msk.f32.mxu1 %vm17474_vm2, %v17473_v1  ;;  %16088 = vmatprep.mubr.msk.f32.mxu0 %vm17474_vm2, %v17473_v1 }
 0x698   : > { %15825 = vmatmul.mubr.msk.f32.gmra.mrb[70].mxu1 %vm435_vm1, %v20266_v8  ;;  %16089 = vmatmul.mubr.msk.f32.gmra.mrb[74].mxu0 %vm435_vm1, %v20376_v16  ;;  %v10646_v16 = vld [vmem:[%s21453_s5 + $0x18] sm:$0xf] }
 0x699   : > { %15827 = vmatprep.mubr.msk.f32.mxu1 %vm17474_vm2, %v17473_v1  ;;  %16091 = vmatprep.mubr.msk.f32.mxu0 %vm17474_vm2, %v17473_v1 }
 0x69c   : > { %15828 = vmatmul.mubr.msk.f32.gmra.mrb[72].mxu1 %vm435_vm1, %v20276_v33  ;;  %16092 = vmatmul.mubr.msk.f32.gmra.mrb[76].mxu0 %vm435_vm1, %v20386_v17 }
 0x69d   : > { %15830 = vmatprep.mubr.msk.f32.mxu1 %vm17474_vm2, %v17473_v1  ;;  %16094 = vmatprep.mubr.msk.f32.mxu0 %vm17474_vm2, %v17473_v1 }
 0x6a0   : > { %15831 = vmatmul.mubr.msk.f32.gmra.mrb[74].mxu1 %vm435_vm1, %v20286_v18  ;;  %16095 = vmatmul.mubr.msk.f32.gmra.mrb[78].mxu0 %vm435_vm1, %v20396_v22 }
 0x6a1   : > { %15833 = vmatprep.mubr.msk.f32.mxu1 %vm17474_vm2, %v17473_v1  ;;  %16097 = vmatprep.mubr.msk.f32.mxu0 %vm17474_vm2, %v17473_v1 }
 0x6a4   : > { %15834 = vmatmul.mubr.msk.f32.gmra.mrb[76].mxu1 %vm435_vm1, %v20296_v29  ;;  %16098 = vmatmul.mubr.msk.f32.gmra.mrb[80].mxu0 %vm435_vm1, %v20406_v30 }
 0x6a5   : > { %15836 = vmatprep.mubr.msk.f32.mxu1 %vm17474_vm2, %v17473_v1  ;;  %16102 = vmatprep.mubr.msk.f32.mxu0 %vm17474_vm2, %v17473_v1 }
 0x6a8   : > { %15837 = vmatmul.mubr.msk.f32.gmra.mrb[78].mxu1 %vm435_vm1, %v20306_v26  ;;  %16103 = vmatmul.mubr.msk.f32.vlgmr.msra.gmra.mrb[64].mxu0 %vm435_vm1, %v20948_v21 }
 0x6a9   : > { %15841 = vmatprep.mubr.msk.f32.mxu1 %vm17474_vm2, %v17473_v1  ;;  %16105 = vmatprep.mubr.msk.f32.mxu0 %vm17474_vm2, %v17473_v1 }
 0x6aa   : > { %16130 = vmatpush3.msk.msra.mxu0 %vm494_vm0, %v11760_v24 }
 0x6ab   : > { %16158 = vmatprep.subr.mxu0 %v17473_v1 }
 0x6ac   : > { %15842 = vmatmul.mubr.msk.f32.vlgmr.msra.gmra.mrb[62].mxu1 %vm435_vm1, %v10160_v55  ;;  %16106 = vmatmul.mubr.msk.f32.gmra.mrb[66].mxu0 %vm435_vm1, %v20965_v14 }
 0x6ad   : > { %15869 = vmatpush3.msk.msra.mxu1 %vm494_vm0, %v10328_v41  ;;  %15844 = vmatprep.mubr.msk.f32.mxu1 %vm17474_vm2, %v17473_v1 }
 0x6ae   : > { %16108 = vmatprep.mubr.msk.f32.mxu0 %vm17474_vm2, %v17473_v1  ;;  %15897 = vmatprep.subr.mxu1 %v17473_v1 }
 0x6b0   : > { %15845 = vmatmul.mubr.msk.f32.gmra.mrb[64].mxu1 %vm435_vm1, %v10161_v12  ;;  %16109 = vmatmul.mubr.msk.f32.gmra.mrb[68].mxu0 %vm435_vm1, %v11594_v54 }
 0x6b1   : > { %15847 = vmatprep.mubr.msk.f32.mxu1 %vm17474_vm2, %v17473_v1  ;;  %16111 = vmatprep.mubr.msk.f32.mxu0 %vm17474_vm2, %v17473_v1 }
 0x6b4   : > { %15848 = vmatmul.mubr.msk.f32.gmra.mrb[66].mxu1 %vm435_vm1, %v10162_v3  ;;  %16112 = vmatmul.mubr.msk.f32.gmra.mrb[70].mxu0 %vm435_vm1, %v11595_v23 }
 0x6b5   : > { %15850 = vmatprep.mubr.msk.f32.mxu1 %vm17474_vm2, %v17473_v1  ;;  %16114 = vmatprep.mubr.msk.f32.mxu0 %vm17474_vm2, %v17473_v1 }
 0x6b8   : > { %15851 = vmatmul.mubr.msk.f32.gmra.mrb[68].mxu1 %vm435_vm1, %v10163_v4  ;;  %16115 = vmatmul.mubr.msk.f32.gmra.mrb[72].mxu0 %vm435_vm1, %v11596_v38 }
 0x6b9   : > { %15853 = vmatprep.mubr.msk.f32.mxu1 %vm17474_vm2, %v17473_v1  ;;  %16117 = vmatprep.mubr.msk.f32.mxu0 %vm17474_vm2, %v17473_v1 }
 0x6bc   : > { %15854 = vmatmul.mubr.msk.f32.gmra.mrb[70].mxu1 %vm435_vm1, %v10164_v11  ;;  %16118 = vmatmul.mubr.msk.f32.gmra.mrb[74].mxu0 %vm435_vm1, %v11597_v6 }
 0x6bd   : > { %15856 = vmatprep.mubr.msk.f32.mxu1 %vm17474_vm2, %v17473_v1  ;;  %16120 = vmatprep.mubr.msk.f32.mxu0 %vm17474_vm2, %v17473_v1 }
 0x6c0   : > { %15857 = vmatmul.mubr.msk.f32.gmra.mrb[72].mxu1 %vm435_vm1, %v10165_v42  ;;  %16121 = vmatmul.mubr.msk.f32.gmra.mrb[76].mxu0 %vm435_vm1, %v11598_v28 }
 0x6c1   : > { %15859 = vmatprep.mubr.msk.f32.mxu1 %vm17474_vm2, %v17473_v1  ;;  %16123 = vmatprep.mubr.msk.f32.mxu0 %vm17474_vm2, %v17473_v1 }
 0x6c4   : > { %15860 = vmatmul.mubr.msk.f32.gmra.mrb[74].mxu1 %vm435_vm1, %v10166_v36  ;;  %16124 = vmatmul.mubr.msk.f32.gmra.mrb[78].mxu0 %vm435_vm1, %v11599_v56 }
 0x6c5   : > { %15862 = vmatprep.mubr.msk.f32.mxu1 %vm17474_vm2, %v17473_v1  ;;  %16126 = vmatprep.mubr.msk.f32.mxu0 %vm17474_vm2, %v17473_v1 }
 0x6c8   : > { %15863 = vmatmul.mubr.msk.f32.gmra.mrb[76].mxu1 %vm435_vm1, %v10167_v45  ;;  %16127 = vmatmul.mubr.msk.f32.gmra.mrb[80].mxu0 %vm435_vm1, %v20490_v63 }
 0x6c9   : > { %15865 = vmatprep.mubr.msk.f32.mxu1 %vm17474_vm2, %v17473_v1  ;;  %16131 = vmatprep.mubr.msk.f32.mxu0 %vm17474_vm2, %v17473_v1 }
 0x6cc   : > { %15866 = vmatmul.mubr.msk.f32.gmra.mrb[78].mxu1 %vm435_vm1, %v20500_v34  ;;  %16132 = vmatmul.mubr.msk.f32.vlgmr.msra.gmra.mrb[64].mxu0 %vm435_vm1, %v20502_v62 }
 0x6cd   : > { %15870 = vmatprep.mubr.msk.f32.mxu1 %vm17474_vm2, %v17473_v1  ;;  %16134 = vmatprep.mubr.msk.f32.mxu0 %vm17474_vm2, %v17473_v1 }
 0x6ce   : > { %16159 = vmatpush3.msk.msra.mxu0 %vm494_vm0, %v11919_v37  ;;  %v21238_v37 = vld [vmem:[#allocation3 + $0x119] sm:$0xff] }
 0x6cf   : > { %16187 = vmatprep.subr.mxu0 %v17473_v1 }
 0x6d0   : > { %15871 = vmatmul.mubr.msk.f32.vlgmr.msra.gmra.mrb[62].mxu1 %vm435_vm1, %v20948_v21  ;;  %16135 = vmatmul.mubr.msk.f32.gmra.mrb[66].mxu0 %vm435_vm1, %v20519_v32 }
 0x6d1   : > { %15898 = vmatpush3.msk.msra.mxu1 %vm494_vm0, %v10487_v61  ;;  %15873 = vmatprep.mubr.msk.f32.mxu1 %vm17474_vm2, %v17473_v1  ;;  %v12071_v61 = vld [vmem:[#allocation3 + $0x121] sm:$0xff] }
 0x6d2   : > { %16137 = vmatprep.mubr.msk.f32.mxu0 %vm17474_vm2, %v17473_v1  ;;  %15926 = vmatprep.subr.mxu1 %v17473_v1 }
 0x6d4   : > { %15874 = vmatmul.mubr.msk.f32.gmra.mrb[64].mxu1 %vm435_vm1, %v20965_v14  ;;  %16138 = vmatmul.mubr.msk.f32.gmra.mrb[68].mxu0 %vm435_vm1, %v20532_v15 }
 0x6d5   : > { %15876 = vmatprep.mubr.msk.f32.mxu1 %vm17474_vm2, %v17473_v1  ;;  %16140 = vmatprep.mubr.msk.f32.mxu0 %vm17474_vm2, %v17473_v1 }
 0x6d8   : > { %15877 = vmatmul.mubr.msk.f32.gmra.mrb[66].mxu1 %vm435_vm1, %v11594_v54  ;;  %16141 = vmatmul.mubr.msk.f32.gmra.mrb[70].mxu0 %vm435_vm1, %v20542_v40 }
 0x6d9   : > { %15879 = vmatprep.mubr.msk.f32.mxu1 %vm17474_vm2, %v17473_v1  ;;  %16143 = vmatprep.mubr.msk.f32.mxu0 %vm17474_vm2, %v17473_v1 }
 0x6dc   : > { %15880 = vmatmul.mubr.msk.f32.gmra.mrb[68].mxu1 %vm435_vm1, %v11595_v23  ;;  %16144 = vmatmul.mubr.msk.f32.gmra.mrb[72].mxu0 %vm435_vm1, %v20552_v57 }
 0x6dd   : > { %15882 = vmatprep.mubr.msk.f32.mxu1 %vm17474_vm2, %v17473_v1  ;;  %16146 = vmatprep.mubr.msk.f32.mxu0 %vm17474_vm2, %v17473_v1 }
 0x6e0   : > { %15883 = vmatmul.mubr.msk.f32.gmra.mrb[70].mxu1 %vm435_vm1, %v11596_v38  ;;  %16147 = vmatmul.mubr.msk.f32.gmra.mrb[74].mxu0 %vm435_vm1, %v20562_v31 }
 0x6e1   : > { %15885 = vmatprep.mubr.msk.f32.mxu1 %vm17474_vm2, %v17473_v1  ;;  %16149 = vmatprep.mubr.msk.f32.mxu0 %vm17474_vm2, %v17473_v1 }
 0x6e4   : > { %15886 = vmatmul.mubr.msk.f32.gmra.mrb[72].mxu1 %vm435_vm1, %v11597_v6  ;;  %16150 = vmatmul.mubr.msk.f32.gmra.mrb[76].mxu0 %vm435_vm1, %v20572_v5 }
 0x6e5   : > { %15888 = vmatprep.mubr.msk.f32.mxu1 %vm17474_vm2, %v17473_v1  ;;  %16152 = vmatprep.mubr.msk.f32.mxu0 %vm17474_vm2, %v17473_v1 }
 0x6e8   : > { %15889 = vmatmul.mubr.msk.f32.gmra.mrb[74].mxu1 %vm435_vm1, %v11598_v28  ;;  %16153 = vmatmul.mubr.msk.f32.gmra.mrb[78].mxu0 %vm435_vm1, %v20582_v25 }
 0x6e9   : > { %15891 = vmatprep.mubr.msk.f32.mxu1 %vm17474_vm2, %v17473_v1  ;;  %16155 = vmatprep.mubr.msk.f32.mxu0 %vm17474_vm2, %v17473_v1 }
 0x6eb   : > { %v9629_v8 = vpop.f32.mrb[46].mxu0 }
 0x6ec   : > { %v9682_v33 = vmax.f32 %v9629_v8, 0.0  ;;  %v15727_v18 = vpop.f32.mrb[47].mxu0  ;;  %15892 = vmatmul.mubr.msk.f32.gmra.mrb[76].mxu1 %vm435_vm1, %v11599_v56  ;;  %16156 = vmatmul.mubr.msk.f32.gmra.mrb[80].mxu0 %vm435_vm1, %v20592_v27  ;;  %v10639_v8 = vld [vmem:[#allocation3 + $0xc9] sm:$0xff] }
 0x6ed   : > { %15894 = vmatprep.mubr.msk.f32.mxu1 %vm17474_vm2, %v17473_v1  ;;  %16160 = vmatprep.mubr.msk.f32.mxu0 %vm17474_vm2, %v17473_v1  ;;  %v10640_v18 = vld [vmem:[#allocation3 + $0xd1] sm:$0xff] }
 0x6ee   : > { %13218 = vst.msk [vmem:[%s21094_s30 + $0x48] sm:$0xff] %vm435_vm1, %v9682_v33  ;;  %v12072_v33 = vld [vmem:[#allocation3 + $0x129] sm:$0xff] }
 0x6ef   : > { %v8198_v29 = vpop.f32.mrb[44].mxu1  ;;  %v9634_v26 = vpop.f32.mrb[48].mxu0 }
 0x6f0   : > { %v8251_v10 = vmax.f32 %v8198_v29, 0.0  ;;  %v9683_v39 = vmax.f32 %v9634_v26, 0.0  ;;  %v15466_v47 = vpop.f32.mrb[45].mxu1  ;;  %v15730_v13 = vpop.f32.mrb[49].mxu0  ;;  %15895 = vmatmul.mubr.msk.f32.gmra.mrb[78].mxu1 %vm435_vm1, %v20490_v63  ;;  %16161 = vmatmul.mubr.msk.f32.vlgmr.msra.gmra.mrb[64].mxu0 %vm435_vm1, %v20602_v51  ;;  %v12073_v29 = vld [vmem:[#allocation3 + $0x131] sm:$0xff]  ;;  %v10641_v26 = vld [vmem:[#allocation3 + $0xd9] sm:$0xff] }
 0x6f1   : > { %15899 = vmatprep.mubr.msk.f32.mxu1 %vm17474_vm2, %v17473_v1  ;;  %16163 = vmatprep.mubr.msk.f32.mxu0 %vm17474_vm2, %v17473_v1  ;;  %v10643_v47 = vld [vmem:[#allocation3 + $0xe9] sm:$0xff] }
 0x6f2   : > { %8260 = vst.msk [vmem:[%s21094_s30] sm:$0xff] %vm435_vm1, %v8251_v10  ;;  %13219 = vst.msk [vmem:[%s21094_s30 + $0x50] sm:$0xff] %vm435_vm1, %v9683_v39  ;;  %16188 = vmatpush3.msk.msra.mxu0 %vm494_vm0, %v12078_v49  ;;  %v12074_v49 = vld [vmem:[#allocation3 + $0x139] sm:$0xff]  ;;  %v10642_v10 = vld [vmem:[#allocation3 + $0xe1] sm:$0xff] }
 0x6f3   : > { %v8203_v17 = vpop.f32.mrb[46].mxu1  ;;  %v9639_v22 = vpop.f32.mrb[50].mxu0  ;;  %16216 = vmatprep.subr.mxu0 %v17473_v1  ;;  %v12075_v39 = vld [vmem:[#allocation3 + $0x141] sm:$0xff]  ;;  %v12076_v13 = vld [vmem:[#allocation3 + $0x149] sm:$0xff] }
 0x6f4   : > { %v8252_v30 = vmax.f32 %v8203_v17, 0.0  ;;  %v9684_v63 = vmax.f32 %v9639_v22, 0.0  ;;  %v15469_v34 = vpop.f32.mrb[47].mxu1  ;;  %v15733_v46 = vpop.f32.mrb[51].mxu0  ;;  %15900 = vmatmul.mubr.msk.f32.vlgmr.msra.gmra.mrb[62].mxu1 %vm435_vm1, %v20502_v62  ;;  %16164 = vmatmul.mubr.msk.f32.gmra.mrb[66].mxu0 %vm435_vm1, %v20619_v7  ;;  %v10644_v17 = vld [vmem:[#allocation3 + $0xf1] sm:$0xff]  ;;  %v10645_v22 = vld [vmem:[#allocation3 + $0xf9] sm:$0xff] }
 0x6f5   : > { %15927 = vmatpush3.msk.msra.mxu1 %vm494_vm0, %v10646_v16  ;;  %15902 = vmatprep.mubr.msk.f32.mxu1 %vm17474_vm2, %v17473_v1  ;;  %v12077_v16 = vld [vmem:[#allocation3 + $0x151] sm:$0xff]  ;;  %v10964_v34 = vld [vmem:[%s21453_s5 + $0x20] sm:$0xf] }
 0x6f6   : > { %8261 = vst.msk [vmem:[%s21094_s30 + $0x8] sm:$0xff] %vm435_vm1, %v8252_v30  ;;  %13220 = vst.msk [vmem:[%s21094_s30 + $0x58] sm:$0xff] %vm435_vm1, %v9684_v63  ;;  %16166 = vmatprep.mubr.msk.f32.mxu0 %vm17474_vm2, %v17473_v1  ;;  %15955 = vmatprep.subr.mxu1 %v17473_v1  ;;  %v12228_v30 = vld [vmem:[#allocation3 + $0xba] sm:$0xff]  ;;  %v12229_v46 = vld [vmem:[#allocation3 + $0xc2] sm:$0xff] }
 0x6f7   : > { %v8208_v62 = vpop.f32.mrb[48].mxu1  ;;  %v9644_v51 = vpop.f32.mrb[52].mxu0  ;;  %v12396_v63 = vld [vmem:[%s21453_s5 + $0x20] sm:$0xf] }
 0x6f8   : > { %v8253_v58 = vmax.f32 %v8208_v62, 0.0  ;;  %v9685_v35 = vmax.f32 %v9644_v51, 0.0  ;;  %v15472_v7 = vpop.f32.mrb[49].mxu1  ;;  %v15736_v19 = vpop.f32.mrb[53].mxu0  ;;  %15903 = vmatmul.mubr.msk.f32.gmra.mrb[64].mxu1 %vm435_vm1, %v20519_v32  ;;  %16167 = vmatmul.mubr.msk.f32.gmra.mrb[68].mxu0 %vm435_vm1, %v20632_v9  ;;  %v12230_v62 = vld [vmem:[#allocation3 + $0xca] sm:$0xff]  ;;  %v12231_v51 = vld [vmem:[#allocation3 + $0xd2] sm:$0xff] }
 0x6f9   : > { %15905 = vmatprep.mubr.msk.f32.mxu1 %vm17474_vm2, %v17473_v1  ;;  %16169 = vmatprep.mubr.msk.f32.mxu0 %vm17474_vm2, %v17473_v1  ;;  %v12234_v7 = vld [vmem:[#allocation3 + $0xea] sm:$0xff]  ;;  %v12235_v19 = vld [vmem:[#allocation3 + $0xf2] sm:$0xff] }
 0x6fa   : > { %8262 = vst.msk [vmem:[%s21094_s30 + $0x10] sm:$0xff] %vm435_vm1, %v8253_v58  ;;  %13221 = vst.msk [vmem:[%s21094_s30 + $0x60] sm:$0xff] %vm435_vm1, %v9685_v35  ;;  %v12232_v58 = vld [vmem:[#allocation3 + $0xda] sm:$0xff]  ;;  %v12233_v35 = vld [vmem:[#allocation3 + $0xe2] sm:$0xff] }
 0x6fb   : > { %v8213_v60 = vpop.f32.mrb[50].mxu1  ;;  %v9649_v53 = vpop.f32.mrb[54].mxu0 }
 0x6fc   : > { %v8254_v20 = vmax.f32 %v8213_v60, 0.0  ;;  %v9686_v2 = vmax.f32 %v9649_v53, 0.0  ;;  %v15475_v32 = vpop.f32.mrb[51].mxu1  ;;  %v15739_v52 = vpop.f32.mrb[55].mxu0  ;;  %15906 = vmatmul.mubr.msk.f32.gmra.mrb[66].mxu1 %vm435_vm1, %v20532_v15  ;;  %16170 = vmatmul.mubr.msk.f32.gmra.mrb[70].mxu0 %vm435_vm1, %v20642_v43  ;;  %v12236_v60 = vld [vmem:[#allocation3 + $0xfa] sm:$0xff]  ;;  %v12387_v53 = vld [vmem:[#allocation3 + $0x112] sm:$0xff] }
 0x6fd   : > { %15908 = vmatprep.mubr.msk.f32.mxu1 %vm17474_vm2, %v17473_v1  ;;  %16172 = vmatprep.mubr.msk.f32.mxu0 %vm17474_vm2, %v17473_v1  ;;  %v12390_v32 = vld [vmem:[#allocation3 + $0x12a] sm:$0xff]  ;;  %v12391_v52 = vld [vmem:[#allocation3 + $0x132] sm:$0xff] }
 0x6fe   : > { %8263 = vst.msk [vmem:[%s21094_s30 + $0x18] sm:$0xff] %vm435_vm1, %v8254_v20  ;;  %13222 = vst.msk [vmem:[%s21094_s30 + $0x68] sm:$0xff] %vm435_vm1, %v9686_v2  ;;  %v12388_v20 = vld [vmem:[#allocation3 + $0x11a] sm:$0xff]  ;;  %v12389_v2 = vld [vmem:[#allocation3 + $0x122] sm:$0xff] }
 0x6ff   : > { %v8218_v9 = vpop.f32.mrb[52].mxu1  ;;  %v9654_v21 = vpop.f32.mrb[56].mxu0 }
 0x700   : > { %v8255_v24 = vmax.f32 %v8218_v9, 0.0  ;;  %v9687_v41 = vmax.f32 %v9654_v21, 0.0  ;;  %v15478_v15 = vpop.f32.mrb[53].mxu1  ;;  %v15742_v55 = vpop.f32.mrb[57].mxu0  ;;  %15909 = vmatmul.mubr.msk.f32.gmra.mrb[68].mxu1 %vm435_vm1, %v20542_v40  ;;  %16173 = vmatmul.mubr.msk.f32.gmra.mrb[72].mxu0 %vm435_vm1, %v20652_v50  ;;  %v12392_v9 = vld [vmem:[#allocation3 + $0x13a] sm:$0xff]  ;;  %v12393_v21 = vld [vmem:[#allocation3 + $0x142] sm:$0xff] }
 0x701   : > { %15911 = vmatprep.mubr.msk.f32.mxu1 %vm17474_vm2, %v17473_v1  ;;  %16175 = vmatprep.mubr.msk.f32.mxu0 %vm17474_vm2, %v17473_v1 }
 0x702   : > { %8264 = vst.msk [vmem:[%s21094_s30 + $0x20] sm:$0xff] %vm435_vm1, %v8255_v24  ;;  %13223 = vst.msk [vmem:[%s21094_s30 + $0x70] sm:$0xff] %vm435_vm1, %v9687_v41  ;;  %v12394_v24 = vld [vmem:[#allocation3 + $0x14a] sm:$0xff]  ;;  %v12395_v41 = vld [vmem:[#allocation3 + $0x152] sm:$0xff] }
 0x703   : > { %v8223_v43 = vpop.f32.mrb[54].mxu1  ;;  %v9659_v14 = vpop.f32.mrb[58].mxu0 }
 0x704   : > { %v8256_v12 = vmax.f32 %v8223_v43, 0.0  ;;  %v9688_v54 = vmax.f32 %v9659_v14, 0.0  ;;  %v15481_v40 = vpop.f32.mrb[55].mxu1  ;;  %v15745_v3 = vpop.f32.mrb[59].mxu0  ;;  %15912 = vmatmul.mubr.msk.f32.gmra.mrb[70].mxu1 %vm435_vm1, %v20552_v57  ;;  %16176 = vmatmul.mubr.msk.f32.gmra.mrb[74].mxu0 %vm435_vm1, %v20662_v48 }
 0x705   : > { %15914 = vmatprep.mubr.msk.f32.mxu1 %vm17474_vm2, %v17473_v1  ;;  %16178 = vmatprep.mubr.msk.f32.mxu0 %vm17474_vm2, %v17473_v1 }
 0x706   : > { %8265 = vst.msk [vmem:[%s21094_s30 + $0x28] sm:$0xff] %vm435_vm1, %v8256_v12  ;;  %13224 = vst.msk [vmem:[%s21094_s30 + $0x78] sm:$0xff] %vm435_vm1, %v9688_v54 }
 0x707   : > { %v8228_v50 = vpop.f32.mrb[56].mxu1  ;;  %v9664_v23 = vpop.f32.mrb[60].mxu0 }
 0x708   : > { %v8257_v4 = vmax.f32 %v8228_v50, 0.0  ;;  %v9689_v38 = vmax.f32 %v9664_v23, 0.0  ;;  %v15484_v57 = vpop.f32.mrb[57].mxu1  ;;  %v15748_v11 = vpop.f32.mrb[61].mxu0  ;;  %15915 = vmatmul.mubr.msk.f32.gmra.mrb[72].mxu1 %vm435_vm1, %v20562_v31  ;;  %16179 = vmatmul.mubr.msk.f32.gmra.mrb[76].mxu0 %vm435_vm1, %v20672_v44 }
 0x709   : > { %15917 = vmatprep.mubr.msk.f32.mxu1 %vm17474_vm2, %v17473_v1  ;;  %16181 = vmatprep.mubr.msk.f32.mxu0 %vm17474_vm2, %v17473_v1 }
 0x70a   : > { %8266 = vst.msk [vmem:[%s21094_s30 + $0x30] sm:$0xff] %vm435_vm1, %v8257_v4  ;;  %13225 = vst.msk [vmem:[%s21094_s30 + $0x80] sm:$0xff] %vm435_vm1, %v9689_v38 }
 0x70b   : > { %v8233_v48 = vpop.f32.mrb[58].mxu1  ;;  %v9669_v6 = vpop.f32.mrb[62].mxu0 }
 0x70c   : > { %v8258_v42 = vmax.f32 %v8233_v48, 0.0  ;;  %v9690_v28 = vmax.f32 %v9669_v6, 0.0  ;;  %v15487_v31 = vpop.f32.mrb[59].mxu1  ;;  %v15751_v36 = vpop.f32.mrb[63].mxu0  ;;  %15918 = vmatmul.mubr.msk.f32.gmra.mrb[74].mxu1 %vm435_vm1, %v20572_v5  ;;  %16182 = vmatmul.mubr.msk.f32.gmra.mrb[78].mxu0 %vm435_vm1, %v20682_v0  ;;  %v21221_v5 = vld [vmem:[#allocation3 + $0x111] sm:$0xff] }
 0x70d   : > { %15920 = vmatprep.mubr.msk.f32.mxu1 %vm17474_vm2, %v17473_v1  ;;  %16184 = vmatprep.mubr.msk.f32.mxu0 %vm17474_vm2, %v17473_v1  ;;  %v12237_v0 = vld [vmem:[%s21453_s5 + $0x1c] sm:$0xf] }
 0x70e   : > { %8267 = vst.msk [vmem:[%s21094_s30 + $0x38] sm:$0xff] %vm435_vm1, %v8258_v42  ;;  %13226 = vst.msk [vmem:[%s21094_s30 + $0x88] sm:$0xff] %vm435_vm1, %v9690_v28 }
 0x70f   : > { %v8238_v44 = vpop.f32.mrb[60].mxu1 }
 0x710   : > { %v8259_v56 = vmax.f32 %v8238_v44, 0.0  ;;  %v15490_v45 = vpop.f32.mrb[61].mxu1  ;;  %15921 = vmatmul.mubr.msk.f32.gmra.mrb[76].mxu1 %vm435_vm1, %v20582_v25  ;;  %16185 = vmatmul.mubr.msk.f32.gmra.mrb[80].mxu0 %vm435_vm1, %v20692_v59  ;;  %v10805_v25 = vld [vmem:[%s21453_s5 + $0x1c] sm:$0xf] }
 0x711   : > { %15923 = vmatprep.mubr.msk.f32.mxu1 %vm17474_vm2, %v17473_v1  ;;  %16189 = vmatprep.mubr.msk.f32.mxu0 %vm17474_vm2, %v17473_v1  ;;  %v10637_v59 = vld [vmem:[#allocation3 + $0xb9] sm:$0xff] }
 0x712   : > { %8268 = vst.msk [vmem:[%s21094_s30 + $0x40] sm:$0xff] %vm435_vm1, %v8259_v56 }
 0x714   : > { %15924 = vmatmul.mubr.msk.f32.gmra.mrb[78].mxu1 %vm435_vm1, %v20592_v27  ;;  %16190 = vmatmul.mubr.msk.f32.vlgmr.msra.gmra.mrb[64].mxu0 %vm435_vm1, %v21221_v5  ;;  %v10638_v27 = vld [vmem:[#allocation3 + $0xc1] sm:$0xff] }
 0x715   : > { %15928 = vmatprep.mubr.msk.f32.mxu1 %vm17474_vm2, %v17473_v1  ;;  %16192 = vmatprep.mubr.msk.f32.mxu0 %vm17474_vm2, %v17473_v1 }
 0x716   : > { %16217 = vmatpush3.msk.msra.mxu0 %vm494_vm0, %v12237_v0 }
 0x717   : > { %16245 = vmatprep.subr.mxu0 %v17473_v1 }
 0x718   : > { %15929 = vmatmul.mubr.msk.f32.vlgmr.msra.gmra.mrb[62].mxu1 %vm435_vm1, %v10637_v59  ;;  %16193 = vmatmul.mubr.msk.f32.gmra.mrb[66].mxu0 %vm435_vm1, %v21238_v37 }
 0x719   : > { %15956 = vmatpush3.msk.msra.mxu1 %vm494_vm0, %v10805_v25  ;;  %15931 = vmatprep.mubr.msk.f32.mxu1 %vm17474_vm2, %v17473_v1 }
 0x71a   : > { %16195 = vmatprep.mubr.msk.f32.mxu0 %vm17474_vm2, %v17473_v1  ;;  %15984 = vmatprep.subr.mxu1 %v17473_v1 }
 0x71c   : > { %15932 = vmatmul.mubr.msk.f32.gmra.mrb[64].mxu1 %vm435_vm1, %v10638_v27  ;;  %16196 = vmatmul.mubr.msk.f32.gmra.mrb[68].mxu0 %vm435_vm1, %v12071_v61 }
 0x71d   : > { %15934 = vmatprep.mubr.msk.f32.mxu1 %vm17474_vm2, %v17473_v1  ;;  %16198 = vmatprep.mubr.msk.f32.mxu0 %vm17474_vm2, %v17473_v1 }
 0x720   : > { %15935 = vmatmul.mubr.msk.f32.gmra.mrb[66].mxu1 %vm435_vm1, %v10639_v8  ;;  %16199 = vmatmul.mubr.msk.f32.gmra.mrb[70].mxu0 %vm435_vm1, %v12072_v33 }
 0x721   : > { %15937 = vmatprep.mubr.msk.f32.mxu1 %vm17474_vm2, %v17473_v1  ;;  %16201 = vmatprep.mubr.msk.f32.mxu0 %vm17474_vm2, %v17473_v1 }
 0x724   : > { %15938 = vmatmul.mubr.msk.f32.gmra.mrb[68].mxu1 %vm435_vm1, %v10640_v18  ;;  %16202 = vmatmul.mubr.msk.f32.gmra.mrb[72].mxu0 %vm435_vm1, %v12073_v29 }
 0x725   : > { %15940 = vmatprep.mubr.msk.f32.mxu1 %vm17474_vm2, %v17473_v1  ;;  %16204 = vmatprep.mubr.msk.f32.mxu0 %vm17474_vm2, %v17473_v1 }
 0x728   : > { %15941 = vmatmul.mubr.msk.f32.gmra.mrb[70].mxu1 %vm435_vm1, %v10641_v26  ;;  %16205 = vmatmul.mubr.msk.f32.gmra.mrb[74].mxu0 %vm435_vm1, %v12074_v49 }
 0x729   : > { %15943 = vmatprep.mubr.msk.f32.mxu1 %vm17474_vm2, %v17473_v1  ;;  %16207 = vmatprep.mubr.msk.f32.mxu0 %vm17474_vm2, %v17473_v1 }
 0x72c   : > { %15944 = vmatmul.mubr.msk.f32.gmra.mrb[72].mxu1 %vm435_vm1, %v10642_v10  ;;  %16208 = vmatmul.mubr.msk.f32.gmra.mrb[76].mxu0 %vm435_vm1, %v12075_v39 }
 0x72d   : > { %15946 = vmatprep.mubr.msk.f32.mxu1 %vm17474_vm2, %v17473_v1  ;;  %16210 = vmatprep.mubr.msk.f32.mxu0 %vm17474_vm2, %v17473_v1 }
 0x730   : > { %15947 = vmatmul.mubr.msk.f32.gmra.mrb[74].mxu1 %vm435_vm1, %v10643_v47  ;;  %16211 = vmatmul.mubr.msk.f32.gmra.mrb[78].mxu0 %vm435_vm1, %v12076_v13 }
 0x731   : > { %15949 = vmatprep.mubr.msk.f32.mxu1 %vm17474_vm2, %v17473_v1  ;;  %16213 = vmatprep.mubr.msk.f32.mxu0 %vm17474_vm2, %v17473_v1 }
 0x734   : > { %15950 = vmatmul.mubr.msk.f32.gmra.mrb[76].mxu1 %vm435_vm1, %v10644_v17  ;;  %16214 = vmatmul.mubr.msk.f32.gmra.mrb[80].mxu0 %vm435_vm1, %v12077_v16 }
 0x735   : > { %15952 = vmatprep.mubr.msk.f32.mxu1 %vm17474_vm2, %v17473_v1  ;;  %16218 = vmatprep.mubr.msk.f32.mxu0 %vm17474_vm2, %v17473_v1 }
 0x738   : > { %15953 = vmatmul.mubr.msk.f32.gmra.mrb[78].mxu1 %vm435_vm1, %v10645_v22  ;;  %16219 = vmatmul.mubr.msk.f32.vlgmr.msra.gmra.mrb[64].mxu0 %vm435_vm1, %v12228_v30 }
 0x739   : > { %15957 = vmatprep.mubr.msk.f32.mxu1 %vm17474_vm2, %v17473_v1  ;;  %16221 = vmatprep.mubr.msk.f32.mxu0 %vm17474_vm2, %v17473_v1 }
 0x73a   : > { %16246 = vmatpush3.msk.msra.mxu0 %vm494_vm0, %v12396_v63 }
 0x73c   : > { %15958 = vmatmul.mubr.msk.f32.vlgmr.msra.gmra.mrb[62].mxu1 %vm435_vm1, %v21221_v5  ;;  %16222 = vmatmul.mubr.msk.f32.gmra.mrb[66].mxu0 %vm435_vm1, %v12229_v46 }
 0x73d   : > { %15985 = vmatpush3.msk.msra.mxu1 %vm494_vm0, %v10964_v34  ;;  %15960 = vmatprep.mubr.msk.f32.mxu1 %vm17474_vm2, %v17473_v1 }
 0x73e   : > { %16224 = vmatprep.mubr.msk.f32.mxu0 %vm17474_vm2, %v17473_v1 }
 0x740   : > { %15961 = vmatmul.mubr.msk.f32.gmra.mrb[64].mxu1 %vm435_vm1, %v21238_v37  ;;  %16225 = vmatmul.mubr.msk.f32.gmra.mrb[68].mxu0 %vm435_vm1, %v12230_v62 }
 0x741   : > { %15963 = vmatprep.mubr.msk.f32.mxu1 %vm17474_vm2, %v17473_v1  ;;  %16227 = vmatprep.mubr.msk.f32.mxu0 %vm17474_vm2, %v17473_v1 }
 0x744   : > { %15964 = vmatmul.mubr.msk.f32.gmra.mrb[66].mxu1 %vm435_vm1, %v12071_v61  ;;  %16228 = vmatmul.mubr.msk.f32.gmra.mrb[70].mxu0 %vm435_vm1, %v12231_v51 }
 0x745   : > { %15966 = vmatprep.mubr.msk.f32.mxu1 %vm17474_vm2, %v17473_v1  ;;  %16230 = vmatprep.mubr.msk.f32.mxu0 %vm17474_vm2, %v17473_v1 }
 0x748   : > { %15967 = vmatmul.mubr.msk.f32.gmra.mrb[68].mxu1 %vm435_vm1, %v12072_v33  ;;  %16231 = vmatmul.mubr.msk.f32.gmra.mrb[72].mxu0 %vm435_vm1, %v12232_v58 }
 0x749   : > { %15969 = vmatprep.mubr.msk.f32.mxu1 %vm17474_vm2, %v17473_v1  ;;  %16233 = vmatprep.mubr.msk.f32.mxu0 %vm17474_vm2, %v17473_v1 }
 0x74c   : > { %15970 = vmatmul.mubr.msk.f32.gmra.mrb[70].mxu1 %vm435_vm1, %v12073_v29  ;;  %16234 = vmatmul.mubr.msk.f32.gmra.mrb[74].mxu0 %vm435_vm1, %v12233_v35 }
 0x74d   : > { %15972 = vmatprep.mubr.msk.f32.mxu1 %vm17474_vm2, %v17473_v1  ;;  %16236 = vmatprep.mubr.msk.f32.mxu0 %vm17474_vm2, %v17473_v1 }
 0x750   : > { %15973 = vmatmul.mubr.msk.f32.gmra.mrb[72].mxu1 %vm435_vm1, %v12074_v49  ;;  %16237 = vmatmul.mubr.msk.f32.gmra.mrb[76].mxu0 %vm435_vm1, %v12234_v7 }
 0x751   : > { %15975 = vmatprep.mubr.msk.f32.mxu1 %vm17474_vm2, %v17473_v1  ;;  %16239 = vmatprep.mubr.msk.f32.mxu0 %vm17474_vm2, %v17473_v1 }
 0x754   : > { %15976 = vmatmul.mubr.msk.f32.gmra.mrb[74].mxu1 %vm435_vm1, %v12075_v39  ;;  %16240 = vmatmul.mubr.msk.f32.gmra.mrb[78].mxu0 %vm435_vm1, %v12235_v19 }
 0x755   : > { %15978 = vmatprep.mubr.msk.f32.mxu1 %vm17474_vm2, %v17473_v1  ;;  %16242 = vmatprep.mubr.msk.f32.mxu0 %vm17474_vm2, %v17473_v1 }
 0x758   : > { %15979 = vmatmul.mubr.msk.f32.gmra.mrb[76].mxu1 %vm435_vm1, %v12076_v13  ;;  %16243 = vmatmul.mubr.msk.f32.gmra.mrb[80].mxu0 %vm435_vm1, %v12236_v60 }
 0x759   : > { %15981 = vmatprep.mubr.msk.f32.mxu1 %vm17474_vm2, %v17473_v1  ;;  %16247 = vmatprep.mubr.msk.f32.mxu0 %vm17474_vm2, %v17473_v1 }
 0x75c   : > { %15982 = vmatmul.mubr.msk.f32.gmra.mrb[78].mxu1 %vm435_vm1, %v12077_v16  ;;  %16248 = vmatmul.mubr.msk.f32.vlgmr.msra.gmra.mrb[64].mxu0 %vm435_vm1, %v12387_v53 }
 0x75d   : > { %15986 = vmatprep.mubr.msk.f32.mxu1 %vm17474_vm2, %v17473_v1  ;;  %16250 = vmatprep.mubr.msk.f32.mxu0 %vm17474_vm2, %v17473_v1 }
 0x760   : > { %15987 = vmatmul.mubr.msk.f32.vlgmr.msra.gmra.mrb[62].mxu1 %vm435_vm1, %v12228_v30  ;;  %16251 = vmatmul.mubr.msk.f32.gmra.mrb[66].mxu0 %vm435_vm1, %v12388_v20 }
 0x761   : > { %15989 = vmatprep.mubr.msk.f32.mxu1 %vm17474_vm2, %v17473_v1  ;;  %16253 = vmatprep.mubr.msk.f32.mxu0 %vm17474_vm2, %v17473_v1 }
 0x764   : > { %15990 = vmatmul.mubr.msk.f32.gmra.mrb[64].mxu1 %vm435_vm1, %v12229_v46  ;;  %16254 = vmatmul.mubr.msk.f32.gmra.mrb[68].mxu0 %vm435_vm1, %v12389_v2 }
 0x765   : > { %15992 = vmatprep.mubr.msk.f32.mxu1 %vm17474_vm2, %v17473_v1  ;;  %16256 = vmatprep.mubr.msk.f32.mxu0 %vm17474_vm2, %v17473_v1 }
 0x768   : > { %15993 = vmatmul.mubr.msk.f32.gmra.mrb[66].mxu1 %vm435_vm1, %v12230_v62  ;;  %16257 = vmatmul.mubr.msk.f32.gmra.mrb[70].mxu0 %vm435_vm1, %v12390_v32 }
 0x769   : > { %15995 = vmatprep.mubr.msk.f32.mxu1 %vm17474_vm2, %v17473_v1  ;;  %16259 = vmatprep.mubr.msk.f32.mxu0 %vm17474_vm2, %v17473_v1 }
 0x76c   : > { %15996 = vmatmul.mubr.msk.f32.gmra.mrb[68].mxu1 %vm435_vm1, %v12231_v51  ;;  %16260 = vmatmul.mubr.msk.f32.gmra.mrb[72].mxu0 %vm435_vm1, %v12391_v52 }
 0x76d   : > { %15998 = vmatprep.mubr.msk.f32.mxu1 %vm17474_vm2, %v17473_v1  ;;  %16262 = vmatprep.mubr.msk.f32.mxu0 %vm17474_vm2, %v17473_v1 }
 0x770   : > { %15999 = vmatmul.mubr.msk.f32.gmra.mrb[70].mxu1 %vm435_vm1, %v12232_v58  ;;  %16263 = vmatmul.mubr.msk.f32.gmra.mrb[74].mxu0 %vm435_vm1, %v12392_v9 }
 0x771   : > { %16001 = vmatprep.mubr.msk.f32.mxu1 %vm17474_vm2, %v17473_v1  ;;  %16265 = vmatprep.mubr.msk.f32.mxu0 %vm17474_vm2, %v17473_v1 }
 0x774   : > { %16002 = vmatmul.mubr.msk.f32.gmra.mrb[72].mxu1 %vm435_vm1, %v12233_v35  ;;  %16266 = vmatmul.mubr.msk.f32.gmra.mrb[76].mxu0 %vm435_vm1, %v12393_v21 }
 0x775   : > { %16004 = vmatprep.mubr.msk.f32.mxu1 %vm17474_vm2, %v17473_v1  ;;  %16268 = vmatprep.mubr.msk.f32.mxu0 %vm17474_vm2, %v17473_v1 }
 0x778   : > { %16005 = vmatmul.mubr.msk.f32.gmra.mrb[74].mxu1 %vm435_vm1, %v12234_v7  ;;  %16269 = vmatmul.mubr.msk.f32.gmra.mrb[78].mxu0 %vm435_vm1, %v12394_v24 }
 0x779   : > { %16007 = vmatprep.mubr.msk.f32.mxu1 %vm17474_vm2, %v17473_v1  ;;  %16271 = vmatprep.mubr.msk.f32.mxu0 %vm17474_vm2, %v17473_v1 }
 0x77c   : > { %16008 = vmatmul.mubr.msk.f32.gmra.mrb[76].mxu1 %vm435_vm1, %v12235_v19  ;;  %16272 = vmatmul.mubr.msk.f32.gmra.mrb[80].mxu0 %vm435_vm1, %v12395_v41 }
 0x77d   : > { %16010 = vmatprep.mubr.msk.f32.mxu1 %vm17474_vm2, %v17473_v1 }
 0x780   : > { %16011 = vmatmul.mubr.msk.f32.gmra.mrb[78].mxu1 %vm435_vm1, %v12236_v60 }
 0x82f   : > { %v12493_v15 = vpop.f32.mrb[64].mxu0 }
 0x830   : > { %v12546_v55 = vmax.f32 %v12493_v15, 0.0  ;;  %v16249_v43 = vpop.f32.mrb[65].mxu0 }
 0x832   : > { %13416 = vst.msk [vmem:[%s21094_s30 + $0xd8] sm:$0xff] %vm435_vm1, %v12546_v55 }
 0x833   : > { %v11061_v14 = vpop.f32.mrb[62].mxu1  ;;  %v12498_v12 = vpop.f32.mrb[66].mxu0 }
 0x834   : > { %v11114_v54 = vmax.f32 %v11061_v14, 0.0  ;;  %v12547_v40 = vmax.f32 %v12498_v12, 0.0  ;;  %v15988_v3 = vpop.f32.mrb[63].mxu1  ;;  %v16252_v50 = vpop.f32.mrb[67].mxu0 }
 0x836   : > { %13317 = vst.msk [vmem:[%s21094_s30 + $0x90] sm:$0xff] %vm435_vm1, %v11114_v54  ;;  %13417 = vst.msk [vmem:[%s21094_s30 + $0xe0] sm:$0xff] %vm435_vm1, %v12547_v40 }
 0x837   : > { %v11066_v1 = vpop.f32.mrb[64].mxu1  ;;  %v12503_v23 = vpop.f32.mrb[68].mxu0 }
 0x838   : > { %v11115_v4 = vmax.f32 %v11066_v1, 0.0  ;;  %v12548_v38 = vmax.f32 %v12503_v23, 0.0  ;;  %v15991_v57 = vpop.f32.mrb[65].mxu1  ;;  %v16255_v11 = vpop.f32.mrb[69].mxu0 }
 0x83a   : > { %13318 = vst.msk [vmem:[%s21094_s30 + $0x98] sm:$0xff] %vm435_vm1, %v11115_v4  ;;  %13418 = vst.msk [vmem:[%s21094_s30 + $0xe8] sm:$0xff] %vm435_vm1, %v12548_v38 }
 0x83b   : > { %v11071_v48 = vpop.f32.mrb[66].mxu1  ;;  %v12508_v6 = vpop.f32.mrb[70].mxu0 }
 0x83c   : > { %v11116_v42 = vmax.f32 %v11071_v48, 0.0  ;;  %v12549_v28 = vmax.f32 %v12508_v6, 0.0  ;;  %v15994_v31 = vpop.f32.mrb[67].mxu1  ;;  %v16258_v36 = vpop.f32.mrb[71].mxu0 }
 0x83e   : > { %13319 = vst.msk [vmem:[%s21094_s30 + $0xa0] sm:$0xff] %vm435_vm1, %v11116_v42  ;;  %13419 = vst.msk [vmem:[%s21094_s30 + $0xf0] sm:$0xff] %vm435_vm1, %v12549_v28 }
 0x83f   : > { %v11076_v44 = vpop.f32.mrb[68].mxu1  ;;  %v12513_v56 = vpop.f32.mrb[72].mxu0 }
 0x840   : > { %v11117_v45 = vmax.f32 %v11076_v44, 0.0  ;;  %v12550_v5 = vmax.f32 %v12513_v56, 0.0  ;;  %v15997_v0 = vpop.f32.mrb[69].mxu1  ;;  %v16261_v25 = vpop.f32.mrb[73].mxu0 }
 0x842   : > { %13320 = vst.msk [vmem:[%s21094_s30 + $0xa8] sm:$0xff] %vm435_vm1, %v11117_v45  ;;  %13420 = vst.msk [vmem:[%s21094_s30 + $0xf8] sm:$0xff] %vm435_vm1, %v12550_v5 }
 0x843   : > { %v11081_v59 = vpop.f32.mrb[70].mxu1  ;;  %v12518_v37 = vpop.f32.mrb[74].mxu0 }
 0x844   : > { %v11118_v27 = vmax.f32 %v11081_v59, 0.0  ;;  %v12551_v61 = vmax.f32 %v12518_v37, 0.0  ;;  %v16000_v8 = vpop.f32.mrb[71].mxu1  ;;  %v16264_v33 = vpop.f32.mrb[75].mxu0 }
 0x846   : > { %13321 = vst.msk [vmem:[%s21094_s30 + $0xb0] sm:$0xff] %vm435_vm1, %v11118_v27  ;;  %13421 = vst.msk [vmem:[%s21094_s30 + $0x100] sm:$0xff] %vm435_vm1, %v12551_v61 }
 0x847   : > { %v11086_v18 = vpop.f32.mrb[72].mxu1  ;;  %v12523_v29 = vpop.f32.mrb[76].mxu0 }
 0x848   : > { %v11119_v26 = vmax.f32 %v11086_v18, 0.0  ;;  %v12552_v49 = vmax.f32 %v12523_v29, 0.0  ;;  %v16003_v10 = vpop.f32.mrb[73].mxu1  ;;  %v16267_v39 = vpop.f32.mrb[77].mxu0 }
 0x84a   : > { %13322 = vst.msk [vmem:[%s21094_s30 + $0xb8] sm:$0xff] %vm435_vm1, %v11119_v26  ;;  %13422 = vst.msk [vmem:[%s21094_s30 + $0x108] sm:$0xff] %vm435_vm1, %v12552_v49 }
 0x84b   : > { %v11091_v47 = vpop.f32.mrb[74].mxu1  ;;  %v12528_v13 = vpop.f32.mrb[78].mxu0 }
 0x84c   : > { %v11120_v16 = vmax.f32 %v11091_v47, 0.0  ;;  %v12553_v17 = vmax.f32 %v12528_v13, 0.0  ;;  %v16006_v22 = vpop.f32.mrb[75].mxu1  ;;  %v16270_v30 = vpop.f32.mrb[79].mxu0 }
 0x84e   : > { %13323 = vst.msk [vmem:[%s21094_s30 + $0xc0] sm:$0xff] %vm435_vm1, %v11120_v16  ;;  %13423 = vst.msk [vmem:[%s21094_s30 + $0x110] sm:$0xff] %vm435_vm1, %v12553_v17 }
 0x84f   : > { %v11096_v63 = vpop.f32.mrb[76].mxu1  ;;  %v12533_v34 = vpop.f32.mrb[80].mxu0 }
 0x850   : > { %v11121_v46 = vmax.f32 %v11096_v63, 0.0  ;;  %v12554_v62 = vmax.f32 %v12533_v34, 0.0  ;;  %v16009_v51 = vpop.f32.mrb[77].mxu1  ;;  %v16273_v58 = vpop.f32.mrb[81].mxu0 }
 0x852   : > { %13324 = vst.msk [vmem:[%s21094_s30 + $0xc8] sm:$0xff] %vm435_vm1, %v11121_v46  ;;  %13424 = vst.msk [vmem:[%s21094_s30 + $0x118] sm:$0xff] %vm435_vm1, %v12554_v62 }
 0x853   : > { %v11101_v35 = vpop.f32.mrb[78].mxu1 }
 0x854   : > { %v11122_v7 = vmax.f32 %v11101_v35, 0.0  ;;  %v16012_v19 = vpop.f32.mrb[79].mxu1 }
 0x856   : > { %13325 = vst.msk [vmem:[%s21094_s30 + $0xd0] sm:$0xff] %vm435_vm1, %v11122_v7 }
 0x857 PF: > { %s16_s21 = sadd.s32 1, %s17471_s21  }
 0x858   : > { %p13_p4 = scmp.ge.s32.totalorder %s16_s21, 4  }
 0x85a   :  { %15 = sbr.rel (!%p13_p4) target bundleno = 1 (0x1), region = 83 }

</bundles_post_ra>
